<compile_context>
chip_gen: v7x
topology: tpu7x:2x2x1
jax: 0.10.0
libtpu: 0.0.40
codegen_flags: <defaults>
</compile_context>

<pallas_src>
import functools

import jax
import jax.numpy as jnp
from jax.experimental import pallas as pl
from jax.experimental.pallas import tpu as pltpu

FLAT_IN = 784      # 1 * 28 * 28
K1_PAD = 1024      # fc1 reduction dim padded to a 128-multiple for pipelining
OUT = 10           # logits
N_OUT_PAD = 128    # fc4 output dim padded to one full lane width


def _linear_kernel(x_ref, w_ref, b_ref, o_ref, *, apply_relu):
    """One (N-tile, K-tile) grid step of y = x @ W + b (+ ReLU).

    The output block index only depends on the N grid axis, so o_ref stays
    resident in VMEM across the K (reduction) axis and doubles as the f32
    accumulator.  Bias add + ReLU are fused into the last K step.
    """
    k = pl.program_id(1)

    @pl.when(k == 0)
    def _():
        o_ref[...] = jnp.zeros_like(o_ref)

    o_ref[...] += jnp.dot(
        x_ref[...], w_ref[...], preferred_element_type=jnp.float32
    )

    @pl.when(k == pl.num_programs(1) - 1)
    def _():
        out = o_ref[...] + b_ref[...]  # bias broadcast over batch rows
        if apply_relu:
            out = jnp.maximum(out, 0.0)
        o_ref[...] = out


def _pick_tile(dim, candidates):
    for c in candidates:
        if dim % c == 0:
            return c
    return dim  # fall back to the full (untiled) dimension


def linear_sp(x, w, b, *, apply_relu):
    """y = x @ w + b (optionally ReLU), as a tiled Pallas kernel.

    x: (M, K) f32
    w: (K, N) f32   (already transposed relative to torch's (N, K) weight)
    b: (N,)   f32
    """
    M, K = x.shape
    Kw, N = w.shape
    assert K == Kw and b.shape == (N,)

    # Reduction tile: 512 keeps double-buffered weight tiles small enough for
    # v5e's 16 MiB default scoped VMEM while still giving >=2 pipeline steps.
    tk = _pick_tile(K, (512, 256, 128))
    # Output-feature tile: 1024 splits N=2048 into two "parallel" halves so a
    # v7x megacore can run one half per TensorCore.
    tn = _pick_tile(N, (1024, 512, 256, 128))

    grid = (N // tn, K // tk)  # (parallel N axis, arbitrary K reduction axis)

    b2 = b.reshape(1, N)
    kernel = functools.partial(_linear_kernel, apply_relu=apply_relu)

    return pl.pallas_call(
        kernel,
        out_shape=jax.ShapeDtypeStruct((M, N), jnp.float32),
        grid_spec=pltpu.PrefetchScalarGridSpec(
            num_scalar_prefetch=0,
            grid=grid,
            in_specs=[
                pl.BlockSpec((M, tk), lambda n, k: (0, k)),   # activations tile
                pl.BlockSpec((tk, tn), lambda n, k: (k, n)),  # weight tile
                pl.BlockSpec((1, tn), lambda n, k: (0, n)),   # bias tile
            ],
            out_specs=pl.BlockSpec((M, tn), lambda n, k: (0, n)),
        ),
        compiler_params=pltpu.CompilerParams(
            dimension_semantics=("parallel", "arbitrary"),
        ),
    )(x, w, b2)


def init_params(key):
    """Deterministic synthetic parameters matching Fc5Mnist's layer shapes.

    Weights stored as (in_features, out_features) for direct x @ W use.
    """
    dims = [(FLAT_IN, 2048), (2048, 2048), (2048, 2048), (2048, OUT)]
    params = []
    for fin, fout in dims:
        kw, kb, key = jax.random.split(key, 3)
        scale = 1.0 / jnp.sqrt(jnp.float32(fin))
        w = jax.random.uniform(kw, (fin, fout), jnp.float32, -scale, scale)
        b = jax.random.uniform(kb, (fout,), jnp.float32, -scale, scale)
        params.append((w, b))
    return params


def prepare_params(params):
    """One-time zero-padding of the parameters for lane/tile-friendly shapes.

    * w1: K padded 784 -> 1024 with zero rows (matching zero-padded x cols).
    * w4/b4: N padded 10 -> 128 with zero columns / zero bias entries.
    The padding is mathematically a no-op on the first 10 logits.
    """
    (w1, b1), (w2, b2), (w3, b3), (w4, b4) = params
    w1p = jnp.pad(w1, ((0, K1_PAD - w1.shape[0]), (0, 0)))
    w4p = jnp.pad(w4, ((0, 0), (0, N_OUT_PAD - w4.shape[1])))
    b4p = jnp.pad(b4, (0, N_OUT_PAD - b4.shape[0]))
    return [(w1p, b1), (w2, b2), (w3, b3), (w4p, b4p)]


def fc5_mnist_forward(x_nchw, prepared_params):
    """Forward pass of Fc5Mnist.

    x_nchw: (B, 1, 28, 28) float32 (NCHW, like the PyTorch module's input).
    prepared_params: output of prepare_params().
    Returns logits of shape (B, 10).
    """
    B = x_nchw.shape[0]
    x = x_nchw.reshape(B, -1)                                  # nn.Flatten -> (B, 784)
    x = jnp.pad(x, ((0, 0), (0, K1_PAD - x.shape[1])))         # zero-pad K to 1024

    (w1, b1), (w2, b2), (w3, b3), (w4, b4) = prepared_params
    x = linear_sp(x, w1, b1, apply_relu=True)    # fc1 + relu
    x = linear_sp(x, w2, b2, apply_relu=True)    # fc2 + relu
    x = linear_sp(x, w3, b3, apply_relu=True)    # fc3 + relu
    x = linear_sp(x, w4, b4, apply_relu=False)   # fc4 (padded logits)
    return x[:, :OUT]                             # slice back to 10 logits


if __name__ == "__main__":
    key = jax.random.PRNGKey(0)
    k_x, k_p = jax.random.split(key)

    # Small batch, MNIST-shaped input (NCHW) consistent with the module (784 = 1*28*28).
    x = jax.random.normal(k_x, (2, 1, 28, 28), jnp.float32)
    params = init_params(k_p)
    prepared = prepare_params(params)

    fwd = jax.jit(fc5_mnist_forward)
    logits = fwd(x, prepared)
    logits = jax.block_until_ready(logits)

    # Sanity check against a pure-JAX reference of the same (unpadded) math.
    def ref_forward(x_nchw, raw_params):
        h = x_nchw.reshape(x_nchw.shape[0], -1)
        for i, (w, b) in enumerate(raw_params):
            h = h @ w + b
            if i < len(raw_params) - 1:
                h = jnp.maximum(h, 0.0)
        return h

    ref = ref_forward(x, params)
    assert logits.shape == (2, OUT)
    assert jnp.allclose(logits, ref, atol=1e-3, rtol=1e-3)

    print("KERNEL_OK")
</pallas_src>

<mosaic_0001>
module attributes {stable_mosaic.version = 11 : i64} {
  func.func @_linear_kernel(%arg0: i32, %arg1: i32, %arg2: memref<2x512xf32, #tpu.memory_space<vmem>>, %arg3: memref<512x1024xf32, #tpu.memory_space<vmem>>, %arg4: memref<1x1024xf32, #tpu.memory_space<vmem>>, %arg5: memref<2x1024xf32, #tpu.memory_space<vmem>>) attributes {dimension_semantics = [#tpu.dimension_semantics<parallel>, #tpu.dimension_semantics<arbitrary>], iteration_bounds = array<i64: 2, 2>, scalar_prefetch = 0 : i64, scratch_operands = 0 : i64, tpu.core_type = #tpu.core_type<tc>, window_params = [{transform_indices = @transform_0, window_bounds = array<i64: 2, 512>}, {transform_indices = @transform_1, window_bounds = array<i64: 512, 1024>}, {transform_indices = @transform_2, window_bounds = array<i64: 1, 1024>}, {transform_indices = @transform_3, window_bounds = array<i64: 2, 1024>}]} {
    %c0_i32 = arith.constant 0 : i32
    %0 = arith.cmpi eq, %arg1, %c0_i32 : i32
    %1 = arith.extui %0 : i1 to i32
    %c0_i32_0 = arith.constant 0 : i32
    %2 = arith.cmpi ne, %1, %c0_i32_0 : i32
    scf.if %2 {
      %cst_9 = arith.constant 0.000000e+00 : f32
      %12 = vector.broadcast %cst_9 : f32 to vector<2x1024xf32>
      %c0_10 = arith.constant 0 : index
      %c0_11 = arith.constant 0 : index
      %13 = vector.load %arg5[%c0_10, %c0_11] : memref<2x1024xf32, #tpu.memory_space<vmem>>, vector<2x1024xf32>
      tpu.vector_store %arg5[%c0_10, %c0_11], %12 {strides = array<i32>} : memref<2x1024xf32, #tpu.memory_space<vmem>>, vector<2x1024xf32>,
    } else {
    }
    %c0 = arith.constant 0 : index
    %c0_1 = arith.constant 0 : index
    %3 = vector.load %arg5[%c0, %c0_1] : memref<2x1024xf32, #tpu.memory_space<vmem>>, vector<2x1024xf32>
    %c0_2 = arith.constant 0 : index
    %c0_3 = arith.constant 0 : index
    %4 = vector.load %arg2[%c0_2, %c0_3] : memref<2x512xf32, #tpu.memory_space<vmem>>, vector<2x512xf32>
    %c0_4 = arith.constant 0 : index
    %c0_5 = arith.constant 0 : index
    %5 = vector.load %arg3[%c0_4, %c0_5] : memref<512x1024xf32, #tpu.memory_space<vmem>>, vector<512x1024xf32>
    %cst = arith.constant dense<0.000000e+00> : vector<2x1024xf32>
    %6 = tpu.matmul %4, %5, %cst {dimension_numbers = #tpu.dot_dimension_numbers<[1], [0], [0], [1], [0, 0, 1, 1], [], []>} : vector<2x512xf32>, vector<512x1024xf32>, vector<2x1024xf32> -> vector<2x1024xf32>
    %7 = arith.addf %3, %6 : vector<2x1024xf32>
    %c0_6 = arith.constant 0 : index
    %c0_7 = arith.constant 0 : index
    %8 = vector.load %arg5[%c0_6, %c0_7] : memref<2x1024xf32, #tpu.memory_space<vmem>>, vector<2x1024xf32>
    tpu.vector_store %arg5[%c0_6, %c0_7], %7 {strides = array<i32>} : memref<2x1024xf32, #tpu.memory_space<vmem>>, vector<2x1024xf32>,
    %c1_i32 = arith.constant 1 : i32
    %9 = arith.cmpi eq, %arg1, %c1_i32 : i32
    %10 = arith.extui %9 : i1 to i32
    %c0_i32_8 = arith.constant 0 : i32
    %11 = arith.cmpi ne, %10, %c0_i32_8 : i32
    scf.if %11 {
      %c0_9 = arith.constant 0 : index
      %c0_10 = arith.constant 0 : index
      %12 = vector.load %arg5[%c0_9, %c0_10] : memref<2x1024xf32, #tpu.memory_space<vmem>>, vector<2x1024xf32>
      %c0_11 = arith.constant 0 : index
      %c0_12 = arith.constant 0 : index
      %13 = vector.load %arg4[%c0_11, %c0_12] : memref<1x1024xf32, #tpu.memory_space<vmem>>, vector<1x1024xf32>
      %14 = vector.broadcast %13 : vector<1x1024xf32> to vector<2x1024xf32>
      %15 = arith.addf %12, %14 : vector<2x1024xf32>
      %cst_13 = arith.constant 0.000000e+00 : f32
      %16 = vector.broadcast %cst_13 : f32 to vector<2x1024xf32>
      %17 = arith.maximumf %15, %16 : vector<2x1024xf32>
      %c0_14 = arith.constant 0 : index
      %c0_15 = arith.constant 0 : index
      %18 = vector.load %arg5[%c0_14, %c0_15] : memref<2x1024xf32, #tpu.memory_space<vmem>>, vector<2x1024xf32>
      tpu.vector_store %arg5[%c0_14, %c0_15], %17 {strides = array<i32>} : memref<2x1024xf32, #tpu.memory_space<vmem>>, vector<2x1024xf32>,
    } else {
    }
    return
  }
  func.func @transform_0(%arg0: i32, %arg1: i32) -> (i32, i32) {
    %c0_i32 = arith.constant 0 : i32
    %c0_i32_0 = arith.constant 0 : i32
    return %c0_i32, %arg1 : i32, i32
  }
  func.func @transform_1(%arg0: i32, %arg1: i32) -> (i32, i32) {
    %c0_i32 = arith.constant 0 : i32
    return %arg1, %arg0 : i32, i32
  }
  func.func @transform_2(%arg0: i32, %arg1: i32) -> (i32, i32) {
    %c0_i32 = arith.constant 0 : i32
    %c0_i32_0 = arith.constant 0 : i32
    return %c0_i32, %arg0 : i32, i32
  }
  func.func @transform_3(%arg0: i32, %arg1: i32) -> (i32, i32) {
    %c0_i32 = arith.constant 0 : i32
    %c0_i32_0 = arith.constant 0 : i32
    return %c0_i32, %arg0 : i32, i32
  }
}

module attributes {stable_mosaic.version = 11 : i64} {
  func.func @_linear_kernel(%arg0: i32, %arg1: i32, %arg2: memref<2x512xf32, #tpu.memory_space<vmem>>, %arg3: memref<512x128xf32, #tpu.memory_space<vmem>>, %arg4: memref<1x128xf32, #tpu.memory_space<vmem>>, %arg5: memref<2x128xf32, #tpu.memory_space<vmem>>) attributes {dimension_semantics = [#tpu.dimension_semantics<parallel>, #tpu.dimension_semantics<arbitrary>], iteration_bounds = array<i64: 1, 4>, scalar_prefetch = 0 : i64, scratch_operands = 0 : i64, tpu.core_type = #tpu.core_type<tc>, window_params = [{transform_indices = @transform_0, window_bounds = array<i64: 2, 512>}, {transform_indices = @transform_1, window_bounds = array<i64: 512, 128>}, {transform_indices = @transform_2, window_bounds = array<i64: 1, 128>}, {transform_indices = @transform_3, window_bounds = array<i64: 2, 128>}]} {
    %c0_i32 = arith.constant 0 : i32
    %0 = arith.cmpi eq, %arg1, %c0_i32 : i32
    %1 = arith.extui %0 : i1 to i32
    %c0_i32_0 = arith.constant 0 : i32
    %2 = arith.cmpi ne, %1, %c0_i32_0 : i32
    scf.if %2 {
      %cst_9 = arith.constant 0.000000e+00 : f32
      %12 = vector.broadcast %cst_9 : f32 to vector<2x128xf32>
      %c0_10 = arith.constant 0 : index
      %c0_11 = arith.constant 0 : index
      %13 = vector.load %arg5[%c0_10, %c0_11] : memref<2x128xf32, #tpu.memory_space<vmem>>, vector<2x128xf32>
      tpu.vector_store %arg5[%c0_10, %c0_11], %12 {strides = array<i32>} : memref<2x128xf32, #tpu.memory_space<vmem>>, vector<2x128xf32>,
    } else {
    }
    %c0 = arith.constant 0 : index
    %c0_1 = arith.constant 0 : index
    %3 = vector.load %arg5[%c0, %c0_1] : memref<2x128xf32, #tpu.memory_space<vmem>>, vector<2x128xf32>
    %c0_2 = arith.constant 0 : index
    %c0_3 = arith.constant 0 : index
    %4 = vector.load %arg2[%c0_2, %c0_3] : memref<2x512xf32, #tpu.memory_space<vmem>>, vector<2x512xf32>
    %c0_4 = arith.constant 0 : index
    %c0_5 = arith.constant 0 : index
    %5 = vector.load %arg3[%c0_4, %c0_5] : memref<512x128xf32, #tpu.memory_space<vmem>>, vector<512x128xf32>
    %cst = arith.constant dense<0.000000e+00> : vector<2x128xf32>
    %6 = tpu.matmul %4, %5, %cst {dimension_numbers = #tpu.dot_dimension_numbers<[1], [0], [0], [1], [0, 0, 1, 1], [], []>} : vector<2x512xf32>, vector<512x128xf32>, vector<2x128xf32> -> vector<2x128xf32>
    %7 = arith.addf %3, %6 : vector<2x128xf32>
    %c0_6 = arith.constant 0 : index
    %c0_7 = arith.constant 0 : index
    %8 = vector.load %arg5[%c0_6, %c0_7] : memref<2x128xf32, #tpu.memory_space<vmem>>, vector<2x128xf32>
    tpu.vector_store %arg5[%c0_6, %c0_7], %7 {strides = array<i32>} : memref<2x128xf32, #tpu.memory_space<vmem>>, vector<2x128xf32>,
    %c3_i32 = arith.constant 3 : i32
    %9 = arith.cmpi eq, %arg1, %c3_i32 : i32
    %10 = arith.extui %9 : i1 to i32
    %c0_i32_8 = arith.constant 0 : i32
    %11 = arith.cmpi ne, %10, %c0_i32_8 : i32
    scf.if %11 {
      %c0_9 = arith.constant 0 : index
      %c0_10 = arith.constant 0 : index
      %12 = vector.load %arg5[%c0_9, %c0_10] : memref<2x128xf32, #tpu.memory_space<vmem>>, vector<2x128xf32>
      %c0_11 = arith.constant 0 : index
      %c0_12 = arith.constant 0 : index
      %13 = vector.load %arg4[%c0_11, %c0_12] : memref<1x128xf32, #tpu.memory_space<vmem>>, vector<1x128xf32>
      %14 = vector.broadcast %13 : vector<1x128xf32> to vector<2x128xf32>
      %15 = arith.addf %12, %14 : vector<2x128xf32>
      %c0_13 = arith.constant 0 : index
      %c0_14 = arith.constant 0 : index
      %16 = vector.load %arg5[%c0_13, %c0_14] : memref<2x128xf32, #tpu.memory_space<vmem>>, vector<2x128xf32>
      tpu.vector_store %arg5[%c0_13, %c0_14], %15 {strides = array<i32>} : memref<2x128xf32, #tpu.memory_space<vmem>>, vector<2x128xf32>,
    } else {
    }
    return
  }
  func.func @transform_0(%arg0: i32, %arg1: i32) -> (i32, i32) {
    %c0_i32 = arith.constant 0 : i32
    %c0_i32_0 = arith.constant 0 : i32
    return %c0_i32, %arg1 : i32, i32
  }
  func.func @transform_1(%arg0: i32, %arg1: i32) -> (i32, i32) {
    %c0_i32 = arith.constant 0 : i32
    return %arg1, %arg0 : i32, i32
  }
  func.func @transform_2(%arg0: i32, %arg1: i32) -> (i32, i32) {
    %c0_i32 = arith.constant 0 : i32
    %c0_i32_0 = arith.constant 0 : i32
    return %c0_i32, %arg0 : i32, i32
  }
  func.func @transform_3(%arg0: i32, %arg1: i32) -> (i32, i32) {
    %c0_i32 = arith.constant 0 : i32
    %c0_i32_0 = arith.constant 0 : i32
    return %c0_i32, %arg0 : i32, i32
  }
}

module attributes {stable_mosaic.version = 11 : i64} {
  func.func @_linear_kernel(%arg0: i32, %arg1: i32, %arg2: memref<2x512xf32, #tpu.memory_space<vmem>>, %arg3: memref<512x1024xf32, #tpu.memory_space<vmem>>, %arg4: memref<1x1024xf32, #tpu.memory_space<vmem>>, %arg5: memref<2x1024xf32, #tpu.memory_space<vmem>>) attributes {dimension_semantics = [#tpu.dimension_semantics<parallel>, #tpu.dimension_semantics<arbitrary>], iteration_bounds = array<i64: 2, 4>, scalar_prefetch = 0 : i64, scratch_operands = 0 : i64, tpu.core_type = #tpu.core_type<tc>, window_params = [{transform_indices = @transform_0, window_bounds = array<i64: 2, 512>}, {transform_indices = @transform_1, window_bounds = array<i64: 512, 1024>}, {transform_indices = @transform_2, window_bounds = array<i64: 1, 1024>}, {transform_indices = @transform_3, window_bounds = array<i64: 2, 1024>}]} {
    %c0_i32 = arith.constant 0 : i32
    %0 = arith.cmpi eq, %arg1, %c0_i32 : i32
    %1 = arith.extui %0 : i1 to i32
    %c0_i32_0 = arith.constant 0 : i32
    %2 = arith.cmpi ne, %1, %c0_i32_0 : i32
    scf.if %2 {
      %cst_9 = arith.constant 0.000000e+00 : f32
      %12 = vector.broadcast %cst_9 : f32 to vector<2x1024xf32>
      %c0_10 = arith.constant 0 : index
      %c0_11 = arith.constant 0 : index
      %13 = vector.load %arg5[%c0_10, %c0_11] : memref<2x1024xf32, #tpu.memory_space<vmem>>, vector<2x1024xf32>
      tpu.vector_store %arg5[%c0_10, %c0_11], %12 {strides = array<i32>} : memref<2x1024xf32, #tpu.memory_space<vmem>>, vector<2x1024xf32>,
    } else {
    }
    %c0 = arith.constant 0 : index
    %c0_1 = arith.constant 0 : index
    %3 = vector.load %arg5[%c0, %c0_1] : memref<2x1024xf32, #tpu.memory_space<vmem>>, vector<2x1024xf32>
    %c0_2 = arith.constant 0 : index
    %c0_3 = arith.constant 0 : index
    %4 = vector.load %arg2[%c0_2, %c0_3] : memref<2x512xf32, #tpu.memory_space<vmem>>, vector<2x512xf32>
    %c0_4 = arith.constant 0 : index
    %c0_5 = arith.constant 0 : index
    %5 = vector.load %arg3[%c0_4, %c0_5] : memref<512x1024xf32, #tpu.memory_space<vmem>>, vector<512x1024xf32>
    %cst = arith.constant dense<0.000000e+00> : vector<2x1024xf32>
    %6 = tpu.matmul %4, %5, %cst {dimension_numbers = #tpu.dot_dimension_numbers<[1], [0], [0], [1], [0, 0, 1, 1], [], []>} : vector<2x512xf32>, vector<512x1024xf32>, vector<2x1024xf32> -> vector<2x1024xf32>
    %7 = arith.addf %3, %6 : vector<2x1024xf32>
    %c0_6 = arith.constant 0 : index
    %c0_7 = arith.constant 0 : index
    %8 = vector.load %arg5[%c0_6, %c0_7] : memref<2x1024xf32, #tpu.memory_space<vmem>>, vector<2x1024xf32>
    tpu.vector_store %arg5[%c0_6, %c0_7], %7 {strides = array<i32>} : memref<2x1024xf32, #tpu.memory_space<vmem>>, vector<2x1024xf32>,
    %c3_i32 = arith.constant 3 : i32
    %9 = arith.cmpi eq, %arg1, %c3_i32 : i32
    %10 = arith.extui %9 : i1 to i32
    %c0_i32_8 = arith.constant 0 : i32
    %11 = arith.cmpi ne, %10, %c0_i32_8 : i32
    scf.if %11 {
      %c0_9 = arith.constant 0 : index
      %c0_10 = arith.constant 0 : index
      %12 = vector.load %arg5[%c0_9, %c0_10] : memref<2x1024xf32, #tpu.memory_space<vmem>>, vector<2x1024xf32>
      %c0_11 = arith.constant 0 : index
      %c0_12 = arith.constant 0 : index
      %13 = vector.load %arg4[%c0_11, %c0_12] : memref<1x1024xf32, #tpu.memory_space<vmem>>, vector<1x1024xf32>
      %14 = vector.broadcast %13 : vector<1x1024xf32> to vector<2x1024xf32>
      %15 = arith.addf %12, %14 : vector<2x1024xf32>
      %cst_13 = arith.constant 0.000000e+00 : f32
      %16 = vector.broadcast %cst_13 : f32 to vector<2x1024xf32>
      %17 = arith.maximumf %15, %16 : vector<2x1024xf32>
      %c0_14 = arith.constant 0 : index
      %c0_15 = arith.constant 0 : index
      %18 = vector.load %arg5[%c0_14, %c0_15] : memref<2x1024xf32, #tpu.memory_space<vmem>>, vector<2x1024xf32>
      tpu.vector_store %arg5[%c0_14, %c0_15], %17 {strides = array<i32>} : memref<2x1024xf32, #tpu.memory_space<vmem>>, vector<2x1024xf32>,
    } else {
    }
    return
  }
  func.func @transform_0(%arg0: i32, %arg1: i32) -> (i32, i32) {
    %c0_i32 = arith.constant 0 : i32
    %c0_i32_0 = arith.constant 0 : i32
    return %c0_i32, %arg1 : i32, i32
  }
  func.func @transform_1(%arg0: i32, %arg1: i32) -> (i32, i32) {
    %c0_i32 = arith.constant 0 : i32
    return %arg1, %arg0 : i32, i32
  }
  func.func @transform_2(%arg0: i32, %arg1: i32) -> (i32, i32) {
    %c0_i32 = arith.constant 0 : i32
    %c0_i32_0 = arith.constant 0 : i32
    return %c0_i32, %arg0 : i32, i32
  }
  func.func @transform_3(%arg0: i32, %arg1: i32) -> (i32, i32) {
    %c0_i32 = arith.constant 0 : i32
    %c0_i32_0 = arith.constant 0 : i32
    return %c0_i32, %arg0 : i32, i32
  }
}

module attributes {stable_mosaic.version = 11 : i64} {
  func.func @_linear_kernel(%arg0: i32, %arg1: i32, %arg2: memref<2x512xf32, #tpu.memory_space<vmem>>, %arg3: memref<512x1024xf32, #tpu.memory_space<vmem>>, %arg4: memref<1x1024xf32, #tpu.memory_space<vmem>>, %arg5: memref<2x1024xf32, #tpu.memory_space<vmem>>) attributes {dimension_semantics = [#tpu.dimension_semantics<parallel>, #tpu.dimension_semantics<arbitrary>], iteration_bounds = array<i64: 2, 4>, scalar_prefetch = 0 : i64, scratch_operands = 0 : i64, tpu.core_type = #tpu.core_type<tc>, window_params = [{transform_indices = @transform_0, window_bounds = array<i64: 2, 512>}, {transform_indices = @transform_1, window_bounds = array<i64: 512, 1024>}, {transform_indices = @transform_2, window_bounds = array<i64: 1, 1024>}, {transform_indices = @transform_3, window_bounds = array<i64: 2, 1024>}]} {
    %c0_i32 = arith.constant 0 : i32
    %0 = arith.cmpi eq, %arg1, %c0_i32 : i32
    %1 = arith.extui %0 : i1 to i32
    %c0_i32_0 = arith.constant 0 : i32
    %2 = arith.cmpi ne, %1, %c0_i32_0 : i32
    scf.if %2 {
      %cst_9 = arith.constant 0.000000e+00 : f32
      %12 = vector.broadcast %cst_9 : f32 to vector<2x1024xf32>
      %c0_10 = arith.constant 0 : index
      %c0_11 = arith.constant 0 : index
      %13 = vector.load %arg5[%c0_10, %c0_11] : memref<2x1024xf32, #tpu.memory_space<vmem>>, vector<2x1024xf32>
      tpu.vector_store %arg5[%c0_10, %c0_11], %12 {strides = array<i32>} : memref<2x1024xf32, #tpu.memory_space<vmem>>, vector<2x1024xf32>,
    } else {
    }
    %c0 = arith.constant 0 : index
    %c0_1 = arith.constant 0 : index
    %3 = vector.load %arg5[%c0, %c0_1] : memref<2x1024xf32, #tpu.memory_space<vmem>>, vector<2x1024xf32>
    %c0_2 = arith.constant 0 : index
    %c0_3 = arith.constant 0 : index
    %4 = vector.load %arg2[%c0_2, %c0_3] : memref<2x512xf32, #tpu.memory_space<vmem>>, vector<2x512xf32>
    %c0_4 = arith.constant 0 : index
    %c0_5 = arith.constant 0 : index
    %5 = vector.load %arg3[%c0_4, %c0_5] : memref<512x1024xf32, #tpu.memory_space<vmem>>, vector<512x1024xf32>
    %cst = arith.constant dense<0.000000e+00> : vector<2x1024xf32>
    %6 = tpu.matmul %4, %5, %cst {dimension_numbers = #tpu.dot_dimension_numbers<[1], [0], [0], [1], [0, 0, 1, 1], [], []>} : vector<2x512xf32>, vector<512x1024xf32>, vector<2x1024xf32> -> vector<2x1024xf32>
    %7 = arith.addf %3, %6 : vector<2x1024xf32>
    %c0_6 = arith.constant 0 : index
    %c0_7 = arith.constant 0 : index
    %8 = vector.load %arg5[%c0_6, %c0_7] : memref<2x1024xf32, #tpu.memory_space<vmem>>, vector<2x1024xf32>
    tpu.vector_store %arg5[%c0_6, %c0_7], %7 {strides = array<i32>} : memref<2x1024xf32, #tpu.memory_space<vmem>>, vector<2x1024xf32>,
    %c3_i32 = arith.constant 3 : i32
    %9 = arith.cmpi eq, %arg1, %c3_i32 : i32
    %10 = arith.extui %9 : i1 to i32
    %c0_i32_8 = arith.constant 0 : i32
    %11 = arith.cmpi ne, %10, %c0_i32_8 : i32
    scf.if %11 {
      %c0_9 = arith.constant 0 : index
      %c0_10 = arith.constant 0 : index
      %12 = vector.load %arg5[%c0_9, %c0_10] : memref<2x1024xf32, #tpu.memory_space<vmem>>, vector<2x1024xf32>
      %c0_11 = arith.constant 0 : index
      %c0_12 = arith.constant 0 : index
      %13 = vector.load %arg4[%c0_11, %c0_12] : memref<1x1024xf32, #tpu.memory_space<vmem>>, vector<1x1024xf32>
      %14 = vector.broadcast %13 : vector<1x1024xf32> to vector<2x1024xf32>
      %15 = arith.addf %12, %14 : vector<2x1024xf32>
      %cst_13 = arith.constant 0.000000e+00 : f32
      %16 = vector.broadcast %cst_13 : f32 to vector<2x1024xf32>
      %17 = arith.maximumf %15, %16 : vector<2x1024xf32>
      %c0_14 = arith.constant 0 : index
      %c0_15 = arith.constant 0 : index
      %18 = vector.load %arg5[%c0_14, %c0_15] : memref<2x1024xf32, #tpu.memory_space<vmem>>, vector<2x1024xf32>
      tpu.vector_store %arg5[%c0_14, %c0_15], %17 {strides = array<i32>} : memref<2x1024xf32, #tpu.memory_space<vmem>>, vector<2x1024xf32>,
    } else {
    }
    return
  }
  func.func @transform_0(%arg0: i32, %arg1: i32) -> (i32, i32) {
    %c0_i32 = arith.constant 0 : i32
    %c0_i32_0 = arith.constant 0 : i32
    return %c0_i32, %arg1 : i32, i32
  }
  func.func @transform_1(%arg0: i32, %arg1: i32) -> (i32, i32) {
    %c0_i32 = arith.constant 0 : i32
    return %arg1, %arg0 : i32, i32
  }
  func.func @transform_2(%arg0: i32, %arg1: i32) -> (i32, i32) {
    %c0_i32 = arith.constant 0 : i32
    %c0_i32_0 = arith.constant 0 : i32
    return %c0_i32, %arg0 : i32, i32
  }
  func.func @transform_3(%arg0: i32, %arg1: i32) -> (i32, i32) {
    %c0_i32 = arith.constant 0 : i32
    %c0_i32_0 = arith.constant 0 : i32
    return %c0_i32, %arg0 : i32, i32
  }
}

</mosaic_0001>

<bundles_post_ra>
// kernel: fc5_mnist_forward.7
= control target key start
LH: loop header
LB: loop body
LE: loop exit
PB: predicated region body
PF: predicated region fallthrough
CT: control target
= control target key end

     0   :  { %8 = vsyncpa [#allocation3], 0  ;;  %s819_s12 = smov 0   ;;  %s821_s13 = smov 0   ;;  %s959_s0 = inlined_call_operand.vmem [shape: f32[2,2048], index: 0, kind: input, shape index: {}]   ;;  %s960_s1 = inlined_call_operand.vmem [shape: f32[2048,128], index: 1, kind: input, shape index: {}]   ;;  %s961_s2 = inlined_call_operand.vmem [shape: f32[1,128], index: 2, kind: input, shape index: {}]   ;;  %s962_s3 = inlined_call_operand.hbm [shape: f32[2,128], index: 3, kind: output, shape index: {}]  }
   0x1   :  { %s823_s14 = smov 0  }
   0x2 LB: > { %s558_s15 = sadd.s32 4294967295, %s794_s14   ;;  %s23_s16 = sadd.s32 1, %s790_s13  ;;  %s794_s14 = sphi %s823_s14, %s14_s14   ;;  %s790_s13 = sphi %s821_s13, %s965_s13   ;;  %s786_s12 = sphi %s819_s12, %s964_s12  }
   0x3   : > { %p24_p0 = scmp.ge.s32.totalorder %s23_s16, 4  ;;  %p562_p1 = scmp.ge.s32.totalorder %s794_s14, 1 }
   0x4   : > { %p175_p2 = scmp.lt.s32.totalorder %s794_s14, 5 }
   0x5   : > { %s967_s16 = smov (%p24_p0, %s23_s16), 0 }
   0x6   : > { %p176_p3 = pnand %p562_p1, %p175_p2 }
   0x7   : > { %s563_s17 = sshll.u32 (!%p176_p3), %s786_s12, 2  ;;  %s565_s18 = sshll.u32 (!%p176_p3), %s786_s12, 6 }
   0x8   : > { %179 = sbr.rel (%p176_p3) target bundleno = 317 (0x13d), region = 32  ;;  %p206_p4 = scmp.lt.s32.totalorder (!%p176_p3), %s563_s17, 15 }
   0x9   : > { %p212_p5 = scmp.lt.s32.totalorder (!%p176_p3), %s565_s18, 255  ;;  %p567_p6 = scmp.ne.s32.totalorder (!%p176_p3), %s786_s12, 0 }
   0xf   : > { %s969_s17 = smov (!%p206_p4, %s563_s17), 15  ;;  %s971_s18 = smov (!%p212_p5, %s565_s18), 255 }
  0x10   : > { %s564_s19 = sshll.u32 %s969_s17, 1  ;;  %s566_s23 = sshll.u32 %s971_s18, 3  ;;  %v796_v0 = vmov (!%p567_p6), 0.0  }
  0x11   : > { %s845_s22 = scalar_lea.vmem %s959_s0, %s564_s19  ;;  %s850_s26 = scalar_lea.vmem %s960_s1, %s566_s23  ;;  %227 = vst [vmem:[#allocation2] sm:$0x3] (!%p567_p6), %v796_v0 }
  0x12   : > { %226 = sbr.rel (%p567_p6) target bundleno = 25 (0x19), region = 36 }
  0x19 PF: > { %v246_v1 = vld [vmem:[%s850_s26 + $0x80] sm:$0xff]  ;;  %v247_v2 = vld [vmem:[%s850_s26 + $0x88] sm:$0xff]  ;;  %v248_v12 = vld [vmem:[%s850_s26 + $0x90] sm:$0xff]  ;;  %v797_v48 = vmov 1983009808   ;;  %v299_v50 = vlaneseq  ;;  %p568_p7 = scmp.ne.s32.totalorder %s786_s12, 3 }
  0x1a   : > { %v278_v3 = vld [vmem:[%s850_s26 + $0x180] sm:$0xff]  ;;  %v644_v4 = vpack.c.bf16 %v247_v2, %v246_v1  ;;  %v279_v5 = vld [vmem:[%s850_s26 + $0x188] sm:$0xff]  ;;  %v249_v14 = vld [vmem:[%s850_s26 + $0x98] sm:$0xff]  ;;  %v297_v49 = vunpack.c.l.s4 %v797_v48 }
  0x1b   : > { %v230_v6 = vld [vmem:[%s850_s26] sm:$0xff]  ;;  %v231_v7 = vld [vmem:[%s850_s26 + $0x8] sm:$0xff]  ;;  %v676_v8 = vpack.c.bf16 %v279_v5, %v278_v3  ;;  %v280_v15 = vld [vmem:[%s850_s26 + $0x190] sm:$0xff]  ;;  %v648_v17 = vpack.c.bf16 %v249_v14, %v248_v12  ;;  %v300_v1 = vshrl.u32 %v299_v50, 7 }
  0x1c   : > { %v646_v9 = vpack.c.bf16 %v231_v7, %v230_v6  ;;  %v262_v10 = vld [vmem:[%s850_s26 + $0x100] sm:$0xff]  ;;  %v263_v11 = vld [vmem:[%s850_s26 + $0x108] sm:$0xff]  ;;  %645 = vmatprep.subr.bf16.mxu0 %v644_v4  ;;  %v281_v16 = vld [vmem:[%s850_s26 + $0x198] sm:$0xff]  ;;  %v298_v0 = vunpack.c.0.s8 %v297_v49 }
  0x1d   : > { %v678_v13 = vpack.c.bf16 %v263_v11, %v262_v10  ;;  %677 = vmatprep.subr.bf16.mxu1 %v676_v8  ;;  %v680_v18 = vpack.c.bf16 %v281_v16, %v280_v15  ;;  %v232_v19 = vld [vmem:[%s850_s26 + $0x10] sm:$0xff]  ;;  %v233_v20 = vld [vmem:[%s850_s26 + $0x18] sm:$0xff]  ;;  %v250_v24 = vld [vmem:[%s850_s26 + $0xa0] sm:$0xff] }
  0x1e   : > { %647 = vmatpush3.bf16.msra.mxu0 %v646_v9  ;;  %v264_v21 = vld [vmem:[%s850_s26 + $0x110] sm:$0xff]  ;;  %v650_v22 = vpack.c.bf16 %v233_v20, %v232_v19  ;;  %v265_v23 = vld [vmem:[%s850_s26 + $0x118] sm:$0xff]  ;;  %v251_v25 = vld [vmem:[%s850_s26 + $0xa8] sm:$0xff]  ;;  %v301_v14 = vsub.s32 %v298_v0, %v300_v1 }
  0x1f   : > { %679 = vmatpush3.bf16.msra.mxu1 %v678_v13  ;;  %649 = vmatprep.subr.bf16.mxu0 %v648_v17  ;;  %v682_v26 = vpack.c.bf16 %v265_v23, %v264_v21  ;;  %v652_v27 = vpack.c.bf16 %v251_v25, %v250_v24  ;;  %v282_v28 = vld [vmem:[%s850_s26 + $0x1a0] sm:$0xff]  ;;  %v283_v29 = vld [vmem:[%s850_s26 + $0x1a8] sm:$0xff]  ;;  %v252_v36 = vld [vmem:[%s850_s26 + $0xb0] sm:$0xff] }
  0x20   : > { %681 = vmatprep.subr.bf16.mxu1 %v680_v18  ;;  %v234_v30 = vld [vmem:[%s850_s26 + $0x20] sm:$0xff]  ;;  %v684_v31 = vpack.c.bf16 %v283_v29, %v282_v28  ;;  %v235_v32 = vld [vmem:[%s850_s26 + $0x28] sm:$0xff]  ;;  %v253_v37 = vld [vmem:[%s850_s26 + $0xb8] sm:$0xff] }
  0x21   : > { %v266_v33 = vld [vmem:[%s850_s26 + $0x120] sm:$0xff]  ;;  %v267_v34 = vld [vmem:[%s850_s26 + $0x128] sm:$0xff]  ;;  %v654_v35 = vpack.c.bf16 %v235_v32, %v234_v30  ;;  %v284_v38 = vld [vmem:[%s850_s26 + $0x1b0] sm:$0xff]  ;;  %v656_v40 = vpack.c.bf16 %v253_v37, %v252_v36 }
  0x22   : > { %651 = vmatpush3.bf16.msra.mxu0 %v650_v22  ;;  %v686_v39 = vpack.c.bf16 %v267_v34, %v266_v33  ;;  %v285_v41 = vld [vmem:[%s850_s26 + $0x1b8] sm:$0xff]  ;;  %v236_v42 = vld [vmem:[%s850_s26 + $0x30] sm:$0xff]  ;;  %v254_v47 = vld [vmem:[%s850_s26 + $0xc0] sm:$0xff] }
  0x23   : > { %683 = vmatpush3.bf16.msra.mxu1 %v682_v26  ;;  %653 = vmatprep.subr.bf16.mxu0 %v652_v27  ;;  %v237_v43 = vld [vmem:[%s850_s26 + $0x38] sm:$0xff]  ;;  %v688_v44 = vpack.c.bf16 %v285_v41, %v284_v38  ;;  %v268_v45 = vld [vmem:[%s850_s26 + $0x130] sm:$0xff]  ;;  %v255_v51 = vld [vmem:[%s850_s26 + $0xc8] sm:$0xff] }
  0x24   : > { %685 = vmatprep.subr.bf16.mxu1 %v684_v31  ;;  %v269_v46 = vld [vmem:[%s850_s26 + $0x138] sm:$0xff]  ;;  %v286_v52 = vld [vmem:[%s850_s26 + $0x1c0] sm:$0xff]  ;;  %v287_v53 = vld [vmem:[%s850_s26 + $0x1c8] sm:$0xff]  ;;  %v658_v54 = vpack.c.bf16 %v237_v43, %v236_v42  ;;  %v660_v56 = vpack.c.bf16 %v255_v51, %v254_v47 }
  0x25   : > { %v690_v55 = vpack.c.bf16 %v269_v46, %v268_v45  ;;  %v238_v57 = vld [vmem:[%s850_s26 + $0x40] sm:$0xff]  ;;  %v239_v58 = vld [vmem:[%s850_s26 + $0x48] sm:$0xff]  ;;  %v692_v60 = vpack.c.bf16 %v287_v53, %v286_v52  ;;  %v256_v62 = vld [vmem:[%s850_s26 + $0xd0] sm:$0xff] }
  0x26   : > { %655 = vmatpush3.bf16.msra.mxu0 %v654_v35  ;;  %v270_v59 = vld [vmem:[%s850_s26 + $0x140] sm:$0xff]  ;;  %v271_v61 = vld [vmem:[%s850_s26 + $0x148] sm:$0xff]  ;;  %v257_v63 = vld [vmem:[%s850_s26 + $0xd8] sm:$0xff]  ;;  %v662_v4 = vpack.c.bf16 %v239_v58, %v238_v57 }
  0x27   : > { %687 = vmatpush3.bf16.msra.mxu1 %v686_v39  ;;  %657 = vmatprep.subr.bf16.mxu0 %v656_v40  ;;  %v288_v2 = vld [vmem:[%s850_s26 + $0x1d0] sm:$0xff]  ;;  %v289_v3 = vld [vmem:[%s850_s26 + $0x1d8] sm:$0xff]  ;;  %v694_v5 = vpack.c.bf16 %v271_v61, %v270_v59  ;;  %v664_v6 = vpack.c.bf16 %v257_v63, %v256_v62  ;;  %v258_v12 = vld [vmem:[%s850_s26 + $0xe0] sm:$0xff] }
  0x28   : > { %689 = vmatprep.subr.bf16.mxu1 %v688_v44  ;;  %v240_v7 = vld [vmem:[%s850_s26 + $0x50] sm:$0xff]  ;;  %v241_v8 = vld [vmem:[%s850_s26 + $0x58] sm:$0xff]  ;;  %v696_v10 = vpack.c.bf16 %v289_v3, %v288_v2  ;;  %v259_v13 = vld [vmem:[%s850_s26 + $0xe8] sm:$0xff] }
  0x29   : > { %v272_v9 = vld [vmem:[%s850_s26 + $0x150] sm:$0xff]  ;;  %v273_v11 = vld [vmem:[%s850_s26 + $0x158] sm:$0xff]  ;;  %v290_v15 = vld [vmem:[%s850_s26 + $0x1e0] sm:$0xff]  ;;  %v666_v17 = vpack.c.bf16 %v241_v8, %v240_v7  ;;  %v668_v20 = vpack.c.bf16 %v259_v13, %v258_v12 }
  0x2a   : > { %659 = vmatpush3.bf16.msra.mxu0 %v658_v54  ;;  %v291_v16 = vld [vmem:[%s850_s26 + $0x1e8] sm:$0xff]  ;;  %v242_v18 = vld [vmem:[%s850_s26 + $0x60] sm:$0xff]  ;;  %v698_v19 = vpack.c.bf16 %v273_v11, %v272_v9  ;;  %v260_v26 = vld [vmem:[%s850_s26 + $0xf0] sm:$0xff] }
  0x2b   : > { %691 = vmatpush3.bf16.msra.mxu1 %v690_v55  ;;  %661 = vmatprep.subr.bf16.mxu0 %v660_v56  ;;  %v243_v21 = vld [vmem:[%s850_s26 + $0x68] sm:$0xff]  ;;  %v274_v22 = vld [vmem:[%s850_s26 + $0x160] sm:$0xff]  ;;  %v700_v24 = vpack.c.bf16 %v291_v16, %v290_v15  ;;  %v261_v27 = vld [vmem:[%s850_s26 + $0xf8] sm:$0xff] }
  0x2c   : > { %693 = vmatprep.subr.bf16.mxu1 %v692_v60  ;;  %v229_v23 = vld [vmem:[%s845_s22] sm:$0xff]  ;;  %v275_v25 = vld [vmem:[%s850_s26 + $0x168] sm:$0xff]  ;;  %v292_v30 = vld [vmem:[%s850_s26 + $0x1f0] sm:$0xff]  ;;  %v670_v32 = vpack.c.bf16 %v243_v21, %v242_v18  ;;  %v672_v36 = vpack.c.bf16 %v261_v27, %v260_v26 }
  0x2d   : > { %v302_v28 = vrot.slane %v229_v23, %v301_v14  ;;  %v295_v29 = vcombine.high %v229_v23, %v229_v23  ;;  %v293_v31 = vld [vmem:[%s850_s26 + $0x1f8] sm:$0xff]  ;;  %v702_v35 = vpack.c.bf16 %v275_v25, %v274_v22  ;;  %v244_v37 = vld [vmem:[%s850_s26 + $0x70] sm:$0xff]  ;;  %v228_v51 = vld [vmem:[#allocation2] sm:$0x3] }
  0x2e   : > { %663 = vmatpush3.bf16.msra.mxu0 %v662_v4  ;;  %v245_v38 = vld [vmem:[%s850_s26 + $0x78] sm:$0xff]  ;;  %v704_v39 = vpack.c.bf16 %v293_v31, %v292_v30  ;;  %v276_v40 = vld [vmem:[%s850_s26 + $0x170] sm:$0xff]  ;;  %v569_v55 = vld [vmem:[%s961_s2] ss:$0 sm:$0xff] (!%p568_p7) }
  0x2f   : > { %695 = vmatpush3.bf16.msra.mxu1 %v694_v5  ;;  %665 = vmatprep.subr.bf16.mxu0 %v664_v6  ;;  %v310_v33 = vcombine.high %v302_v28, %v302_v28  ;;  %v309_v34 = vrot.slane %v295_v29, %v301_v14  ;;  %v277_v41 = vld [vmem:[%s850_s26 + $0x178] sm:$0xff]  ;;  %v674_v43 = vpack.c.bf16 %v245_v38, %v244_v37 }
  0x30   : > { %697 = vmatprep.subr.bf16.mxu1 %v696_v10  ;;  %v706_v44 = vpack.c.bf16 %v277_v41, %v276_v40 }
  0x31   : > { %380 = vmatprep.mubr.f32.mxu0 %v310_v33  ;;  %v311_v42 = vcombine.high %v309_v34, %v309_v34 }
  0x32   : > { %667 = vmatpush3.bf16.msra.mxu0 %v666_v17 }
  0x33   : > { %699 = vmatpush3.bf16.msra.mxu1 %v698_v19  ;;  %669 = vmatprep.subr.bf16.mxu0 %v668_v20 }
  0x34   : > { %701 = vmatprep.subr.bf16.mxu1 %v700_v24  ;;  %450 = vmatprep.mubr.f32.mxu1 %v311_v42 }
  0x36   : > { %671 = vmatpush3.bf16.msra.mxu0 %v670_v32 }
  0x37   : > { %703 = vmatpush3.bf16.msra.mxu1 %v702_v35  ;;  %673 = vmatprep.subr.bf16.mxu0 %v672_v36 }
  0x38   : > { %705 = vmatprep.subr.bf16.mxu1 %v704_v39 }
  0x3a   : > { %675 = vmatpush3.bf16.msra.mxu0 %v674_v43 }
  0x3b   : > { %707 = vmatpush3.bf16.msra.mxu1 %v706_v44 }
  0x3d   : > { %381 = vmatmul.mubr.f32.vlgmr.msra.gmra.mrb[0].mxu0 %v302_v28 }
  0x3e   : > { %451 = vmatmul.mubr.f32.vlgmr.msra.gmra.mrb[0].mxu1 %v309_v34 }
 0x110   : > { %v606_v45 = vpop.f32.mrb[0].mxu0 }
 0x111   : > { %v641_v46 = vpop.f32.mrb[0].mxu1  ;;  %v607_v47 = vpop.f32.mrb[1].mxu0 }
 0x112   : > { %v608_v48 = vadd.f32 %v607_v47, %v606_v45  ;;  %v642_v49 = vpop.f32.mrb[1].mxu1 }
 0x113   : > { %v643_v50 = vadd.f32 %v642_v49, %v641_v46  ;;  %461 = sbr.rel (%p568_p7) target bundleno = 292 (0x124), region = 40 }
 0x115   : > { %v453_v52 = vadd.f32 %v643_v50, %v608_v48 }
 0x117   : > { %v456_v53 = vadd.f32 %v453_v52, %v228_v51 }
 0x119   : > { %457 = vst [vmem:[#allocation2] sm:$0x3] %v456_v53 }
 0x120   : > { %v462_v54 = vld [vmem:[#allocation2] sm:$0x3] }
 0x121   : > { %v470_v56 = vadd.f32 %v569_v55, %v462_v54 }
 0x123   : > { %471 = vst [vmem:[#allocation2] sm:$0x3] %v470_v56 }
 0x124 PF: > { %p924_p8 = scmp.eq.s32.totalorder %s558_s15, 3  ;;  %s798_s30 = smov [#allocation2]  }
 0x125   : > { %s481_s4 = sshll.u32 %s798_s30, 4  ;;  %s482_s4 = int_to_ptr.vmem [resolvable:$true] %s481_s4 }
 0x126   : > { %s742_s5 = scalar_lea.vmem %s482_s4, 32  ;;  %p749_p12 = scmp.lt.s32.totalorder %s482_s4, %s482_s4 }
 0x127   : > { %p743_p9 = scmp.ne.s32.totalorder %s482_s4, %s742_s5  ;;  %p750_p13 = scmp.lt.s32.totalorder %s742_s5, %s742_s5 }
 0x129   : > { %p744_p10 = pnand %p743_p9, %p924_p8  ;;  %p751_p0 = por %p750_p13, %p749_p12 }
 0x12b   : > { %p745_p11 = pneg %p744_p10 }
 0x12d   : > { %p752_p1 = pnand %p751_p0, %p745_p11 }
 0x12f   : > { %755 = shalt.err (!%p752_p1)
}
 0x130   : > { %s756_s8 = scalar_lea.hbm %s962_s3, 32 }
 0x131   : > { %p757_p2 = scmp.ne.s32.totalorder %s962_s3, %s756_s8  ;;  %p762_p5 = scmp.lt.u32.totalorder %s756_s8, %s962_s3 }
 0x133   : > { %p758_p3 = pnand %p757_p2, %p924_p8 }
 0x135   : > { %p759_p4 = pneg %p758_p3 }
 0x137   : > { %p764_p6 = pnand %p762_p5, %p759_p4 }
 0x139   : > { %767 = shalt.err (!%p764_p6)
}
 0x13a   : > { %709 = dma.vmem_to_hbm [thread:$0]  (%p924_p8), %s482_s4, 32, %s962_s3, [#allocation3]  }
 0x13b   : > { %781 = dma.done.wait (%p924_p8), [#allocation3], 32  }
 0x13c   : > { %783 = vsyncadd (%p924_p8), [#allocation3], 4294967264 }
 0x13d PF: > { %s14_s14 = sadd.s32 1, %s794_s14   ;;  %s964_s12 = smov %s790_s13 }
 0x13e   : > { %p11_p7 = scmp.ge.s32.totalorder %s14_s14, 6   ;;  %s965_s13 = smov %s967_s16 }
 0x140   :  { %13 = sbr.rel (!%p11_p7) target bundleno = 2 (0x2), region = 74 }
 0x147   :  { %494 = vsyncpa [#allocation3], 1 }
 0x148   :  { %496 = vsyncpa [#allocation3 + $0x1], 1 }

// kernel: fc5_mnist_forward.4
= control target key start
LH: loop header
LB: loop body
LE: loop exit
PB: predicated region body
PF: predicated region fallthrough
CT: control target
= control target key end

     0   :  { %s3325_s0 = inlined_call_operand.vmem [shape: f32[2,1024], index: 0, kind: input, shape index: {}]   ;;  %s3326_s1 = inlined_call_operand.hbm [shape: f32[1024,2048], index: 1, kind: input, shape index: {}]   ;;  %s3327_s2 = inlined_call_operand.hbm [shape: f32[1,2048], index: 2, kind: input, shape index: {}]   ;;  %s3328_s3 = inlined_call_operand.vmem [shape: f32[2,2048], index: 3, kind: output, shape index: {}]  }
   0x1   :  { %3334 = sst [smem:[#allocation9_spill]] %s3326_s1 }
   0x2   :  { %8 = vsyncpa [#allocation3], 0 }
   0x3   :  { %10 = vsyncpa [#allocation3 + $0x1], 0 }
   0x4   :  { %11 = vsyncpa [#allocation5], 0 }
   0x5   :  { %13 = vsyncpa [#allocation5 + $0x1], 0  ;;  %s2464_s12 = smov 0   ;;  %s2466_s13 = smov 0  }
   0x6   :  { %s2468_s14 = smov 0   ;;  %s2470_s15 = smov 0  }
   0x7   :  { %s2472_s16 = smov 0   ;;  %s2474_s17 = smov 0  }
   0x8   :  { %s2476_s18 = smov 0   ;;  %s2478_s19 = smov 0  }
   0x9   :  { %s2480_s20 = smov 0   ;;  %s2482_s21 = smov 0  }
   0xa   :  { %s2484_s22 = smov 0  }
   0xb LB: > { %s28_s23 = sadd.s32 1, %s2427_s20  ;;  %s66_s24 = sadd.s32 1, %s2415_s17  ;;  %s2435_s22 = sphi %s2484_s22, %s19_s22   ;;  %s2431_s21 = sphi %s2482_s21, %s3360_s21   ;;  %s2427_s20 = sphi %s2480_s20, %s3359_s20   ;;  %s2423_s19 = sphi %s2478_s19, %s3358_s19   ;;  %s2419_s18 = sphi %s2476_s18, %s3357_s18   ;;  %s2415_s17 = sphi %s2474_s17, %s3356_s17   ;;  %s2411_s16 = sphi %s2472_s16, %s3355_s16   ;;  %s2407_s15 = sphi %s2470_s15, %s3354_s15   ;;  %s2403_s14 = sphi %s2468_s14, %s3353_s14   ;;  %s2399_s13 = sphi %s2466_s13, %s3352_s13   ;;  %s2395_s12 = sphi %s2464_s12, %s3351_s12  }
   0xc   : > { %p2521_p0 = scmp.ge.s32.totalorder %s28_s23, 2  ;;  %p73_p1 = scmp.ne.s32.totalorder %s2415_s17, %s2411_s16 }
   0xd   : > { %p3330_p2 = scmp.eq.s32.totalorder %s2435_s22, 0  ;;  %p3329_p4 = scmp.lt.s32.totalorder %s2435_s22, 4 }
   0xe   : > { %s3362_s23 = smov (%p2521_p0, %s28_s23), 0  ;;  %s164_s27 = sand.u32 1, %s2415_s17  }
   0xf   : > { %p75_p3 = por %p3330_p2, %p73_p1  ;;  %s61_s26 = ssub.s32 %s2427_s20, %s3362_s23 }
  0x10   : > { %s1634_s28 = sshll.u32 %s164_s27, 12  ;;  %s1636_s29 = sshll.u32 %s2431_s21, 3 }
  0x11   : > { %s1653_s30 = sshll.u32 %s2427_s20, 10  ;;  %s168_s4 = scalar_lea.vmem [#allocation2], %s1634_s28 }
  0x12   : > { %s178_s5 = sshll.u32 %s168_s4, 4  ;;  %s175_s6 = sadd.s32 %s1653_s30, %s1636_s29  ;;  %s2540_s5 = int_to_ptr.vmem [resolvable:$true] %s178_s5 }
  0x13   : > { %s1638_s7 = sshll.u32 %s175_s6, 7  ;;  %p2544_p5 = pnand %p3329_p4, %p75_p3 }
  0x14   : > { %s3337_s1 = sld [smem:[#allocation9_spill]]  ;;  %s2554_s28 = scalar_lea.sflag [#allocation3], %s164_s27 }
  0x15   : > { %p2283_p8 = pneg %p2544_p5 }
  0x1a   : > { %s2551_s11 = scalar_lea.hbm %s3337_s1, %s1638_s7  ;;  %s2286_s6 = scalar_lea.hbm %s3337_s1, 262144 }
  0x1b   : > { %s2281_s29 = scalar_lea.hbm %s2551_s11, 65536  ;;  %p2287_p11 = scmp.lt.u32.totalorder %s2551_s11, %s3337_s1 }
  0x1c   : > { %p2282_p7 = scmp.ne.s32.totalorder %s2551_s11, %s2281_s29  ;;  %p2288_p12 = scmp.lt.u32.totalorder %s2286_s6, %s2281_s29 }
  0x1d   : > { %p2290_p1 = scmp.lt.u32.totalorder %s2281_s29, %s2551_s11 }
  0x1e   : > { %p2284_p9 = pnand %p2283_p8, %p2282_p7  ;;  %p2289_p13 = por %p2288_p12, %p2287_p11 }
  0x20   : > { %p2285_p10 = pneg %p2284_p9  ;;  %p2291_p3 = por %p2290_p1, %p2289_p13 }
  0x22   : > { %p2292_p4 = pnand %p2291_p3, %p2285_p10 }
  0x24   : > { %2295 = shalt.err (!%p2292_p4)
}
  0x25   : > { %s2296_s27 = scalar_lea.vmem %s2540_s5, 65536  ;;  %s2437_s10 = smov [#allocation2]  }
  0x26   : > { %p2297_p7 = scmp.ne.s32.totalorder %s2540_s5, %s2296_s27  ;;  %s2301_s30 = sshll.u32 %s2437_s10, 4  ;;  %s2302_s30 = int_to_ptr.vmem [resolvable:$false] %s2301_s30 }
  0x27   : > { %s2303_s4 = scalar_lea.vmem %s2302_s30, 131072  ;;  %p2304_p6 = scmp.lt.s32.totalorder %s2540_s5, %s2302_s30 }
  0x28   : > { %p2299_p9 = pnand %p2297_p7, %p2283_p8  ;;  %p2305_p11 = scmp.lt.s32.totalorder %s2303_s4, %s2296_s27 }
  0x2a   : > { %p2300_p2 = pneg %p2299_p9  ;;  %p2306_p12 = por %p2305_p11, %p2304_p6 }
  0x2c   : > { %p2307_p13 = pnand %p2306_p12, %p2300_p2 }
  0x2e   : > { %2310 = shalt.err (!%p2307_p13)
}
  0x2f   : > { %s2438_s29 = smov 2048   ;;  %s2439_s6 = smov 1024  }
  0x30   : > { %s2440_s7 = smov 64   ;;  %p205_p2 = scmp.lt.s32.totalorder %s2435_s22, 5 }
  0x31   : > { %2182 = dma.hbm_to_vmem [thread:$0]  (!%p2544_p5), %s2551_s11, 65536, %s2540_s5, %s2554_s28, %s2438_s29, %s2439_s6, %s2440_s7  }
  0x32   : > { %p3338_p4 = scmp.ge.s32.totalorder %s2435_s22, 1  ;;  %s1630_s27 = sadd.s32 4294967295, %s2435_s22  }
  0x33   : > { %s31_s10 = sadd.s32 1, %s2431_s21  ;;  %p79_p8 = scmp.ne.s32.totalorder %s2411_s16, %s2407_s15 }
  0x34   : > { %p2585_p6 = pnand %p3338_p4, %p205_p2  ;;  %s3364_s10 = smov (!%p2521_p0, %s31_s10), %s2431_s21 }
  0x35   : > { %p2596_p10 = scmp.eq.s32.totalorder %s1630_s27, 0  ;;  %p33_p5 = scmp.ge.s32.totalorder %s3364_s10, 2 }
  0x36   : > { %s92_s5 = sadd.s32 1, %s2403_s14  ;;  %p99_p3 = scmp.ne.s32.totalorder %s2403_s14, %s2399_s13 }
  0x37   : > { %p2603_p1 = por %p2596_p10, %p79_p8  ;;  %s3366_s10 = smov (%p33_p5, %s3364_s10), 0 }
  0x38   : > { %3342 = sst [smem:[#allocation8_spill]] %s3366_s10  ;;  %p3343_p0 = scmp.eq.s32.totalorder %s2435_s22, 0 }
  0x39   : > { %s3341_s11 = scalar_select %p2603_p1, 1, 0 }
  0x3a   : > { %p2613_p7 = por %p99_p3, %p3343_p0  ;;  %p105_p9 = scmp.ne.s32.totalorder %s2399_s13, %s2395_s12 }
  0x3b   : > { %s62_s25 = ssub.s32 %s2431_s21, %s3366_s10  ;;  %s188_s28 = sand.u32 1, %s2403_s14  }
  0x3c   : > { %s63_s30 = sor.u32 %s62_s25, %s61_s26  ;;  %p90_p11 = scmp.eq.s32.totalorder %s62_s25, 0 }
  0x3d   : > { %p64_p12 = scmp.eq.s32.totalorder %s63_s30, 0  ;;  %p2627_p13 = por %p105_p9, %p2596_p10 }
  0x3e   : > { %s2632_s29 = scalar_select %p90_p11, %s2403_s14, %s92_s5  }
  0x3f   : > { %s3345_s4 = scalar_select %p2627_p13, 1, 0 }
  0x40   : > { %s2637_s6 = scalar_select %p64_p12, %s2415_s17, %s66_s24  }
  0x41   : > { %s1639_s7 = sshll.u32 %s188_s28, 3  ;;  %s1654_s27 = sshll.u32 %s2431_s21, 7 }
  0x42   : > { %s2643_s10 = scalar_lea.hbm %s3327_s2, %s1654_s27  ;;  %s192_s26 = scalar_lea.vmem [#allocation4], %s1639_s7 }
  0x43   : > { %s200_s8 = sshll.u32 %s192_s26, 4  ;;  %p3346_p2 = scmp.lt.s32.totalorder %s2435_s22, 4  ;;  %s2645_s8 = int_to_ptr.vmem [resolvable:$true] %s200_s8 }
  0x44   : > { %s189_s5 = scalar_lea.sflag [#allocation5], %s188_s28  ;;  %s2311_s1 = scalar_lea.hbm %s2643_s10, 128 }
  0x45   : > { %p2651_p4 = pnand %p3346_p2, %p2613_p7  ;;  %p2312_p8 = scmp.ne.s32.totalorder %s2643_s10, %s2311_s1 }
  0x46   : > { %s2316_s15 = scalar_lea.hbm %s3327_s2, 256  ;;  %p2317_p0 = scmp.lt.u32.totalorder %s2643_s10, %s3327_s2 }
  0x47   : > { %p2313_p10 = pneg %p2651_p4  ;;  %p2318_p7 = scmp.lt.u32.totalorder %s2316_s15, %s2311_s1 }
  0x48   : > { %p2320_p11 = scmp.lt.u32.totalorder %s2311_s1, %s2643_s10 }
  0x49   : > { %p2314_p5 = pnand %p2313_p10, %p2312_p8  ;;  %p2319_p9 = por %p2318_p7, %p2317_p0 }
  0x4b   : > { %p2315_p3 = pneg %p2314_p5  ;;  %p2321_p12 = por %p2320_p11, %p2319_p9 }
  0x4d   : > { %p2322_p2 = pnand %p2321_p12, %p2315_p3 }
  0x4f   : > { %2325 = shalt.err (!%p2322_p2)
}
  0x50   : > { %s2326_s28 = scalar_lea.vmem %s2645_s8, 128  ;;  %s2441_s12 = smov [#allocation4]  }
  0x51   : > { %p2327_p8 = scmp.ne.s32.totalorder %s2645_s8, %s2326_s28  ;;  %s2331_s26 = sshll.u32 %s2441_s12, 4  ;;  %s2332_s26 = int_to_ptr.vmem [resolvable:$false] %s2331_s26 }
  0x52   : > { %s2333_s25 = scalar_lea.vmem %s2332_s26, 256  ;;  %p2334_p1 = scmp.lt.s32.totalorder %s2645_s8, %s2332_s26 }
  0x53   : > { %p2329_p5 = pnand %p2327_p8, %p2313_p10  ;;  %p2335_p0 = scmp.lt.s32.totalorder %s2333_s25, %s2326_s28 }
  0x55   : > { %p2330_p13 = pneg %p2329_p5  ;;  %p2336_p7 = por %p2335_p0, %p2334_p1 }
  0x57   : > { %p2337_p9 = pnand %p2336_p7, %p2330_p13 }
  0x59   : > { %2340 = shalt.err (!%p2337_p9)
}
  0x5a   : > { %2185 = dma.hbm_to_vmem [thread:$0]  (!%p2651_p4), %s2643_s10, 128, %s2645_s8, %s189_s5  }
  0x5b   : > { %209 = sbr.rel (%p2585_p6) target bundleno = 611 (0x263), region = 32  ;;  %s211_s1 = sand.u32 (!%p2585_p6), 1, %s2411_s16  }
  0x5c   : > { %s1643_s30 = sshll.u32 (!%p2585_p6), %s211_s1, 12  ;;  %s212_s15 = scalar_lea.sflag (!%p2585_p6), [#allocation3], %s211_s1 }
  0x5d   : > { %s2683_s7 = scalar_lea.vmem (!%p2585_p6), [#allocation2], %s1643_s30  ;;  %p3348_p10 = scmp.ne.s32.totalorder (!%p2585_p6), %s3341_s11, 0 }
  0x62   : > { %2386 = dma.done.wait (%p3348_p10), %s212_s15, 65536  }
  0x63   : > { %2388 = vsyncadd (%p3348_p10), %s212_s15, 4294901760  ;;  %s220_s24 = sand.u32 1, %s2399_s13   ;;  %p3349_p6 = scmp.ne.s32.totalorder %s3345_s4, 0 }
  0x64   : > { %s2690_s27 = sshll.u32 %s220_s24, 3  ;;  %s221_s9 = scalar_lea.sflag [#allocation5], %s220_s24 }
  0x65   : > { %s224_s10 = scalar_lea.vmem [#allocation4], %s2690_s27 }
  0x66   : > { %2390 = dma.done.wait (%p3349_p6), %s221_s9, 128  }
  0x67   : > { %2392 = vsyncadd (%p3349_p6), %s221_s9, 4294967168  ;;  %s1645_s8 = sshll.u32 %s2419_s18, 2  ;;  %s1647_s5 = sshll.u32 %s2423_s19, 3 }
  0x68   : > { %p258_p1 = scmp.lt.s32.totalorder %s1645_s8, 7  ;;  %p267_p13 = scmp.lt.s32.totalorder %s1647_s5, 15 }
  0x69   : > { %p1649_p4 = scmp.ne.s32.totalorder %s2419_s18, 0 }
  0x6a   : > { %s3368_s8 = smov (!%p258_p1, %s1645_s8), 7  ;;  %s3370_s5 = smov (!%p267_p13, %s1647_s5), 15 }
  0x6b   : > { %s1646_s11 = sshll.u32 %s3368_s8, 1  ;;  %s1648_s25 = sshll.u32 %s3370_s5, 1  ;;  %v2442_v0 = vmov (!%p1649_p4), 0.0  }
  0x6c   : > { %s2702_s26 = scalar_lea.vmem %s3325_s0, %s1646_s11  ;;  %s2707_s4 = scalar_lea.vmem %s3328_s3, %s1648_s25 }
  0x6d   : > { %275 = sbr.rel (%p1649_p4) target bundleno = 116 (0x74), region = 44  ;;  %276 = vst [vmem:[%s2707_s4] sm:$0xff] (!%p1649_p4), %v2442_v0  ;;  %277 = vst [vmem:[%s2707_s4 + $0x8] sm:$0xff] (!%p1649_p4), %v2442_v0 }
  0x74 PF: > { %v282_v1 = vld [vmem:[%s2683_s7 + $0x8] sm:$0xff]  ;;  %v284_v3 = vld [vmem:[%s2683_s7 + $0x18] sm:$0xff]  ;;  %v281_v6 = vld [vmem:[%s2683_s7] sm:$0xff]  ;;  %p1650_p3 = scmp.ne.s32.totalorder %s2419_s18, 1 }
  0x75   : > { %v290_v2 = vld [vmem:[%s2683_s7 + $0x48] sm:$0xff]  ;;  %v292_v5 = vld [vmem:[%s2683_s7 + $0x58] sm:$0xff]  ;;  %v289_v7 = vld [vmem:[%s2683_s7 + $0x40] sm:$0xff] }
  0x76   : > { %v1655_v4 = vpack.c.bf16 %v290_v2, %v282_v1  ;;  %v1783_v8 = vpack.c.bf16 %v292_v5, %v284_v3  ;;  %v1657_v9 = vpack.c.bf16 %v289_v7, %v281_v6  ;;  %v283_v10 = vld [vmem:[%s2683_s7 + $0x10] sm:$0xff]  ;;  %v298_v12 = vld [vmem:[%s2683_s7 + $0x88] sm:$0xff]  ;;  %v300_v15 = vld [vmem:[%s2683_s7 + $0x98] sm:$0xff] }
  0x77   : > { %v291_v11 = vld [vmem:[%s2683_s7 + $0x50] sm:$0xff]  ;;  %v306_v14 = vld [vmem:[%s2683_s7 + $0xc8] sm:$0xff]  ;;  %v308_v16 = vld [vmem:[%s2683_s7 + $0xd8] sm:$0xff] }
  0x78   : > { %1656 = vmatprep.subr.bf16.mxu0 %v1655_v4  ;;  %v1785_v13 = vpack.c.bf16 %v291_v11, %v283_v10  ;;  %1784 = vmatprep.subr.bf16.mxu1 %v1783_v8  ;;  %v1659_v17 = vpack.c.bf16 %v306_v14, %v298_v12  ;;  %v1787_v18 = vpack.c.bf16 %v308_v16, %v300_v15  ;;  %v297_v19 = vld [vmem:[%s2683_s7 + $0x80] sm:$0xff]  ;;  %v299_v21 = vld [vmem:[%s2683_s7 + $0x90] sm:$0xff]  ;;  %v314_v24 = vld [vmem:[%s2683_s7 + $0x108] sm:$0xff] }
  0x79   : > { %1658 = vmatpush1.bf16.msra.mxu0 %v1657_v9  ;;  %v305_v20 = vld [vmem:[%s2683_s7 + $0xc0] sm:$0xff]  ;;  %v307_v23 = vld [vmem:[%s2683_s7 + $0xd0] sm:$0xff]  ;;  %v322_v25 = vld [vmem:[%s2683_s7 + $0x148] sm:$0xff] }
  0x7a   : > { %1786 = vmatpush1.bf16.msra.mxu1 %v1785_v13  ;;  %v1661_v22 = vpack.c.bf16 %v305_v20, %v297_v19  ;;  %1660 = vmatprep.subr.bf16.mxu0 %v1659_v17  ;;  %v1789_v26 = vpack.c.bf16 %v307_v23, %v299_v21  ;;  %v1663_v27 = vpack.c.bf16 %v322_v25, %v314_v24  ;;  %v316_v28 = vld [vmem:[%s2683_s7 + $0x118] sm:$0xff]  ;;  %v313_v30 = vld [vmem:[%s2683_s7 + $0x100] sm:$0xff]  ;;  %v315_v33 = vld [vmem:[%s2683_s7 + $0x110] sm:$0xff] }
  0x7b   : > { %1788 = vmatprep.subr.bf16.mxu1 %v1787_v18  ;;  %v324_v29 = vld [vmem:[%s2683_s7 + $0x158] sm:$0xff]  ;;  %v321_v32 = vld [vmem:[%s2683_s7 + $0x140] sm:$0xff]  ;;  %v323_v34 = vld [vmem:[%s2683_s7 + $0x150] sm:$0xff] }
  0x7c   : > { %v1791_v31 = vpack.c.bf16 %v324_v29, %v316_v28  ;;  %v1665_v35 = vpack.c.bf16 %v321_v32, %v313_v30  ;;  %v330_v36 = vld [vmem:[%s2683_s7 + $0x188] sm:$0xff]  ;;  %v332_v38 = vld [vmem:[%s2683_s7 + $0x198] sm:$0xff]  ;;  %v1793_v39 = vpack.c.bf16 %v323_v34, %v315_v33  ;;  %v329_v42 = vld [vmem:[%s2683_s7 + $0x180] sm:$0xff] }
  0x7d   : > { %1662 = vmatpush1.bf16.msra.mxu0 %v1661_v22  ;;  %v338_v37 = vld [vmem:[%s2683_s7 + $0x1c8] sm:$0xff]  ;;  %v340_v41 = vld [vmem:[%s2683_s7 + $0x1d8] sm:$0xff]  ;;  %v337_v43 = vld [vmem:[%s2683_s7 + $0x1c0] sm:$0xff] }
  0x7e   : > { %1790 = vmatpush1.bf16.msra.mxu1 %v1789_v26  ;;  %1664 = vmatprep.subr.bf16.mxu0 %v1663_v27  ;;  %v1667_v40 = vpack.c.bf16 %v338_v37, %v330_v36  ;;  %v1795_v44 = vpack.c.bf16 %v340_v41, %v332_v38  ;;  %v331_v45 = vld [vmem:[%s2683_s7 + $0x190] sm:$0xff]  ;;  %v346_v47 = vld [vmem:[%s2683_s7 + $0x208] sm:$0xff]  ;;  %v348_v49 = vld [vmem:[%s2683_s7 + $0x218] sm:$0xff]  ;;  %v1669_v51 = vpack.c.bf16 %v337_v43, %v329_v42 }
  0x7f   : > { %1792 = vmatprep.subr.bf16.mxu1 %v1791_v31  ;;  %v339_v46 = vld [vmem:[%s2683_s7 + $0x1d0] sm:$0xff]  ;;  %v354_v48 = vld [vmem:[%s2683_s7 + $0x248] sm:$0xff]  ;;  %v356_v50 = vld [vmem:[%s2683_s7 + $0x258] sm:$0xff] }
  0x80   : > { %v1797_v52 = vpack.c.bf16 %v339_v46, %v331_v45  ;;  %v1671_v53 = vpack.c.bf16 %v354_v48, %v346_v47  ;;  %v345_v54 = vld [vmem:[%s2683_s7 + $0x200] sm:$0xff]  ;;  %v347_v56 = vld [vmem:[%s2683_s7 + $0x210] sm:$0xff]  ;;  %v1799_v57 = vpack.c.bf16 %v356_v50, %v348_v49  ;;  %v362_v59 = vld [vmem:[%s2683_s7 + $0x288] sm:$0xff]  ;;  %v2443_v47 = vmov 1983009808  }
  0x81   : > { %1666 = vmatpush1.bf16.msra.mxu0 %v1665_v35  ;;  %v353_v55 = vld [vmem:[%s2683_s7 + $0x240] sm:$0xff]  ;;  %v355_v58 = vld [vmem:[%s2683_s7 + $0x250] sm:$0xff]  ;;  %v370_v60 = vld [vmem:[%s2683_s7 + $0x2c8] sm:$0xff]  ;;  %v796_v48 = vunpack.c.l.s4 %v2443_v47  ;;  %v798_v49 = vlaneseq }
  0x82   : > { %1794 = vmatpush1.bf16.msra.mxu1 %v1793_v39  ;;  %1668 = vmatprep.subr.bf16.mxu0 %v1667_v40  ;;  %v364_v61 = vld [vmem:[%s2683_s7 + $0x298] sm:$0xff]  ;;  %v1673_v63 = vpack.c.bf16 %v353_v55, %v345_v54  ;;  %v1801_v0 = vpack.c.bf16 %v355_v58, %v347_v56  ;;  %v1675_v1 = vpack.c.bf16 %v370_v60, %v362_v59  ;;  %v361_v2 = vld [vmem:[%s2683_s7 + $0x280] sm:$0xff]  ;;  %v363_v4 = vld [vmem:[%s2683_s7 + $0x290] sm:$0xff] }
  0x83   : > { %1796 = vmatprep.subr.bf16.mxu1 %v1795_v44  ;;  %v372_v62 = vld [vmem:[%s2683_s7 + $0x2d8] sm:$0xff]  ;;  %v369_v3 = vld [vmem:[%s2683_s7 + $0x2c0] sm:$0xff]  ;;  %v371_v6 = vld [vmem:[%s2683_s7 + $0x2d0] sm:$0xff] }
  0x84   : > { %v1803_v5 = vpack.c.bf16 %v372_v62, %v364_v61  ;;  %v378_v7 = vld [vmem:[%s2683_s7 + $0x308] sm:$0xff]  ;;  %v380_v9 = vld [vmem:[%s2683_s7 + $0x318] sm:$0xff]  ;;  %v1677_v11 = vpack.c.bf16 %v369_v3, %v361_v2  ;;  %v1805_v12 = vpack.c.bf16 %v371_v6, %v363_v4  ;;  %v377_v14 = vld [vmem:[%s2683_s7 + $0x300] sm:$0xff]  ;;  %v797_v62 = vunpack.c.0.s8 %v796_v48 }
  0x85   : > { %1670 = vmatpush1.bf16.msra.mxu0 %v1669_v51  ;;  %v386_v8 = vld [vmem:[%s2683_s7 + $0x348] sm:$0xff]  ;;  %v388_v10 = vld [vmem:[%s2683_s7 + $0x358] sm:$0xff]  ;;  %v385_v15 = vld [vmem:[%s2683_s7 + $0x340] sm:$0xff] }
  0x86   : > { %1798 = vmatpush1.bf16.msra.mxu1 %v1797_v52  ;;  %1672 = vmatprep.subr.bf16.mxu0 %v1671_v53  ;;  %v1679_v13 = vpack.c.bf16 %v386_v8, %v378_v7  ;;  %v379_v16 = vld [vmem:[%s2683_s7 + $0x310] sm:$0xff]  ;;  %v1807_v17 = vpack.c.bf16 %v388_v10, %v380_v9  ;;  %v394_v19 = vld [vmem:[%s2683_s7 + $0x388] sm:$0xff]  ;;  %v396_v21 = vld [vmem:[%s2683_s7 + $0x398] sm:$0xff]  ;;  %v1681_v23 = vpack.c.bf16 %v385_v15, %v377_v14 }
  0x87   : > { %1800 = vmatprep.subr.bf16.mxu1 %v1799_v57  ;;  %v387_v18 = vld [vmem:[%s2683_s7 + $0x350] sm:$0xff]  ;;  %v402_v20 = vld [vmem:[%s2683_s7 + $0x3c8] sm:$0xff]  ;;  %v404_v22 = vld [vmem:[%s2683_s7 + $0x3d8] sm:$0xff] }
  0x88   : > { %v1809_v24 = vpack.c.bf16 %v387_v18, %v379_v16  ;;  %v1683_v25 = vpack.c.bf16 %v402_v20, %v394_v19  ;;  %v393_v26 = vld [vmem:[%s2683_s7 + $0x380] sm:$0xff]  ;;  %v395_v28 = vld [vmem:[%s2683_s7 + $0x390] sm:$0xff]  ;;  %v1811_v29 = vpack.c.bf16 %v404_v22, %v396_v21  ;;  %v410_v31 = vld [vmem:[%s2683_s7 + $0x408] sm:$0xff] }
  0x89   : > { %1674 = vmatpush1.bf16.msra.mxu0 %v1673_v63  ;;  %v401_v27 = vld [vmem:[%s2683_s7 + $0x3c0] sm:$0xff]  ;;  %v403_v30 = vld [vmem:[%s2683_s7 + $0x3d0] sm:$0xff]  ;;  %v418_v32 = vld [vmem:[%s2683_s7 + $0x448] sm:$0xff]  ;;  %v2796_v63 = vshrl.u32 %v798_v49, 7 }
  0x8a   : > { %1802 = vmatpush1.bf16.msra.mxu1 %v1801_v0  ;;  %1676 = vmatprep.subr.bf16.mxu0 %v1675_v1  ;;  %v412_v33 = vld [vmem:[%s2683_s7 + $0x418] sm:$0xff]  ;;  %v1685_v35 = vpack.c.bf16 %v401_v27, %v393_v26  ;;  %v1813_v36 = vpack.c.bf16 %v403_v30, %v395_v28  ;;  %v1687_v37 = vpack.c.bf16 %v418_v32, %v410_v31  ;;  %v409_v38 = vld [vmem:[%s2683_s7 + $0x400] sm:$0xff]  ;;  %v411_v40 = vld [vmem:[%s2683_s7 + $0x410] sm:$0xff] }
  0x8b   : > { %1804 = vmatprep.subr.bf16.mxu1 %v1803_v5  ;;  %v420_v34 = vld [vmem:[%s2683_s7 + $0x458] sm:$0xff]  ;;  %v417_v39 = vld [vmem:[%s2683_s7 + $0x440] sm:$0xff]  ;;  %v419_v42 = vld [vmem:[%s2683_s7 + $0x450] sm:$0xff] }
  0x8c   : > { %v1815_v41 = vpack.c.bf16 %v420_v34, %v412_v33  ;;  %v426_v43 = vld [vmem:[%s2683_s7 + $0x488] sm:$0xff]  ;;  %v428_v45 = vld [vmem:[%s2683_s7 + $0x498] sm:$0xff]  ;;  %v1689_v50 = vpack.c.bf16 %v417_v39, %v409_v38  ;;  %v1817_v51 = vpack.c.bf16 %v419_v42, %v411_v40  ;;  %v425_v53 = vld [vmem:[%s2683_s7 + $0x480] sm:$0xff] }
  0x8d   : > { %1678 = vmatpush1.bf16.msra.mxu0 %v1677_v11  ;;  %v434_v44 = vld [vmem:[%s2683_s7 + $0x4c8] sm:$0xff]  ;;  %v436_v46 = vld [vmem:[%s2683_s7 + $0x4d8] sm:$0xff]  ;;  %v433_v54 = vld [vmem:[%s2683_s7 + $0x4c0] sm:$0xff] }
  0x8e   : > { %1806 = vmatpush1.bf16.msra.mxu1 %v1805_v12  ;;  %1680 = vmatprep.subr.bf16.mxu0 %v1679_v13  ;;  %v1691_v52 = vpack.c.bf16 %v434_v44, %v426_v43  ;;  %v427_v55 = vld [vmem:[%s2683_s7 + $0x490] sm:$0xff]  ;;  %v1819_v56 = vpack.c.bf16 %v436_v46, %v428_v45  ;;  %v442_v58 = vld [vmem:[%s2683_s7 + $0x508] sm:$0xff]  ;;  %v444_v60 = vld [vmem:[%s2683_s7 + $0x518] sm:$0xff]  ;;  %v1693_v0 = vpack.c.bf16 %v433_v54, %v425_v53 }
  0x8f   : > { %1808 = vmatprep.subr.bf16.mxu1 %v1807_v17  ;;  %v435_v57 = vld [vmem:[%s2683_s7 + $0x4d0] sm:$0xff]  ;;  %v450_v59 = vld [vmem:[%s2683_s7 + $0x548] sm:$0xff]  ;;  %v452_v61 = vld [vmem:[%s2683_s7 + $0x558] sm:$0xff]  ;;  %v2807_v12 = vsub.s32 %v797_v62, %v2796_v63 }
  0x90   : > { %v1821_v1 = vpack.c.bf16 %v435_v57, %v427_v55  ;;  %v1695_v2 = vpack.c.bf16 %v450_v59, %v442_v58  ;;  %v441_v3 = vld [vmem:[%s2683_s7 + $0x500] sm:$0xff]  ;;  %v443_v5 = vld [vmem:[%s2683_s7 + $0x510] sm:$0xff]  ;;  %v1823_v6 = vpack.c.bf16 %v452_v61, %v444_v60  ;;  %v458_v8 = vld [vmem:[%s2683_s7 + $0x588] sm:$0xff] }
  0x91   : > { %1682 = vmatpush1.bf16.msra.mxu0 %v1681_v23  ;;  %v449_v4 = vld [vmem:[%s2683_s7 + $0x540] sm:$0xff]  ;;  %v451_v7 = vld [vmem:[%s2683_s7 + $0x550] sm:$0xff]  ;;  %v466_v9 = vld [vmem:[%s2683_s7 + $0x5c8] sm:$0xff] }
  0x92   : > { %1810 = vmatpush1.bf16.msra.mxu1 %v1809_v24  ;;  %1684 = vmatprep.subr.bf16.mxu0 %v1683_v25  ;;  %v460_v10 = vld [vmem:[%s2683_s7 + $0x598] sm:$0xff]  ;;  %v1697_v13 = vpack.c.bf16 %v449_v4, %v441_v3  ;;  %v457_v14 = vld [vmem:[%s2683_s7 + $0x580] sm:$0xff]  ;;  %v1825_v15 = vpack.c.bf16 %v451_v7, %v443_v5  ;;  %v1699_v16 = vpack.c.bf16 %v466_v9, %v458_v8  ;;  %v459_v18 = vld [vmem:[%s2683_s7 + $0x590] sm:$0xff] }
  0x93   : > { %1812 = vmatprep.subr.bf16.mxu1 %v1811_v29  ;;  %v468_v11 = vld [vmem:[%s2683_s7 + $0x5d8] sm:$0xff]  ;;  %v465_v17 = vld [vmem:[%s2683_s7 + $0x5c0] sm:$0xff]  ;;  %v467_v19 = vld [vmem:[%s2683_s7 + $0x5d0] sm:$0xff] }
  0x94   : > { %v1827_v20 = vpack.c.bf16 %v468_v11, %v460_v10  ;;  %v474_v21 = vld [vmem:[%s2683_s7 + $0x608] sm:$0xff]  ;;  %v2816_v23 = vld [vmem:[%s2702_s26] sm:$0xff]  ;;  %v476_v24 = vld [vmem:[%s2683_s7 + $0x618] sm:$0xff]  ;;  %v1701_v27 = vpack.c.bf16 %v465_v17, %v457_v14  ;;  %v1829_v28 = vpack.c.bf16 %v467_v19, %v459_v18 }
  0x95   : > { %1686 = vmatpush1.bf16.msra.mxu0 %v1685_v35  ;;  %v482_v22 = vld [vmem:[%s2683_s7 + $0x648] sm:$0xff]  ;;  %v484_v25 = vld [vmem:[%s2683_s7 + $0x658] sm:$0xff]  ;;  %v2822_v26 = vrot.slane %v2816_v23, %v2807_v12  ;;  %v473_v30 = vld [vmem:[%s2683_s7 + $0x600] sm:$0xff]  ;;  %v794_v11 = vcombine.high %v2816_v23, %v2816_v23 }
  0x96   : > { %1814 = vmatpush1.bf16.msra.mxu1 %v1813_v36  ;;  %1688 = vmatprep.subr.bf16.mxu0 %v1687_v37  ;;  %v1703_v29 = vpack.c.bf16 %v482_v22, %v474_v21  ;;  %v481_v31 = vld [vmem:[%s2683_s7 + $0x640] sm:$0xff]  ;;  %v475_v32 = vld [vmem:[%s2683_s7 + $0x610] sm:$0xff]  ;;  %v1831_v34 = vpack.c.bf16 %v484_v25, %v476_v24  ;;  %v490_v36 = vld [vmem:[%s2683_s7 + $0x688] sm:$0xff] }
  0x97   : > { %1816 = vmatprep.subr.bf16.mxu1 %v1815_v41  ;;  %v2829_v33 = vcombine.high %v2822_v26, %v2822_v26  ;;  %v483_v35 = vld [vmem:[%s2683_s7 + $0x650] sm:$0xff]  ;;  %v498_v37 = vld [vmem:[%s2683_s7 + $0x6c8] sm:$0xff]  ;;  %v492_v38 = vld [vmem:[%s2683_s7 + $0x698] sm:$0xff]  ;;  %v1705_v40 = vpack.c.bf16 %v481_v31, %v473_v30  ;;  %v2871_v25 = vrot.slane %v794_v11, %v2807_v12 }
  0x98   : > { %v500_v39 = vld [vmem:[%s2683_s7 + $0x6d8] sm:$0xff]  ;;  %v1833_v41 = vpack.c.bf16 %v483_v35, %v475_v32  ;;  %v1707_v42 = vpack.c.bf16 %v498_v37, %v490_v36  ;;  %v489_v43 = vld [vmem:[%s2683_s7 + $0x680] sm:$0xff]  ;;  %v491_v45 = vld [vmem:[%s2683_s7 + $0x690] sm:$0xff] }
  0x99   : > { %1690 = vmatpush1.bf16.msra.mxu0 %v1689_v50  ;;  %879 = vmatprep.mubr.f32.mxu0 %v2829_v33  ;;  %v497_v44 = vld [vmem:[%s2683_s7 + $0x6c0] sm:$0xff]  ;;  %v1835_v46 = vpack.c.bf16 %v500_v39, %v492_v38  ;;  %v499_v47 = vld [vmem:[%s2683_s7 + $0x6d0] sm:$0xff]  ;;  %v506_v48 = vld [vmem:[%s2683_s7 + $0x708] sm:$0xff] }
  0x9a   : > { %1818 = vmatpush1.bf16.msra.mxu1 %v1817_v51  ;;  %1692 = vmatprep.subr.bf16.mxu0 %v1691_v52  ;;  %v514_v49 = vld [vmem:[%s2683_s7 + $0x748] sm:$0xff]  ;;  %v508_v50 = vld [vmem:[%s2683_s7 + $0x718] sm:$0xff]  ;;  %v1709_v52 = vpack.c.bf16 %v497_v44, %v489_v43  ;;  %v1837_v53 = vpack.c.bf16 %v499_v47, %v491_v45  ;;  %v505_v55 = vld [vmem:[%s2683_s7 + $0x700] sm:$0xff] }
  0x9b   : > { %1820 = vmatprep.subr.bf16.mxu1 %v1819_v56  ;;  %1021 = vmatprep.mubr.f32.mxu1 %v2829_v33  ;;  %v516_v51 = vld [vmem:[%s2683_s7 + $0x758] sm:$0xff]  ;;  %v1711_v54 = vpack.c.bf16 %v514_v49, %v506_v48  ;;  %v513_v56 = vld [vmem:[%s2683_s7 + $0x740] sm:$0xff]  ;;  %v507_v57 = vld [vmem:[%s2683_s7 + $0x710] sm:$0xff] }
  0x9c   : > { %v1839_v58 = vpack.c.bf16 %v516_v51, %v508_v50  ;;  %v515_v59 = vld [vmem:[%s2683_s7 + $0x750] sm:$0xff]  ;;  %v522_v60 = vld [vmem:[%s2683_s7 + $0x788] sm:$0xff]  ;;  %v524_v62 = vld [vmem:[%s2683_s7 + $0x798] sm:$0xff] }
  0x9d   : > { %1694 = vmatpush1.bf16.msra.mxu0 %v1693_v0  ;;  %v530_v61 = vld [vmem:[%s2683_s7 + $0x7c8] sm:$0xff]  ;;  %v532_v0 = vld [vmem:[%s2683_s7 + $0x7d8] sm:$0xff]  ;;  %v521_v4 = vld [vmem:[%s2683_s7 + $0x780] sm:$0xff] }
  0x9e   : > { %1822 = vmatpush1.bf16.msra.mxu1 %v1821_v1  ;;  %1696 = vmatprep.subr.bf16.mxu0 %v1695_v2  ;;  %v1713_v1 = vpack.c.bf16 %v513_v56, %v505_v55  ;;  %v1841_v2 = vpack.c.bf16 %v515_v59, %v507_v57  ;;  %v1715_v3 = vpack.c.bf16 %v530_v61, %v522_v60  ;;  %v529_v5 = vld [vmem:[%s2683_s7 + $0x7c0] sm:$0xff]  ;;  %v531_v8 = vld [vmem:[%s2683_s7 + $0x7d0] sm:$0xff]  ;;  %v538_v9 = vld [vmem:[%s2683_s7 + $0x808] sm:$0xff] }
  0x9f   : > { %1824 = vmatprep.subr.bf16.mxu1 %v1823_v6  ;;  %v523_v6 = vld [vmem:[%s2683_s7 + $0x790] sm:$0xff]  ;;  %v1843_v7 = vpack.c.bf16 %v532_v0, %v524_v62  ;;  %v546_v10 = vld [vmem:[%s2683_s7 + $0x848] sm:$0xff]  ;;  %v548_v14 = vld [vmem:[%s2683_s7 + $0x858] sm:$0xff] }
  0xa0   : > { %v1719_v17 = vpack.c.bf16 %v546_v10, %v538_v9  ;;  %v537_v18 = vld [vmem:[%s2683_s7 + $0x800] sm:$0xff]  ;;  %v547_v22 = vld [vmem:[%s2683_s7 + $0x850] sm:$0xff]  ;;  %v554_v23 = vld [vmem:[%s2683_s7 + $0x888] sm:$0xff] }
  0xa1   : > { %1698 = vmatpush1.bf16.msra.mxu0 %v1697_v13  ;;  %v540_v13 = vld [vmem:[%s2683_s7 + $0x818] sm:$0xff]  ;;  %v545_v19 = vld [vmem:[%s2683_s7 + $0x840] sm:$0xff]  ;;  %v562_v24 = vld [vmem:[%s2683_s7 + $0x8c8] sm:$0xff] }
  0xa2   : > { %1826 = vmatpush1.bf16.msra.mxu1 %v1825_v15  ;;  %1700 = vmatprep.subr.bf16.mxu0 %v1699_v16  ;;  %v1717_v15 = vpack.c.bf16 %v529_v5, %v521_v4  ;;  %v1845_v16 = vpack.c.bf16 %v531_v8, %v523_v6  ;;  %v1847_v21 = vpack.c.bf16 %v548_v14, %v540_v13  ;;  %v553_v32 = vld [vmem:[%s2683_s7 + $0x880] sm:$0xff]  ;;  %v555_v35 = vld [vmem:[%s2683_s7 + $0x890] sm:$0xff]  ;;  %v570_v38 = vld [vmem:[%s2683_s7 + $0x908] sm:$0xff] }
  0xa3   : > { %1828 = vmatprep.subr.bf16.mxu1 %v1827_v20  ;;  %v539_v20 = vld [vmem:[%s2683_s7 + $0x810] sm:$0xff]  ;;  %v1723_v31 = vpack.c.bf16 %v562_v24, %v554_v23  ;;  %v578_v39 = vld [vmem:[%s2683_s7 + $0x948] sm:$0xff]  ;;  %v577_v47 = vld [vmem:[%s2683_s7 + $0x940] sm:$0xff] }
  0xa4   : > { %v1849_v30 = vpack.c.bf16 %v547_v22, %v539_v20  ;;  %v563_v37 = vld [vmem:[%s2683_s7 + $0x8d0] sm:$0xff]  ;;  %v1727_v45 = vpack.c.bf16 %v578_v39, %v570_v38  ;;  %v586_v51 = vld [vmem:[%s2683_s7 + $0x988] sm:$0xff]  ;;  %v593_v59 = vld [vmem:[%s2683_s7 + $0x9c0] sm:$0xff] }
  0xa5   : > { %1702 = vmatpush1.bf16.msra.mxu0 %v1701_v27  ;;  %v556_v27 = vld [vmem:[%s2683_s7 + $0x898] sm:$0xff]  ;;  %v1853_v44 = vpack.c.bf16 %v563_v37, %v555_v35  ;;  %v571_v48 = vld [vmem:[%s2683_s7 + $0x910] sm:$0xff]  ;;  %v602_v0 = vld [vmem:[%s2683_s7 + $0xa08] sm:$0xff] }
  0xa6   : > { %1830 = vmatpush1.bf16.msra.mxu1 %v1829_v28  ;;  %1704 = vmatprep.subr.bf16.mxu0 %v1703_v29  ;;  %v564_v28 = vld [vmem:[%s2683_s7 + $0x8d8] sm:$0xff]  ;;  %v1721_v29 = vpack.c.bf16 %v545_v19, %v537_v18  ;;  %v579_v50 = vld [vmem:[%s2683_s7 + $0x950] sm:$0xff]  ;;  %v609_v8 = vld [vmem:[%s2683_s7 + $0xa40] sm:$0xff] }
  0xa7   : > { %1832 = vmatprep.subr.bf16.mxu1 %v1831_v34  ;;  %v561_v34 = vld [vmem:[%s2683_s7 + $0x8c0] sm:$0xff]  ;;  %v1851_v36 = vpack.c.bf16 %v564_v28, %v556_v27  ;;  %v1857_v56 = vpack.c.bf16 %v579_v50, %v571_v48  ;;  %v587_v60 = vld [vmem:[%s2683_s7 + $0x990] sm:$0xff]  ;;  %v618_v13 = vld [vmem:[%s2683_s7 + $0xa88] sm:$0xff] }
  0xa8   : > { %v1725_v43 = vpack.c.bf16 %v561_v34, %v553_v32  ;;  %v595_v62 = vld [vmem:[%s2683_s7 + $0x9d0] sm:$0xff]  ;;  %v626_v14 = vld [vmem:[%s2683_s7 + $0xac8] sm:$0xff]  ;;  %v617_v20 = vld [vmem:[%s2683_s7 + $0xa80] sm:$0xff] }
  0xa9   : > { %1706 = vmatpush1.bf16.msra.mxu0 %v1705_v40  ;;  %v2883_v40 = vcombine.high %v2871_v25, %v2871_v25  ;;  %v1861_v5 = vpack.c.bf16 %v595_v62, %v587_v60  ;;  %v603_v9 = vld [vmem:[%s2683_s7 + $0xa10] sm:$0xff]  ;;  %v1739_v19 = vpack.c.bf16 %v626_v14, %v618_v13  ;;  %v634_v27 = vld [vmem:[%s2683_s7 + $0xb08] sm:$0xff]  ;;  %v633_v35 = vld [vmem:[%s2683_s7 + $0xb00] sm:$0xff] }
  0xaa   : > { %1834 = vmatpush1.bf16.msra.mxu1 %v1833_v41  ;;  %1708 = vmatprep.subr.bf16.mxu0 %v1707_v42  ;;  %v572_v41 = vld [vmem:[%s2683_s7 + $0x918] sm:$0xff]  ;;  %v611_v11 = vld [vmem:[%s2683_s7 + $0xa50] sm:$0xff]  ;;  %v642_v28 = vld [vmem:[%s2683_s7 + $0xb48] sm:$0xff] }
  0xab   : > { %1836 = vmatprep.subr.bf16.mxu1 %v1835_v46  ;;  %v580_v42 = vld [vmem:[%s2683_s7 + $0x958] sm:$0xff]  ;;  %v569_v46 = vld [vmem:[%s2683_s7 + $0x900] sm:$0xff]  ;;  %v1865_v18 = vpack.c.bf16 %v611_v11, %v603_v9  ;;  %v619_v22 = vld [vmem:[%s2683_s7 + $0xa90] sm:$0xff]  ;;  %v1743_v34 = vpack.c.bf16 %v642_v28, %v634_v27 }
  0xac   : > { %v1855_v49 = vpack.c.bf16 %v580_v42, %v572_v41  ;;  %v1729_v55 = vpack.c.bf16 %v577_v47, %v569_v46  ;;  %v627_v24 = vld [vmem:[%s2683_s7 + $0xad0] sm:$0xff]  ;;  %v650_v41 = vld [vmem:[%s2683_s7 + $0xb88] sm:$0xff]  ;;  %v649_v48 = vld [vmem:[%s2683_s7 + $0xb80] sm:$0xff] }
  0xad   : > { %1710 = vmatpush1.bf16.msra.mxu0 %v1709_v52  ;;  %v594_v52 = vld [vmem:[%s2683_s7 + $0x9c8] sm:$0xff]  ;;  %v1869_v32 = vpack.c.bf16 %v627_v24, %v619_v22  ;;  %v635_v37 = vld [vmem:[%s2683_s7 + $0xb10] sm:$0xff]  ;;  %v665_v60 = vld [vmem:[%s2683_s7 + $0xc00] sm:$0xff] }
  0xae   : > { %1838 = vmatpush1.bf16.msra.mxu1 %v1837_v53  ;;  %1712 = vmatprep.subr.bf16.mxu0 %v1711_v54  ;;  %v588_v53 = vld [vmem:[%s2683_s7 + $0x998] sm:$0xff]  ;;  %v1731_v57 = vpack.c.bf16 %v594_v52, %v586_v51  ;;  %v643_v39 = vld [vmem:[%s2683_s7 + $0xb50] sm:$0xff]  ;;  %v658_v42 = vld [vmem:[%s2683_s7 + $0xbc8] sm:$0xff] }
  0xaf   : > { %1840 = vmatprep.subr.bf16.mxu1 %v1839_v58  ;;  %v596_v54 = vld [vmem:[%s2683_s7 + $0x9d8] sm:$0xff]  ;;  %v585_v58 = vld [vmem:[%s2683_s7 + $0x980] sm:$0xff]  ;;  %v1873_v46 = vpack.c.bf16 %v643_v39, %v635_v37  ;;  %v1747_v47 = vpack.c.bf16 %v658_v42, %v650_v41  ;;  %v651_v50 = vld [vmem:[%s2683_s7 + $0xb90] sm:$0xff] }
  0xb0   : > { %v1859_v61 = vpack.c.bf16 %v596_v54, %v588_v53  ;;  %v1733_v4 = vpack.c.bf16 %v593_v59, %v585_v58  ;;  %v659_v52 = vld [vmem:[%s2683_s7 + $0xbd0] sm:$0xff]  ;;  %v666_v53 = vld [vmem:[%s2683_s7 + $0xc08] sm:$0xff]  ;;  %v681_v9 = vld [vmem:[%s2683_s7 + $0xc80] sm:$0xff] }
  0xb1   : > { %1714 = vmatpush1.bf16.msra.mxu0 %v1713_v1  ;;  %v610_v1 = vld [vmem:[%s2683_s7 + $0xa48] sm:$0xff]  ;;  %v1877_v58 = vpack.c.bf16 %v659_v52, %v651_v50  ;;  %v667_v62 = vld [vmem:[%s2683_s7 + $0xc10] sm:$0xff]  ;;  %v697_v22 = vld [vmem:[%s2683_s7 + $0xd00] sm:$0xff] }
  0xb2   : > { %1842 = vmatpush1.bf16.msra.mxu1 %v1841_v2  ;;  %1716 = vmatprep.subr.bf16.mxu0 %v1715_v3  ;;  %v604_v2 = vld [vmem:[%s2683_s7 + $0xa18] sm:$0xff]  ;;  %v1735_v6 = vpack.c.bf16 %v610_v1, %v602_v0  ;;  %v674_v54 = vld [vmem:[%s2683_s7 + $0xc48] sm:$0xff]  ;;  %v675_v1 = vld [vmem:[%s2683_s7 + $0xc50] sm:$0xff] }
  0xb3   : > { %1844 = vmatprep.subr.bf16.mxu1 %v1843_v7  ;;  %v612_v3 = vld [vmem:[%s2683_s7 + $0xa58] sm:$0xff]  ;;  %v601_v7 = vld [vmem:[%s2683_s7 + $0xa00] sm:$0xff]  ;;  %v1751_v59 = vpack.c.bf16 %v674_v54, %v666_v53  ;;  %v683_v11 = vld [vmem:[%s2683_s7 + $0xc90] sm:$0xff] }
  0xb4   : > { %v1863_v10 = vpack.c.bf16 %v612_v3, %v604_v2  ;;  %v682_v2 = vld [vmem:[%s2683_s7 + $0xc88] sm:$0xff]  ;;  %v691_v14 = vld [vmem:[%s2683_s7 + $0xcd0] sm:$0xff]  ;;  %v713_v37 = vld [vmem:[%s2683_s7 + $0xd80] sm:$0xff] }
  0xb5   : > { %1718 = vmatpush1.bf16.msra.mxu0 %v1717_v15  ;;  %v620_v15 = vld [vmem:[%s2683_s7 + $0xa98] sm:$0xff]  ;;  %v690_v3 = vld [vmem:[%s2683_s7 + $0xcc8] sm:$0xff]  ;;  %v699_v24 = vld [vmem:[%s2683_s7 + $0xd10] sm:$0xff] }
  0xb6   : > { %1846 = vmatpush1.bf16.msra.mxu1 %v1845_v16  ;;  %1720 = vmatprep.subr.bf16.mxu0 %v1719_v17  ;;  %v628_v16 = vld [vmem:[%s2683_s7 + $0xad8] sm:$0xff]  ;;  %v1737_v17 = vpack.c.bf16 %v609_v8, %v601_v7  ;;  %v1881_v7 = vpack.c.bf16 %v675_v1, %v667_v62  ;;  %v1755_v8 = vpack.c.bf16 %v690_v3, %v682_v2  ;;  %v707_v28 = vld [vmem:[%s2683_s7 + $0xd50] sm:$0xff]  ;;  %v729_v50 = vld [vmem:[%s2683_s7 + $0xe00] sm:$0xff] }
  0xb7   : > { %1848 = vmatprep.subr.bf16.mxu1 %v1847_v21  ;;  %v625_v21 = vld [vmem:[%s2683_s7 + $0xac0] sm:$0xff]  ;;  %v1867_v23 = vpack.c.bf16 %v628_v16, %v620_v15  ;;  %v698_v15 = vld [vmem:[%s2683_s7 + $0xd08] sm:$0xff]  ;;  %v715_v39 = vld [vmem:[%s2683_s7 + $0xd90] sm:$0xff] }
  0xb8   : > { %880 = vmatmul.mubr.f32.vlgmr.msra.gmra.mrb[0].mxu0 %v2822_v26  ;;  %v706_v16 = vld [vmem:[%s2683_s7 + $0xd48] sm:$0xff]  ;;  %v723_v42 = vld [vmem:[%s2683_s7 + $0xdd0] sm:$0xff]  ;;  %v745_v62 = vld [vmem:[%s2683_s7 + $0xe80] sm:$0xff] }
  0xb9   : > { %1722 = vmatpush1.bf16.msra.mxu0 %v1721_v29  ;;  %1022 = vmatmul.mubr.f32.vlgmr.msra.gmra.mrb[0].mxu1 %v2822_v26  ;;  %v636_v29 = vld [vmem:[%s2683_s7 + $0xb18] sm:$0xff]  ;;  %v731_v52 = vld [vmem:[%s2683_s7 + $0xe10] sm:$0xff] }
  0xba   : > { %1850 = vmatpush1.bf16.msra.mxu1 %v1849_v30  ;;  %1724 = vmatprep.subr.bf16.mxu0 %v1723_v31  ;;  %v644_v30 = vld [vmem:[%s2683_s7 + $0xb58] sm:$0xff]  ;;  %v1741_v31 = vpack.c.bf16 %v625_v21, %v617_v20  ;;  %v1885_v20 = vpack.c.bf16 %v691_v14, %v683_v11  ;;  %v1759_v21 = vpack.c.bf16 %v706_v16, %v698_v15  ;;  %v739_v54 = vld [vmem:[%s2683_s7 + $0xe50] sm:$0xff]  ;;  %v761_v11 = vld [vmem:[%s2683_s7 + $0xf00] sm:$0xff] }
  0xbb   : > { %1852 = vmatprep.subr.bf16.mxu1 %v1851_v36  ;;  %950 = vmatprep.mubr.f32.mxu0 %v2883_v40  ;;  %v641_v36 = vld [vmem:[%s2683_s7 + $0xb40] sm:$0xff]  ;;  %v1871_v38 = vpack.c.bf16 %v644_v30, %v636_v29  ;;  %v714_v29 = vld [vmem:[%s2683_s7 + $0xd88] sm:$0xff]  ;;  %v747_v1 = vld [vmem:[%s2683_s7 + $0xe90] sm:$0xff] }
  0xbc   : > { %1092 = vmatprep.mubr.f32.mxu1 %v2883_v40  ;;  %v722_v30 = vld [vmem:[%s2683_s7 + $0xdc8] sm:$0xff]  ;;  %v755_v3 = vld [vmem:[%s2683_s7 + $0xed0] sm:$0xff] }
  0xbd   : > { %1726 = vmatpush1.bf16.msra.mxu0 %v1725_v43  ;;  %v652_v43 = vld [vmem:[%s2683_s7 + $0xb98] sm:$0xff]  ;;  %v763_v14 = vld [vmem:[%s2683_s7 + $0xf10] sm:$0xff] }
  0xbe   : > { %1854 = vmatpush1.bf16.msra.mxu1 %v1853_v44  ;;  %1728 = vmatprep.subr.bf16.mxu0 %v1727_v45  ;;  %v660_v44 = vld [vmem:[%s2683_s7 + $0xbd8] sm:$0xff]  ;;  %v1745_v45 = vpack.c.bf16 %v641_v36, %v633_v35  ;;  %v1889_v35 = vpack.c.bf16 %v707_v28, %v699_v24  ;;  %v1763_v36 = vpack.c.bf16 %v722_v30, %v714_v29  ;;  %v771_v16 = vld [vmem:[%s2683_s7 + $0xf50] sm:$0xff]  ;;  %v777_v24 = vld [vmem:[%s2683_s7 + $0xf80] sm:$0xff] }
  0xbf   : > { %1856 = vmatprep.subr.bf16.mxu1 %v1855_v49  ;;  %v657_v49 = vld [vmem:[%s2683_s7 + $0xbc0] sm:$0xff]  ;;  %v1875_v51 = vpack.c.bf16 %v660_v44, %v652_v43  ;;  %v730_v43 = vld [vmem:[%s2683_s7 + $0xe08] sm:$0xff]  ;;  %v779_v28 = vld [vmem:[%s2683_s7 + $0xf90] sm:$0xff] }
  0xc0   : > { %v738_v44 = vld [vmem:[%s2683_s7 + $0xe48] sm:$0xff]  ;;  %v787_v30 = vld [vmem:[%s2683_s7 + $0xfd0] sm:$0xff] }
  0xc1   : > { %1730 = vmatpush1.bf16.msra.mxu0 %v1729_v55  ;;  %v668_v55 = vld [vmem:[%s2683_s7 + $0xc18] sm:$0xff] }
  0xc2   : > { %1858 = vmatpush1.bf16.msra.mxu1 %v1857_v56  ;;  %1732 = vmatprep.subr.bf16.mxu0 %v1731_v57  ;;  %v676_v56 = vld [vmem:[%s2683_s7 + $0xc58] sm:$0xff]  ;;  %v1749_v57 = vpack.c.bf16 %v657_v49, %v649_v48  ;;  %v1893_v48 = vpack.c.bf16 %v723_v42, %v715_v39  ;;  %v1767_v49 = vpack.c.bf16 %v738_v44, %v730_v43  ;;  %v285_v39 = vld [vmem:[%s2683_s7 + $0x20] sm:$0xff]  ;;  %v287_v42 = vld [vmem:[%s2683_s7 + $0x30] sm:$0xff] }
  0xc3   : > { %1860 = vmatprep.subr.bf16.mxu1 %v1859_v61  ;;  %v673_v61 = vld [vmem:[%s2683_s7 + $0xc40] sm:$0xff]  ;;  %v1879_v0 = vpack.c.bf16 %v676_v56, %v668_v55  ;;  %v746_v55 = vld [vmem:[%s2683_s7 + $0xe88] sm:$0xff]  ;;  %v295_v44 = vld [vmem:[%s2683_s7 + $0x70] sm:$0xff] }
  0xc4   : > { %v754_v56 = vld [vmem:[%s2683_s7 + $0xec8] sm:$0xff] }
  0xc5   : > { %1734 = vmatpush1.bf16.msra.mxu0 %v1733_v4  ;;  %v684_v4 = vld [vmem:[%s2683_s7 + $0xc98] sm:$0xff] }
  0xc6   : > { %1862 = vmatpush1.bf16.msra.mxu1 %v1861_v5  ;;  %1736 = vmatprep.subr.bf16.mxu0 %v1735_v6  ;;  %v692_v5 = vld [vmem:[%s2683_s7 + $0xcd8] sm:$0xff]  ;;  %v1753_v6 = vpack.c.bf16 %v673_v61, %v665_v60  ;;  %v1897_v60 = vpack.c.bf16 %v739_v54, %v731_v52  ;;  %v1771_v61 = vpack.c.bf16 %v754_v56, %v746_v55  ;;  %v301_v52 = vld [vmem:[%s2683_s7 + $0xa0] sm:$0xff]  ;;  %v303_v54 = vld [vmem:[%s2683_s7 + $0xb0] sm:$0xff] }
  0xc7   : > { %1864 = vmatprep.subr.bf16.mxu1 %v1863_v10  ;;  %v689_v10 = vld [vmem:[%s2683_s7 + $0xcc0] sm:$0xff]  ;;  %v1883_v13 = vpack.c.bf16 %v692_v5, %v684_v4  ;;  %v762_v4 = vld [vmem:[%s2683_s7 + $0xf08] sm:$0xff]  ;;  %v311_v56 = vld [vmem:[%s2683_s7 + $0xf0] sm:$0xff] }
  0xc8   : > { %v770_v5 = vld [vmem:[%s2683_s7 + $0xf48] sm:$0xff] }
  0xc9   : > { %1738 = vmatpush1.bf16.msra.mxu0 %v1737_v17  ;;  %v700_v17 = vld [vmem:[%s2683_s7 + $0xd18] sm:$0xff] }
  0xca   : > { %1866 = vmatpush1.bf16.msra.mxu1 %v1865_v18  ;;  %1740 = vmatprep.subr.bf16.mxu0 %v1739_v19  ;;  %v708_v18 = vld [vmem:[%s2683_s7 + $0xd58] sm:$0xff]  ;;  %v1757_v19 = vpack.c.bf16 %v689_v10, %v681_v9  ;;  %v1901_v9 = vpack.c.bf16 %v755_v3, %v747_v1  ;;  %v1775_v10 = vpack.c.bf16 %v770_v5, %v762_v4  ;;  %v317_v1 = vld [vmem:[%s2683_s7 + $0x120] sm:$0xff]  ;;  %v319_v3 = vld [vmem:[%s2683_s7 + $0x130] sm:$0xff] }
  0xcb   : > { %1868 = vmatprep.subr.bf16.mxu1 %v1867_v23  ;;  %v705_v23 = vld [vmem:[%s2683_s7 + $0xd40] sm:$0xff]  ;;  %v1887_v27 = vpack.c.bf16 %v708_v18, %v700_v17  ;;  %v778_v17 = vld [vmem:[%s2683_s7 + $0xf88] sm:$0xff]  ;;  %v327_v5 = vld [vmem:[%s2683_s7 + $0x170] sm:$0xff] }
  0xcc   : > { %v786_v18 = vld [vmem:[%s2683_s7 + $0xfc8] sm:$0xff] }
  0xcd   : > { %1742 = vmatpush1.bf16.msra.mxu0 %v1741_v31  ;;  %v716_v31 = vld [vmem:[%s2683_s7 + $0xd98] sm:$0xff] }
  0xce   : > { %1870 = vmatpush1.bf16.msra.mxu1 %v1869_v32  ;;  %1744 = vmatprep.subr.bf16.mxu0 %v1743_v34  ;;  %v724_v32 = vld [vmem:[%s2683_s7 + $0xdd8] sm:$0xff]  ;;  %v1761_v34 = vpack.c.bf16 %v705_v23, %v697_v22  ;;  %v1905_v22 = vpack.c.bf16 %v771_v16, %v763_v14  ;;  %v1779_v23 = vpack.c.bf16 %v786_v18, %v778_v17  ;;  %v333_v14 = vld [vmem:[%s2683_s7 + $0x1a0] sm:$0xff]  ;;  %v335_v16 = vld [vmem:[%s2683_s7 + $0x1b0] sm:$0xff] }
  0xcf   : > { %1872 = vmatprep.subr.bf16.mxu1 %v1871_v38  ;;  %v721_v38 = vld [vmem:[%s2683_s7 + $0xdc0] sm:$0xff]  ;;  %v1891_v41 = vpack.c.bf16 %v724_v32, %v716_v31  ;;  %v286_v31 = vld [vmem:[%s2683_s7 + $0x28] sm:$0xff]  ;;  %v343_v18 = vld [vmem:[%s2683_s7 + $0x1f0] sm:$0xff] }
  0xd0   : > { %v294_v32 = vld [vmem:[%s2683_s7 + $0x68] sm:$0xff] }
  0xd1   : > { %1746 = vmatpush1.bf16.msra.mxu0 %v1745_v45  ;;  %v732_v45 = vld [vmem:[%s2683_s7 + $0xe18] sm:$0xff] }
  0xd2   : > { %1874 = vmatpush1.bf16.msra.mxu1 %v1873_v46  ;;  %1748 = vmatprep.subr.bf16.mxu0 %v1747_v47  ;;  %v740_v46 = vld [vmem:[%s2683_s7 + $0xe58] sm:$0xff]  ;;  %v1765_v47 = vpack.c.bf16 %v721_v38, %v713_v37  ;;  %v1909_v37 = vpack.c.bf16 %v787_v30, %v779_v28  ;;  %v1911_v38 = vpack.c.bf16 %v294_v32, %v286_v31  ;;  %v357_v28 = vld [vmem:[%s2683_s7 + $0x260] sm:$0xff]  ;;  %v359_v31 = vld [vmem:[%s2683_s7 + $0x270] sm:$0xff] }
  0xd3   : > { %1876 = vmatprep.subr.bf16.mxu1 %v1875_v51  ;;  %v737_v51 = vld [vmem:[%s2683_s7 + $0xe40] sm:$0xff]  ;;  %v1895_v53 = vpack.c.bf16 %v740_v46, %v732_v45  ;;  %v302_v45 = vld [vmem:[%s2683_s7 + $0xa8] sm:$0xff] }
  0xd4   : > { %v310_v46 = vld [vmem:[%s2683_s7 + $0xe8] sm:$0xff] }
  0xd5   : > { %1750 = vmatpush1.bf16.msra.mxu0 %v1749_v57  ;;  %v748_v57 = vld [vmem:[%s2683_s7 + $0xe98] sm:$0xff]  ;;  %v366_v32 = vld [vmem:[%s2683_s7 + $0x2a8] sm:$0xff] }
  0xd6   : > { %1878 = vmatpush1.bf16.msra.mxu1 %v1877_v58  ;;  %1752 = vmatprep.subr.bf16.mxu0 %v1751_v59  ;;  %v756_v58 = vld [vmem:[%s2683_s7 + $0xed8] sm:$0xff]  ;;  %v1769_v59 = vpack.c.bf16 %v737_v51, %v729_v50  ;;  %v2041_v50 = vpack.c.bf16 %v295_v44, %v287_v42  ;;  %v1915_v51 = vpack.c.bf16 %v310_v46, %v302_v45  ;;  %v373_v42 = vld [vmem:[%s2683_s7 + $0x2e0] sm:$0xff]  ;;  %v375_v45 = vld [vmem:[%s2683_s7 + $0x2f0] sm:$0xff] }
  0xd7   : > { %1880 = vmatprep.subr.bf16.mxu1 %v1879_v0  ;;  %v753_v0 = vld [vmem:[%s2683_s7 + $0xec0] sm:$0xff]  ;;  %v1899_v2 = vpack.c.bf16 %v756_v58, %v748_v57  ;;  %v318_v57 = vld [vmem:[%s2683_s7 + $0x128] sm:$0xff] }
  0xd8   : > { %v326_v58 = vld [vmem:[%s2683_s7 + $0x168] sm:$0xff] }
  0xd9   : > { %1754 = vmatpush1.bf16.msra.mxu0 %v1753_v6  ;;  %v764_v6 = vld [vmem:[%s2683_s7 + $0xf18] sm:$0xff]  ;;  %v382_v46 = vld [vmem:[%s2683_s7 + $0x328] sm:$0xff] }
  0xda   : > { %1882 = vmatpush1.bf16.msra.mxu1 %v1881_v7  ;;  %1756 = vmatprep.subr.bf16.mxu0 %v1755_v8  ;;  %v772_v7 = vld [vmem:[%s2683_s7 + $0xf58] sm:$0xff]  ;;  %v1773_v8 = vpack.c.bf16 %v753_v0, %v745_v62  ;;  %v2045_v62 = vpack.c.bf16 %v311_v56, %v303_v54  ;;  %v1919_v0 = vpack.c.bf16 %v326_v58, %v318_v57  ;;  %v389_v54 = vld [vmem:[%s2683_s7 + $0x360] sm:$0xff]  ;;  %v391_v57 = vld [vmem:[%s2683_s7 + $0x370] sm:$0xff] }
  0xdb   : > { %1884 = vmatprep.subr.bf16.mxu1 %v1883_v13  ;;  %v769_v13 = vld [vmem:[%s2683_s7 + $0xf40] sm:$0xff]  ;;  %v1903_v15 = vpack.c.bf16 %v772_v7, %v764_v6  ;;  %v334_v6 = vld [vmem:[%s2683_s7 + $0x1a8] sm:$0xff] }
  0xdc   : > { %v342_v7 = vld [vmem:[%s2683_s7 + $0x1e8] sm:$0xff] }
  0xdd   : > { %1758 = vmatpush1.bf16.msra.mxu0 %v1757_v19  ;;  %v780_v19 = vld [vmem:[%s2683_s7 + $0xf98] sm:$0xff]  ;;  %v398_v58 = vld [vmem:[%s2683_s7 + $0x3a8] sm:$0xff] }
  0xde   : > { %1886 = vmatpush1.bf16.msra.mxu1 %v1885_v20  ;;  %1760 = vmatprep.subr.bf16.mxu0 %v1759_v21  ;;  %v788_v20 = vld [vmem:[%s2683_s7 + $0xfd8] sm:$0xff]  ;;  %v1777_v21 = vpack.c.bf16 %v769_v13, %v761_v11  ;;  %v2049_v11 = vpack.c.bf16 %v327_v5, %v319_v3  ;;  %v1923_v13 = vpack.c.bf16 %v342_v7, %v334_v6  ;;  %v405_v3 = vld [vmem:[%s2683_s7 + $0x3e0] sm:$0xff]  ;;  %v407_v6 = vld [vmem:[%s2683_s7 + $0x3f0] sm:$0xff] }
  0xdf   : > { %1888 = vmatprep.subr.bf16.mxu1 %v1887_v27  ;;  %v785_v27 = vld [vmem:[%s2683_s7 + $0xfc0] sm:$0xff]  ;;  %v1907_v29 = vpack.c.bf16 %v788_v20, %v780_v19  ;;  %v350_v19 = vld [vmem:[%s2683_s7 + $0x228] sm:$0xff]  ;;  %v352_v20 = vld [vmem:[%s2683_s7 + $0x238] sm:$0xff] }
  0xe0   : > { %v414_v7 = vld [vmem:[%s2683_s7 + $0x428] sm:$0xff] }
  0xe1   : > { %1762 = vmatpush1.bf16.msra.mxu0 %v1761_v34  ;;  %v288_v34 = vld [vmem:[%s2683_s7 + $0x38] sm:$0xff] }
  0xe2   : > { %1890 = vmatpush1.bf16.msra.mxu1 %v1889_v35  ;;  %1764 = vmatprep.subr.bf16.mxu0 %v1763_v36  ;;  %v296_v35 = vld [vmem:[%s2683_s7 + $0x78] sm:$0xff]  ;;  %v1781_v36 = vpack.c.bf16 %v785_v27, %v777_v24  ;;  %v349_v27 = vld [vmem:[%s2683_s7 + $0x220] sm:$0xff] }
  0xe3   : > { %1892 = vmatprep.subr.bf16.mxu1 %v1891_v41  ;;  %v293_v41 = vld [vmem:[%s2683_s7 + $0x60] sm:$0xff]  ;;  %v2039_v43 = vpack.c.bf16 %v296_v35, %v288_v34  ;;  %v374_v34 = vld [vmem:[%s2683_s7 + $0x2e8] sm:$0xff]  ;;  %v368_v35 = vld [vmem:[%s2683_s7 + $0x2b8] sm:$0xff] }
  0xe5   : > { %1766 = vmatpush1.bf16.msra.mxu0 %v1765_v47  ;;  %v304_v47 = vld [vmem:[%s2683_s7 + $0xb8] sm:$0xff] }
  0xe6   : > { %1894 = vmatpush1.bf16.msra.mxu1 %v1893_v48  ;;  %1768 = vmatprep.subr.bf16.mxu0 %v1767_v49  ;;  %v312_v48 = vld [vmem:[%s2683_s7 + $0xf8] sm:$0xff]  ;;  %v1913_v49 = vpack.c.bf16 %v293_v41, %v285_v39  ;;  %v1931_v39 = vpack.c.bf16 %v374_v34, %v366_v32  ;;  %v365_v41 = vld [vmem:[%s2683_s7 + $0x2a0] sm:$0xff]  ;;  %v439_v32 = vld [vmem:[%s2683_s7 + $0x4f0] sm:$0xff] }
  0xe7   : > { %1896 = vmatprep.subr.bf16.mxu1 %v1895_v53  ;;  %v309_v53 = vld [vmem:[%s2683_s7 + $0xe0] sm:$0xff]  ;;  %v2043_v55 = vpack.c.bf16 %v312_v48, %v304_v47  ;;  %v390_v47 = vld [vmem:[%s2683_s7 + $0x368] sm:$0xff]  ;;  %v384_v48 = vld [vmem:[%s2683_s7 + $0x338] sm:$0xff] }
  0xe8   : > { %v446_v34 = vld [vmem:[%s2683_s7 + $0x528] sm:$0xff] }
  0xe9   : > { %1770 = vmatpush1.bf16.msra.mxu0 %v1769_v59  ;;  %v320_v59 = vld [vmem:[%s2683_s7 + $0x138] sm:$0xff] }
  0xea   : > { %1898 = vmatpush1.bf16.msra.mxu1 %v1897_v60  ;;  %1772 = vmatprep.subr.bf16.mxu0 %v1771_v61  ;;  %v328_v60 = vld [vmem:[%s2683_s7 + $0x178] sm:$0xff]  ;;  %v1917_v61 = vpack.c.bf16 %v309_v53, %v301_v52  ;;  %v1935_v52 = vpack.c.bf16 %v390_v47, %v382_v46  ;;  %v381_v53 = vld [vmem:[%s2683_s7 + $0x320] sm:$0xff]  ;;  %v455_v46 = vld [vmem:[%s2683_s7 + $0x570] sm:$0xff] }
  0xeb   : > { %1900 = vmatprep.subr.bf16.mxu1 %v1899_v2  ;;  %v325_v2 = vld [vmem:[%s2683_s7 + $0x160] sm:$0xff]  ;;  %v2047_v4 = vpack.c.bf16 %v328_v60, %v320_v59  ;;  %v406_v59 = vld [vmem:[%s2683_s7 + $0x3e8] sm:$0xff]  ;;  %v400_v60 = vld [vmem:[%s2683_s7 + $0x3b8] sm:$0xff] }
  0xec   : > { %v462_v47 = vld [vmem:[%s2683_s7 + $0x5a8] sm:$0xff] }
  0xed   : > { %1774 = vmatpush1.bf16.msra.mxu0 %v1773_v8  ;;  %v336_v8 = vld [vmem:[%s2683_s7 + $0x1b8] sm:$0xff] }
  0xee   : > { %1902 = vmatpush1.bf16.msra.mxu1 %v1901_v9  ;;  %1776 = vmatprep.subr.bf16.mxu0 %v1775_v10  ;;  %v344_v9 = vld [vmem:[%s2683_s7 + $0x1f8] sm:$0xff]  ;;  %v1921_v10 = vpack.c.bf16 %v325_v2, %v317_v1  ;;  %v1939_v1 = vpack.c.bf16 %v406_v59, %v398_v58  ;;  %v397_v2 = vld [vmem:[%s2683_s7 + $0x3a0] sm:$0xff]  ;;  %v471_v58 = vld [vmem:[%s2683_s7 + $0x5f0] sm:$0xff] }
  0xef   : > { %1904 = vmatprep.subr.bf16.mxu1 %v1903_v15  ;;  %v341_v15 = vld [vmem:[%s2683_s7 + $0x1e0] sm:$0xff]  ;;  %v2051_v17 = vpack.c.bf16 %v344_v9, %v336_v8  ;;  %v422_v8 = vld [vmem:[%s2683_s7 + $0x468] sm:$0xff]  ;;  %v416_v9 = vld [vmem:[%s2683_s7 + $0x438] sm:$0xff] }
  0xf0   : > { %v478_v59 = vld [vmem:[%s2683_s7 + $0x628] sm:$0xff] }
  0xf1   : > { %1778 = vmatpush1.bf16.msra.mxu0 %v1777_v21  ;;  %v360_v21 = vld [vmem:[%s2683_s7 + $0x278] sm:$0xff] }
  0xf2   : > { %1906 = vmatpush1.bf16.msra.mxu1 %v1905_v22  ;;  %1780 = vmatprep.subr.bf16.mxu0 %v1779_v23  ;;  %v1925_v22 = vpack.c.bf16 %v341_v15, %v333_v14  ;;  %v2053_v23 = vpack.c.bf16 %v343_v18, %v335_v16  ;;  %v2055_v30 = vpack.c.bf16 %v360_v21, %v352_v20  ;;  %v413_v15 = vld [vmem:[%s2683_s7 + $0x420] sm:$0xff]  ;;  %v438_v20 = vld [vmem:[%s2683_s7 + $0x4e8] sm:$0xff]  ;;  %v432_v21 = vld [vmem:[%s2683_s7 + $0x4b8] sm:$0xff] }
  0xf3   : > { %1908 = vmatprep.subr.bf16.mxu1 %v1907_v29  ;;  %v351_v29 = vld [vmem:[%s2683_s7 + $0x230] sm:$0xff]  ;;  %v1943_v14 = vpack.c.bf16 %v422_v8, %v414_v7  ;;  %v421_v16 = vld [vmem:[%s2683_s7 + $0x460] sm:$0xff]  ;;  %v494_v8 = vld [vmem:[%s2683_s7 + $0x6a8] sm:$0xff] }
  0xf4   : > { %v487_v7 = vld [vmem:[%s2683_s7 + $0x670] sm:$0xff] }
  0xf5   : > { %1782 = vmatpush1.bf16.msra.mxu0 %v1781_v36  ;;  %v376_v36 = vld [vmem:[%s2683_s7 + $0x2f8] sm:$0xff] }
  0xf6   : > { %1910 = vmatpush1.bf16.msra.mxu1 %v1909_v37  ;;  %1912 = vmatprep.subr.bf16.mxu0 %v1911_v38  ;;  %v1929_v37 = vpack.c.bf16 %v357_v28, %v349_v27  ;;  %v2057_v38 = vpack.c.bf16 %v359_v31, %v351_v29  ;;  %v2059_v44 = vpack.c.bf16 %v376_v36, %v368_v35  ;;  %v429_v28 = vld [vmem:[%s2683_s7 + $0x4a0] sm:$0xff]  ;;  %v454_v35 = vld [vmem:[%s2683_s7 + $0x568] sm:$0xff]  ;;  %v448_v36 = vld [vmem:[%s2683_s7 + $0x538] sm:$0xff] }
  0xf7   : > { %2040 = vmatprep.subr.bf16.mxu1 %v2039_v43  ;;  %v367_v43 = vld [vmem:[%s2683_s7 + $0x2b0] sm:$0xff]  ;;  %v437_v29 = vld [vmem:[%s2683_s7 + $0x4e0] sm:$0xff] }
  0xf8   : > { %951 = vmatmul.mubr.f32.vlgmr.msra.gmra.mrb[0].mxu0 %v2871_v25 }
  0xf9   : > { %1093 = vmatmul.mubr.f32.vlgmr.msra.gmra.mrb[0].mxu1 %v2871_v25  ;;  %1914 = vmatpush1.bf16.msra.mxu0 %v1913_v49  ;;  %v392_v49 = vld [vmem:[%s2683_s7 + $0x378] sm:$0xff] }
  0xfa   : > { %2042 = vmatpush1.bf16.msra.mxu1 %v2041_v50  ;;  %1916 = vmatprep.subr.bf16.mxu0 %v1915_v51  ;;  %v1933_v50 = vpack.c.bf16 %v373_v42, %v365_v41  ;;  %v2061_v51 = vpack.c.bf16 %v375_v45, %v367_v43  ;;  %v2063_v56 = vpack.c.bf16 %v392_v49, %v384_v48  ;;  %v445_v42 = vld [vmem:[%s2683_s7 + $0x520] sm:$0xff]  ;;  %v470_v48 = vld [vmem:[%s2683_s7 + $0x5e8] sm:$0xff]  ;;  %v464_v49 = vld [vmem:[%s2683_s7 + $0x5b8] sm:$0xff] }
  0xfb   : > { %2044 = vmatprep.subr.bf16.mxu1 %v2043_v55  ;;  %1163 = vmatprep.mubr.f32.mxu0 %v2829_v33  ;;  %v383_v55 = vld [vmem:[%s2683_s7 + $0x330] sm:$0xff]  ;;  %v1951_v41 = vpack.c.bf16 %v454_v35, %v446_v34  ;;  %v453_v43 = vld [vmem:[%s2683_s7 + $0x560] sm:$0xff]  ;;  %v526_v35 = vld [vmem:[%s2683_s7 + $0x7a8] sm:$0xff] }
  0xfc   : > { %1305 = vmatprep.mubr.f32.mxu1 %v2829_v33  ;;  %v358_v33 = vld [vmem:[%s2683_s7 + $0x268] sm:$0xff]  ;;  %v519_v34 = vld [vmem:[%s2683_s7 + $0x770] sm:$0xff] }
  0xfd   : > { %1918 = vmatpush1.bf16.msra.mxu0 %v1917_v61  ;;  %v1927_v24 = vpack.c.bf16 %v358_v33, %v350_v19  ;;  %v408_v61 = vld [vmem:[%s2683_s7 + $0x3f8] sm:$0xff]  ;;  %v423_v19 = vld [vmem:[%s2683_s7 + $0x470] sm:$0xff]  ;;  %v430_v33 = vld [vmem:[%s2683_s7 + $0x4a8] sm:$0xff] }
  0xfe   : > { %2046 = vmatpush1.bf16.msra.mxu1 %v2045_v62  ;;  %1920 = vmatprep.subr.bf16.mxu0 %v1919_v0  ;;  %v1937_v62 = vpack.c.bf16 %v389_v54, %v381_v53  ;;  %v2065_v0 = vpack.c.bf16 %v391_v57, %v383_v55  ;;  %v2067_v5 = vpack.c.bf16 %v408_v61, %v400_v60  ;;  %v461_v54 = vld [vmem:[%s2683_s7 + $0x5a0] sm:$0xff]  ;;  %v486_v60 = vld [vmem:[%s2683_s7 + $0x668] sm:$0xff]  ;;  %v480_v61 = vld [vmem:[%s2683_s7 + $0x638] sm:$0xff] }
  0xff   : > { %2048 = vmatprep.subr.bf16.mxu1 %v2047_v4  ;;  %v399_v4 = vld [vmem:[%s2683_s7 + $0x3b0] sm:$0xff]  ;;  %v1947_v27 = vpack.c.bf16 %v438_v20, %v430_v33  ;;  %v1955_v53 = vpack.c.bf16 %v470_v48, %v462_v47  ;;  %v469_v55 = vld [vmem:[%s2683_s7 + $0x5e0] sm:$0xff]  ;;  %v510_v20 = vld [vmem:[%s2683_s7 + $0x728] sm:$0xff] }
 0x100   : > { %v503_v33 = vld [vmem:[%s2683_s7 + $0x6f0] sm:$0xff]  ;;  %v542_v48 = vld [vmem:[%s2683_s7 + $0x828] sm:$0xff] }
 0x101   : > { %1922 = vmatpush1.bf16.msra.mxu0 %v1921_v10  ;;  %v424_v10 = vld [vmem:[%s2683_s7 + $0x478] sm:$0xff]  ;;  %v535_v47 = vld [vmem:[%s2683_s7 + $0x7f0] sm:$0xff] }
 0x102   : > { %2050 = vmatpush1.bf16.msra.mxu1 %v2049_v11  ;;  %1924 = vmatprep.subr.bf16.mxu0 %v1923_v13  ;;  %v1941_v11 = vpack.c.bf16 %v405_v3, %v397_v2  ;;  %v2069_v13 = vpack.c.bf16 %v407_v6, %v399_v4  ;;  %v2071_v18 = vpack.c.bf16 %v424_v10, %v416_v9  ;;  %v477_v3 = vld [vmem:[%s2683_s7 + $0x620] sm:$0xff]  ;;  %v502_v9 = vld [vmem:[%s2683_s7 + $0x6e8] sm:$0xff]  ;;  %v496_v10 = vld [vmem:[%s2683_s7 + $0x6b8] sm:$0xff] }
 0x103   : > { %2052 = vmatprep.subr.bf16.mxu1 %v2051_v17  ;;  %v415_v17 = vld [vmem:[%s2683_s7 + $0x430] sm:$0xff]  ;;  %v1959_v2 = vpack.c.bf16 %v486_v60, %v478_v59  ;;  %v485_v4 = vld [vmem:[%s2683_s7 + $0x660] sm:$0xff]  ;;  %v558_v60 = vld [vmem:[%s2683_s7 + $0x8a8] sm:$0xff] }
 0x104   : > { %v551_v59 = vld [vmem:[%s2683_s7 + $0x870] sm:$0xff] }
 0x105   : > { %1926 = vmatpush1.bf16.msra.mxu0 %v1925_v22  ;;  %v440_v22 = vld [vmem:[%s2683_s7 + $0x4f8] sm:$0xff] }
 0x106   : > { %2054 = vmatpush1.bf16.msra.mxu1 %v2053_v23  ;;  %1928 = vmatprep.subr.bf16.mxu0 %v1927_v24  ;;  %v1945_v23 = vpack.c.bf16 %v421_v16, %v413_v15  ;;  %v2073_v24 = vpack.c.bf16 %v423_v19, %v415_v17  ;;  %v2075_v31 = vpack.c.bf16 %v440_v22, %v432_v21  ;;  %v493_v16 = vld [vmem:[%s2683_s7 + $0x6a0] sm:$0xff]  ;;  %v518_v21 = vld [vmem:[%s2683_s7 + $0x768] sm:$0xff]  ;;  %v512_v22 = vld [vmem:[%s2683_s7 + $0x738] sm:$0xff] }
 0x107   : > { %2056 = vmatprep.subr.bf16.mxu1 %v2055_v30  ;;  %v431_v30 = vld [vmem:[%s2683_s7 + $0x4b0] sm:$0xff]  ;;  %v1963_v15 = vpack.c.bf16 %v502_v9, %v494_v8  ;;  %v501_v17 = vld [vmem:[%s2683_s7 + $0x6e0] sm:$0xff]  ;;  %v574_v9 = vld [vmem:[%s2683_s7 + $0x928] sm:$0xff] }
 0x108   : > { %v567_v8 = vld [vmem:[%s2683_s7 + $0x8f0] sm:$0xff] }
 0x109   : > { %1930 = vmatpush1.bf16.msra.mxu0 %v1929_v37  ;;  %v456_v37 = vld [vmem:[%s2683_s7 + $0x578] sm:$0xff] }
 0x10a   : > { %2058 = vmatpush1.bf16.msra.mxu1 %v2057_v38  ;;  %1932 = vmatprep.subr.bf16.mxu0 %v1931_v39  ;;  %v1949_v38 = vpack.c.bf16 %v437_v29, %v429_v28  ;;  %v2077_v39 = vpack.c.bf16 %v439_v32, %v431_v30  ;;  %v2079_v45 = vpack.c.bf16 %v456_v37, %v448_v36  ;;  %v509_v29 = vld [vmem:[%s2683_s7 + $0x720] sm:$0xff]  ;;  %v534_v36 = vld [vmem:[%s2683_s7 + $0x7e8] sm:$0xff]  ;;  %v528_v37 = vld [vmem:[%s2683_s7 + $0x7b8] sm:$0xff] }
 0x10b   : > { %2060 = vmatprep.subr.bf16.mxu1 %v2059_v44  ;;  %v447_v44 = vld [vmem:[%s2683_s7 + $0x530] sm:$0xff]  ;;  %v1967_v28 = vpack.c.bf16 %v518_v21, %v510_v20  ;;  %v517_v30 = vld [vmem:[%s2683_s7 + $0x760] sm:$0xff]  ;;  %v590_v21 = vld [vmem:[%s2683_s7 + $0x9a8] sm:$0xff] }
 0x10c   : > { %v583_v20 = vld [vmem:[%s2683_s7 + $0x970] sm:$0xff] }
 0x10d   : > { %1934 = vmatpush1.bf16.msra.mxu0 %v1933_v50  ;;  %v472_v50 = vld [vmem:[%s2683_s7 + $0x5f8] sm:$0xff] }
 0x10e   : > { %2062 = vmatpush1.bf16.msra.mxu1 %v2061_v51  ;;  %1936 = vmatprep.subr.bf16.mxu0 %v1935_v52  ;;  %v1953_v51 = vpack.c.bf16 %v453_v43, %v445_v42  ;;  %v2081_v52 = vpack.c.bf16 %v455_v46, %v447_v44  ;;  %v2083_v57 = vpack.c.bf16 %v472_v50, %v464_v49  ;;  %v525_v43 = vld [vmem:[%s2683_s7 + $0x7a0] sm:$0xff]  ;;  %v550_v49 = vld [vmem:[%s2683_s7 + $0x868] sm:$0xff]  ;;  %v544_v50 = vld [vmem:[%s2683_s7 + $0x838] sm:$0xff] }
 0x10f   : > { %2064 = vmatprep.subr.bf16.mxu1 %v2063_v56  ;;  %v463_v56 = vld [vmem:[%s2683_s7 + $0x5b0] sm:$0xff]  ;;  %v1971_v42 = vpack.c.bf16 %v534_v36, %v526_v35  ;;  %v533_v44 = vld [vmem:[%s2683_s7 + $0x7e0] sm:$0xff]  ;;  %v606_v35 = vld [vmem:[%s2683_s7 + $0xa28] sm:$0xff] }
 0x110   : > { %v608_v36 = vld [vmem:[%s2683_s7 + $0xa38] sm:$0xff] }
 0x111   : > { %1938 = vmatpush1.bf16.msra.mxu0 %v1937_v62  ;;  %v488_v62 = vld [vmem:[%s2683_s7 + $0x678] sm:$0xff] }
 0x112   : > { %2066 = vmatpush1.bf16.msra.mxu1 %v2065_v0  ;;  %1940 = vmatprep.subr.bf16.mxu0 %v1939_v1  ;;  %v1957_v0 = vpack.c.bf16 %v469_v55, %v461_v54  ;;  %v2085_v1 = vpack.c.bf16 %v471_v58, %v463_v56  ;;  %v2087_v6 = vpack.c.bf16 %v488_v62, %v480_v61  ;;  %v541_v55 = vld [vmem:[%s2683_s7 + $0x820] sm:$0xff]  ;;  %v566_v61 = vld [vmem:[%s2683_s7 + $0x8e8] sm:$0xff]  ;;  %v560_v62 = vld [vmem:[%s2683_s7 + $0x8b8] sm:$0xff] }
 0x113   : > { %2068 = vmatprep.subr.bf16.mxu1 %v2067_v5  ;;  %v479_v5 = vld [vmem:[%s2683_s7 + $0x630] sm:$0xff]  ;;  %v1975_v54 = vpack.c.bf16 %v550_v49, %v542_v48  ;;  %v549_v56 = vld [vmem:[%s2683_s7 + $0x860] sm:$0xff]  ;;  %v630_v48 = vld [vmem:[%s2683_s7 + $0xae8] sm:$0xff] }
 0x114   : > { %v624_v49 = vld [vmem:[%s2683_s7 + $0xab8] sm:$0xff] }
 0x115   : > { %1942 = vmatpush1.bf16.msra.mxu0 %v1941_v11  ;;  %v504_v11 = vld [vmem:[%s2683_s7 + $0x6f8] sm:$0xff] }
 0x116   : > { %2070 = vmatpush1.bf16.msra.mxu1 %v2069_v13  ;;  %1944 = vmatprep.subr.bf16.mxu0 %v1943_v14  ;;  %v1961_v13 = vpack.c.bf16 %v485_v4, %v477_v3  ;;  %v2089_v14 = vpack.c.bf16 %v487_v7, %v479_v5  ;;  %v2091_v19 = vpack.c.bf16 %v504_v11, %v496_v10  ;;  %v557_v4 = vld [vmem:[%s2683_s7 + $0x8a0] sm:$0xff]  ;;  %v582_v10 = vld [vmem:[%s2683_s7 + $0x968] sm:$0xff]  ;;  %v576_v11 = vld [vmem:[%s2683_s7 + $0x938] sm:$0xff] }
 0x117   : > { %2072 = vmatprep.subr.bf16.mxu1 %v2071_v18  ;;  %v495_v18 = vld [vmem:[%s2683_s7 + $0x6b0] sm:$0xff]  ;;  %v1979_v3 = vpack.c.bf16 %v566_v61, %v558_v60  ;;  %v565_v5 = vld [vmem:[%s2683_s7 + $0x8e0] sm:$0xff]  ;;  %v646_v60 = vld [vmem:[%s2683_s7 + $0xb68] sm:$0xff] }
 0x118   : > { %v640_v61 = vld [vmem:[%s2683_s7 + $0xb38] sm:$0xff] }
 0x119   : > { %1946 = vmatpush1.bf16.msra.mxu0 %v1945_v23  ;;  %v520_v23 = vld [vmem:[%s2683_s7 + $0x778] sm:$0xff] }
 0x11a   : > { %2074 = vmatpush1.bf16.msra.mxu1 %v2073_v24  ;;  %1948 = vmatprep.subr.bf16.mxu0 %v1947_v27  ;;  %v1965_v24 = vpack.c.bf16 %v501_v17, %v493_v16  ;;  %v2093_v27 = vpack.c.bf16 %v503_v33, %v495_v18  ;;  %v2095_v32 = vpack.c.bf16 %v520_v23, %v512_v22  ;;  %v573_v17 = vld [vmem:[%s2683_s7 + $0x920] sm:$0xff]  ;;  %v598_v22 = vld [vmem:[%s2683_s7 + $0x9e8] sm:$0xff]  ;;  %v600_v23 = vld [vmem:[%s2683_s7 + $0x9f8] sm:$0xff] }
 0x11b   : > { %2076 = vmatprep.subr.bf16.mxu1 %v2075_v31  ;;  %v511_v31 = vld [vmem:[%s2683_s7 + $0x730] sm:$0xff]  ;;  %v1983_v16 = vpack.c.bf16 %v582_v10, %v574_v9  ;;  %v581_v18 = vld [vmem:[%s2683_s7 + $0x960] sm:$0xff]  ;;  %v662_v9 = vld [vmem:[%s2683_s7 + $0xbe8] sm:$0xff] }
 0x11c   : > { %v656_v10 = vld [vmem:[%s2683_s7 + $0xbb8] sm:$0xff] }
 0x11d   : > { %1950 = vmatpush1.bf16.msra.mxu0 %v1949_v38  ;;  %v536_v38 = vld [vmem:[%s2683_s7 + $0x7f8] sm:$0xff] }
 0x11e   : > { %2078 = vmatpush1.bf16.msra.mxu1 %v2077_v39  ;;  %1952 = vmatprep.subr.bf16.mxu0 %v1951_v41  ;;  %v1969_v39 = vpack.c.bf16 %v517_v30, %v509_v29  ;;  %v2097_v41 = vpack.c.bf16 %v519_v34, %v511_v31  ;;  %v2099_v46 = vpack.c.bf16 %v536_v38, %v528_v37  ;;  %v589_v29 = vld [vmem:[%s2683_s7 + $0x9a0] sm:$0xff]  ;;  %v591_v31 = vld [vmem:[%s2683_s7 + $0x9b0] sm:$0xff]  ;;  %v616_v37 = vld [vmem:[%s2683_s7 + $0xa78] sm:$0xff] }
 0x11f   : > { %2080 = vmatprep.subr.bf16.mxu1 %v2079_v45  ;;  %v527_v45 = vld [vmem:[%s2683_s7 + $0x7b0] sm:$0xff]  ;;  %v597_v30 = vld [vmem:[%s2683_s7 + $0x9e0] sm:$0xff] }
 0x120   : > { %v599_v34 = vld [vmem:[%s2683_s7 + $0x9f0] sm:$0xff]  ;;  %v1989_v38 = vpack.c.bf16 %v597_v30, %v589_v29  ;;  %v677_v29 = vld [vmem:[%s2683_s7 + $0xc60] sm:$0xff] }
 0x121   : > { %1954 = vmatpush1.bf16.msra.mxu0 %v1953_v51  ;;  %v552_v51 = vld [vmem:[%s2683_s7 + $0x878] sm:$0xff]  ;;  %v671_v30 = vld [vmem:[%s2683_s7 + $0xc30] sm:$0xff] }
 0x122   : > { %2082 = vmatpush1.bf16.msra.mxu1 %v2081_v52  ;;  %1956 = vmatprep.subr.bf16.mxu0 %v1955_v53  ;;  %v1973_v52 = vpack.c.bf16 %v533_v44, %v525_v43  ;;  %v2101_v53 = vpack.c.bf16 %v535_v47, %v527_v45  ;;  %v2103_v58 = vpack.c.bf16 %v552_v51, %v544_v50  ;;  %v613_v43 = vld [vmem:[%s2683_s7 + $0xa60] sm:$0xff]  ;;  %v607_v44 = vld [vmem:[%s2683_s7 + $0xa30] sm:$0xff]  ;;  %v622_v47 = vld [vmem:[%s2683_s7 + $0xaa8] sm:$0xff] }
 0x123   : > { %2084 = vmatprep.subr.bf16.mxu1 %v2083_v57  ;;  %v543_v57 = vld [vmem:[%s2683_s7 + $0x830] sm:$0xff]  ;;  %v2119_v45 = vpack.c.bf16 %v616_v37, %v608_v36  ;;  %v632_v50 = vld [vmem:[%s2683_s7 + $0xaf8] sm:$0xff] }
 0x124   : > { %v696_v36 = vld [vmem:[%s2683_s7 + $0xcf8] sm:$0xff] }
 0x125   : > { %1958 = vmatpush1.bf16.msra.mxu0 %v1957_v0  ;;  %v568_v0 = vld [vmem:[%s2683_s7 + $0x8f8] sm:$0xff] }
 0x126   : > { %2086 = vmatpush1.bf16.msra.mxu1 %v2085_v1  ;;  %1960 = vmatprep.subr.bf16.mxu0 %v1959_v2  ;;  %v1977_v1 = vpack.c.bf16 %v549_v56, %v541_v55  ;;  %v2105_v2 = vpack.c.bf16 %v551_v59, %v543_v57  ;;  %v2107_v7 = vpack.c.bf16 %v568_v0, %v560_v62  ;;  %v629_v55 = vld [vmem:[%s2683_s7 + $0xae0] sm:$0xff]  ;;  %v623_v56 = vld [vmem:[%s2683_s7 + $0xab0] sm:$0xff]  ;;  %v638_v59 = vld [vmem:[%s2683_s7 + $0xb28] sm:$0xff] }
 0x127   : > { %2088 = vmatprep.subr.bf16.mxu1 %v2087_v6  ;;  %v559_v6 = vld [vmem:[%s2683_s7 + $0x8b0] sm:$0xff]  ;;  %v2123_v57 = vpack.c.bf16 %v632_v50, %v624_v49  ;;  %v648_v62 = vld [vmem:[%s2683_s7 + $0xb78] sm:$0xff] }
 0x128   : > { %v712_v49 = vld [vmem:[%s2683_s7 + $0xd78] sm:$0xff] }
 0x129   : > { %1962 = vmatpush1.bf16.msra.mxu0 %v1961_v13  ;;  %v584_v13 = vld [vmem:[%s2683_s7 + $0x978] sm:$0xff] }
 0x12a   : > { %2090 = vmatpush1.bf16.msra.mxu1 %v2089_v14  ;;  %1964 = vmatprep.subr.bf16.mxu0 %v1963_v15  ;;  %v1981_v14 = vpack.c.bf16 %v565_v5, %v557_v4  ;;  %v2109_v15 = vpack.c.bf16 %v567_v8, %v559_v6  ;;  %v2111_v33 = vpack.c.bf16 %v584_v13, %v576_v11  ;;  %v645_v4 = vld [vmem:[%s2683_s7 + $0xb60] sm:$0xff]  ;;  %v639_v5 = vld [vmem:[%s2683_s7 + $0xb30] sm:$0xff]  ;;  %v654_v8 = vld [vmem:[%s2683_s7 + $0xba8] sm:$0xff] }
 0x12b   : > { %2092 = vmatprep.subr.bf16.mxu1 %v2091_v19  ;;  %v575_v19 = vld [vmem:[%s2683_s7 + $0x930] sm:$0xff]  ;;  %v2127_v6 = vpack.c.bf16 %v648_v62, %v640_v61  ;;  %v664_v11 = vld [vmem:[%s2683_s7 + $0xbf8] sm:$0xff] }
 0x12c   : > { %v728_v61 = vld [vmem:[%s2683_s7 + $0xdf8] sm:$0xff] }
 0x12d   : > { %1966 = vmatpush1.bf16.msra.mxu0 %v1965_v24  ;;  %v1985_v24 = vpack.c.bf16 %v581_v18, %v573_v17  ;;  %v661_v17 = vld [vmem:[%s2683_s7 + $0xbe0] sm:$0xff]  ;;  %v655_v18 = vld [vmem:[%s2683_s7 + $0xbb0] sm:$0xff] }
 0x12e   : > { %2094 = vmatpush1.bf16.msra.mxu1 %v2093_v27  ;;  %1968 = vmatprep.subr.bf16.mxu0 %v1967_v28  ;;  %v2113_v27 = vpack.c.bf16 %v583_v20, %v575_v19  ;;  %v1987_v28 = vpack.c.bf16 %v598_v22, %v590_v21  ;;  %v2131_v19 = vpack.c.bf16 %v664_v11, %v656_v10  ;;  %v670_v20 = vld [vmem:[%s2683_s7 + $0xc28] sm:$0xff]  ;;  %v672_v22 = vld [vmem:[%s2683_s7 + $0xc38] sm:$0xff] }
 0x12f   : > { %2096 = vmatprep.subr.bf16.mxu1 %v2095_v32  ;;  %v678_v21 = vld [vmem:[%s2683_s7 + $0xc68] sm:$0xff]  ;;  %v744_v10 = vld [vmem:[%s2683_s7 + $0xe78] sm:$0xff] }
 0x131   : > { %1970 = vmatpush1.bf16.msra.mxu0 %v1969_v39  ;;  %v2117_v39 = vpack.c.bf16 %v599_v34, %v591_v31  ;;  %v686_v34 = vld [vmem:[%s2683_s7 + $0xca8] sm:$0xff] }
 0x132   : > { %2098 = vmatpush1.bf16.msra.mxu1 %v2097_v41  ;;  %1972 = vmatprep.subr.bf16.mxu0 %v1971_v42  ;;  %v605_v42 = vld [vmem:[%s2683_s7 + $0xa20] sm:$0xff] }
 0x133   : > { %2100 = vmatprep.subr.bf16.mxu1 %v2099_v46  ;;  %v615_v46 = vld [vmem:[%s2683_s7 + $0xa70] sm:$0xff]  ;;  %v1993_v51 = vpack.c.bf16 %v613_v43, %v605_v42  ;;  %v693_v42 = vld [vmem:[%s2683_s7 + $0xce0] sm:$0xff] }
 0x134   : > { %v687_v43 = vld [vmem:[%s2683_s7 + $0xcb0] sm:$0xff] }
 0x135   : > { %1974 = vmatpush1.bf16.msra.mxu0 %v1973_v52  ;;  %v2121_v52 = vpack.c.bf16 %v615_v46, %v607_v44  ;;  %v702_v46 = vld [vmem:[%s2683_s7 + $0xd28] sm:$0xff] }
 0x136   : > { %2102 = vmatpush1.bf16.msra.mxu1 %v2101_v53  ;;  %1976 = vmatprep.subr.bf16.mxu0 %v1975_v54  ;;  %v1995_v53 = vpack.c.bf16 %v630_v48, %v622_v47  ;;  %v621_v54 = vld [vmem:[%s2683_s7 + $0xaa0] sm:$0xff]  ;;  %v710_v47 = vld [vmem:[%s2683_s7 + $0xd68] sm:$0xff]  ;;  %v704_v48 = vld [vmem:[%s2683_s7 + $0xd38] sm:$0xff] }
 0x137   : > { %2104 = vmatprep.subr.bf16.mxu1 %v2103_v58  ;;  %v631_v58 = vld [vmem:[%s2683_s7 + $0xaf0] sm:$0xff]  ;;  %v1997_v0 = vpack.c.bf16 %v629_v55, %v621_v54  ;;  %v709_v54 = vld [vmem:[%s2683_s7 + $0xd60] sm:$0xff] }
 0x138   : > { %1164 = vmatmul.mubr.f32.vlgmr.msra.gmra.mrb[2].mxu0 %v2822_v26  ;;  %v703_v55 = vld [vmem:[%s2683_s7 + $0xd30] sm:$0xff] }
 0x139   : > { %1978 = vmatpush1.bf16.msra.mxu0 %v1977_v1  ;;  %1306 = vmatmul.mubr.f32.vlgmr.msra.gmra.mrb[2].mxu1 %v2822_v26  ;;  %v592_v26 = vld [vmem:[%s2683_s7 + $0x9b8] sm:$0xff]  ;;  %v2125_v1 = vpack.c.bf16 %v631_v58, %v623_v56  ;;  %v2143_v56 = vpack.c.bf16 %v712_v49, %v704_v48  ;;  %v718_v58 = vld [vmem:[%s2683_s7 + $0xda8] sm:$0xff] }
 0x13a   : > { %2106 = vmatpush1.bf16.msra.mxu1 %v2105_v2  ;;  %1980 = vmatprep.subr.bf16.mxu0 %v1979_v3  ;;  %v2115_v32 = vpack.c.bf16 %v600_v23, %v592_v26  ;;  %v1999_v2 = vpack.c.bf16 %v646_v60, %v638_v59  ;;  %v637_v3 = vld [vmem:[%s2683_s7 + $0xb20] sm:$0xff]  ;;  %v680_v26 = vld [vmem:[%s2683_s7 + $0xc78] sm:$0xff]  ;;  %v726_v59 = vld [vmem:[%s2683_s7 + $0xde8] sm:$0xff] }
 0x13b   : > { %2108 = vmatprep.subr.bf16.mxu1 %v2107_v7  ;;  %1234 = vmatprep.mubr.f32.mxu0 %v2883_v40  ;;  %v647_v7 = vld [vmem:[%s2683_s7 + $0xb70] sm:$0xff]  ;;  %v2001_v13 = vpack.c.bf16 %v645_v4, %v637_v3  ;;  %v2135_v31 = vpack.c.bf16 %v680_v26, %v672_v22  ;;  %v720_v60 = vld [vmem:[%s2683_s7 + $0xdb8] sm:$0xff]  ;;  %v725_v3 = vld [vmem:[%s2683_s7 + $0xde0] sm:$0xff] }
 0x13c   : > { %1376 = vmatprep.mubr.f32.mxu1 %v2883_v40  ;;  %v614_v40 = vld [vmem:[%s2683_s7 + $0xa68] sm:$0xff]  ;;  %v719_v4 = vld [vmem:[%s2683_s7 + $0xdb0] sm:$0xff]  ;;  %v760_v22 = vld [vmem:[%s2683_s7 + $0xef8] sm:$0xff] }
 0x13d   : > { %1982 = vmatpush1.bf16.msra.mxu0 %v1981_v14  ;;  %v1991_v41 = vpack.c.bf16 %v614_v40, %v606_v35  ;;  %v2129_v14 = vpack.c.bf16 %v647_v7, %v639_v5  ;;  %v694_v35 = vld [vmem:[%s2683_s7 + $0xce8] sm:$0xff]  ;;  %v688_v40 = vld [vmem:[%s2683_s7 + $0xcb8] sm:$0xff]  ;;  %v2147_v5 = vpack.c.bf16 %v728_v61, %v720_v60 }
 0x13e   : > { %2110 = vmatpush1.bf16.msra.mxu1 %v2109_v15  ;;  %1984 = vmatprep.subr.bf16.mxu0 %v1983_v16  ;;  %v2003_v15 = vpack.c.bf16 %v662_v9, %v654_v8  ;;  %v653_v16 = vld [vmem:[%s2683_s7 + $0xba0] sm:$0xff]  ;;  %v2139_v44 = vpack.c.bf16 %v696_v36, %v688_v40  ;;  %v734_v7 = vld [vmem:[%s2683_s7 + $0xe28] sm:$0xff]  ;;  %v736_v9 = vld [vmem:[%s2683_s7 + $0xe38] sm:$0xff] }
 0x13f   : > { %2112 = vmatprep.subr.bf16.mxu1 %v2111_v33  ;;  %v663_v33 = vld [vmem:[%s2683_s7 + $0xbf0] sm:$0xff]  ;;  %v2005_v23 = vpack.c.bf16 %v661_v17, %v653_v16  ;;  %v742_v8 = vld [vmem:[%s2683_s7 + $0xe68] sm:$0xff]  ;;  %v741_v16 = vld [vmem:[%s2683_s7 + $0xe60] sm:$0xff] }
 0x140   : > { %v735_v17 = vld [vmem:[%s2683_s7 + $0xe30] sm:$0xff]  ;;  %v776_v40 = vld [vmem:[%s2683_s7 + $0xf78] sm:$0xff] }
 0x141   : > { %1986 = vmatpush1.bf16.msra.mxu0 %v1985_v24  ;;  %v2133_v24 = vpack.c.bf16 %v663_v33, %v655_v18  ;;  %v2151_v18 = vpack.c.bf16 %v744_v10, %v736_v9  ;;  %v750_v33 = vld [vmem:[%s2683_s7 + $0xea8] sm:$0xff]  ;;  %v792_v48 = vld [vmem:[%s2683_s7 + $0xff8] sm:$0xff] }
 0x142   : > { %2114 = vmatpush1.bf16.msra.mxu1 %v2113_v27  ;;  %1988 = vmatprep.subr.bf16.mxu0 %v1987_v28  ;;  %v2007_v27 = vpack.c.bf16 %v678_v21, %v670_v20  ;;  %v669_v28 = vld [vmem:[%s2683_s7 + $0xc20] sm:$0xff]  ;;  %v758_v20 = vld [vmem:[%s2683_s7 + $0xee8] sm:$0xff]  ;;  %v752_v21 = vld [vmem:[%s2683_s7 + $0xeb8] sm:$0xff] }
 0x143   : > { %2116 = vmatprep.subr.bf16.mxu1 %v2115_v32  ;;  %v679_v32 = vld [vmem:[%s2683_s7 + $0xc70] sm:$0xff]  ;;  %v2009_v37 = vpack.c.bf16 %v677_v29, %v669_v28  ;;  %v757_v28 = vld [vmem:[%s2683_s7 + $0xee0] sm:$0xff] }
 0x144   : > { %v751_v29 = vld [vmem:[%s2683_s7 + $0xeb0] sm:$0xff] }
 0x145   : > { %1990 = vmatpush1.bf16.msra.mxu0 %v1989_v38  ;;  %v2137_v38 = vpack.c.bf16 %v679_v32, %v671_v30  ;;  %v2155_v30 = vpack.c.bf16 %v760_v22, %v752_v21  ;;  %v766_v32 = vld [vmem:[%s2683_s7 + $0xf28] sm:$0xff]  ;;  %v1453_v21 = vsub.s32 (!%p1650_p3), 3, %v2796_v63  ;;  %v1457_v22 = vsub.s32 (!%p1650_p3), 4, %v2796_v63 }
 0x146   : > { %2118 = vmatpush1.bf16.msra.mxu1 %v2117_v39  ;;  %1992 = vmatprep.subr.bf16.mxu0 %v1991_v41  ;;  %v2011_v39 = vpack.c.bf16 %v694_v35, %v686_v34  ;;  %v685_v41 = vld [vmem:[%s2683_s7 + $0xca0] sm:$0xff]  ;;  %v774_v34 = vld [vmem:[%s2683_s7 + $0xf68] sm:$0xff]  ;;  %v768_v35 = vld [vmem:[%s2683_s7 + $0xf38] sm:$0xff] }
 0x147   : > { %2120 = vmatprep.subr.bf16.mxu1 %v2119_v45  ;;  %v695_v45 = vld [vmem:[%s2683_s7 + $0xcf0] sm:$0xff]  ;;  %v2013_v50 = vpack.c.bf16 %v693_v42, %v685_v41  ;;  %v773_v41 = vld [vmem:[%s2683_s7 + $0xf60] sm:$0xff] }
 0x148   : > { %v767_v42 = vld [vmem:[%s2683_s7 + $0xf30] sm:$0xff] }
 0x149   : > { %1994 = vmatpush1.bf16.msra.mxu0 %v1993_v51  ;;  %v2141_v51 = vpack.c.bf16 %v695_v45, %v687_v43  ;;  %v2159_v43 = vpack.c.bf16 %v776_v40, %v768_v35  ;;  %v782_v45 = vld [vmem:[%s2683_s7 + $0xfa8] sm:$0xff] }
 0x14a   : > { %2122 = vmatpush1.bf16.msra.mxu1 %v2121_v52  ;;  %1996 = vmatprep.subr.bf16.mxu0 %v1995_v53  ;;  %v2015_v52 = vpack.c.bf16 %v710_v47, %v702_v46  ;;  %v701_v53 = vld [vmem:[%s2683_s7 + $0xd20] sm:$0xff]  ;;  %v790_v46 = vld [vmem:[%s2683_s7 + $0xfe8] sm:$0xff]  ;;  %v784_v47 = vld [vmem:[%s2683_s7 + $0xfb8] sm:$0xff] }
 0x14b   : > { %2124 = vmatprep.subr.bf16.mxu1 %v2123_v57  ;;  %v711_v57 = vld [vmem:[%s2683_s7 + $0xd70] sm:$0xff]  ;;  %v2017_v62 = vpack.c.bf16 %v709_v54, %v701_v53  ;;  %v789_v53 = vld [vmem:[%s2683_s7 + $0xfe0] sm:$0xff]  ;;  %v2163_v54 = vpack.c.bf16 %v792_v48, %v784_v47 }
 0x14d   : > { %1998 = vmatpush1.bf16.msra.mxu0 %v1997_v0  ;;  %v2145_v0 = vpack.c.bf16 %v711_v57, %v703_v55  ;;  %v783_v55 = vld [vmem:[%s2683_s7 + $0xfb0] sm:$0xff] }
 0x14e   : > { %2126 = vmatpush1.bf16.msra.mxu1 %v2125_v1  ;;  %2000 = vmatprep.subr.bf16.mxu0 %v1999_v2  ;;  %v2019_v1 = vpack.c.bf16 %v726_v59, %v718_v58  ;;  %v717_v2 = vld [vmem:[%s2683_s7 + $0xda0] sm:$0xff] }
 0x14f   : > { %2128 = vmatprep.subr.bf16.mxu1 %v2127_v6  ;;  %v727_v6 = vld [vmem:[%s2683_s7 + $0xdf0] sm:$0xff]  ;;  %v2021_v11 = vpack.c.bf16 %v725_v3, %v717_v2 }
 0x151   : > { %2002 = vmatpush1.bf16.msra.mxu0 %v2001_v13  ;;  %v2149_v13 = vpack.c.bf16 %v727_v6, %v719_v4  ;;  %v278_v4 = vld [vmem:[%s2707_s4] sm:$0xff] }
 0x152   : > { %2130 = vmatpush1.bf16.msra.mxu1 %v2129_v14  ;;  %2004 = vmatprep.subr.bf16.mxu0 %v2003_v15  ;;  %v2023_v14 = vpack.c.bf16 %v742_v8, %v734_v7  ;;  %v733_v15 = vld [vmem:[%s2683_s7 + $0xe20] sm:$0xff] }
 0x153   : > { %2132 = vmatprep.subr.bf16.mxu1 %v2131_v19  ;;  %v743_v19 = vld [vmem:[%s2683_s7 + $0xe70] sm:$0xff]  ;;  %v2025_v26 = vpack.c.bf16 %v741_v16, %v733_v15  ;;  %v279_v15 = vld [vmem:[%s2707_s4 + $0x8] sm:$0xff] }
 0x155   : > { %2006 = vmatpush1.bf16.msra.mxu0 %v2005_v23  ;;  %v2153_v23 = vpack.c.bf16 %v743_v19, %v735_v17  ;;  %v1441_v19 = vsub.s32 (!%p1650_p3), 0, %v2796_v63 }
 0x156   : > { %2134 = vmatpush1.bf16.msra.mxu1 %v2133_v24  ;;  %2008 = vmatprep.subr.bf16.mxu0 %v2007_v27  ;;  %v2027_v24 = vpack.c.bf16 %v758_v20, %v750_v33  ;;  %v749_v27 = vld [vmem:[%s2683_s7 + $0xea0] sm:$0xff]  ;;  %v1445_v33 = vsub.s32 (!%p1650_p3), 1, %v2796_v63  ;;  %v1449_v20 = vsub.s32 (!%p1650_p3), 2, %v2796_v63 }
 0x157   : > { %2136 = vmatprep.subr.bf16.mxu1 %v2135_v31  ;;  %v759_v31 = vld [vmem:[%s2683_s7 + $0xef0] sm:$0xff]  ;;  %v2029_v36 = vpack.c.bf16 %v757_v28, %v749_v27 }
 0x159   : > { %2010 = vmatpush1.bf16.msra.mxu0 %v2009_v37  ;;  %v2157_v37 = vpack.c.bf16 %v759_v31, %v751_v29 }
 0x15a   : > { %2138 = vmatpush1.bf16.msra.mxu1 %v2137_v38  ;;  %2012 = vmatprep.subr.bf16.mxu0 %v2011_v39  ;;  %v2031_v38 = vpack.c.bf16 %v774_v34, %v766_v32  ;;  %v765_v39 = vld [vmem:[%s2683_s7 + $0xf20] sm:$0xff] }
 0x15b   : > { %2140 = vmatprep.subr.bf16.mxu1 %v2139_v44  ;;  %v775_v44 = vld [vmem:[%s2683_s7 + $0xf70] sm:$0xff]  ;;  %v2033_v49 = vpack.c.bf16 %v773_v41, %v765_v39 }
 0x15d   : > { %2014 = vmatpush1.bf16.msra.mxu0 %v2013_v50  ;;  %v2161_v50 = vpack.c.bf16 %v775_v44, %v767_v42 }
 0x15e   : > { %2142 = vmatpush1.bf16.msra.mxu1 %v2141_v51  ;;  %2016 = vmatprep.subr.bf16.mxu0 %v2015_v52  ;;  %v2035_v51 = vpack.c.bf16 %v790_v46, %v782_v45  ;;  %v781_v52 = vld [vmem:[%s2683_s7 + $0xfa0] sm:$0xff] }
 0x15f   : > { %2144 = vmatprep.subr.bf16.mxu1 %v2143_v56  ;;  %v791_v56 = vld [vmem:[%s2683_s7 + $0xff0] sm:$0xff]  ;;  %v2037_v57 = vpack.c.bf16 %v789_v53, %v781_v52 }
 0x160   : > { %v2165_v58 = vpack.c.bf16 %v791_v56, %v783_v55 }
 0x161   : > { %2018 = vmatpush1.bf16.msra.mxu0 %v2017_v62 }
 0x162   : > { %2146 = vmatpush1.bf16.msra.mxu1 %v2145_v0  ;;  %2020 = vmatprep.subr.bf16.mxu0 %v2019_v1 }
 0x163   : > { %2148 = vmatprep.subr.bf16.mxu1 %v2147_v5 }
 0x165   : > { %2022 = vmatpush1.bf16.msra.mxu0 %v2021_v11 }
 0x166   : > { %2150 = vmatpush1.bf16.msra.mxu1 %v2149_v13  ;;  %2024 = vmatprep.subr.bf16.mxu0 %v2023_v14 }
 0x167   : > { %2152 = vmatprep.subr.bf16.mxu1 %v2151_v18  ;;  %v1437_v18 = vld [vmem:[%s224_s10] sm:$0xff] (!%p1650_p3) }
 0x168   : > { %v1442_v27 = vrot.slane (!%p1650_p3), %v1437_v18, %v1441_v19  ;;  %v1446_v28 = vrot.slane (!%p1650_p3), %v1437_v18, %v1445_v33  ;;  %v1450_v29 = vrot.slane (!%p1650_p3), %v1437_v18, %v1449_v20  ;;  %v1458_v31 = vrot.slane (!%p1650_p3), %v1437_v18, %v1457_v22 }
 0x169   : > { %2026 = vmatpush1.bf16.msra.mxu0 %v2025_v26  ;;  %v1461_v26 = vsub.s32 (!%p1650_p3), 5, %v2796_v63 }
 0x16a   : > { %2154 = vmatpush1.bf16.msra.mxu1 %v2153_v23  ;;  %2028 = vmatprep.subr.bf16.mxu0 %v2027_v24  ;;  %v1465_v23 = vsub.s32 (!%p1650_p3), 6, %v2796_v63  ;;  %v1469_v24 = vsub.s32 (!%p1650_p3), 7, %v2796_v63  ;;  %v1471_v40 = vcombine.low (!%p1650_p3), %v1442_v27, %v1446_v28 }
 0x16b   : > { %2156 = vmatprep.subr.bf16.mxu1 %v2155_v30  ;;  %v1454_v30 = vrot.slane (!%p1650_p3), %v1437_v18, %v1453_v21  ;;  %v1462_v32 = vrot.slane (!%p1650_p3), %v1437_v18, %v1461_v26 }
 0x16c   : > { %v1466_v34 = vrot.slane (!%p1650_p3), %v1437_v18, %v1465_v23  ;;  %v1470_v35 = vrot.slane (!%p1650_p3), %v1437_v18, %v1469_v24  ;;  %v1479_v39 = vrot.slane (!%p1650_p3), %v1471_v40, %v2807_v12 }
 0x16d   : > { %2030 = vmatpush1.bf16.msra.mxu0 %v2029_v36  ;;  %v1472_v36 = vcombine.low (!%p1650_p3), %v1450_v29, %v1454_v30 }
 0x16e   : > { %2158 = vmatpush1.bf16.msra.mxu1 %v2157_v37  ;;  %2032 = vmatprep.subr.bf16.mxu0 %v2031_v38  ;;  %v1488_v37 = vcombine.low (!%p1650_p3), %v1458_v31, %v1462_v32  ;;  %v1489_v38 = vcombine.low (!%p1650_p3), %v1466_v34, %v1470_v35 }
 0x16f   : > { %2160 = vmatprep.subr.bf16.mxu1 %v2159_v43  ;;  %v1486_v41 = vrot.slane (!%p1650_p3), %v1472_v36, %v2807_v12 }
 0x170   : > { %v1496_v42 = vrot.slane (!%p1650_p3), %v1488_v37, %v2807_v12  ;;  %v1503_v43 = vrot.slane (!%p1650_p3), %v1489_v38, %v2807_v12 }
 0x171   : > { %2034 = vmatpush1.bf16.msra.mxu0 %v2033_v49  ;;  %v1487_v44 = vcombine.low (!%p1650_p3), %v1479_v39, %v1486_v41 }
 0x172   : > { %2162 = vmatpush1.bf16.msra.mxu1 %v2161_v50  ;;  %2036 = vmatprep.subr.bf16.mxu0 %v2035_v51  ;;  %v1504_v46 = vcombine.low (!%p1650_p3), %v1496_v42, %v1503_v43 }
 0x173   : > { %2164 = vmatprep.subr.bf16.mxu1 %v2163_v54 }
 0x175   : > { %2038 = vmatpush1.bf16.msra.mxu0 %v2037_v57 }
 0x176   : > { %2166 = vmatpush1.bf16.msra.mxu1 %v2165_v58 }
 0x178   : > { %1235 = vmatmul.mubr.f32.vlgmr.msra.gmra.mrb[2].mxu0 %v2871_v25 }
 0x179   : > { %1377 = vmatmul.mubr.f32.vlgmr.msra.gmra.mrb[2].mxu1 %v2871_v25 }
 0x1cb   : > { %v952_v59 = vpop.f32.mrb[0].mxu0 }
 0x1cc   : > { %v1094_v60 = vpop.f32.mrb[0].mxu1  ;;  %v954_v61 = vpop.f32.mrb[1].mxu0 }
 0x1cd   : > { %v1391_v62 = vcombine.low %v952_v59, %v954_v61  ;;  %v1096_v0 = vpop.f32.mrb[1].mxu1 }
 0x1ce   : > { %v1392_v1 = vcombine.low %v1094_v60, %v1096_v0 }
 0x1cf   : > { %v1399_v2 = vrot.slane %v1391_v62, %v2807_v12 }
 0x1d0   : > { %v1406_v3 = vrot.slane %v1392_v1, %v2807_v12 }
 0x1d2   : > { %v1407_v5 = vcombine.low %v1399_v2, %v1406_v3 }
 0x1d4   : > { %v1427_v6 = vadd.f32 %v1407_v5, %v278_v4 }
 0x1d6   : > { %1429 = vst [vmem:[%s2707_s4] sm:$0xff] %v1427_v6 }
 0x1dd   : > { %v1435_v63 = vld [vmem:[%s2707_s4] sm:$0xff] (!%p1650_p3) }
 0x1de   : > { %v1507_v47 = vadd.f32 (!%p1650_p3), %v1487_v44, %v1435_v63 }
 0x1e0   : > { %v1509_v49 = vmax.f32 (!%p1650_p3), %v1507_v47, 0.0 }
 0x1e2   : > { %1511 = vst [vmem:[%s2707_s4] sm:$0xff] (!%p1650_p3), %v1509_v49 }
 0x24b   : > { %v1236_v7 = vpop.f32.mrb[2].mxu0 }
 0x24c   : > { %v1378_v8 = vpop.f32.mrb[2].mxu1  ;;  %v1238_v9 = vpop.f32.mrb[3].mxu0 }
 0x24d   : > { %v1408_v25 = vcombine.low %v1236_v7, %v1238_v9  ;;  %v1380_v10 = vpop.f32.mrb[3].mxu1 }
 0x24e   : > { %v1409_v11 = vcombine.low %v1378_v8, %v1380_v10 }
 0x24f   : > { %v1416_v13 = vrot.slane %v1408_v25, %v2807_v12 }
 0x250   : > { %v1423_v14 = vrot.slane %v1409_v11, %v2807_v12  ;;  %1434 = sbr.rel (%p1650_p3) target bundleno = 611 (0x263), region = 48 }
 0x252   : > { %v1424_v16 = vcombine.low %v1416_v13, %v1423_v14 }
 0x254   : > { %v1428_v17 = vadd.f32 %v1424_v16, %v279_v15 }
 0x256   : > { %1430 = vst [vmem:[%s2707_s4 + $0x8] sm:$0xff] %v1428_v17 }
 0x25d   : > { %v1436_v45 = vld [vmem:[%s2707_s4 + $0x8] sm:$0xff] }
 0x25e   : > { %v1508_v48 = vadd.f32 %v1504_v46, %v1436_v45 }
 0x260   : > { %v1510_v50 = vmax.f32 %v1508_v48, 0.0 }
 0x262   : > { %1512 = vst [vmem:[%s2707_s4 + $0x8] sm:$0xff] %v1510_v50 }
 0x263 PF: > { %s19_s22 = sadd.s32 1, %s2435_s22   ;;  %s3350_s7 = sld [smem:[#allocation8_spill]] }
 0x264   : > { %p16_p11 = scmp.ge.s32.totalorder %s19_s22, 6   ;;  %s3351_s12 = smov %s2399_s13 }
 0x265   : > { %s3352_s13 = smov %s2403_s14  ;;  %s3353_s14 = smov %s2632_s29 }
 0x266   : > { %s3354_s15 = smov %s2411_s16  ;;  %s3355_s16 = smov %s2415_s17 }
 0x267   : > { %s3356_s17 = smov %s2637_s6  ;;  %s3357_s18 = smov %s2427_s20 }
 0x268   : > { %s3358_s19 = smov %s2431_s21  ;;  %s3359_s20 = smov %s3362_s23 }
 0x269   : > { %s3360_s21 = smov %s3350_s7  ;;  %18 = sbr.rel (!%p16_p11) target bundleno = 11 (0xb), region = 96 }
 0x270   :  { %1535 = vsyncpa [#allocation3], 1 }
 0x271   :  { %1537 = vsyncpa [#allocation3 + $0x1], 1 }
 0x272   :  { %1538 = vsyncpa [#allocation5], 1 }
 0x273   :  { %1540 = vsyncpa [#allocation5 + $0x1], 1 }

// kernel: fc5_mnist_forward.5
= control target key start
LH: loop header
LB: loop body
LE: loop exit
PB: predicated region body
PF: predicated region fallthrough
CT: control target
= control target key end

     0   :  { %s3325_s0 = inlined_call_operand.vmem [shape: f32[2,2048], index: 0, kind: input, shape index: {}]   ;;  %s3326_s1 = inlined_call_operand.hbm [shape: f32[2048,2048], index: 1, kind: input, shape index: {}]   ;;  %s3327_s2 = inlined_call_operand.hbm [shape: f32[1,2048], index: 2, kind: input, shape index: {}]   ;;  %s3328_s3 = inlined_call_operand.vmem [shape: f32[2,2048], index: 3, kind: output, shape index: {}]  }
   0x1   :  { %3334 = sst [smem:[#allocation9_spill]] %s3326_s1 }
   0x2   :  { %8 = vsyncpa [#allocation3], 0 }
   0x3   :  { %10 = vsyncpa [#allocation3 + $0x1], 0 }
   0x4   :  { %11 = vsyncpa [#allocation5], 0 }
   0x5   :  { %13 = vsyncpa [#allocation5 + $0x1], 0  ;;  %s2464_s12 = smov 0   ;;  %s2466_s13 = smov 0  }
   0x6   :  { %s2468_s14 = smov 0   ;;  %s2470_s15 = smov 0  }
   0x7   :  { %s2472_s16 = smov 0   ;;  %s2474_s17 = smov 0  }
   0x8   :  { %s2476_s18 = smov 0   ;;  %s2478_s19 = smov 0  }
   0x9   :  { %s2480_s20 = smov 0   ;;  %s2482_s21 = smov 0  }
   0xa   :  { %s2484_s22 = smov 0  }
   0xb LB: > { %s28_s23 = sadd.s32 1, %s2427_s20  ;;  %s66_s24 = sadd.s32 1, %s2415_s17  ;;  %s2435_s22 = sphi %s2484_s22, %s19_s22   ;;  %s2431_s21 = sphi %s2482_s21, %s3360_s21   ;;  %s2427_s20 = sphi %s2480_s20, %s3359_s20   ;;  %s2423_s19 = sphi %s2478_s19, %s3358_s19   ;;  %s2419_s18 = sphi %s2476_s18, %s3357_s18   ;;  %s2415_s17 = sphi %s2474_s17, %s3356_s17   ;;  %s2411_s16 = sphi %s2472_s16, %s3355_s16   ;;  %s2407_s15 = sphi %s2470_s15, %s3354_s15   ;;  %s2403_s14 = sphi %s2468_s14, %s3353_s14   ;;  %s2399_s13 = sphi %s2466_s13, %s3352_s13   ;;  %s2395_s12 = sphi %s2464_s12, %s3351_s12  }
   0xc   : > { %p2521_p0 = scmp.ge.s32.totalorder %s28_s23, 4  ;;  %p73_p1 = scmp.ne.s32.totalorder %s2415_s17, %s2411_s16 }
   0xd   : > { %p3330_p2 = scmp.eq.s32.totalorder %s2435_s22, 0  ;;  %p3329_p4 = scmp.lt.s32.totalorder %s2435_s22, 8 }
   0xe   : > { %s3362_s23 = smov (%p2521_p0, %s28_s23), 0  ;;  %s164_s27 = sand.u32 1, %s2415_s17  }
   0xf   : > { %p75_p3 = por %p3330_p2, %p73_p1  ;;  %s61_s26 = ssub.s32 %s2427_s20, %s3362_s23 }
  0x10   : > { %s1634_s28 = sshll.u32 %s164_s27, 12  ;;  %s1636_s29 = sshll.u32 %s2431_s21, 3 }
  0x11   : > { %s1653_s30 = sshll.u32 %s2427_s20, 10  ;;  %s168_s4 = scalar_lea.vmem [#allocation2], %s1634_s28 }
  0x12   : > { %s178_s5 = sshll.u32 %s168_s4, 4  ;;  %s175_s6 = sadd.s32 %s1653_s30, %s1636_s29  ;;  %s2540_s5 = int_to_ptr.vmem [resolvable:$true] %s178_s5 }
  0x13   : > { %s1638_s7 = sshll.u32 %s175_s6, 7  ;;  %p2544_p5 = pnand %p3329_p4, %p75_p3 }
  0x14   : > { %s3337_s1 = sld [smem:[#allocation9_spill]]  ;;  %s2554_s28 = scalar_lea.sflag [#allocation3], %s164_s27 }
  0x15   : > { %p2283_p8 = pneg %p2544_p5 }
  0x1a   : > { %s2551_s11 = scalar_lea.hbm %s3337_s1, %s1638_s7  ;;  %s2286_s6 = scalar_lea.hbm %s3337_s1, 524288 }
  0x1b   : > { %s2281_s29 = scalar_lea.hbm %s2551_s11, 65536  ;;  %p2287_p11 = scmp.lt.u32.totalorder %s2551_s11, %s3337_s1 }
  0x1c   : > { %p2282_p7 = scmp.ne.s32.totalorder %s2551_s11, %s2281_s29  ;;  %p2288_p12 = scmp.lt.u32.totalorder %s2286_s6, %s2281_s29 }
  0x1d   : > { %p2290_p1 = scmp.lt.u32.totalorder %s2281_s29, %s2551_s11 }
  0x1e   : > { %p2284_p9 = pnand %p2283_p8, %p2282_p7  ;;  %p2289_p13 = por %p2288_p12, %p2287_p11 }
  0x20   : > { %p2285_p10 = pneg %p2284_p9  ;;  %p2291_p3 = por %p2290_p1, %p2289_p13 }
  0x22   : > { %p2292_p4 = pnand %p2291_p3, %p2285_p10 }
  0x24   : > { %2295 = shalt.err (!%p2292_p4)
}
  0x25   : > { %s2296_s27 = scalar_lea.vmem %s2540_s5, 65536  ;;  %s2437_s10 = smov [#allocation2]  }
  0x26   : > { %p2297_p7 = scmp.ne.s32.totalorder %s2540_s5, %s2296_s27  ;;  %s2301_s30 = sshll.u32 %s2437_s10, 4  ;;  %s2302_s30 = int_to_ptr.vmem [resolvable:$false] %s2301_s30 }
  0x27   : > { %s2303_s4 = scalar_lea.vmem %s2302_s30, 131072  ;;  %p2304_p6 = scmp.lt.s32.totalorder %s2540_s5, %s2302_s30 }
  0x28   : > { %p2299_p9 = pnand %p2297_p7, %p2283_p8  ;;  %p2305_p11 = scmp.lt.s32.totalorder %s2303_s4, %s2296_s27 }
  0x2a   : > { %p2300_p2 = pneg %p2299_p9  ;;  %p2306_p12 = por %p2305_p11, %p2304_p6 }
  0x2c   : > { %p2307_p13 = pnand %p2306_p12, %p2300_p2 }
  0x2e   : > { %2310 = shalt.err (!%p2307_p13)
}
  0x2f   : > { %s2438_s29 = smov 2048   ;;  %s2439_s6 = smov 1024  }
  0x30   : > { %s2440_s7 = smov 64   ;;  %p205_p2 = scmp.lt.s32.totalorder %s2435_s22, 9 }
  0x31   : > { %2182 = dma.hbm_to_vmem [thread:$0]  (!%p2544_p5), %s2551_s11, 65536, %s2540_s5, %s2554_s28, %s2438_s29, %s2439_s6, %s2440_s7  }
  0x32   : > { %p3338_p4 = scmp.ge.s32.totalorder %s2435_s22, 1  ;;  %s1630_s27 = sadd.s32 4294967295, %s2435_s22  }
  0x33   : > { %s31_s10 = sadd.s32 1, %s2431_s21  ;;  %p79_p8 = scmp.ne.s32.totalorder %s2411_s16, %s2407_s15 }
  0x34   : > { %p2585_p6 = pnand %p3338_p4, %p205_p2  ;;  %s3364_s10 = smov (!%p2521_p0, %s31_s10), %s2431_s21 }
  0x35   : > { %p2596_p10 = scmp.eq.s32.totalorder %s1630_s27, 0  ;;  %p33_p5 = scmp.ge.s32.totalorder %s3364_s10, 2 }
  0x36   : > { %s92_s5 = sadd.s32 1, %s2403_s14  ;;  %p99_p3 = scmp.ne.s32.totalorder %s2403_s14, %s2399_s13 }
  0x37   : > { %p2603_p1 = por %p2596_p10, %p79_p8  ;;  %s3366_s10 = smov (%p33_p5, %s3364_s10), 0 }
  0x38   : > { %3342 = sst [smem:[#allocation8_spill]] %s3366_s10  ;;  %p3343_p0 = scmp.eq.s32.totalorder %s2435_s22, 0 }
  0x39   : > { %s3341_s11 = scalar_select %p2603_p1, 1, 0 }
  0x3a   : > { %p2613_p7 = por %p99_p3, %p3343_p0  ;;  %p105_p9 = scmp.ne.s32.totalorder %s2399_s13, %s2395_s12 }
  0x3b   : > { %s62_s25 = ssub.s32 %s2431_s21, %s3366_s10  ;;  %s188_s28 = sand.u32 1, %s2403_s14  }
  0x3c   : > { %s63_s30 = sor.u32 %s62_s25, %s61_s26  ;;  %p90_p11 = scmp.eq.s32.totalorder %s62_s25, 0 }
  0x3d   : > { %p64_p12 = scmp.eq.s32.totalorder %s63_s30, 0  ;;  %p2627_p13 = por %p105_p9, %p2596_p10 }
  0x3e   : > { %s2632_s29 = scalar_select %p90_p11, %s2403_s14, %s92_s5  }
  0x3f   : > { %s3345_s4 = scalar_select %p2627_p13, 1, 0 }
  0x40   : > { %s2637_s6 = scalar_select %p64_p12, %s2415_s17, %s66_s24  }
  0x41   : > { %s1639_s7 = sshll.u32 %s188_s28, 3  ;;  %s1654_s27 = sshll.u32 %s2431_s21, 7 }
  0x42   : > { %s2643_s10 = scalar_lea.hbm %s3327_s2, %s1654_s27  ;;  %s192_s26 = scalar_lea.vmem [#allocation4], %s1639_s7 }
  0x43   : > { %s200_s8 = sshll.u32 %s192_s26, 4  ;;  %p3346_p2 = scmp.lt.s32.totalorder %s2435_s22, 8  ;;  %s2645_s8 = int_to_ptr.vmem [resolvable:$true] %s200_s8 }
  0x44   : > { %s189_s5 = scalar_lea.sflag [#allocation5], %s188_s28  ;;  %s2311_s1 = scalar_lea.hbm %s2643_s10, 128 }
  0x45   : > { %p2651_p4 = pnand %p3346_p2, %p2613_p7  ;;  %p2312_p8 = scmp.ne.s32.totalorder %s2643_s10, %s2311_s1 }
  0x46   : > { %s2316_s15 = scalar_lea.hbm %s3327_s2, 256  ;;  %p2317_p0 = scmp.lt.u32.totalorder %s2643_s10, %s3327_s2 }
  0x47   : > { %p2313_p10 = pneg %p2651_p4  ;;  %p2318_p7 = scmp.lt.u32.totalorder %s2316_s15, %s2311_s1 }
  0x48   : > { %p2320_p11 = scmp.lt.u32.totalorder %s2311_s1, %s2643_s10 }
  0x49   : > { %p2314_p5 = pnand %p2313_p10, %p2312_p8  ;;  %p2319_p9 = por %p2318_p7, %p2317_p0 }
  0x4b   : > { %p2315_p3 = pneg %p2314_p5  ;;  %p2321_p12 = por %p2320_p11, %p2319_p9 }
  0x4d   : > { %p2322_p2 = pnand %p2321_p12, %p2315_p3 }
  0x4f   : > { %2325 = shalt.err (!%p2322_p2)
}
  0x50   : > { %s2326_s28 = scalar_lea.vmem %s2645_s8, 128  ;;  %s2441_s12 = smov [#allocation4]  }
  0x51   : > { %p2327_p8 = scmp.ne.s32.totalorder %s2645_s8, %s2326_s28  ;;  %s2331_s26 = sshll.u32 %s2441_s12, 4  ;;  %s2332_s26 = int_to_ptr.vmem [resolvable:$false] %s2331_s26 }
  0x52   : > { %s2333_s25 = scalar_lea.vmem %s2332_s26, 256  ;;  %p2334_p1 = scmp.lt.s32.totalorder %s2645_s8, %s2332_s26 }
  0x53   : > { %p2329_p5 = pnand %p2327_p8, %p2313_p10  ;;  %p2335_p0 = scmp.lt.s32.totalorder %s2333_s25, %s2326_s28 }
  0x55   : > { %p2330_p13 = pneg %p2329_p5  ;;  %p2336_p7 = por %p2335_p0, %p2334_p1 }
  0x57   : > { %p2337_p9 = pnand %p2336_p7, %p2330_p13 }
  0x59   : > { %2340 = shalt.err (!%p2337_p9)
}
  0x5a   : > { %2185 = dma.hbm_to_vmem [thread:$0]  (!%p2651_p4), %s2643_s10, 128, %s2645_s8, %s189_s5  }
  0x5b   : > { %209 = sbr.rel (%p2585_p6) target bundleno = 611 (0x263), region = 32  ;;  %s211_s1 = sand.u32 (!%p2585_p6), 1, %s2411_s16  }
  0x5c   : > { %s1643_s30 = sshll.u32 (!%p2585_p6), %s211_s1, 12  ;;  %s212_s15 = scalar_lea.sflag (!%p2585_p6), [#allocation3], %s211_s1 }
  0x5d   : > { %s2683_s7 = scalar_lea.vmem (!%p2585_p6), [#allocation2], %s1643_s30  ;;  %p3348_p10 = scmp.ne.s32.totalorder (!%p2585_p6), %s3341_s11, 0 }
  0x62   : > { %2386 = dma.done.wait (%p3348_p10), %s212_s15, 65536  }
  0x63   : > { %2388 = vsyncadd (%p3348_p10), %s212_s15, 4294901760  ;;  %s220_s24 = sand.u32 1, %s2399_s13   ;;  %p3349_p6 = scmp.ne.s32.totalorder %s3345_s4, 0 }
  0x64   : > { %s2690_s27 = sshll.u32 %s220_s24, 3  ;;  %s221_s9 = scalar_lea.sflag [#allocation5], %s220_s24 }
  0x65   : > { %s224_s10 = scalar_lea.vmem [#allocation4], %s2690_s27 }
  0x66   : > { %2390 = dma.done.wait (%p3349_p6), %s221_s9, 128  }
  0x67   : > { %2392 = vsyncadd (%p3349_p6), %s221_s9, 4294967168  ;;  %s1645_s8 = sshll.u32 %s2419_s18, 2  ;;  %s1647_s5 = sshll.u32 %s2423_s19, 3 }
  0x68   : > { %p258_p1 = scmp.lt.s32.totalorder %s1645_s8, 15  ;;  %p267_p13 = scmp.lt.s32.totalorder %s1647_s5, 15 }
  0x69   : > { %p1649_p4 = scmp.ne.s32.totalorder %s2419_s18, 0 }
  0x6a   : > { %s3368_s8 = smov (!%p258_p1, %s1645_s8), 15  ;;  %s3370_s5 = smov (!%p267_p13, %s1647_s5), 15 }
  0x6b   : > { %s1646_s11 = sshll.u32 %s3368_s8, 1  ;;  %s1648_s25 = sshll.u32 %s3370_s5, 1  ;;  %v2442_v0 = vmov (!%p1649_p4), 0.0  }
  0x6c   : > { %s2702_s26 = scalar_lea.vmem %s3325_s0, %s1646_s11  ;;  %s2707_s4 = scalar_lea.vmem %s3328_s3, %s1648_s25 }
  0x6d   : > { %275 = sbr.rel (%p1649_p4) target bundleno = 116 (0x74), region = 44  ;;  %276 = vst [vmem:[%s2707_s4] sm:$0xff] (!%p1649_p4), %v2442_v0  ;;  %277 = vst [vmem:[%s2707_s4 + $0x8] sm:$0xff] (!%p1649_p4), %v2442_v0 }
  0x74 PF: > { %v282_v1 = vld [vmem:[%s2683_s7 + $0x8] sm:$0xff]  ;;  %v284_v3 = vld [vmem:[%s2683_s7 + $0x18] sm:$0xff]  ;;  %v281_v6 = vld [vmem:[%s2683_s7] sm:$0xff]  ;;  %p1650_p3 = scmp.ne.s32.totalorder %s2419_s18, 3 }
  0x75   : > { %v290_v2 = vld [vmem:[%s2683_s7 + $0x48] sm:$0xff]  ;;  %v292_v5 = vld [vmem:[%s2683_s7 + $0x58] sm:$0xff]  ;;  %v289_v7 = vld [vmem:[%s2683_s7 + $0x40] sm:$0xff] }
  0x76   : > { %v1655_v4 = vpack.c.bf16 %v290_v2, %v282_v1  ;;  %v1783_v8 = vpack.c.bf16 %v292_v5, %v284_v3  ;;  %v1657_v9 = vpack.c.bf16 %v289_v7, %v281_v6  ;;  %v283_v10 = vld [vmem:[%s2683_s7 + $0x10] sm:$0xff]  ;;  %v298_v12 = vld [vmem:[%s2683_s7 + $0x88] sm:$0xff]  ;;  %v300_v15 = vld [vmem:[%s2683_s7 + $0x98] sm:$0xff] }
  0x77   : > { %v291_v11 = vld [vmem:[%s2683_s7 + $0x50] sm:$0xff]  ;;  %v306_v14 = vld [vmem:[%s2683_s7 + $0xc8] sm:$0xff]  ;;  %v308_v16 = vld [vmem:[%s2683_s7 + $0xd8] sm:$0xff] }
  0x78   : > { %1656 = vmatprep.subr.bf16.mxu0 %v1655_v4  ;;  %v1785_v13 = vpack.c.bf16 %v291_v11, %v283_v10  ;;  %1784 = vmatprep.subr.bf16.mxu1 %v1783_v8  ;;  %v1659_v17 = vpack.c.bf16 %v306_v14, %v298_v12  ;;  %v1787_v18 = vpack.c.bf16 %v308_v16, %v300_v15  ;;  %v297_v19 = vld [vmem:[%s2683_s7 + $0x80] sm:$0xff]  ;;  %v299_v21 = vld [vmem:[%s2683_s7 + $0x90] sm:$0xff]  ;;  %v314_v24 = vld [vmem:[%s2683_s7 + $0x108] sm:$0xff] }
  0x79   : > { %1658 = vmatpush1.bf16.msra.mxu0 %v1657_v9  ;;  %v305_v20 = vld [vmem:[%s2683_s7 + $0xc0] sm:$0xff]  ;;  %v307_v23 = vld [vmem:[%s2683_s7 + $0xd0] sm:$0xff]  ;;  %v322_v25 = vld [vmem:[%s2683_s7 + $0x148] sm:$0xff] }
  0x7a   : > { %1786 = vmatpush1.bf16.msra.mxu1 %v1785_v13  ;;  %v1661_v22 = vpack.c.bf16 %v305_v20, %v297_v19  ;;  %1660 = vmatprep.subr.bf16.mxu0 %v1659_v17  ;;  %v1789_v26 = vpack.c.bf16 %v307_v23, %v299_v21  ;;  %v1663_v27 = vpack.c.bf16 %v322_v25, %v314_v24  ;;  %v316_v28 = vld [vmem:[%s2683_s7 + $0x118] sm:$0xff]  ;;  %v313_v30 = vld [vmem:[%s2683_s7 + $0x100] sm:$0xff]  ;;  %v315_v33 = vld [vmem:[%s2683_s7 + $0x110] sm:$0xff] }
  0x7b   : > { %1788 = vmatprep.subr.bf16.mxu1 %v1787_v18  ;;  %v324_v29 = vld [vmem:[%s2683_s7 + $0x158] sm:$0xff]  ;;  %v321_v32 = vld [vmem:[%s2683_s7 + $0x140] sm:$0xff]  ;;  %v323_v34 = vld [vmem:[%s2683_s7 + $0x150] sm:$0xff] }
  0x7c   : > { %v1791_v31 = vpack.c.bf16 %v324_v29, %v316_v28  ;;  %v1665_v35 = vpack.c.bf16 %v321_v32, %v313_v30  ;;  %v330_v36 = vld [vmem:[%s2683_s7 + $0x188] sm:$0xff]  ;;  %v332_v38 = vld [vmem:[%s2683_s7 + $0x198] sm:$0xff]  ;;  %v1793_v39 = vpack.c.bf16 %v323_v34, %v315_v33  ;;  %v329_v42 = vld [vmem:[%s2683_s7 + $0x180] sm:$0xff] }
  0x7d   : > { %1662 = vmatpush1.bf16.msra.mxu0 %v1661_v22  ;;  %v338_v37 = vld [vmem:[%s2683_s7 + $0x1c8] sm:$0xff]  ;;  %v340_v41 = vld [vmem:[%s2683_s7 + $0x1d8] sm:$0xff]  ;;  %v337_v43 = vld [vmem:[%s2683_s7 + $0x1c0] sm:$0xff] }
  0x7e   : > { %1790 = vmatpush1.bf16.msra.mxu1 %v1789_v26  ;;  %1664 = vmatprep.subr.bf16.mxu0 %v1663_v27  ;;  %v1667_v40 = vpack.c.bf16 %v338_v37, %v330_v36  ;;  %v1795_v44 = vpack.c.bf16 %v340_v41, %v332_v38  ;;  %v331_v45 = vld [vmem:[%s2683_s7 + $0x190] sm:$0xff]  ;;  %v346_v47 = vld [vmem:[%s2683_s7 + $0x208] sm:$0xff]  ;;  %v348_v49 = vld [vmem:[%s2683_s7 + $0x218] sm:$0xff]  ;;  %v1669_v51 = vpack.c.bf16 %v337_v43, %v329_v42 }
  0x7f   : > { %1792 = vmatprep.subr.bf16.mxu1 %v1791_v31  ;;  %v339_v46 = vld [vmem:[%s2683_s7 + $0x1d0] sm:$0xff]  ;;  %v354_v48 = vld [vmem:[%s2683_s7 + $0x248] sm:$0xff]  ;;  %v356_v50 = vld [vmem:[%s2683_s7 + $0x258] sm:$0xff] }
  0x80   : > { %v1797_v52 = vpack.c.bf16 %v339_v46, %v331_v45  ;;  %v1671_v53 = vpack.c.bf16 %v354_v48, %v346_v47  ;;  %v345_v54 = vld [vmem:[%s2683_s7 + $0x200] sm:$0xff]  ;;  %v347_v56 = vld [vmem:[%s2683_s7 + $0x210] sm:$0xff]  ;;  %v1799_v57 = vpack.c.bf16 %v356_v50, %v348_v49  ;;  %v362_v59 = vld [vmem:[%s2683_s7 + $0x288] sm:$0xff]  ;;  %v2443_v47 = vmov 1983009808  }
  0x81   : > { %1666 = vmatpush1.bf16.msra.mxu0 %v1665_v35  ;;  %v353_v55 = vld [vmem:[%s2683_s7 + $0x240] sm:$0xff]  ;;  %v355_v58 = vld [vmem:[%s2683_s7 + $0x250] sm:$0xff]  ;;  %v370_v60 = vld [vmem:[%s2683_s7 + $0x2c8] sm:$0xff]  ;;  %v796_v48 = vunpack.c.l.s4 %v2443_v47  ;;  %v798_v49 = vlaneseq }
  0x82   : > { %1794 = vmatpush1.bf16.msra.mxu1 %v1793_v39  ;;  %1668 = vmatprep.subr.bf16.mxu0 %v1667_v40  ;;  %v364_v61 = vld [vmem:[%s2683_s7 + $0x298] sm:$0xff]  ;;  %v1673_v63 = vpack.c.bf16 %v353_v55, %v345_v54  ;;  %v1801_v0 = vpack.c.bf16 %v355_v58, %v347_v56  ;;  %v1675_v1 = vpack.c.bf16 %v370_v60, %v362_v59  ;;  %v361_v2 = vld [vmem:[%s2683_s7 + $0x280] sm:$0xff]  ;;  %v363_v4 = vld [vmem:[%s2683_s7 + $0x290] sm:$0xff] }
  0x83   : > { %1796 = vmatprep.subr.bf16.mxu1 %v1795_v44  ;;  %v372_v62 = vld [vmem:[%s2683_s7 + $0x2d8] sm:$0xff]  ;;  %v369_v3 = vld [vmem:[%s2683_s7 + $0x2c0] sm:$0xff]  ;;  %v371_v6 = vld [vmem:[%s2683_s7 + $0x2d0] sm:$0xff] }
  0x84   : > { %v1803_v5 = vpack.c.bf16 %v372_v62, %v364_v61  ;;  %v378_v7 = vld [vmem:[%s2683_s7 + $0x308] sm:$0xff]  ;;  %v380_v9 = vld [vmem:[%s2683_s7 + $0x318] sm:$0xff]  ;;  %v1677_v11 = vpack.c.bf16 %v369_v3, %v361_v2  ;;  %v1805_v12 = vpack.c.bf16 %v371_v6, %v363_v4  ;;  %v377_v14 = vld [vmem:[%s2683_s7 + $0x300] sm:$0xff]  ;;  %v797_v62 = vunpack.c.0.s8 %v796_v48 }
  0x85   : > { %1670 = vmatpush1.bf16.msra.mxu0 %v1669_v51  ;;  %v386_v8 = vld [vmem:[%s2683_s7 + $0x348] sm:$0xff]  ;;  %v388_v10 = vld [vmem:[%s2683_s7 + $0x358] sm:$0xff]  ;;  %v385_v15 = vld [vmem:[%s2683_s7 + $0x340] sm:$0xff] }
  0x86   : > { %1798 = vmatpush1.bf16.msra.mxu1 %v1797_v52  ;;  %1672 = vmatprep.subr.bf16.mxu0 %v1671_v53  ;;  %v1679_v13 = vpack.c.bf16 %v386_v8, %v378_v7  ;;  %v379_v16 = vld [vmem:[%s2683_s7 + $0x310] sm:$0xff]  ;;  %v1807_v17 = vpack.c.bf16 %v388_v10, %v380_v9  ;;  %v394_v19 = vld [vmem:[%s2683_s7 + $0x388] sm:$0xff]  ;;  %v396_v21 = vld [vmem:[%s2683_s7 + $0x398] sm:$0xff]  ;;  %v1681_v23 = vpack.c.bf16 %v385_v15, %v377_v14 }
  0x87   : > { %1800 = vmatprep.subr.bf16.mxu1 %v1799_v57  ;;  %v387_v18 = vld [vmem:[%s2683_s7 + $0x350] sm:$0xff]  ;;  %v402_v20 = vld [vmem:[%s2683_s7 + $0x3c8] sm:$0xff]  ;;  %v404_v22 = vld [vmem:[%s2683_s7 + $0x3d8] sm:$0xff] }
  0x88   : > { %v1809_v24 = vpack.c.bf16 %v387_v18, %v379_v16  ;;  %v1683_v25 = vpack.c.bf16 %v402_v20, %v394_v19  ;;  %v393_v26 = vld [vmem:[%s2683_s7 + $0x380] sm:$0xff]  ;;  %v395_v28 = vld [vmem:[%s2683_s7 + $0x390] sm:$0xff]  ;;  %v1811_v29 = vpack.c.bf16 %v404_v22, %v396_v21  ;;  %v410_v31 = vld [vmem:[%s2683_s7 + $0x408] sm:$0xff] }
  0x89   : > { %1674 = vmatpush1.bf16.msra.mxu0 %v1673_v63  ;;  %v401_v27 = vld [vmem:[%s2683_s7 + $0x3c0] sm:$0xff]  ;;  %v403_v30 = vld [vmem:[%s2683_s7 + $0x3d0] sm:$0xff]  ;;  %v418_v32 = vld [vmem:[%s2683_s7 + $0x448] sm:$0xff]  ;;  %v2796_v63 = vshrl.u32 %v798_v49, 7 }
  0x8a   : > { %1802 = vmatpush1.bf16.msra.mxu1 %v1801_v0  ;;  %1676 = vmatprep.subr.bf16.mxu0 %v1675_v1  ;;  %v412_v33 = vld [vmem:[%s2683_s7 + $0x418] sm:$0xff]  ;;  %v1685_v35 = vpack.c.bf16 %v401_v27, %v393_v26  ;;  %v1813_v36 = vpack.c.bf16 %v403_v30, %v395_v28  ;;  %v1687_v37 = vpack.c.bf16 %v418_v32, %v410_v31  ;;  %v409_v38 = vld [vmem:[%s2683_s7 + $0x400] sm:$0xff]  ;;  %v411_v40 = vld [vmem:[%s2683_s7 + $0x410] sm:$0xff] }
  0x8b   : > { %1804 = vmatprep.subr.bf16.mxu1 %v1803_v5  ;;  %v420_v34 = vld [vmem:[%s2683_s7 + $0x458] sm:$0xff]  ;;  %v417_v39 = vld [vmem:[%s2683_s7 + $0x440] sm:$0xff]  ;;  %v419_v42 = vld [vmem:[%s2683_s7 + $0x450] sm:$0xff] }
  0x8c   : > { %v1815_v41 = vpack.c.bf16 %v420_v34, %v412_v33  ;;  %v426_v43 = vld [vmem:[%s2683_s7 + $0x488] sm:$0xff]  ;;  %v428_v45 = vld [vmem:[%s2683_s7 + $0x498] sm:$0xff]  ;;  %v1689_v50 = vpack.c.bf16 %v417_v39, %v409_v38  ;;  %v1817_v51 = vpack.c.bf16 %v419_v42, %v411_v40  ;;  %v425_v53 = vld [vmem:[%s2683_s7 + $0x480] sm:$0xff] }
  0x8d   : > { %1678 = vmatpush1.bf16.msra.mxu0 %v1677_v11  ;;  %v434_v44 = vld [vmem:[%s2683_s7 + $0x4c8] sm:$0xff]  ;;  %v436_v46 = vld [vmem:[%s2683_s7 + $0x4d8] sm:$0xff]  ;;  %v433_v54 = vld [vmem:[%s2683_s7 + $0x4c0] sm:$0xff] }
  0x8e   : > { %1806 = vmatpush1.bf16.msra.mxu1 %v1805_v12  ;;  %1680 = vmatprep.subr.bf16.mxu0 %v1679_v13  ;;  %v1691_v52 = vpack.c.bf16 %v434_v44, %v426_v43  ;;  %v427_v55 = vld [vmem:[%s2683_s7 + $0x490] sm:$0xff]  ;;  %v1819_v56 = vpack.c.bf16 %v436_v46, %v428_v45  ;;  %v442_v58 = vld [vmem:[%s2683_s7 + $0x508] sm:$0xff]  ;;  %v444_v60 = vld [vmem:[%s2683_s7 + $0x518] sm:$0xff]  ;;  %v1693_v0 = vpack.c.bf16 %v433_v54, %v425_v53 }
  0x8f   : > { %1808 = vmatprep.subr.bf16.mxu1 %v1807_v17  ;;  %v435_v57 = vld [vmem:[%s2683_s7 + $0x4d0] sm:$0xff]  ;;  %v450_v59 = vld [vmem:[%s2683_s7 + $0x548] sm:$0xff]  ;;  %v452_v61 = vld [vmem:[%s2683_s7 + $0x558] sm:$0xff]  ;;  %v2807_v12 = vsub.s32 %v797_v62, %v2796_v63 }
  0x90   : > { %v1821_v1 = vpack.c.bf16 %v435_v57, %v427_v55  ;;  %v1695_v2 = vpack.c.bf16 %v450_v59, %v442_v58  ;;  %v441_v3 = vld [vmem:[%s2683_s7 + $0x500] sm:$0xff]  ;;  %v443_v5 = vld [vmem:[%s2683_s7 + $0x510] sm:$0xff]  ;;  %v1823_v6 = vpack.c.bf16 %v452_v61, %v444_v60  ;;  %v458_v8 = vld [vmem:[%s2683_s7 + $0x588] sm:$0xff] }
  0x91   : > { %1682 = vmatpush1.bf16.msra.mxu0 %v1681_v23  ;;  %v449_v4 = vld [vmem:[%s2683_s7 + $0x540] sm:$0xff]  ;;  %v451_v7 = vld [vmem:[%s2683_s7 + $0x550] sm:$0xff]  ;;  %v466_v9 = vld [vmem:[%s2683_s7 + $0x5c8] sm:$0xff] }
  0x92   : > { %1810 = vmatpush1.bf16.msra.mxu1 %v1809_v24  ;;  %1684 = vmatprep.subr.bf16.mxu0 %v1683_v25  ;;  %v460_v10 = vld [vmem:[%s2683_s7 + $0x598] sm:$0xff]  ;;  %v1697_v13 = vpack.c.bf16 %v449_v4, %v441_v3  ;;  %v457_v14 = vld [vmem:[%s2683_s7 + $0x580] sm:$0xff]  ;;  %v1825_v15 = vpack.c.bf16 %v451_v7, %v443_v5  ;;  %v1699_v16 = vpack.c.bf16 %v466_v9, %v458_v8  ;;  %v459_v18 = vld [vmem:[%s2683_s7 + $0x590] sm:$0xff] }
  0x93   : > { %1812 = vmatprep.subr.bf16.mxu1 %v1811_v29  ;;  %v468_v11 = vld [vmem:[%s2683_s7 + $0x5d8] sm:$0xff]  ;;  %v465_v17 = vld [vmem:[%s2683_s7 + $0x5c0] sm:$0xff]  ;;  %v467_v19 = vld [vmem:[%s2683_s7 + $0x5d0] sm:$0xff] }
  0x94   : > { %v1827_v20 = vpack.c.bf16 %v468_v11, %v460_v10  ;;  %v474_v21 = vld [vmem:[%s2683_s7 + $0x608] sm:$0xff]  ;;  %v2816_v23 = vld [vmem:[%s2702_s26] sm:$0xff]  ;;  %v476_v24 = vld [vmem:[%s2683_s7 + $0x618] sm:$0xff]  ;;  %v1701_v27 = vpack.c.bf16 %v465_v17, %v457_v14  ;;  %v1829_v28 = vpack.c.bf16 %v467_v19, %v459_v18 }
  0x95   : > { %1686 = vmatpush1.bf16.msra.mxu0 %v1685_v35  ;;  %v482_v22 = vld [vmem:[%s2683_s7 + $0x648] sm:$0xff]  ;;  %v484_v25 = vld [vmem:[%s2683_s7 + $0x658] sm:$0xff]  ;;  %v2822_v26 = vrot.slane %v2816_v23, %v2807_v12  ;;  %v473_v30 = vld [vmem:[%s2683_s7 + $0x600] sm:$0xff]  ;;  %v794_v11 = vcombine.high %v2816_v23, %v2816_v23 }
  0x96   : > { %1814 = vmatpush1.bf16.msra.mxu1 %v1813_v36  ;;  %1688 = vmatprep.subr.bf16.mxu0 %v1687_v37  ;;  %v1703_v29 = vpack.c.bf16 %v482_v22, %v474_v21  ;;  %v481_v31 = vld [vmem:[%s2683_s7 + $0x640] sm:$0xff]  ;;  %v475_v32 = vld [vmem:[%s2683_s7 + $0x610] sm:$0xff]  ;;  %v1831_v34 = vpack.c.bf16 %v484_v25, %v476_v24  ;;  %v490_v36 = vld [vmem:[%s2683_s7 + $0x688] sm:$0xff] }
  0x97   : > { %1816 = vmatprep.subr.bf16.mxu1 %v1815_v41  ;;  %v2829_v33 = vcombine.high %v2822_v26, %v2822_v26  ;;  %v483_v35 = vld [vmem:[%s2683_s7 + $0x650] sm:$0xff]  ;;  %v498_v37 = vld [vmem:[%s2683_s7 + $0x6c8] sm:$0xff]  ;;  %v492_v38 = vld [vmem:[%s2683_s7 + $0x698] sm:$0xff]  ;;  %v1705_v40 = vpack.c.bf16 %v481_v31, %v473_v30  ;;  %v2871_v25 = vrot.slane %v794_v11, %v2807_v12 }
  0x98   : > { %v500_v39 = vld [vmem:[%s2683_s7 + $0x6d8] sm:$0xff]  ;;  %v1833_v41 = vpack.c.bf16 %v483_v35, %v475_v32  ;;  %v1707_v42 = vpack.c.bf16 %v498_v37, %v490_v36  ;;  %v489_v43 = vld [vmem:[%s2683_s7 + $0x680] sm:$0xff]  ;;  %v491_v45 = vld [vmem:[%s2683_s7 + $0x690] sm:$0xff] }
  0x99   : > { %1690 = vmatpush1.bf16.msra.mxu0 %v1689_v50  ;;  %879 = vmatprep.mubr.f32.mxu0 %v2829_v33  ;;  %v497_v44 = vld [vmem:[%s2683_s7 + $0x6c0] sm:$0xff]  ;;  %v1835_v46 = vpack.c.bf16 %v500_v39, %v492_v38  ;;  %v499_v47 = vld [vmem:[%s2683_s7 + $0x6d0] sm:$0xff]  ;;  %v506_v48 = vld [vmem:[%s2683_s7 + $0x708] sm:$0xff] }
  0x9a   : > { %1818 = vmatpush1.bf16.msra.mxu1 %v1817_v51  ;;  %1692 = vmatprep.subr.bf16.mxu0 %v1691_v52  ;;  %v514_v49 = vld [vmem:[%s2683_s7 + $0x748] sm:$0xff]  ;;  %v508_v50 = vld [vmem:[%s2683_s7 + $0x718] sm:$0xff]  ;;  %v1709_v52 = vpack.c.bf16 %v497_v44, %v489_v43  ;;  %v1837_v53 = vpack.c.bf16 %v499_v47, %v491_v45  ;;  %v505_v55 = vld [vmem:[%s2683_s7 + $0x700] sm:$0xff] }
  0x9b   : > { %1820 = vmatprep.subr.bf16.mxu1 %v1819_v56  ;;  %1021 = vmatprep.mubr.f32.mxu1 %v2829_v33  ;;  %v516_v51 = vld [vmem:[%s2683_s7 + $0x758] sm:$0xff]  ;;  %v1711_v54 = vpack.c.bf16 %v514_v49, %v506_v48  ;;  %v513_v56 = vld [vmem:[%s2683_s7 + $0x740] sm:$0xff]  ;;  %v507_v57 = vld [vmem:[%s2683_s7 + $0x710] sm:$0xff] }
  0x9c   : > { %v1839_v58 = vpack.c.bf16 %v516_v51, %v508_v50  ;;  %v515_v59 = vld [vmem:[%s2683_s7 + $0x750] sm:$0xff]  ;;  %v522_v60 = vld [vmem:[%s2683_s7 + $0x788] sm:$0xff]  ;;  %v524_v62 = vld [vmem:[%s2683_s7 + $0x798] sm:$0xff] }
  0x9d   : > { %1694 = vmatpush1.bf16.msra.mxu0 %v1693_v0  ;;  %v530_v61 = vld [vmem:[%s2683_s7 + $0x7c8] sm:$0xff]  ;;  %v532_v0 = vld [vmem:[%s2683_s7 + $0x7d8] sm:$0xff]  ;;  %v521_v4 = vld [vmem:[%s2683_s7 + $0x780] sm:$0xff] }
  0x9e   : > { %1822 = vmatpush1.bf16.msra.mxu1 %v1821_v1  ;;  %1696 = vmatprep.subr.bf16.mxu0 %v1695_v2  ;;  %v1713_v1 = vpack.c.bf16 %v513_v56, %v505_v55  ;;  %v1841_v2 = vpack.c.bf16 %v515_v59, %v507_v57  ;;  %v1715_v3 = vpack.c.bf16 %v530_v61, %v522_v60  ;;  %v529_v5 = vld [vmem:[%s2683_s7 + $0x7c0] sm:$0xff]  ;;  %v531_v8 = vld [vmem:[%s2683_s7 + $0x7d0] sm:$0xff]  ;;  %v538_v9 = vld [vmem:[%s2683_s7 + $0x808] sm:$0xff] }
  0x9f   : > { %1824 = vmatprep.subr.bf16.mxu1 %v1823_v6  ;;  %v523_v6 = vld [vmem:[%s2683_s7 + $0x790] sm:$0xff]  ;;  %v1843_v7 = vpack.c.bf16 %v532_v0, %v524_v62  ;;  %v546_v10 = vld [vmem:[%s2683_s7 + $0x848] sm:$0xff]  ;;  %v548_v14 = vld [vmem:[%s2683_s7 + $0x858] sm:$0xff] }
  0xa0   : > { %v1719_v17 = vpack.c.bf16 %v546_v10, %v538_v9  ;;  %v537_v18 = vld [vmem:[%s2683_s7 + $0x800] sm:$0xff]  ;;  %v547_v22 = vld [vmem:[%s2683_s7 + $0x850] sm:$0xff]  ;;  %v554_v23 = vld [vmem:[%s2683_s7 + $0x888] sm:$0xff] }
  0xa1   : > { %1698 = vmatpush1.bf16.msra.mxu0 %v1697_v13  ;;  %v540_v13 = vld [vmem:[%s2683_s7 + $0x818] sm:$0xff]  ;;  %v545_v19 = vld [vmem:[%s2683_s7 + $0x840] sm:$0xff]  ;;  %v562_v24 = vld [vmem:[%s2683_s7 + $0x8c8] sm:$0xff] }
  0xa2   : > { %1826 = vmatpush1.bf16.msra.mxu1 %v1825_v15  ;;  %1700 = vmatprep.subr.bf16.mxu0 %v1699_v16  ;;  %v1717_v15 = vpack.c.bf16 %v529_v5, %v521_v4  ;;  %v1845_v16 = vpack.c.bf16 %v531_v8, %v523_v6  ;;  %v1847_v21 = vpack.c.bf16 %v548_v14, %v540_v13  ;;  %v553_v32 = vld [vmem:[%s2683_s7 + $0x880] sm:$0xff]  ;;  %v555_v35 = vld [vmem:[%s2683_s7 + $0x890] sm:$0xff]  ;;  %v570_v38 = vld [vmem:[%s2683_s7 + $0x908] sm:$0xff] }
  0xa3   : > { %1828 = vmatprep.subr.bf16.mxu1 %v1827_v20  ;;  %v539_v20 = vld [vmem:[%s2683_s7 + $0x810] sm:$0xff]  ;;  %v1723_v31 = vpack.c.bf16 %v562_v24, %v554_v23  ;;  %v578_v39 = vld [vmem:[%s2683_s7 + $0x948] sm:$0xff]  ;;  %v577_v47 = vld [vmem:[%s2683_s7 + $0x940] sm:$0xff] }
  0xa4   : > { %v1849_v30 = vpack.c.bf16 %v547_v22, %v539_v20  ;;  %v563_v37 = vld [vmem:[%s2683_s7 + $0x8d0] sm:$0xff]  ;;  %v1727_v45 = vpack.c.bf16 %v578_v39, %v570_v38  ;;  %v586_v51 = vld [vmem:[%s2683_s7 + $0x988] sm:$0xff]  ;;  %v593_v59 = vld [vmem:[%s2683_s7 + $0x9c0] sm:$0xff] }
  0xa5   : > { %1702 = vmatpush1.bf16.msra.mxu0 %v1701_v27  ;;  %v556_v27 = vld [vmem:[%s2683_s7 + $0x898] sm:$0xff]  ;;  %v1853_v44 = vpack.c.bf16 %v563_v37, %v555_v35  ;;  %v571_v48 = vld [vmem:[%s2683_s7 + $0x910] sm:$0xff]  ;;  %v602_v0 = vld [vmem:[%s2683_s7 + $0xa08] sm:$0xff] }
  0xa6   : > { %1830 = vmatpush1.bf16.msra.mxu1 %v1829_v28  ;;  %1704 = vmatprep.subr.bf16.mxu0 %v1703_v29  ;;  %v564_v28 = vld [vmem:[%s2683_s7 + $0x8d8] sm:$0xff]  ;;  %v1721_v29 = vpack.c.bf16 %v545_v19, %v537_v18  ;;  %v579_v50 = vld [vmem:[%s2683_s7 + $0x950] sm:$0xff]  ;;  %v609_v8 = vld [vmem:[%s2683_s7 + $0xa40] sm:$0xff] }
  0xa7   : > { %1832 = vmatprep.subr.bf16.mxu1 %v1831_v34  ;;  %v561_v34 = vld [vmem:[%s2683_s7 + $0x8c0] sm:$0xff]  ;;  %v1851_v36 = vpack.c.bf16 %v564_v28, %v556_v27  ;;  %v1857_v56 = vpack.c.bf16 %v579_v50, %v571_v48  ;;  %v587_v60 = vld [vmem:[%s2683_s7 + $0x990] sm:$0xff]  ;;  %v618_v13 = vld [vmem:[%s2683_s7 + $0xa88] sm:$0xff] }
  0xa8   : > { %v1725_v43 = vpack.c.bf16 %v561_v34, %v553_v32  ;;  %v595_v62 = vld [vmem:[%s2683_s7 + $0x9d0] sm:$0xff]  ;;  %v626_v14 = vld [vmem:[%s2683_s7 + $0xac8] sm:$0xff]  ;;  %v617_v20 = vld [vmem:[%s2683_s7 + $0xa80] sm:$0xff] }
  0xa9   : > { %1706 = vmatpush1.bf16.msra.mxu0 %v1705_v40  ;;  %v2883_v40 = vcombine.high %v2871_v25, %v2871_v25  ;;  %v1861_v5 = vpack.c.bf16 %v595_v62, %v587_v60  ;;  %v603_v9 = vld [vmem:[%s2683_s7 + $0xa10] sm:$0xff]  ;;  %v1739_v19 = vpack.c.bf16 %v626_v14, %v618_v13  ;;  %v634_v27 = vld [vmem:[%s2683_s7 + $0xb08] sm:$0xff]  ;;  %v633_v35 = vld [vmem:[%s2683_s7 + $0xb00] sm:$0xff] }
  0xaa   : > { %1834 = vmatpush1.bf16.msra.mxu1 %v1833_v41  ;;  %1708 = vmatprep.subr.bf16.mxu0 %v1707_v42  ;;  %v572_v41 = vld [vmem:[%s2683_s7 + $0x918] sm:$0xff]  ;;  %v611_v11 = vld [vmem:[%s2683_s7 + $0xa50] sm:$0xff]  ;;  %v642_v28 = vld [vmem:[%s2683_s7 + $0xb48] sm:$0xff] }
  0xab   : > { %1836 = vmatprep.subr.bf16.mxu1 %v1835_v46  ;;  %v580_v42 = vld [vmem:[%s2683_s7 + $0x958] sm:$0xff]  ;;  %v569_v46 = vld [vmem:[%s2683_s7 + $0x900] sm:$0xff]  ;;  %v1865_v18 = vpack.c.bf16 %v611_v11, %v603_v9  ;;  %v619_v22 = vld [vmem:[%s2683_s7 + $0xa90] sm:$0xff]  ;;  %v1743_v34 = vpack.c.bf16 %v642_v28, %v634_v27 }
  0xac   : > { %v1855_v49 = vpack.c.bf16 %v580_v42, %v572_v41  ;;  %v1729_v55 = vpack.c.bf16 %v577_v47, %v569_v46  ;;  %v627_v24 = vld [vmem:[%s2683_s7 + $0xad0] sm:$0xff]  ;;  %v650_v41 = vld [vmem:[%s2683_s7 + $0xb88] sm:$0xff]  ;;  %v649_v48 = vld [vmem:[%s2683_s7 + $0xb80] sm:$0xff] }
  0xad   : > { %1710 = vmatpush1.bf16.msra.mxu0 %v1709_v52  ;;  %v594_v52 = vld [vmem:[%s2683_s7 + $0x9c8] sm:$0xff]  ;;  %v1869_v32 = vpack.c.bf16 %v627_v24, %v619_v22  ;;  %v635_v37 = vld [vmem:[%s2683_s7 + $0xb10] sm:$0xff]  ;;  %v665_v60 = vld [vmem:[%s2683_s7 + $0xc00] sm:$0xff] }
  0xae   : > { %1838 = vmatpush1.bf16.msra.mxu1 %v1837_v53  ;;  %1712 = vmatprep.subr.bf16.mxu0 %v1711_v54  ;;  %v588_v53 = vld [vmem:[%s2683_s7 + $0x998] sm:$0xff]  ;;  %v1731_v57 = vpack.c.bf16 %v594_v52, %v586_v51  ;;  %v643_v39 = vld [vmem:[%s2683_s7 + $0xb50] sm:$0xff]  ;;  %v658_v42 = vld [vmem:[%s2683_s7 + $0xbc8] sm:$0xff] }
  0xaf   : > { %1840 = vmatprep.subr.bf16.mxu1 %v1839_v58  ;;  %v596_v54 = vld [vmem:[%s2683_s7 + $0x9d8] sm:$0xff]  ;;  %v585_v58 = vld [vmem:[%s2683_s7 + $0x980] sm:$0xff]  ;;  %v1873_v46 = vpack.c.bf16 %v643_v39, %v635_v37  ;;  %v1747_v47 = vpack.c.bf16 %v658_v42, %v650_v41  ;;  %v651_v50 = vld [vmem:[%s2683_s7 + $0xb90] sm:$0xff] }
  0xb0   : > { %v1859_v61 = vpack.c.bf16 %v596_v54, %v588_v53  ;;  %v1733_v4 = vpack.c.bf16 %v593_v59, %v585_v58  ;;  %v659_v52 = vld [vmem:[%s2683_s7 + $0xbd0] sm:$0xff]  ;;  %v666_v53 = vld [vmem:[%s2683_s7 + $0xc08] sm:$0xff]  ;;  %v681_v9 = vld [vmem:[%s2683_s7 + $0xc80] sm:$0xff] }
  0xb1   : > { %1714 = vmatpush1.bf16.msra.mxu0 %v1713_v1  ;;  %v610_v1 = vld [vmem:[%s2683_s7 + $0xa48] sm:$0xff]  ;;  %v1877_v58 = vpack.c.bf16 %v659_v52, %v651_v50  ;;  %v667_v62 = vld [vmem:[%s2683_s7 + $0xc10] sm:$0xff]  ;;  %v697_v22 = vld [vmem:[%s2683_s7 + $0xd00] sm:$0xff] }
  0xb2   : > { %1842 = vmatpush1.bf16.msra.mxu1 %v1841_v2  ;;  %1716 = vmatprep.subr.bf16.mxu0 %v1715_v3  ;;  %v604_v2 = vld [vmem:[%s2683_s7 + $0xa18] sm:$0xff]  ;;  %v1735_v6 = vpack.c.bf16 %v610_v1, %v602_v0  ;;  %v674_v54 = vld [vmem:[%s2683_s7 + $0xc48] sm:$0xff]  ;;  %v675_v1 = vld [vmem:[%s2683_s7 + $0xc50] sm:$0xff] }
  0xb3   : > { %1844 = vmatprep.subr.bf16.mxu1 %v1843_v7  ;;  %v612_v3 = vld [vmem:[%s2683_s7 + $0xa58] sm:$0xff]  ;;  %v601_v7 = vld [vmem:[%s2683_s7 + $0xa00] sm:$0xff]  ;;  %v1751_v59 = vpack.c.bf16 %v674_v54, %v666_v53  ;;  %v683_v11 = vld [vmem:[%s2683_s7 + $0xc90] sm:$0xff] }
  0xb4   : > { %v1863_v10 = vpack.c.bf16 %v612_v3, %v604_v2  ;;  %v682_v2 = vld [vmem:[%s2683_s7 + $0xc88] sm:$0xff]  ;;  %v691_v14 = vld [vmem:[%s2683_s7 + $0xcd0] sm:$0xff]  ;;  %v713_v37 = vld [vmem:[%s2683_s7 + $0xd80] sm:$0xff] }
  0xb5   : > { %1718 = vmatpush1.bf16.msra.mxu0 %v1717_v15  ;;  %v620_v15 = vld [vmem:[%s2683_s7 + $0xa98] sm:$0xff]  ;;  %v690_v3 = vld [vmem:[%s2683_s7 + $0xcc8] sm:$0xff]  ;;  %v699_v24 = vld [vmem:[%s2683_s7 + $0xd10] sm:$0xff] }
  0xb6   : > { %1846 = vmatpush1.bf16.msra.mxu1 %v1845_v16  ;;  %1720 = vmatprep.subr.bf16.mxu0 %v1719_v17  ;;  %v628_v16 = vld [vmem:[%s2683_s7 + $0xad8] sm:$0xff]  ;;  %v1737_v17 = vpack.c.bf16 %v609_v8, %v601_v7  ;;  %v1881_v7 = vpack.c.bf16 %v675_v1, %v667_v62  ;;  %v1755_v8 = vpack.c.bf16 %v690_v3, %v682_v2  ;;  %v707_v28 = vld [vmem:[%s2683_s7 + $0xd50] sm:$0xff]  ;;  %v729_v50 = vld [vmem:[%s2683_s7 + $0xe00] sm:$0xff] }
  0xb7   : > { %1848 = vmatprep.subr.bf16.mxu1 %v1847_v21  ;;  %v625_v21 = vld [vmem:[%s2683_s7 + $0xac0] sm:$0xff]  ;;  %v1867_v23 = vpack.c.bf16 %v628_v16, %v620_v15  ;;  %v698_v15 = vld [vmem:[%s2683_s7 + $0xd08] sm:$0xff]  ;;  %v715_v39 = vld [vmem:[%s2683_s7 + $0xd90] sm:$0xff] }
  0xb8   : > { %880 = vmatmul.mubr.f32.vlgmr.msra.gmra.mrb[0].mxu0 %v2822_v26  ;;  %v706_v16 = vld [vmem:[%s2683_s7 + $0xd48] sm:$0xff]  ;;  %v723_v42 = vld [vmem:[%s2683_s7 + $0xdd0] sm:$0xff]  ;;  %v745_v62 = vld [vmem:[%s2683_s7 + $0xe80] sm:$0xff] }
  0xb9   : > { %1722 = vmatpush1.bf16.msra.mxu0 %v1721_v29  ;;  %1022 = vmatmul.mubr.f32.vlgmr.msra.gmra.mrb[0].mxu1 %v2822_v26  ;;  %v636_v29 = vld [vmem:[%s2683_s7 + $0xb18] sm:$0xff]  ;;  %v731_v52 = vld [vmem:[%s2683_s7 + $0xe10] sm:$0xff] }
  0xba   : > { %1850 = vmatpush1.bf16.msra.mxu1 %v1849_v30  ;;  %1724 = vmatprep.subr.bf16.mxu0 %v1723_v31  ;;  %v644_v30 = vld [vmem:[%s2683_s7 + $0xb58] sm:$0xff]  ;;  %v1741_v31 = vpack.c.bf16 %v625_v21, %v617_v20  ;;  %v1885_v20 = vpack.c.bf16 %v691_v14, %v683_v11  ;;  %v1759_v21 = vpack.c.bf16 %v706_v16, %v698_v15  ;;  %v739_v54 = vld [vmem:[%s2683_s7 + $0xe50] sm:$0xff]  ;;  %v761_v11 = vld [vmem:[%s2683_s7 + $0xf00] sm:$0xff] }
  0xbb   : > { %1852 = vmatprep.subr.bf16.mxu1 %v1851_v36  ;;  %950 = vmatprep.mubr.f32.mxu0 %v2883_v40  ;;  %v641_v36 = vld [vmem:[%s2683_s7 + $0xb40] sm:$0xff]  ;;  %v1871_v38 = vpack.c.bf16 %v644_v30, %v636_v29  ;;  %v714_v29 = vld [vmem:[%s2683_s7 + $0xd88] sm:$0xff]  ;;  %v747_v1 = vld [vmem:[%s2683_s7 + $0xe90] sm:$0xff] }
  0xbc   : > { %1092 = vmatprep.mubr.f32.mxu1 %v2883_v40  ;;  %v722_v30 = vld [vmem:[%s2683_s7 + $0xdc8] sm:$0xff]  ;;  %v755_v3 = vld [vmem:[%s2683_s7 + $0xed0] sm:$0xff] }
  0xbd   : > { %1726 = vmatpush1.bf16.msra.mxu0 %v1725_v43  ;;  %v652_v43 = vld [vmem:[%s2683_s7 + $0xb98] sm:$0xff]  ;;  %v763_v14 = vld [vmem:[%s2683_s7 + $0xf10] sm:$0xff] }
  0xbe   : > { %1854 = vmatpush1.bf16.msra.mxu1 %v1853_v44  ;;  %1728 = vmatprep.subr.bf16.mxu0 %v1727_v45  ;;  %v660_v44 = vld [vmem:[%s2683_s7 + $0xbd8] sm:$0xff]  ;;  %v1745_v45 = vpack.c.bf16 %v641_v36, %v633_v35  ;;  %v1889_v35 = vpack.c.bf16 %v707_v28, %v699_v24  ;;  %v1763_v36 = vpack.c.bf16 %v722_v30, %v714_v29  ;;  %v771_v16 = vld [vmem:[%s2683_s7 + $0xf50] sm:$0xff]  ;;  %v777_v24 = vld [vmem:[%s2683_s7 + $0xf80] sm:$0xff] }
  0xbf   : > { %1856 = vmatprep.subr.bf16.mxu1 %v1855_v49  ;;  %v657_v49 = vld [vmem:[%s2683_s7 + $0xbc0] sm:$0xff]  ;;  %v1875_v51 = vpack.c.bf16 %v660_v44, %v652_v43  ;;  %v730_v43 = vld [vmem:[%s2683_s7 + $0xe08] sm:$0xff]  ;;  %v779_v28 = vld [vmem:[%s2683_s7 + $0xf90] sm:$0xff] }
  0xc0   : > { %v738_v44 = vld [vmem:[%s2683_s7 + $0xe48] sm:$0xff]  ;;  %v787_v30 = vld [vmem:[%s2683_s7 + $0xfd0] sm:$0xff] }
  0xc1   : > { %1730 = vmatpush1.bf16.msra.mxu0 %v1729_v55  ;;  %v668_v55 = vld [vmem:[%s2683_s7 + $0xc18] sm:$0xff] }
  0xc2   : > { %1858 = vmatpush1.bf16.msra.mxu1 %v1857_v56  ;;  %1732 = vmatprep.subr.bf16.mxu0 %v1731_v57  ;;  %v676_v56 = vld [vmem:[%s2683_s7 + $0xc58] sm:$0xff]  ;;  %v1749_v57 = vpack.c.bf16 %v657_v49, %v649_v48  ;;  %v1893_v48 = vpack.c.bf16 %v723_v42, %v715_v39  ;;  %v1767_v49 = vpack.c.bf16 %v738_v44, %v730_v43  ;;  %v285_v39 = vld [vmem:[%s2683_s7 + $0x20] sm:$0xff]  ;;  %v287_v42 = vld [vmem:[%s2683_s7 + $0x30] sm:$0xff] }
  0xc3   : > { %1860 = vmatprep.subr.bf16.mxu1 %v1859_v61  ;;  %v673_v61 = vld [vmem:[%s2683_s7 + $0xc40] sm:$0xff]  ;;  %v1879_v0 = vpack.c.bf16 %v676_v56, %v668_v55  ;;  %v746_v55 = vld [vmem:[%s2683_s7 + $0xe88] sm:$0xff]  ;;  %v295_v44 = vld [vmem:[%s2683_s7 + $0x70] sm:$0xff] }
  0xc4   : > { %v754_v56 = vld [vmem:[%s2683_s7 + $0xec8] sm:$0xff] }
  0xc5   : > { %1734 = vmatpush1.bf16.msra.mxu0 %v1733_v4  ;;  %v684_v4 = vld [vmem:[%s2683_s7 + $0xc98] sm:$0xff] }
  0xc6   : > { %1862 = vmatpush1.bf16.msra.mxu1 %v1861_v5  ;;  %1736 = vmatprep.subr.bf16.mxu0 %v1735_v6  ;;  %v692_v5 = vld [vmem:[%s2683_s7 + $0xcd8] sm:$0xff]  ;;  %v1753_v6 = vpack.c.bf16 %v673_v61, %v665_v60  ;;  %v1897_v60 = vpack.c.bf16 %v739_v54, %v731_v52  ;;  %v1771_v61 = vpack.c.bf16 %v754_v56, %v746_v55  ;;  %v301_v52 = vld [vmem:[%s2683_s7 + $0xa0] sm:$0xff]  ;;  %v303_v54 = vld [vmem:[%s2683_s7 + $0xb0] sm:$0xff] }
  0xc7   : > { %1864 = vmatprep.subr.bf16.mxu1 %v1863_v10  ;;  %v689_v10 = vld [vmem:[%s2683_s7 + $0xcc0] sm:$0xff]  ;;  %v1883_v13 = vpack.c.bf16 %v692_v5, %v684_v4  ;;  %v762_v4 = vld [vmem:[%s2683_s7 + $0xf08] sm:$0xff]  ;;  %v311_v56 = vld [vmem:[%s2683_s7 + $0xf0] sm:$0xff] }
  0xc8   : > { %v770_v5 = vld [vmem:[%s2683_s7 + $0xf48] sm:$0xff] }
  0xc9   : > { %1738 = vmatpush1.bf16.msra.mxu0 %v1737_v17  ;;  %v700_v17 = vld [vmem:[%s2683_s7 + $0xd18] sm:$0xff] }
  0xca   : > { %1866 = vmatpush1.bf16.msra.mxu1 %v1865_v18  ;;  %1740 = vmatprep.subr.bf16.mxu0 %v1739_v19  ;;  %v708_v18 = vld [vmem:[%s2683_s7 + $0xd58] sm:$0xff]  ;;  %v1757_v19 = vpack.c.bf16 %v689_v10, %v681_v9  ;;  %v1901_v9 = vpack.c.bf16 %v755_v3, %v747_v1  ;;  %v1775_v10 = vpack.c.bf16 %v770_v5, %v762_v4  ;;  %v317_v1 = vld [vmem:[%s2683_s7 + $0x120] sm:$0xff]  ;;  %v319_v3 = vld [vmem:[%s2683_s7 + $0x130] sm:$0xff] }
  0xcb   : > { %1868 = vmatprep.subr.bf16.mxu1 %v1867_v23  ;;  %v705_v23 = vld [vmem:[%s2683_s7 + $0xd40] sm:$0xff]  ;;  %v1887_v27 = vpack.c.bf16 %v708_v18, %v700_v17  ;;  %v778_v17 = vld [vmem:[%s2683_s7 + $0xf88] sm:$0xff]  ;;  %v327_v5 = vld [vmem:[%s2683_s7 + $0x170] sm:$0xff] }
  0xcc   : > { %v786_v18 = vld [vmem:[%s2683_s7 + $0xfc8] sm:$0xff] }
  0xcd   : > { %1742 = vmatpush1.bf16.msra.mxu0 %v1741_v31  ;;  %v716_v31 = vld [vmem:[%s2683_s7 + $0xd98] sm:$0xff] }
  0xce   : > { %1870 = vmatpush1.bf16.msra.mxu1 %v1869_v32  ;;  %1744 = vmatprep.subr.bf16.mxu0 %v1743_v34  ;;  %v724_v32 = vld [vmem:[%s2683_s7 + $0xdd8] sm:$0xff]  ;;  %v1761_v34 = vpack.c.bf16 %v705_v23, %v697_v22  ;;  %v1905_v22 = vpack.c.bf16 %v771_v16, %v763_v14  ;;  %v1779_v23 = vpack.c.bf16 %v786_v18, %v778_v17  ;;  %v333_v14 = vld [vmem:[%s2683_s7 + $0x1a0] sm:$0xff]  ;;  %v335_v16 = vld [vmem:[%s2683_s7 + $0x1b0] sm:$0xff] }
  0xcf   : > { %1872 = vmatprep.subr.bf16.mxu1 %v1871_v38  ;;  %v721_v38 = vld [vmem:[%s2683_s7 + $0xdc0] sm:$0xff]  ;;  %v1891_v41 = vpack.c.bf16 %v724_v32, %v716_v31  ;;  %v286_v31 = vld [vmem:[%s2683_s7 + $0x28] sm:$0xff]  ;;  %v343_v18 = vld [vmem:[%s2683_s7 + $0x1f0] sm:$0xff] }
  0xd0   : > { %v294_v32 = vld [vmem:[%s2683_s7 + $0x68] sm:$0xff] }
  0xd1   : > { %1746 = vmatpush1.bf16.msra.mxu0 %v1745_v45  ;;  %v732_v45 = vld [vmem:[%s2683_s7 + $0xe18] sm:$0xff] }
  0xd2   : > { %1874 = vmatpush1.bf16.msra.mxu1 %v1873_v46  ;;  %1748 = vmatprep.subr.bf16.mxu0 %v1747_v47  ;;  %v740_v46 = vld [vmem:[%s2683_s7 + $0xe58] sm:$0xff]  ;;  %v1765_v47 = vpack.c.bf16 %v721_v38, %v713_v37  ;;  %v1909_v37 = vpack.c.bf16 %v787_v30, %v779_v28  ;;  %v1911_v38 = vpack.c.bf16 %v294_v32, %v286_v31  ;;  %v357_v28 = vld [vmem:[%s2683_s7 + $0x260] sm:$0xff]  ;;  %v359_v31 = vld [vmem:[%s2683_s7 + $0x270] sm:$0xff] }
  0xd3   : > { %1876 = vmatprep.subr.bf16.mxu1 %v1875_v51  ;;  %v737_v51 = vld [vmem:[%s2683_s7 + $0xe40] sm:$0xff]  ;;  %v1895_v53 = vpack.c.bf16 %v740_v46, %v732_v45  ;;  %v302_v45 = vld [vmem:[%s2683_s7 + $0xa8] sm:$0xff] }
  0xd4   : > { %v310_v46 = vld [vmem:[%s2683_s7 + $0xe8] sm:$0xff] }
  0xd5   : > { %1750 = vmatpush1.bf16.msra.mxu0 %v1749_v57  ;;  %v748_v57 = vld [vmem:[%s2683_s7 + $0xe98] sm:$0xff]  ;;  %v366_v32 = vld [vmem:[%s2683_s7 + $0x2a8] sm:$0xff] }
  0xd6   : > { %1878 = vmatpush1.bf16.msra.mxu1 %v1877_v58  ;;  %1752 = vmatprep.subr.bf16.mxu0 %v1751_v59  ;;  %v756_v58 = vld [vmem:[%s2683_s7 + $0xed8] sm:$0xff]  ;;  %v1769_v59 = vpack.c.bf16 %v737_v51, %v729_v50  ;;  %v2041_v50 = vpack.c.bf16 %v295_v44, %v287_v42  ;;  %v1915_v51 = vpack.c.bf16 %v310_v46, %v302_v45  ;;  %v373_v42 = vld [vmem:[%s2683_s7 + $0x2e0] sm:$0xff]  ;;  %v375_v45 = vld [vmem:[%s2683_s7 + $0x2f0] sm:$0xff] }
  0xd7   : > { %1880 = vmatprep.subr.bf16.mxu1 %v1879_v0  ;;  %v753_v0 = vld [vmem:[%s2683_s7 + $0xec0] sm:$0xff]  ;;  %v1899_v2 = vpack.c.bf16 %v756_v58, %v748_v57  ;;  %v318_v57 = vld [vmem:[%s2683_s7 + $0x128] sm:$0xff] }
  0xd8   : > { %v326_v58 = vld [vmem:[%s2683_s7 + $0x168] sm:$0xff] }
  0xd9   : > { %1754 = vmatpush1.bf16.msra.mxu0 %v1753_v6  ;;  %v764_v6 = vld [vmem:[%s2683_s7 + $0xf18] sm:$0xff]  ;;  %v382_v46 = vld [vmem:[%s2683_s7 + $0x328] sm:$0xff] }
  0xda   : > { %1882 = vmatpush1.bf16.msra.mxu1 %v1881_v7  ;;  %1756 = vmatprep.subr.bf16.mxu0 %v1755_v8  ;;  %v772_v7 = vld [vmem:[%s2683_s7 + $0xf58] sm:$0xff]  ;;  %v1773_v8 = vpack.c.bf16 %v753_v0, %v745_v62  ;;  %v2045_v62 = vpack.c.bf16 %v311_v56, %v303_v54  ;;  %v1919_v0 = vpack.c.bf16 %v326_v58, %v318_v57  ;;  %v389_v54 = vld [vmem:[%s2683_s7 + $0x360] sm:$0xff]  ;;  %v391_v57 = vld [vmem:[%s2683_s7 + $0x370] sm:$0xff] }
  0xdb   : > { %1884 = vmatprep.subr.bf16.mxu1 %v1883_v13  ;;  %v769_v13 = vld [vmem:[%s2683_s7 + $0xf40] sm:$0xff]  ;;  %v1903_v15 = vpack.c.bf16 %v772_v7, %v764_v6  ;;  %v334_v6 = vld [vmem:[%s2683_s7 + $0x1a8] sm:$0xff] }
  0xdc   : > { %v342_v7 = vld [vmem:[%s2683_s7 + $0x1e8] sm:$0xff] }
  0xdd   : > { %1758 = vmatpush1.bf16.msra.mxu0 %v1757_v19  ;;  %v780_v19 = vld [vmem:[%s2683_s7 + $0xf98] sm:$0xff]  ;;  %v398_v58 = vld [vmem:[%s2683_s7 + $0x3a8] sm:$0xff] }
  0xde   : > { %1886 = vmatpush1.bf16.msra.mxu1 %v1885_v20  ;;  %1760 = vmatprep.subr.bf16.mxu0 %v1759_v21  ;;  %v788_v20 = vld [vmem:[%s2683_s7 + $0xfd8] sm:$0xff]  ;;  %v1777_v21 = vpack.c.bf16 %v769_v13, %v761_v11  ;;  %v2049_v11 = vpack.c.bf16 %v327_v5, %v319_v3  ;;  %v1923_v13 = vpack.c.bf16 %v342_v7, %v334_v6  ;;  %v405_v3 = vld [vmem:[%s2683_s7 + $0x3e0] sm:$0xff]  ;;  %v407_v6 = vld [vmem:[%s2683_s7 + $0x3f0] sm:$0xff] }
  0xdf   : > { %1888 = vmatprep.subr.bf16.mxu1 %v1887_v27  ;;  %v785_v27 = vld [vmem:[%s2683_s7 + $0xfc0] sm:$0xff]  ;;  %v1907_v29 = vpack.c.bf16 %v788_v20, %v780_v19  ;;  %v350_v19 = vld [vmem:[%s2683_s7 + $0x228] sm:$0xff]  ;;  %v352_v20 = vld [vmem:[%s2683_s7 + $0x238] sm:$0xff] }
  0xe0   : > { %v414_v7 = vld [vmem:[%s2683_s7 + $0x428] sm:$0xff] }
  0xe1   : > { %1762 = vmatpush1.bf16.msra.mxu0 %v1761_v34  ;;  %v288_v34 = vld [vmem:[%s2683_s7 + $0x38] sm:$0xff] }
  0xe2   : > { %1890 = vmatpush1.bf16.msra.mxu1 %v1889_v35  ;;  %1764 = vmatprep.subr.bf16.mxu0 %v1763_v36  ;;  %v296_v35 = vld [vmem:[%s2683_s7 + $0x78] sm:$0xff]  ;;  %v1781_v36 = vpack.c.bf16 %v785_v27, %v777_v24  ;;  %v349_v27 = vld [vmem:[%s2683_s7 + $0x220] sm:$0xff] }
  0xe3   : > { %1892 = vmatprep.subr.bf16.mxu1 %v1891_v41  ;;  %v293_v41 = vld [vmem:[%s2683_s7 + $0x60] sm:$0xff]  ;;  %v2039_v43 = vpack.c.bf16 %v296_v35, %v288_v34  ;;  %v374_v34 = vld [vmem:[%s2683_s7 + $0x2e8] sm:$0xff]  ;;  %v368_v35 = vld [vmem:[%s2683_s7 + $0x2b8] sm:$0xff] }
  0xe5   : > { %1766 = vmatpush1.bf16.msra.mxu0 %v1765_v47  ;;  %v304_v47 = vld [vmem:[%s2683_s7 + $0xb8] sm:$0xff] }
  0xe6   : > { %1894 = vmatpush1.bf16.msra.mxu1 %v1893_v48  ;;  %1768 = vmatprep.subr.bf16.mxu0 %v1767_v49  ;;  %v312_v48 = vld [vmem:[%s2683_s7 + $0xf8] sm:$0xff]  ;;  %v1913_v49 = vpack.c.bf16 %v293_v41, %v285_v39  ;;  %v1931_v39 = vpack.c.bf16 %v374_v34, %v366_v32  ;;  %v365_v41 = vld [vmem:[%s2683_s7 + $0x2a0] sm:$0xff]  ;;  %v439_v32 = vld [vmem:[%s2683_s7 + $0x4f0] sm:$0xff] }
  0xe7   : > { %1896 = vmatprep.subr.bf16.mxu1 %v1895_v53  ;;  %v309_v53 = vld [vmem:[%s2683_s7 + $0xe0] sm:$0xff]  ;;  %v2043_v55 = vpack.c.bf16 %v312_v48, %v304_v47  ;;  %v390_v47 = vld [vmem:[%s2683_s7 + $0x368] sm:$0xff]  ;;  %v384_v48 = vld [vmem:[%s2683_s7 + $0x338] sm:$0xff] }
  0xe8   : > { %v446_v34 = vld [vmem:[%s2683_s7 + $0x528] sm:$0xff] }
  0xe9   : > { %1770 = vmatpush1.bf16.msra.mxu0 %v1769_v59  ;;  %v320_v59 = vld [vmem:[%s2683_s7 + $0x138] sm:$0xff] }
  0xea   : > { %1898 = vmatpush1.bf16.msra.mxu1 %v1897_v60  ;;  %1772 = vmatprep.subr.bf16.mxu0 %v1771_v61  ;;  %v328_v60 = vld [vmem:[%s2683_s7 + $0x178] sm:$0xff]  ;;  %v1917_v61 = vpack.c.bf16 %v309_v53, %v301_v52  ;;  %v1935_v52 = vpack.c.bf16 %v390_v47, %v382_v46  ;;  %v381_v53 = vld [vmem:[%s2683_s7 + $0x320] sm:$0xff]  ;;  %v455_v46 = vld [vmem:[%s2683_s7 + $0x570] sm:$0xff] }
  0xeb   : > { %1900 = vmatprep.subr.bf16.mxu1 %v1899_v2  ;;  %v325_v2 = vld [vmem:[%s2683_s7 + $0x160] sm:$0xff]  ;;  %v2047_v4 = vpack.c.bf16 %v328_v60, %v320_v59  ;;  %v406_v59 = vld [vmem:[%s2683_s7 + $0x3e8] sm:$0xff]  ;;  %v400_v60 = vld [vmem:[%s2683_s7 + $0x3b8] sm:$0xff] }
  0xec   : > { %v462_v47 = vld [vmem:[%s2683_s7 + $0x5a8] sm:$0xff] }
  0xed   : > { %1774 = vmatpush1.bf16.msra.mxu0 %v1773_v8  ;;  %v336_v8 = vld [vmem:[%s2683_s7 + $0x1b8] sm:$0xff] }
  0xee   : > { %1902 = vmatpush1.bf16.msra.mxu1 %v1901_v9  ;;  %1776 = vmatprep.subr.bf16.mxu0 %v1775_v10  ;;  %v344_v9 = vld [vmem:[%s2683_s7 + $0x1f8] sm:$0xff]  ;;  %v1921_v10 = vpack.c.bf16 %v325_v2, %v317_v1  ;;  %v1939_v1 = vpack.c.bf16 %v406_v59, %v398_v58  ;;  %v397_v2 = vld [vmem:[%s2683_s7 + $0x3a0] sm:$0xff]  ;;  %v471_v58 = vld [vmem:[%s2683_s7 + $0x5f0] sm:$0xff] }
  0xef   : > { %1904 = vmatprep.subr.bf16.mxu1 %v1903_v15  ;;  %v341_v15 = vld [vmem:[%s2683_s7 + $0x1e0] sm:$0xff]  ;;  %v2051_v17 = vpack.c.bf16 %v344_v9, %v336_v8  ;;  %v422_v8 = vld [vmem:[%s2683_s7 + $0x468] sm:$0xff]  ;;  %v416_v9 = vld [vmem:[%s2683_s7 + $0x438] sm:$0xff] }
  0xf0   : > { %v478_v59 = vld [vmem:[%s2683_s7 + $0x628] sm:$0xff] }
  0xf1   : > { %1778 = vmatpush1.bf16.msra.mxu0 %v1777_v21  ;;  %v360_v21 = vld [vmem:[%s2683_s7 + $0x278] sm:$0xff] }
  0xf2   : > { %1906 = vmatpush1.bf16.msra.mxu1 %v1905_v22  ;;  %1780 = vmatprep.subr.bf16.mxu0 %v1779_v23  ;;  %v1925_v22 = vpack.c.bf16 %v341_v15, %v333_v14  ;;  %v2053_v23 = vpack.c.bf16 %v343_v18, %v335_v16  ;;  %v2055_v30 = vpack.c.bf16 %v360_v21, %v352_v20  ;;  %v413_v15 = vld [vmem:[%s2683_s7 + $0x420] sm:$0xff]  ;;  %v438_v20 = vld [vmem:[%s2683_s7 + $0x4e8] sm:$0xff]  ;;  %v432_v21 = vld [vmem:[%s2683_s7 + $0x4b8] sm:$0xff] }
  0xf3   : > { %1908 = vmatprep.subr.bf16.mxu1 %v1907_v29  ;;  %v351_v29 = vld [vmem:[%s2683_s7 + $0x230] sm:$0xff]  ;;  %v1943_v14 = vpack.c.bf16 %v422_v8, %v414_v7  ;;  %v421_v16 = vld [vmem:[%s2683_s7 + $0x460] sm:$0xff]  ;;  %v494_v8 = vld [vmem:[%s2683_s7 + $0x6a8] sm:$0xff] }
  0xf4   : > { %v487_v7 = vld [vmem:[%s2683_s7 + $0x670] sm:$0xff] }
  0xf5   : > { %1782 = vmatpush1.bf16.msra.mxu0 %v1781_v36  ;;  %v376_v36 = vld [vmem:[%s2683_s7 + $0x2f8] sm:$0xff] }
  0xf6   : > { %1910 = vmatpush1.bf16.msra.mxu1 %v1909_v37  ;;  %1912 = vmatprep.subr.bf16.mxu0 %v1911_v38  ;;  %v1929_v37 = vpack.c.bf16 %v357_v28, %v349_v27  ;;  %v2057_v38 = vpack.c.bf16 %v359_v31, %v351_v29  ;;  %v2059_v44 = vpack.c.bf16 %v376_v36, %v368_v35  ;;  %v429_v28 = vld [vmem:[%s2683_s7 + $0x4a0] sm:$0xff]  ;;  %v454_v35 = vld [vmem:[%s2683_s7 + $0x568] sm:$0xff]  ;;  %v448_v36 = vld [vmem:[%s2683_s7 + $0x538] sm:$0xff] }
  0xf7   : > { %2040 = vmatprep.subr.bf16.mxu1 %v2039_v43  ;;  %v367_v43 = vld [vmem:[%s2683_s7 + $0x2b0] sm:$0xff]  ;;  %v437_v29 = vld [vmem:[%s2683_s7 + $0x4e0] sm:$0xff] }
  0xf8   : > { %951 = vmatmul.mubr.f32.vlgmr.msra.gmra.mrb[0].mxu0 %v2871_v25 }
  0xf9   : > { %1093 = vmatmul.mubr.f32.vlgmr.msra.gmra.mrb[0].mxu1 %v2871_v25  ;;  %1914 = vmatpush1.bf16.msra.mxu0 %v1913_v49  ;;  %v392_v49 = vld [vmem:[%s2683_s7 + $0x378] sm:$0xff] }
  0xfa   : > { %2042 = vmatpush1.bf16.msra.mxu1 %v2041_v50  ;;  %1916 = vmatprep.subr.bf16.mxu0 %v1915_v51  ;;  %v1933_v50 = vpack.c.bf16 %v373_v42, %v365_v41  ;;  %v2061_v51 = vpack.c.bf16 %v375_v45, %v367_v43  ;;  %v2063_v56 = vpack.c.bf16 %v392_v49, %v384_v48  ;;  %v445_v42 = vld [vmem:[%s2683_s7 + $0x520] sm:$0xff]  ;;  %v470_v48 = vld [vmem:[%s2683_s7 + $0x5e8] sm:$0xff]  ;;  %v464_v49 = vld [vmem:[%s2683_s7 + $0x5b8] sm:$0xff] }
  0xfb   : > { %2044 = vmatprep.subr.bf16.mxu1 %v2043_v55  ;;  %1163 = vmatprep.mubr.f32.mxu0 %v2829_v33  ;;  %v383_v55 = vld [vmem:[%s2683_s7 + $0x330] sm:$0xff]  ;;  %v1951_v41 = vpack.c.bf16 %v454_v35, %v446_v34  ;;  %v453_v43 = vld [vmem:[%s2683_s7 + $0x560] sm:$0xff]  ;;  %v526_v35 = vld [vmem:[%s2683_s7 + $0x7a8] sm:$0xff] }
  0xfc   : > { %1305 = vmatprep.mubr.f32.mxu1 %v2829_v33  ;;  %v358_v33 = vld [vmem:[%s2683_s7 + $0x268] sm:$0xff]  ;;  %v519_v34 = vld [vmem:[%s2683_s7 + $0x770] sm:$0xff] }
  0xfd   : > { %1918 = vmatpush1.bf16.msra.mxu0 %v1917_v61  ;;  %v1927_v24 = vpack.c.bf16 %v358_v33, %v350_v19  ;;  %v408_v61 = vld [vmem:[%s2683_s7 + $0x3f8] sm:$0xff]  ;;  %v423_v19 = vld [vmem:[%s2683_s7 + $0x470] sm:$0xff]  ;;  %v430_v33 = vld [vmem:[%s2683_s7 + $0x4a8] sm:$0xff] }
  0xfe   : > { %2046 = vmatpush1.bf16.msra.mxu1 %v2045_v62  ;;  %1920 = vmatprep.subr.bf16.mxu0 %v1919_v0  ;;  %v1937_v62 = vpack.c.bf16 %v389_v54, %v381_v53  ;;  %v2065_v0 = vpack.c.bf16 %v391_v57, %v383_v55  ;;  %v2067_v5 = vpack.c.bf16 %v408_v61, %v400_v60  ;;  %v461_v54 = vld [vmem:[%s2683_s7 + $0x5a0] sm:$0xff]  ;;  %v486_v60 = vld [vmem:[%s2683_s7 + $0x668] sm:$0xff]  ;;  %v480_v61 = vld [vmem:[%s2683_s7 + $0x638] sm:$0xff] }
  0xff   : > { %2048 = vmatprep.subr.bf16.mxu1 %v2047_v4  ;;  %v399_v4 = vld [vmem:[%s2683_s7 + $0x3b0] sm:$0xff]  ;;  %v1947_v27 = vpack.c.bf16 %v438_v20, %v430_v33  ;;  %v1955_v53 = vpack.c.bf16 %v470_v48, %v462_v47  ;;  %v469_v55 = vld [vmem:[%s2683_s7 + $0x5e0] sm:$0xff]  ;;  %v510_v20 = vld [vmem:[%s2683_s7 + $0x728] sm:$0xff] }
 0x100   : > { %v503_v33 = vld [vmem:[%s2683_s7 + $0x6f0] sm:$0xff]  ;;  %v542_v48 = vld [vmem:[%s2683_s7 + $0x828] sm:$0xff] }
 0x101   : > { %1922 = vmatpush1.bf16.msra.mxu0 %v1921_v10  ;;  %v424_v10 = vld [vmem:[%s2683_s7 + $0x478] sm:$0xff]  ;;  %v535_v47 = vld [vmem:[%s2683_s7 + $0x7f0] sm:$0xff] }
 0x102   : > { %2050 = vmatpush1.bf16.msra.mxu1 %v2049_v11  ;;  %1924 = vmatprep.subr.bf16.mxu0 %v1923_v13  ;;  %v1941_v11 = vpack.c.bf16 %v405_v3, %v397_v2  ;;  %v2069_v13 = vpack.c.bf16 %v407_v6, %v399_v4  ;;  %v2071_v18 = vpack.c.bf16 %v424_v10, %v416_v9  ;;  %v477_v3 = vld [vmem:[%s2683_s7 + $0x620] sm:$0xff]  ;;  %v502_v9 = vld [vmem:[%s2683_s7 + $0x6e8] sm:$0xff]  ;;  %v496_v10 = vld [vmem:[%s2683_s7 + $0x6b8] sm:$0xff] }
 0x103   : > { %2052 = vmatprep.subr.bf16.mxu1 %v2051_v17  ;;  %v415_v17 = vld [vmem:[%s2683_s7 + $0x430] sm:$0xff]  ;;  %v1959_v2 = vpack.c.bf16 %v486_v60, %v478_v59  ;;  %v485_v4 = vld [vmem:[%s2683_s7 + $0x660] sm:$0xff]  ;;  %v558_v60 = vld [vmem:[%s2683_s7 + $0x8a8] sm:$0xff] }
 0x104   : > { %v551_v59 = vld [vmem:[%s2683_s7 + $0x870] sm:$0xff] }
 0x105   : > { %1926 = vmatpush1.bf16.msra.mxu0 %v1925_v22  ;;  %v440_v22 = vld [vmem:[%s2683_s7 + $0x4f8] sm:$0xff] }
 0x106   : > { %2054 = vmatpush1.bf16.msra.mxu1 %v2053_v23  ;;  %1928 = vmatprep.subr.bf16.mxu0 %v1927_v24  ;;  %v1945_v23 = vpack.c.bf16 %v421_v16, %v413_v15  ;;  %v2073_v24 = vpack.c.bf16 %v423_v19, %v415_v17  ;;  %v2075_v31 = vpack.c.bf16 %v440_v22, %v432_v21  ;;  %v493_v16 = vld [vmem:[%s2683_s7 + $0x6a0] sm:$0xff]  ;;  %v518_v21 = vld [vmem:[%s2683_s7 + $0x768] sm:$0xff]  ;;  %v512_v22 = vld [vmem:[%s2683_s7 + $0x738] sm:$0xff] }
 0x107   : > { %2056 = vmatprep.subr.bf16.mxu1 %v2055_v30  ;;  %v431_v30 = vld [vmem:[%s2683_s7 + $0x4b0] sm:$0xff]  ;;  %v1963_v15 = vpack.c.bf16 %v502_v9, %v494_v8  ;;  %v501_v17 = vld [vmem:[%s2683_s7 + $0x6e0] sm:$0xff]  ;;  %v574_v9 = vld [vmem:[%s2683_s7 + $0x928] sm:$0xff] }
 0x108   : > { %v567_v8 = vld [vmem:[%s2683_s7 + $0x8f0] sm:$0xff] }
 0x109   : > { %1930 = vmatpush1.bf16.msra.mxu0 %v1929_v37  ;;  %v456_v37 = vld [vmem:[%s2683_s7 + $0x578] sm:$0xff] }
 0x10a   : > { %2058 = vmatpush1.bf16.msra.mxu1 %v2057_v38  ;;  %1932 = vmatprep.subr.bf16.mxu0 %v1931_v39  ;;  %v1949_v38 = vpack.c.bf16 %v437_v29, %v429_v28  ;;  %v2077_v39 = vpack.c.bf16 %v439_v32, %v431_v30  ;;  %v2079_v45 = vpack.c.bf16 %v456_v37, %v448_v36  ;;  %v509_v29 = vld [vmem:[%s2683_s7 + $0x720] sm:$0xff]  ;;  %v534_v36 = vld [vmem:[%s2683_s7 + $0x7e8] sm:$0xff]  ;;  %v528_v37 = vld [vmem:[%s2683_s7 + $0x7b8] sm:$0xff] }
 0x10b   : > { %2060 = vmatprep.subr.bf16.mxu1 %v2059_v44  ;;  %v447_v44 = vld [vmem:[%s2683_s7 + $0x530] sm:$0xff]  ;;  %v1967_v28 = vpack.c.bf16 %v518_v21, %v510_v20  ;;  %v517_v30 = vld [vmem:[%s2683_s7 + $0x760] sm:$0xff]  ;;  %v590_v21 = vld [vmem:[%s2683_s7 + $0x9a8] sm:$0xff] }
 0x10c   : > { %v583_v20 = vld [vmem:[%s2683_s7 + $0x970] sm:$0xff] }
 0x10d   : > { %1934 = vmatpush1.bf16.msra.mxu0 %v1933_v50  ;;  %v472_v50 = vld [vmem:[%s2683_s7 + $0x5f8] sm:$0xff] }
 0x10e   : > { %2062 = vmatpush1.bf16.msra.mxu1 %v2061_v51  ;;  %1936 = vmatprep.subr.bf16.mxu0 %v1935_v52  ;;  %v1953_v51 = vpack.c.bf16 %v453_v43, %v445_v42  ;;  %v2081_v52 = vpack.c.bf16 %v455_v46, %v447_v44  ;;  %v2083_v57 = vpack.c.bf16 %v472_v50, %v464_v49  ;;  %v525_v43 = vld [vmem:[%s2683_s7 + $0x7a0] sm:$0xff]  ;;  %v550_v49 = vld [vmem:[%s2683_s7 + $0x868] sm:$0xff]  ;;  %v544_v50 = vld [vmem:[%s2683_s7 + $0x838] sm:$0xff] }
 0x10f   : > { %2064 = vmatprep.subr.bf16.mxu1 %v2063_v56  ;;  %v463_v56 = vld [vmem:[%s2683_s7 + $0x5b0] sm:$0xff]  ;;  %v1971_v42 = vpack.c.bf16 %v534_v36, %v526_v35  ;;  %v533_v44 = vld [vmem:[%s2683_s7 + $0x7e0] sm:$0xff]  ;;  %v606_v35 = vld [vmem:[%s2683_s7 + $0xa28] sm:$0xff] }
 0x110   : > { %v608_v36 = vld [vmem:[%s2683_s7 + $0xa38] sm:$0xff] }
 0x111   : > { %1938 = vmatpush1.bf16.msra.mxu0 %v1937_v62  ;;  %v488_v62 = vld [vmem:[%s2683_s7 + $0x678] sm:$0xff] }
 0x112   : > { %2066 = vmatpush1.bf16.msra.mxu1 %v2065_v0  ;;  %1940 = vmatprep.subr.bf16.mxu0 %v1939_v1  ;;  %v1957_v0 = vpack.c.bf16 %v469_v55, %v461_v54  ;;  %v2085_v1 = vpack.c.bf16 %v471_v58, %v463_v56  ;;  %v2087_v6 = vpack.c.bf16 %v488_v62, %v480_v61  ;;  %v541_v55 = vld [vmem:[%s2683_s7 + $0x820] sm:$0xff]  ;;  %v566_v61 = vld [vmem:[%s2683_s7 + $0x8e8] sm:$0xff]  ;;  %v560_v62 = vld [vmem:[%s2683_s7 + $0x8b8] sm:$0xff] }
 0x113   : > { %2068 = vmatprep.subr.bf16.mxu1 %v2067_v5  ;;  %v479_v5 = vld [vmem:[%s2683_s7 + $0x630] sm:$0xff]  ;;  %v1975_v54 = vpack.c.bf16 %v550_v49, %v542_v48  ;;  %v549_v56 = vld [vmem:[%s2683_s7 + $0x860] sm:$0xff]  ;;  %v630_v48 = vld [vmem:[%s2683_s7 + $0xae8] sm:$0xff] }
 0x114   : > { %v624_v49 = vld [vmem:[%s2683_s7 + $0xab8] sm:$0xff] }
 0x115   : > { %1942 = vmatpush1.bf16.msra.mxu0 %v1941_v11  ;;  %v504_v11 = vld [vmem:[%s2683_s7 + $0x6f8] sm:$0xff] }
 0x116   : > { %2070 = vmatpush1.bf16.msra.mxu1 %v2069_v13  ;;  %1944 = vmatprep.subr.bf16.mxu0 %v1943_v14  ;;  %v1961_v13 = vpack.c.bf16 %v485_v4, %v477_v3  ;;  %v2089_v14 = vpack.c.bf16 %v487_v7, %v479_v5  ;;  %v2091_v19 = vpack.c.bf16 %v504_v11, %v496_v10  ;;  %v557_v4 = vld [vmem:[%s2683_s7 + $0x8a0] sm:$0xff]  ;;  %v582_v10 = vld [vmem:[%s2683_s7 + $0x968] sm:$0xff]  ;;  %v576_v11 = vld [vmem:[%s2683_s7 + $0x938] sm:$0xff] }
 0x117   : > { %2072 = vmatprep.subr.bf16.mxu1 %v2071_v18  ;;  %v495_v18 = vld [vmem:[%s2683_s7 + $0x6b0] sm:$0xff]  ;;  %v1979_v3 = vpack.c.bf16 %v566_v61, %v558_v60  ;;  %v565_v5 = vld [vmem:[%s2683_s7 + $0x8e0] sm:$0xff]  ;;  %v646_v60 = vld [vmem:[%s2683_s7 + $0xb68] sm:$0xff] }
 0x118   : > { %v640_v61 = vld [vmem:[%s2683_s7 + $0xb38] sm:$0xff] }
 0x119   : > { %1946 = vmatpush1.bf16.msra.mxu0 %v1945_v23  ;;  %v520_v23 = vld [vmem:[%s2683_s7 + $0x778] sm:$0xff] }
 0x11a   : > { %2074 = vmatpush1.bf16.msra.mxu1 %v2073_v24  ;;  %1948 = vmatprep.subr.bf16.mxu0 %v1947_v27  ;;  %v1965_v24 = vpack.c.bf16 %v501_v17, %v493_v16  ;;  %v2093_v27 = vpack.c.bf16 %v503_v33, %v495_v18  ;;  %v2095_v32 = vpack.c.bf16 %v520_v23, %v512_v22  ;;  %v573_v17 = vld [vmem:[%s2683_s7 + $0x920] sm:$0xff]  ;;  %v598_v22 = vld [vmem:[%s2683_s7 + $0x9e8] sm:$0xff]  ;;  %v600_v23 = vld [vmem:[%s2683_s7 + $0x9f8] sm:$0xff] }
 0x11b   : > { %2076 = vmatprep.subr.bf16.mxu1 %v2075_v31  ;;  %v511_v31 = vld [vmem:[%s2683_s7 + $0x730] sm:$0xff]  ;;  %v1983_v16 = vpack.c.bf16 %v582_v10, %v574_v9  ;;  %v581_v18 = vld [vmem:[%s2683_s7 + $0x960] sm:$0xff]  ;;  %v662_v9 = vld [vmem:[%s2683_s7 + $0xbe8] sm:$0xff] }
 0x11c   : > { %v656_v10 = vld [vmem:[%s2683_s7 + $0xbb8] sm:$0xff] }
 0x11d   : > { %1950 = vmatpush1.bf16.msra.mxu0 %v1949_v38  ;;  %v536_v38 = vld [vmem:[%s2683_s7 + $0x7f8] sm:$0xff] }
 0x11e   : > { %2078 = vmatpush1.bf16.msra.mxu1 %v2077_v39  ;;  %1952 = vmatprep.subr.bf16.mxu0 %v1951_v41  ;;  %v1969_v39 = vpack.c.bf16 %v517_v30, %v509_v29  ;;  %v2097_v41 = vpack.c.bf16 %v519_v34, %v511_v31  ;;  %v2099_v46 = vpack.c.bf16 %v536_v38, %v528_v37  ;;  %v589_v29 = vld [vmem:[%s2683_s7 + $0x9a0] sm:$0xff]  ;;  %v591_v31 = vld [vmem:[%s2683_s7 + $0x9b0] sm:$0xff]  ;;  %v616_v37 = vld [vmem:[%s2683_s7 + $0xa78] sm:$0xff] }
 0x11f   : > { %2080 = vmatprep.subr.bf16.mxu1 %v2079_v45  ;;  %v527_v45 = vld [vmem:[%s2683_s7 + $0x7b0] sm:$0xff]  ;;  %v597_v30 = vld [vmem:[%s2683_s7 + $0x9e0] sm:$0xff] }
 0x120   : > { %v599_v34 = vld [vmem:[%s2683_s7 + $0x9f0] sm:$0xff]  ;;  %v1989_v38 = vpack.c.bf16 %v597_v30, %v589_v29  ;;  %v677_v29 = vld [vmem:[%s2683_s7 + $0xc60] sm:$0xff] }
 0x121   : > { %1954 = vmatpush1.bf16.msra.mxu0 %v1953_v51  ;;  %v552_v51 = vld [vmem:[%s2683_s7 + $0x878] sm:$0xff]  ;;  %v671_v30 = vld [vmem:[%s2683_s7 + $0xc30] sm:$0xff] }
 0x122   : > { %2082 = vmatpush1.bf16.msra.mxu1 %v2081_v52  ;;  %1956 = vmatprep.subr.bf16.mxu0 %v1955_v53  ;;  %v1973_v52 = vpack.c.bf16 %v533_v44, %v525_v43  ;;  %v2101_v53 = vpack.c.bf16 %v535_v47, %v527_v45  ;;  %v2103_v58 = vpack.c.bf16 %v552_v51, %v544_v50  ;;  %v613_v43 = vld [vmem:[%s2683_s7 + $0xa60] sm:$0xff]  ;;  %v607_v44 = vld [vmem:[%s2683_s7 + $0xa30] sm:$0xff]  ;;  %v622_v47 = vld [vmem:[%s2683_s7 + $0xaa8] sm:$0xff] }
 0x123   : > { %2084 = vmatprep.subr.bf16.mxu1 %v2083_v57  ;;  %v543_v57 = vld [vmem:[%s2683_s7 + $0x830] sm:$0xff]  ;;  %v2119_v45 = vpack.c.bf16 %v616_v37, %v608_v36  ;;  %v632_v50 = vld [vmem:[%s2683_s7 + $0xaf8] sm:$0xff] }
 0x124   : > { %v696_v36 = vld [vmem:[%s2683_s7 + $0xcf8] sm:$0xff] }
 0x125   : > { %1958 = vmatpush1.bf16.msra.mxu0 %v1957_v0  ;;  %v568_v0 = vld [vmem:[%s2683_s7 + $0x8f8] sm:$0xff] }
 0x126   : > { %2086 = vmatpush1.bf16.msra.mxu1 %v2085_v1  ;;  %1960 = vmatprep.subr.bf16.mxu0 %v1959_v2  ;;  %v1977_v1 = vpack.c.bf16 %v549_v56, %v541_v55  ;;  %v2105_v2 = vpack.c.bf16 %v551_v59, %v543_v57  ;;  %v2107_v7 = vpack.c.bf16 %v568_v0, %v560_v62  ;;  %v629_v55 = vld [vmem:[%s2683_s7 + $0xae0] sm:$0xff]  ;;  %v623_v56 = vld [vmem:[%s2683_s7 + $0xab0] sm:$0xff]  ;;  %v638_v59 = vld [vmem:[%s2683_s7 + $0xb28] sm:$0xff] }
 0x127   : > { %2088 = vmatprep.subr.bf16.mxu1 %v2087_v6  ;;  %v559_v6 = vld [vmem:[%s2683_s7 + $0x8b0] sm:$0xff]  ;;  %v2123_v57 = vpack.c.bf16 %v632_v50, %v624_v49  ;;  %v648_v62 = vld [vmem:[%s2683_s7 + $0xb78] sm:$0xff] }
 0x128   : > { %v712_v49 = vld [vmem:[%s2683_s7 + $0xd78] sm:$0xff] }
 0x129   : > { %1962 = vmatpush1.bf16.msra.mxu0 %v1961_v13  ;;  %v584_v13 = vld [vmem:[%s2683_s7 + $0x978] sm:$0xff] }
 0x12a   : > { %2090 = vmatpush1.bf16.msra.mxu1 %v2089_v14  ;;  %1964 = vmatprep.subr.bf16.mxu0 %v1963_v15  ;;  %v1981_v14 = vpack.c.bf16 %v565_v5, %v557_v4  ;;  %v2109_v15 = vpack.c.bf16 %v567_v8, %v559_v6  ;;  %v2111_v33 = vpack.c.bf16 %v584_v13, %v576_v11  ;;  %v645_v4 = vld [vmem:[%s2683_s7 + $0xb60] sm:$0xff]  ;;  %v639_v5 = vld [vmem:[%s2683_s7 + $0xb30] sm:$0xff]  ;;  %v654_v8 = vld [vmem:[%s2683_s7 + $0xba8] sm:$0xff] }
 0x12b   : > { %2092 = vmatprep.subr.bf16.mxu1 %v2091_v19  ;;  %v575_v19 = vld [vmem:[%s2683_s7 + $0x930] sm:$0xff]  ;;  %v2127_v6 = vpack.c.bf16 %v648_v62, %v640_v61  ;;  %v664_v11 = vld [vmem:[%s2683_s7 + $0xbf8] sm:$0xff] }
 0x12c   : > { %v728_v61 = vld [vmem:[%s2683_s7 + $0xdf8] sm:$0xff] }
 0x12d   : > { %1966 = vmatpush1.bf16.msra.mxu0 %v1965_v24  ;;  %v1985_v24 = vpack.c.bf16 %v581_v18, %v573_v17  ;;  %v661_v17 = vld [vmem:[%s2683_s7 + $0xbe0] sm:$0xff]  ;;  %v655_v18 = vld [vmem:[%s2683_s7 + $0xbb0] sm:$0xff] }
 0x12e   : > { %2094 = vmatpush1.bf16.msra.mxu1 %v2093_v27  ;;  %1968 = vmatprep.subr.bf16.mxu0 %v1967_v28  ;;  %v2113_v27 = vpack.c.bf16 %v583_v20, %v575_v19  ;;  %v1987_v28 = vpack.c.bf16 %v598_v22, %v590_v21  ;;  %v2131_v19 = vpack.c.bf16 %v664_v11, %v656_v10  ;;  %v670_v20 = vld [vmem:[%s2683_s7 + $0xc28] sm:$0xff]  ;;  %v672_v22 = vld [vmem:[%s2683_s7 + $0xc38] sm:$0xff] }
 0x12f   : > { %2096 = vmatprep.subr.bf16.mxu1 %v2095_v32  ;;  %v678_v21 = vld [vmem:[%s2683_s7 + $0xc68] sm:$0xff]  ;;  %v744_v10 = vld [vmem:[%s2683_s7 + $0xe78] sm:$0xff] }
 0x131   : > { %1970 = vmatpush1.bf16.msra.mxu0 %v1969_v39  ;;  %v2117_v39 = vpack.c.bf16 %v599_v34, %v591_v31  ;;  %v686_v34 = vld [vmem:[%s2683_s7 + $0xca8] sm:$0xff] }
 0x132   : > { %2098 = vmatpush1.bf16.msra.mxu1 %v2097_v41  ;;  %1972 = vmatprep.subr.bf16.mxu0 %v1971_v42  ;;  %v605_v42 = vld [vmem:[%s2683_s7 + $0xa20] sm:$0xff] }
 0x133   : > { %2100 = vmatprep.subr.bf16.mxu1 %v2099_v46  ;;  %v615_v46 = vld [vmem:[%s2683_s7 + $0xa70] sm:$0xff]  ;;  %v1993_v51 = vpack.c.bf16 %v613_v43, %v605_v42  ;;  %v693_v42 = vld [vmem:[%s2683_s7 + $0xce0] sm:$0xff] }
 0x134   : > { %v687_v43 = vld [vmem:[%s2683_s7 + $0xcb0] sm:$0xff] }
 0x135   : > { %1974 = vmatpush1.bf16.msra.mxu0 %v1973_v52  ;;  %v2121_v52 = vpack.c.bf16 %v615_v46, %v607_v44  ;;  %v702_v46 = vld [vmem:[%s2683_s7 + $0xd28] sm:$0xff] }
 0x136   : > { %2102 = vmatpush1.bf16.msra.mxu1 %v2101_v53  ;;  %1976 = vmatprep.subr.bf16.mxu0 %v1975_v54  ;;  %v1995_v53 = vpack.c.bf16 %v630_v48, %v622_v47  ;;  %v621_v54 = vld [vmem:[%s2683_s7 + $0xaa0] sm:$0xff]  ;;  %v710_v47 = vld [vmem:[%s2683_s7 + $0xd68] sm:$0xff]  ;;  %v704_v48 = vld [vmem:[%s2683_s7 + $0xd38] sm:$0xff] }
 0x137   : > { %2104 = vmatprep.subr.bf16.mxu1 %v2103_v58  ;;  %v631_v58 = vld [vmem:[%s2683_s7 + $0xaf0] sm:$0xff]  ;;  %v1997_v0 = vpack.c.bf16 %v629_v55, %v621_v54  ;;  %v709_v54 = vld [vmem:[%s2683_s7 + $0xd60] sm:$0xff] }
 0x138   : > { %1164 = vmatmul.mubr.f32.vlgmr.msra.gmra.mrb[2].mxu0 %v2822_v26  ;;  %v703_v55 = vld [vmem:[%s2683_s7 + $0xd30] sm:$0xff] }
 0x139   : > { %1978 = vmatpush1.bf16.msra.mxu0 %v1977_v1  ;;  %1306 = vmatmul.mubr.f32.vlgmr.msra.gmra.mrb[2].mxu1 %v2822_v26  ;;  %v592_v26 = vld [vmem:[%s2683_s7 + $0x9b8] sm:$0xff]  ;;  %v2125_v1 = vpack.c.bf16 %v631_v58, %v623_v56  ;;  %v2143_v56 = vpack.c.bf16 %v712_v49, %v704_v48  ;;  %v718_v58 = vld [vmem:[%s2683_s7 + $0xda8] sm:$0xff] }
 0x13a   : > { %2106 = vmatpush1.bf16.msra.mxu1 %v2105_v2  ;;  %1980 = vmatprep.subr.bf16.mxu0 %v1979_v3  ;;  %v2115_v32 = vpack.c.bf16 %v600_v23, %v592_v26  ;;  %v1999_v2 = vpack.c.bf16 %v646_v60, %v638_v59  ;;  %v637_v3 = vld [vmem:[%s2683_s7 + $0xb20] sm:$0xff]  ;;  %v680_v26 = vld [vmem:[%s2683_s7 + $0xc78] sm:$0xff]  ;;  %v726_v59 = vld [vmem:[%s2683_s7 + $0xde8] sm:$0xff] }
 0x13b   : > { %2108 = vmatprep.subr.bf16.mxu1 %v2107_v7  ;;  %1234 = vmatprep.mubr.f32.mxu0 %v2883_v40  ;;  %v647_v7 = vld [vmem:[%s2683_s7 + $0xb70] sm:$0xff]  ;;  %v2001_v13 = vpack.c.bf16 %v645_v4, %v637_v3  ;;  %v2135_v31 = vpack.c.bf16 %v680_v26, %v672_v22  ;;  %v720_v60 = vld [vmem:[%s2683_s7 + $0xdb8] sm:$0xff]  ;;  %v725_v3 = vld [vmem:[%s2683_s7 + $0xde0] sm:$0xff] }
 0x13c   : > { %1376 = vmatprep.mubr.f32.mxu1 %v2883_v40  ;;  %v614_v40 = vld [vmem:[%s2683_s7 + $0xa68] sm:$0xff]  ;;  %v719_v4 = vld [vmem:[%s2683_s7 + $0xdb0] sm:$0xff]  ;;  %v760_v22 = vld [vmem:[%s2683_s7 + $0xef8] sm:$0xff] }
 0x13d   : > { %1982 = vmatpush1.bf16.msra.mxu0 %v1981_v14  ;;  %v1991_v41 = vpack.c.bf16 %v614_v40, %v606_v35  ;;  %v2129_v14 = vpack.c.bf16 %v647_v7, %v639_v5  ;;  %v694_v35 = vld [vmem:[%s2683_s7 + $0xce8] sm:$0xff]  ;;  %v688_v40 = vld [vmem:[%s2683_s7 + $0xcb8] sm:$0xff]  ;;  %v2147_v5 = vpack.c.bf16 %v728_v61, %v720_v60 }
 0x13e   : > { %2110 = vmatpush1.bf16.msra.mxu1 %v2109_v15  ;;  %1984 = vmatprep.subr.bf16.mxu0 %v1983_v16  ;;  %v2003_v15 = vpack.c.bf16 %v662_v9, %v654_v8  ;;  %v653_v16 = vld [vmem:[%s2683_s7 + $0xba0] sm:$0xff]  ;;  %v2139_v44 = vpack.c.bf16 %v696_v36, %v688_v40  ;;  %v734_v7 = vld [vmem:[%s2683_s7 + $0xe28] sm:$0xff]  ;;  %v736_v9 = vld [vmem:[%s2683_s7 + $0xe38] sm:$0xff] }
 0x13f   : > { %2112 = vmatprep.subr.bf16.mxu1 %v2111_v33  ;;  %v663_v33 = vld [vmem:[%s2683_s7 + $0xbf0] sm:$0xff]  ;;  %v2005_v23 = vpack.c.bf16 %v661_v17, %v653_v16  ;;  %v742_v8 = vld [vmem:[%s2683_s7 + $0xe68] sm:$0xff]  ;;  %v741_v16 = vld [vmem:[%s2683_s7 + $0xe60] sm:$0xff] }
 0x140   : > { %v735_v17 = vld [vmem:[%s2683_s7 + $0xe30] sm:$0xff]  ;;  %v776_v40 = vld [vmem:[%s2683_s7 + $0xf78] sm:$0xff] }
 0x141   : > { %1986 = vmatpush1.bf16.msra.mxu0 %v1985_v24  ;;  %v2133_v24 = vpack.c.bf16 %v663_v33, %v655_v18  ;;  %v2151_v18 = vpack.c.bf16 %v744_v10, %v736_v9  ;;  %v750_v33 = vld [vmem:[%s2683_s7 + $0xea8] sm:$0xff]  ;;  %v792_v48 = vld [vmem:[%s2683_s7 + $0xff8] sm:$0xff] }
 0x142   : > { %2114 = vmatpush1.bf16.msra.mxu1 %v2113_v27  ;;  %1988 = vmatprep.subr.bf16.mxu0 %v1987_v28  ;;  %v2007_v27 = vpack.c.bf16 %v678_v21, %v670_v20  ;;  %v669_v28 = vld [vmem:[%s2683_s7 + $0xc20] sm:$0xff]  ;;  %v758_v20 = vld [vmem:[%s2683_s7 + $0xee8] sm:$0xff]  ;;  %v752_v21 = vld [vmem:[%s2683_s7 + $0xeb8] sm:$0xff] }
 0x143   : > { %2116 = vmatprep.subr.bf16.mxu1 %v2115_v32  ;;  %v679_v32 = vld [vmem:[%s2683_s7 + $0xc70] sm:$0xff]  ;;  %v2009_v37 = vpack.c.bf16 %v677_v29, %v669_v28  ;;  %v757_v28 = vld [vmem:[%s2683_s7 + $0xee0] sm:$0xff] }
 0x144   : > { %v751_v29 = vld [vmem:[%s2683_s7 + $0xeb0] sm:$0xff] }
 0x145   : > { %1990 = vmatpush1.bf16.msra.mxu0 %v1989_v38  ;;  %v2137_v38 = vpack.c.bf16 %v679_v32, %v671_v30  ;;  %v2155_v30 = vpack.c.bf16 %v760_v22, %v752_v21  ;;  %v766_v32 = vld [vmem:[%s2683_s7 + $0xf28] sm:$0xff]  ;;  %v1453_v21 = vsub.s32 (!%p1650_p3), 3, %v2796_v63  ;;  %v1457_v22 = vsub.s32 (!%p1650_p3), 4, %v2796_v63 }
 0x146   : > { %2118 = vmatpush1.bf16.msra.mxu1 %v2117_v39  ;;  %1992 = vmatprep.subr.bf16.mxu0 %v1991_v41  ;;  %v2011_v39 = vpack.c.bf16 %v694_v35, %v686_v34  ;;  %v685_v41 = vld [vmem:[%s2683_s7 + $0xca0] sm:$0xff]  ;;  %v774_v34 = vld [vmem:[%s2683_s7 + $0xf68] sm:$0xff]  ;;  %v768_v35 = vld [vmem:[%s2683_s7 + $0xf38] sm:$0xff] }
 0x147   : > { %2120 = vmatprep.subr.bf16.mxu1 %v2119_v45  ;;  %v695_v45 = vld [vmem:[%s2683_s7 + $0xcf0] sm:$0xff]  ;;  %v2013_v50 = vpack.c.bf16 %v693_v42, %v685_v41  ;;  %v773_v41 = vld [vmem:[%s2683_s7 + $0xf60] sm:$0xff] }
 0x148   : > { %v767_v42 = vld [vmem:[%s2683_s7 + $0xf30] sm:$0xff] }
 0x149   : > { %1994 = vmatpush1.bf16.msra.mxu0 %v1993_v51  ;;  %v2141_v51 = vpack.c.bf16 %v695_v45, %v687_v43  ;;  %v2159_v43 = vpack.c.bf16 %v776_v40, %v768_v35  ;;  %v782_v45 = vld [vmem:[%s2683_s7 + $0xfa8] sm:$0xff] }
 0x14a   : > { %2122 = vmatpush1.bf16.msra.mxu1 %v2121_v52  ;;  %1996 = vmatprep.subr.bf16.mxu0 %v1995_v53  ;;  %v2015_v52 = vpack.c.bf16 %v710_v47, %v702_v46  ;;  %v701_v53 = vld [vmem:[%s2683_s7 + $0xd20] sm:$0xff]  ;;  %v790_v46 = vld [vmem:[%s2683_s7 + $0xfe8] sm:$0xff]  ;;  %v784_v47 = vld [vmem:[%s2683_s7 + $0xfb8] sm:$0xff] }
 0x14b   : > { %2124 = vmatprep.subr.bf16.mxu1 %v2123_v57  ;;  %v711_v57 = vld [vmem:[%s2683_s7 + $0xd70] sm:$0xff]  ;;  %v2017_v62 = vpack.c.bf16 %v709_v54, %v701_v53  ;;  %v789_v53 = vld [vmem:[%s2683_s7 + $0xfe0] sm:$0xff]  ;;  %v2163_v54 = vpack.c.bf16 %v792_v48, %v784_v47 }
 0x14d   : > { %1998 = vmatpush1.bf16.msra.mxu0 %v1997_v0  ;;  %v2145_v0 = vpack.c.bf16 %v711_v57, %v703_v55  ;;  %v783_v55 = vld [vmem:[%s2683_s7 + $0xfb0] sm:$0xff] }
 0x14e   : > { %2126 = vmatpush1.bf16.msra.mxu1 %v2125_v1  ;;  %2000 = vmatprep.subr.bf16.mxu0 %v1999_v2  ;;  %v2019_v1 = vpack.c.bf16 %v726_v59, %v718_v58  ;;  %v717_v2 = vld [vmem:[%s2683_s7 + $0xda0] sm:$0xff] }
 0x14f   : > { %2128 = vmatprep.subr.bf16.mxu1 %v2127_v6  ;;  %v727_v6 = vld [vmem:[%s2683_s7 + $0xdf0] sm:$0xff]  ;;  %v2021_v11 = vpack.c.bf16 %v725_v3, %v717_v2 }
 0x151   : > { %2002 = vmatpush1.bf16.msra.mxu0 %v2001_v13  ;;  %v2149_v13 = vpack.c.bf16 %v727_v6, %v719_v4  ;;  %v278_v4 = vld [vmem:[%s2707_s4] sm:$0xff] }
 0x152   : > { %2130 = vmatpush1.bf16.msra.mxu1 %v2129_v14  ;;  %2004 = vmatprep.subr.bf16.mxu0 %v2003_v15  ;;  %v2023_v14 = vpack.c.bf16 %v742_v8, %v734_v7  ;;  %v733_v15 = vld [vmem:[%s2683_s7 + $0xe20] sm:$0xff] }
 0x153   : > { %2132 = vmatprep.subr.bf16.mxu1 %v2131_v19  ;;  %v743_v19 = vld [vmem:[%s2683_s7 + $0xe70] sm:$0xff]  ;;  %v2025_v26 = vpack.c.bf16 %v741_v16, %v733_v15  ;;  %v279_v15 = vld [vmem:[%s2707_s4 + $0x8] sm:$0xff] }
 0x155   : > { %2006 = vmatpush1.bf16.msra.mxu0 %v2005_v23  ;;  %v2153_v23 = vpack.c.bf16 %v743_v19, %v735_v17  ;;  %v1441_v19 = vsub.s32 (!%p1650_p3), 0, %v2796_v63 }
 0x156   : > { %2134 = vmatpush1.bf16.msra.mxu1 %v2133_v24  ;;  %2008 = vmatprep.subr.bf16.mxu0 %v2007_v27  ;;  %v2027_v24 = vpack.c.bf16 %v758_v20, %v750_v33  ;;  %v749_v27 = vld [vmem:[%s2683_s7 + $0xea0] sm:$0xff]  ;;  %v1445_v33 = vsub.s32 (!%p1650_p3), 1, %v2796_v63  ;;  %v1449_v20 = vsub.s32 (!%p1650_p3), 2, %v2796_v63 }
 0x157   : > { %2136 = vmatprep.subr.bf16.mxu1 %v2135_v31  ;;  %v759_v31 = vld [vmem:[%s2683_s7 + $0xef0] sm:$0xff]  ;;  %v2029_v36 = vpack.c.bf16 %v757_v28, %v749_v27 }
 0x159   : > { %2010 = vmatpush1.bf16.msra.mxu0 %v2009_v37  ;;  %v2157_v37 = vpack.c.bf16 %v759_v31, %v751_v29 }
 0x15a   : > { %2138 = vmatpush1.bf16.msra.mxu1 %v2137_v38  ;;  %2012 = vmatprep.subr.bf16.mxu0 %v2011_v39  ;;  %v2031_v38 = vpack.c.bf16 %v774_v34, %v766_v32  ;;  %v765_v39 = vld [vmem:[%s2683_s7 + $0xf20] sm:$0xff] }
 0x15b   : > { %2140 = vmatprep.subr.bf16.mxu1 %v2139_v44  ;;  %v775_v44 = vld [vmem:[%s2683_s7 + $0xf70] sm:$0xff]  ;;  %v2033_v49 = vpack.c.bf16 %v773_v41, %v765_v39 }
 0x15d   : > { %2014 = vmatpush1.bf16.msra.mxu0 %v2013_v50  ;;  %v2161_v50 = vpack.c.bf16 %v775_v44, %v767_v42 }
 0x15e   : > { %2142 = vmatpush1.bf16.msra.mxu1 %v2141_v51  ;;  %2016 = vmatprep.subr.bf16.mxu0 %v2015_v52  ;;  %v2035_v51 = vpack.c.bf16 %v790_v46, %v782_v45  ;;  %v781_v52 = vld [vmem:[%s2683_s7 + $0xfa0] sm:$0xff] }
 0x15f   : > { %2144 = vmatprep.subr.bf16.mxu1 %v2143_v56  ;;  %v791_v56 = vld [vmem:[%s2683_s7 + $0xff0] sm:$0xff]  ;;  %v2037_v57 = vpack.c.bf16 %v789_v53, %v781_v52 }
 0x160   : > { %v2165_v58 = vpack.c.bf16 %v791_v56, %v783_v55 }
 0x161   : > { %2018 = vmatpush1.bf16.msra.mxu0 %v2017_v62 }
 0x162   : > { %2146 = vmatpush1.bf16.msra.mxu1 %v2145_v0  ;;  %2020 = vmatprep.subr.bf16.mxu0 %v2019_v1 }
 0x163   : > { %2148 = vmatprep.subr.bf16.mxu1 %v2147_v5 }
 0x165   : > { %2022 = vmatpush1.bf16.msra.mxu0 %v2021_v11 }
 0x166   : > { %2150 = vmatpush1.bf16.msra.mxu1 %v2149_v13  ;;  %2024 = vmatprep.subr.bf16.mxu0 %v2023_v14 }
 0x167   : > { %2152 = vmatprep.subr.bf16.mxu1 %v2151_v18  ;;  %v1437_v18 = vld [vmem:[%s224_s10] sm:$0xff] (!%p1650_p3) }
 0x168   : > { %v1442_v27 = vrot.slane (!%p1650_p3), %v1437_v18, %v1441_v19  ;;  %v1446_v28 = vrot.slane (!%p1650_p3), %v1437_v18, %v1445_v33  ;;  %v1450_v29 = vrot.slane (!%p1650_p3), %v1437_v18, %v1449_v20  ;;  %v1458_v31 = vrot.slane (!%p1650_p3), %v1437_v18, %v1457_v22 }
 0x169   : > { %2026 = vmatpush1.bf16.msra.mxu0 %v2025_v26  ;;  %v1461_v26 = vsub.s32 (!%p1650_p3), 5, %v2796_v63 }
 0x16a   : > { %2154 = vmatpush1.bf16.msra.mxu1 %v2153_v23  ;;  %2028 = vmatprep.subr.bf16.mxu0 %v2027_v24  ;;  %v1465_v23 = vsub.s32 (!%p1650_p3), 6, %v2796_v63  ;;  %v1469_v24 = vsub.s32 (!%p1650_p3), 7, %v2796_v63  ;;  %v1471_v40 = vcombine.low (!%p1650_p3), %v1442_v27, %v1446_v28 }
 0x16b   : > { %2156 = vmatprep.subr.bf16.mxu1 %v2155_v30  ;;  %v1454_v30 = vrot.slane (!%p1650_p3), %v1437_v18, %v1453_v21  ;;  %v1462_v32 = vrot.slane (!%p1650_p3), %v1437_v18, %v1461_v26 }
 0x16c   : > { %v1466_v34 = vrot.slane (!%p1650_p3), %v1437_v18, %v1465_v23  ;;  %v1470_v35 = vrot.slane (!%p1650_p3), %v1437_v18, %v1469_v24  ;;  %v1479_v39 = vrot.slane (!%p1650_p3), %v1471_v40, %v2807_v12 }
 0x16d   : > { %2030 = vmatpush1.bf16.msra.mxu0 %v2029_v36  ;;  %v1472_v36 = vcombine.low (!%p1650_p3), %v1450_v29, %v1454_v30 }
 0x16e   : > { %2158 = vmatpush1.bf16.msra.mxu1 %v2157_v37  ;;  %2032 = vmatprep.subr.bf16.mxu0 %v2031_v38  ;;  %v1488_v37 = vcombine.low (!%p1650_p3), %v1458_v31, %v1462_v32  ;;  %v1489_v38 = vcombine.low (!%p1650_p3), %v1466_v34, %v1470_v35 }
 0x16f   : > { %2160 = vmatprep.subr.bf16.mxu1 %v2159_v43  ;;  %v1486_v41 = vrot.slane (!%p1650_p3), %v1472_v36, %v2807_v12 }
 0x170   : > { %v1496_v42 = vrot.slane (!%p1650_p3), %v1488_v37, %v2807_v12  ;;  %v1503_v43 = vrot.slane (!%p1650_p3), %v1489_v38, %v2807_v12 }
 0x171   : > { %2034 = vmatpush1.bf16.msra.mxu0 %v2033_v49  ;;  %v1487_v44 = vcombine.low (!%p1650_p3), %v1479_v39, %v1486_v41 }
 0x172   : > { %2162 = vmatpush1.bf16.msra.mxu1 %v2161_v50  ;;  %2036 = vmatprep.subr.bf16.mxu0 %v2035_v51  ;;  %v1504_v46 = vcombine.low (!%p1650_p3), %v1496_v42, %v1503_v43 }
 0x173   : > { %2164 = vmatprep.subr.bf16.mxu1 %v2163_v54 }
 0x175   : > { %2038 = vmatpush1.bf16.msra.mxu0 %v2037_v57 }
 0x176   : > { %2166 = vmatpush1.bf16.msra.mxu1 %v2165_v58 }
 0x178   : > { %1235 = vmatmul.mubr.f32.vlgmr.msra.gmra.mrb[2].mxu0 %v2871_v25 }
 0x179   : > { %1377 = vmatmul.mubr.f32.vlgmr.msra.gmra.mrb[2].mxu1 %v2871_v25 }
 0x1cb   : > { %v952_v59 = vpop.f32.mrb[0].mxu0 }
 0x1cc   : > { %v1094_v60 = vpop.f32.mrb[0].mxu1  ;;  %v954_v61 = vpop.f32.mrb[1].mxu0 }
 0x1cd   : > { %v1391_v62 = vcombine.low %v952_v59, %v954_v61  ;;  %v1096_v0 = vpop.f32.mrb[1].mxu1 }
 0x1ce   : > { %v1392_v1 = vcombine.low %v1094_v60, %v1096_v0 }
 0x1cf   : > { %v1399_v2 = vrot.slane %v1391_v62, %v2807_v12 }
 0x1d0   : > { %v1406_v3 = vrot.slane %v1392_v1, %v2807_v12 }
 0x1d2   : > { %v1407_v5 = vcombine.low %v1399_v2, %v1406_v3 }
 0x1d4   : > { %v1427_v6 = vadd.f32 %v1407_v5, %v278_v4 }
 0x1d6   : > { %1429 = vst [vmem:[%s2707_s4] sm:$0xff] %v1427_v6 }
 0x1dd   : > { %v1435_v63 = vld [vmem:[%s2707_s4] sm:$0xff] (!%p1650_p3) }
 0x1de   : > { %v1507_v47 = vadd.f32 (!%p1650_p3), %v1487_v44, %v1435_v63 }
 0x1e0   : > { %v1509_v49 = vmax.f32 (!%p1650_p3), %v1507_v47, 0.0 }
 0x1e2   : > { %1511 = vst [vmem:[%s2707_s4] sm:$0xff] (!%p1650_p3), %v1509_v49 }
 0x24b   : > { %v1236_v7 = vpop.f32.mrb[2].mxu0 }
 0x24c   : > { %v1378_v8 = vpop.f32.mrb[2].mxu1  ;;  %v1238_v9 = vpop.f32.mrb[3].mxu0 }
 0x24d   : > { %v1408_v25 = vcombine.low %v1236_v7, %v1238_v9  ;;  %v1380_v10 = vpop.f32.mrb[3].mxu1 }
 0x24e   : > { %v1409_v11 = vcombine.low %v1378_v8, %v1380_v10 }
 0x24f   : > { %v1416_v13 = vrot.slane %v1408_v25, %v2807_v12 }
 0x250   : > { %v1423_v14 = vrot.slane %v1409_v11, %v2807_v12  ;;  %1434 = sbr.rel (%p1650_p3) target bundleno = 611 (0x263), region = 48 }
 0x252   : > { %v1424_v16 = vcombine.low %v1416_v13, %v1423_v14 }
 0x254   : > { %v1428_v17 = vadd.f32 %v1424_v16, %v279_v15 }
 0x256   : > { %1430 = vst [vmem:[%s2707_s4 + $0x8] sm:$0xff] %v1428_v17 }
 0x25d   : > { %v1436_v45 = vld [vmem:[%s2707_s4 + $0x8] sm:$0xff] }
 0x25e   : > { %v1508_v48 = vadd.f32 %v1504_v46, %v1436_v45 }
 0x260   : > { %v1510_v50 = vmax.f32 %v1508_v48, 0.0 }
 0x262   : > { %1512 = vst [vmem:[%s2707_s4 + $0x8] sm:$0xff] %v1510_v50 }
 0x263 PF: > { %s19_s22 = sadd.s32 1, %s2435_s22   ;;  %s3350_s7 = sld [smem:[#allocation8_spill]] }
 0x264   : > { %p16_p11 = scmp.ge.s32.totalorder %s19_s22, 10   ;;  %s3351_s12 = smov %s2399_s13 }
 0x265   : > { %s3352_s13 = smov %s2403_s14  ;;  %s3353_s14 = smov %s2632_s29 }
 0x266   : > { %s3354_s15 = smov %s2411_s16  ;;  %s3355_s16 = smov %s2415_s17 }
 0x267   : > { %s3356_s17 = smov %s2637_s6  ;;  %s3357_s18 = smov %s2427_s20 }
 0x268   : > { %s3358_s19 = smov %s2431_s21  ;;  %s3359_s20 = smov %s3362_s23 }
 0x269   : > { %s3360_s21 = smov %s3350_s7  ;;  %18 = sbr.rel (!%p16_p11) target bundleno = 11 (0xb), region = 96 }
 0x270   :  { %1535 = vsyncpa [#allocation3], 1 }
 0x271   :  { %1537 = vsyncpa [#allocation3 + $0x1], 1 }
 0x272   :  { %1538 = vsyncpa [#allocation5], 1 }
 0x273   :  { %1540 = vsyncpa [#allocation5 + $0x1], 1 }

// kernel: fc5_mnist_forward.6
= control target key start
LH: loop header
LB: loop body
LE: loop exit
PB: predicated region body
PF: predicated region fallthrough
CT: control target
= control target key end

     0   :  { %s3291_s12 = smov 0   ;;  %s3293_s13 = smov 0   ;;  %s5010_s0 = inlined_call_operand.vmem [shape: f32[2,2048], index: 0, kind: input, shape index: {}]   ;;  %s5011_s1 = inlined_call_operand.vmem [shape: f32[2048,2048], index: 1, kind: input, shape index: {}]   ;;  %s5012_s2 = inlined_call_operand.vmem [shape: f32[1,2048], index: 2, kind: input, shape index: {}]   ;;  %s5013_s3 = inlined_call_operand.vmem [shape: f32[2,2048], index: 3, kind: output, shape index: {}]  }
   0x1   :  { %s3295_s14 = smov 0   ;;  %s3297_s15 = smov 0  }
   0x2   :  { %s3299_s16 = smov 0   ;;  %s3301_s17 = smov 0  }
   0x3   :  { %s3303_s18 = smov 0  }
   0x4 LB: > { %s22_s19 = sadd.s32 1, %s3259_s16  ;;  %s25_s20 = sadd.s32 1, %s3263_s17  ;;  %s3267_s18 = sphi %s3303_s18, %s13_s18   ;;  %s3263_s17 = sphi %s3301_s17, %s5019_s17   ;;  %s3259_s16 = sphi %s3299_s16, %s5018_s16   ;;  %s3255_s15 = sphi %s3297_s15, %s5017_s15   ;;  %s3251_s14 = sphi %s3295_s14, %s5016_s14   ;;  %s3247_s13 = sphi %s3293_s13, %s5015_s13   ;;  %s3243_s12 = sphi %s3291_s12, %s5014_s12  }
   0x5   : > { %p23_p0 = scmp.ge.s32.totalorder %s22_s19, 4  ;;  %p67_p1 = scmp.ne.s32.totalorder %s3247_s13, %s3243_s12 }
   0x6   : > { %p68_p2 = scmp.eq.s32.totalorder %s3267_s18, 0  ;;  %s60_s24 = sadd.s32 1, %s3247_s13 }
   0x7   : > { %s5021_s19 = smov (%p23_p0, %s22_s19), 0  ;;  %s5023_s20 = smov (!%p23_p0, %s25_s20), %s3263_s17 }
   0x8   : > { %p69_p3 = por %p68_p2, %p67_p1  ;;  %p27_p4 = scmp.ge.s32.totalorder %s5023_s20, 2 }
   0x9   : > { %s55_s21 = ssub.s32 %s3259_s16, %s5021_s19  ;;  %p2616_p6 = scmp.ge.s32.totalorder %s3267_s18, 8 }
   0xa   : > { %s5025_s20 = smov (%p27_p4, %s5023_s20), 0 }
   0xb   : > { %s56_s22 = ssub.s32 %s3263_s17, %s5025_s20  ;;  %145 = sbr.rel (%p2616_p6) target bundleno = 281 (0x119), region = 16 }
   0xc   : > { %s57_s23 = sor.u32 %s56_s22, %s55_s21 }
   0xd   : > { %p58_p5 = scmp.eq.s32.totalorder %s57_s23, 0 }
   0xf   : > { %s3342_s25 = scalar_select %p58_p5, %s3247_s13, %s60_s24  }
  0x12   : > { %157 = sbr.rel (!%p69_p3) target bundleno = 281 (0x119), region = 24  ;;  %s159_s26 = sand.u32 (%p69_p3), 1, %s3247_s13  }
  0x13   : > { %s2619_s27 = sshll.u32 (%p69_p3), %s3263_s17, 3  ;;  %s2617_s28 = sshll.u32 (%p69_p3), %s159_s26, 12 }
  0x14   : > { %s2633_s29 = sshll.u32 (%p69_p3), %s3259_s16, 10  ;;  %s3356_s8 = scalar_lea.vmem (%p69_p3), [#allocation2], %s2617_s28 }
  0x15   : > { %s165_s30 = sadd.s32 (%p69_p3), %s2633_s29, %s2619_s27 }
  0x16   : > { %s2621_s4 = sshll.u32 (%p69_p3), %s165_s30, 3 }
  0x17   : > { %s3351_s7 = scalar_lea.vmem (%p69_p3), %s5011_s1, %s2621_s4 }
  0x18   : > { %v180_v0 = vld [vmem:[%s3351_s7] sm:$0xff] (%p69_p3)  ;;  %v182_v1 = vld [vmem:[%s3351_s7 + $0x8] sm:$0xff] (%p69_p3)  ;;  %v184_v2 = vld [vmem:[%s3351_s7 + $0x10] sm:$0xff] (%p69_p3) }
  0x19   : > { %181 = vst [vmem:[%s3356_s8] sm:$0xff] %v180_v0  ;;  %183 = vst [vmem:[%s3356_s8 + $0x8] sm:$0xff] %v182_v1  ;;  %v186_v3 = vld [vmem:[%s3351_s7 + $0x18] sm:$0xff]  ;;  %v188_v4 = vld [vmem:[%s3351_s7 + $0x20] sm:$0xff] }
  0x1a   : > { %185 = vst [vmem:[%s3356_s8 + $0x10] sm:$0xff] %v184_v2  ;;  %v190_v5 = vld [vmem:[%s3351_s7 + $0x28] sm:$0xff]  ;;  %187 = vst [vmem:[%s3356_s8 + $0x18] sm:$0xff] %v186_v3  ;;  %v192_v6 = vld [vmem:[%s3351_s7 + $0x30] sm:$0xff] }
  0x1b   : > { %189 = vst [vmem:[%s3356_s8 + $0x20] sm:$0xff] %v188_v4  ;;  %191 = vst [vmem:[%s3356_s8 + $0x28] sm:$0xff] %v190_v5  ;;  %v194_v7 = vld [vmem:[%s3351_s7 + $0x38] sm:$0xff]  ;;  %v196_v8 = vld [vmem:[%s3351_s7 + $0x80] sm:$0xff] }
  0x1c   : > { %193 = vst [vmem:[%s3356_s8 + $0x30] sm:$0xff] %v192_v6  ;;  %195 = vst [vmem:[%s3356_s8 + $0x38] sm:$0xff] %v194_v7  ;;  %v198_v9 = vld [vmem:[%s3351_s7 + $0x88] sm:$0xff]  ;;  %v200_v10 = vld [vmem:[%s3351_s7 + $0x90] sm:$0xff] }
  0x1d   : > { %197 = vst [vmem:[%s3356_s8 + $0x40] sm:$0xff] %v196_v8  ;;  %v202_v11 = vld [vmem:[%s3351_s7 + $0x98] sm:$0xff]  ;;  %199 = vst [vmem:[%s3356_s8 + $0x48] sm:$0xff] %v198_v9  ;;  %v204_v12 = vld [vmem:[%s3351_s7 + $0xa0] sm:$0xff] }
  0x1e   : > { %201 = vst [vmem:[%s3356_s8 + $0x50] sm:$0xff] %v200_v10  ;;  %203 = vst [vmem:[%s3356_s8 + $0x58] sm:$0xff] %v202_v11  ;;  %v206_v13 = vld [vmem:[%s3351_s7 + $0xa8] sm:$0xff]  ;;  %v208_v14 = vld [vmem:[%s3351_s7 + $0xb0] sm:$0xff] }
  0x1f   : > { %205 = vst [vmem:[%s3356_s8 + $0x60] sm:$0xff] %v204_v12  ;;  %207 = vst [vmem:[%s3356_s8 + $0x68] sm:$0xff] %v206_v13  ;;  %v210_v15 = vld [vmem:[%s3351_s7 + $0xb8] sm:$0xff]  ;;  %v212_v16 = vld [vmem:[%s3351_s7 + $0x100] sm:$0xff] }
  0x20   : > { %209 = vst [vmem:[%s3356_s8 + $0x70] sm:$0xff] %v208_v14  ;;  %v214_v17 = vld [vmem:[%s3351_s7 + $0x108] sm:$0xff]  ;;  %211 = vst [vmem:[%s3356_s8 + $0x78] sm:$0xff] %v210_v15  ;;  %v216_v18 = vld [vmem:[%s3351_s7 + $0x110] sm:$0xff] }
  0x21   : > { %213 = vst [vmem:[%s3356_s8 + $0x80] sm:$0xff] %v212_v16  ;;  %215 = vst [vmem:[%s3356_s8 + $0x88] sm:$0xff] %v214_v17  ;;  %v218_v19 = vld [vmem:[%s3351_s7 + $0x118] sm:$0xff]  ;;  %v220_v20 = vld [vmem:[%s3351_s7 + $0x120] sm:$0xff] }
  0x22   : > { %217 = vst [vmem:[%s3356_s8 + $0x90] sm:$0xff] %v216_v18  ;;  %219 = vst [vmem:[%s3356_s8 + $0x98] sm:$0xff] %v218_v19  ;;  %v222_v21 = vld [vmem:[%s3351_s7 + $0x128] sm:$0xff]  ;;  %v224_v22 = vld [vmem:[%s3351_s7 + $0x130] sm:$0xff] }
  0x23   : > { %221 = vst [vmem:[%s3356_s8 + $0xa0] sm:$0xff] %v220_v20  ;;  %v226_v23 = vld [vmem:[%s3351_s7 + $0x138] sm:$0xff]  ;;  %223 = vst [vmem:[%s3356_s8 + $0xa8] sm:$0xff] %v222_v21  ;;  %v228_v24 = vld [vmem:[%s3351_s7 + $0x180] sm:$0xff] }
  0x24   : > { %225 = vst [vmem:[%s3356_s8 + $0xb0] sm:$0xff] %v224_v22  ;;  %227 = vst [vmem:[%s3356_s8 + $0xb8] sm:$0xff] %v226_v23  ;;  %v230_v25 = vld [vmem:[%s3351_s7 + $0x188] sm:$0xff]  ;;  %v232_v26 = vld [vmem:[%s3351_s7 + $0x190] sm:$0xff] }
  0x25   : > { %229 = vst [vmem:[%s3356_s8 + $0xc0] sm:$0xff] %v228_v24  ;;  %231 = vst [vmem:[%s3356_s8 + $0xc8] sm:$0xff] %v230_v25  ;;  %v234_v27 = vld [vmem:[%s3351_s7 + $0x198] sm:$0xff]  ;;  %v236_v28 = vld [vmem:[%s3351_s7 + $0x1a0] sm:$0xff] }
  0x26   : > { %233 = vst [vmem:[%s3356_s8 + $0xd0] sm:$0xff] %v232_v26  ;;  %v238_v29 = vld [vmem:[%s3351_s7 + $0x1a8] sm:$0xff]  ;;  %235 = vst [vmem:[%s3356_s8 + $0xd8] sm:$0xff] %v234_v27  ;;  %v240_v30 = vld [vmem:[%s3351_s7 + $0x1b0] sm:$0xff] }
  0x27   : > { %237 = vst [vmem:[%s3356_s8 + $0xe0] sm:$0xff] %v236_v28  ;;  %239 = vst [vmem:[%s3356_s8 + $0xe8] sm:$0xff] %v238_v29  ;;  %v242_v31 = vld [vmem:[%s3351_s7 + $0x1b8] sm:$0xff]  ;;  %v244_v32 = vld [vmem:[%s3351_s7 + $0x200] sm:$0xff] }
  0x28   : > { %241 = vst [vmem:[%s3356_s8 + $0xf0] sm:$0xff] %v240_v30  ;;  %243 = vst [vmem:[%s3356_s8 + $0xf8] sm:$0xff] %v242_v31  ;;  %v246_v33 = vld [vmem:[%s3351_s7 + $0x208] sm:$0xff]  ;;  %v248_v34 = vld [vmem:[%s3351_s7 + $0x210] sm:$0xff] }
  0x29   : > { %245 = vst [vmem:[%s3356_s8 + $0x100] sm:$0xff] %v244_v32  ;;  %v250_v35 = vld [vmem:[%s3351_s7 + $0x218] sm:$0xff]  ;;  %247 = vst [vmem:[%s3356_s8 + $0x108] sm:$0xff] %v246_v33  ;;  %v252_v36 = vld [vmem:[%s3351_s7 + $0x220] sm:$0xff] }
  0x2a   : > { %249 = vst [vmem:[%s3356_s8 + $0x110] sm:$0xff] %v248_v34  ;;  %251 = vst [vmem:[%s3356_s8 + $0x118] sm:$0xff] %v250_v35  ;;  %v254_v37 = vld [vmem:[%s3351_s7 + $0x228] sm:$0xff]  ;;  %v256_v38 = vld [vmem:[%s3351_s7 + $0x230] sm:$0xff] }
  0x2b   : > { %253 = vst [vmem:[%s3356_s8 + $0x120] sm:$0xff] %v252_v36  ;;  %255 = vst [vmem:[%s3356_s8 + $0x128] sm:$0xff] %v254_v37  ;;  %v258_v39 = vld [vmem:[%s3351_s7 + $0x238] sm:$0xff]  ;;  %v260_v40 = vld [vmem:[%s3351_s7 + $0x280] sm:$0xff] }
  0x2c   : > { %257 = vst [vmem:[%s3356_s8 + $0x130] sm:$0xff] %v256_v38  ;;  %v262_v41 = vld [vmem:[%s3351_s7 + $0x288] sm:$0xff]  ;;  %259 = vst [vmem:[%s3356_s8 + $0x138] sm:$0xff] %v258_v39  ;;  %v264_v42 = vld [vmem:[%s3351_s7 + $0x290] sm:$0xff] }
  0x2d   : > { %261 = vst [vmem:[%s3356_s8 + $0x140] sm:$0xff] %v260_v40  ;;  %263 = vst [vmem:[%s3356_s8 + $0x148] sm:$0xff] %v262_v41  ;;  %v266_v43 = vld [vmem:[%s3351_s7 + $0x298] sm:$0xff]  ;;  %v268_v44 = vld [vmem:[%s3351_s7 + $0x2a0] sm:$0xff] }
  0x2e   : > { %265 = vst [vmem:[%s3356_s8 + $0x150] sm:$0xff] %v264_v42  ;;  %267 = vst [vmem:[%s3356_s8 + $0x158] sm:$0xff] %v266_v43  ;;  %v270_v45 = vld [vmem:[%s3351_s7 + $0x2a8] sm:$0xff]  ;;  %v272_v46 = vld [vmem:[%s3351_s7 + $0x2b0] sm:$0xff] }
  0x2f   : > { %269 = vst [vmem:[%s3356_s8 + $0x160] sm:$0xff] %v268_v44  ;;  %v274_v47 = vld [vmem:[%s3351_s7 + $0x2b8] sm:$0xff]  ;;  %271 = vst [vmem:[%s3356_s8 + $0x168] sm:$0xff] %v270_v45  ;;  %v276_v48 = vld [vmem:[%s3351_s7 + $0x300] sm:$0xff] }
  0x30   : > { %273 = vst [vmem:[%s3356_s8 + $0x170] sm:$0xff] %v272_v46  ;;  %275 = vst [vmem:[%s3356_s8 + $0x178] sm:$0xff] %v274_v47  ;;  %v278_v49 = vld [vmem:[%s3351_s7 + $0x308] sm:$0xff]  ;;  %v280_v50 = vld [vmem:[%s3351_s7 + $0x310] sm:$0xff] }
  0x31   : > { %277 = vst [vmem:[%s3356_s8 + $0x180] sm:$0xff] %v276_v48  ;;  %279 = vst [vmem:[%s3356_s8 + $0x188] sm:$0xff] %v278_v49  ;;  %v282_v51 = vld [vmem:[%s3351_s7 + $0x318] sm:$0xff]  ;;  %v284_v52 = vld [vmem:[%s3351_s7 + $0x320] sm:$0xff] }
  0x32   : > { %281 = vst [vmem:[%s3356_s8 + $0x190] sm:$0xff] %v280_v50  ;;  %v286_v53 = vld [vmem:[%s3351_s7 + $0x328] sm:$0xff]  ;;  %283 = vst [vmem:[%s3356_s8 + $0x198] sm:$0xff] %v282_v51  ;;  %v288_v54 = vld [vmem:[%s3351_s7 + $0x330] sm:$0xff] }
  0x33   : > { %285 = vst [vmem:[%s3356_s8 + $0x1a0] sm:$0xff] %v284_v52  ;;  %287 = vst [vmem:[%s3356_s8 + $0x1a8] sm:$0xff] %v286_v53  ;;  %v290_v55 = vld [vmem:[%s3351_s7 + $0x338] sm:$0xff]  ;;  %v292_v56 = vld [vmem:[%s3351_s7 + $0x380] sm:$0xff] }
  0x34   : > { %289 = vst [vmem:[%s3356_s8 + $0x1b0] sm:$0xff] %v288_v54  ;;  %291 = vst [vmem:[%s3356_s8 + $0x1b8] sm:$0xff] %v290_v55  ;;  %v294_v57 = vld [vmem:[%s3351_s7 + $0x388] sm:$0xff]  ;;  %v296_v58 = vld [vmem:[%s3351_s7 + $0x390] sm:$0xff] }
  0x35   : > { %293 = vst [vmem:[%s3356_s8 + $0x1c0] sm:$0xff] %v292_v56  ;;  %v298_v59 = vld [vmem:[%s3351_s7 + $0x398] sm:$0xff]  ;;  %295 = vst [vmem:[%s3356_s8 + $0x1c8] sm:$0xff] %v294_v57  ;;  %v300_v60 = vld [vmem:[%s3351_s7 + $0x3a0] sm:$0xff] }
  0x36   : > { %297 = vst [vmem:[%s3356_s8 + $0x1d0] sm:$0xff] %v296_v58  ;;  %299 = vst [vmem:[%s3356_s8 + $0x1d8] sm:$0xff] %v298_v59  ;;  %v302_v61 = vld [vmem:[%s3351_s7 + $0x3a8] sm:$0xff]  ;;  %v304_v62 = vld [vmem:[%s3351_s7 + $0x3b0] sm:$0xff] }
  0x37   : > { %301 = vst [vmem:[%s3356_s8 + $0x1e0] sm:$0xff] %v300_v60  ;;  %303 = vst [vmem:[%s3356_s8 + $0x1e8] sm:$0xff] %v302_v61  ;;  %v306_v63 = vld [vmem:[%s3351_s7 + $0x3b8] sm:$0xff]  ;;  %v308_v0 = vld [vmem:[%s3351_s7 + $0x400] sm:$0xff] }
  0x38   : > { %305 = vst [vmem:[%s3356_s8 + $0x1f0] sm:$0xff] %v304_v62  ;;  %v310_v1 = vld [vmem:[%s3351_s7 + $0x408] sm:$0xff]  ;;  %307 = vst [vmem:[%s3356_s8 + $0x1f8] sm:$0xff] %v306_v63  ;;  %v312_v2 = vld [vmem:[%s3351_s7 + $0x410] sm:$0xff] }
  0x39   : > { %309 = vst [vmem:[%s3356_s8 + $0x200] sm:$0xff] %v308_v0  ;;  %311 = vst [vmem:[%s3356_s8 + $0x208] sm:$0xff] %v310_v1  ;;  %v314_v3 = vld [vmem:[%s3351_s7 + $0x418] sm:$0xff]  ;;  %v316_v4 = vld [vmem:[%s3351_s7 + $0x420] sm:$0xff] }
  0x3a   : > { %313 = vst [vmem:[%s3356_s8 + $0x210] sm:$0xff] %v312_v2  ;;  %315 = vst [vmem:[%s3356_s8 + $0x218] sm:$0xff] %v314_v3  ;;  %v318_v5 = vld [vmem:[%s3351_s7 + $0x428] sm:$0xff]  ;;  %v320_v6 = vld [vmem:[%s3351_s7 + $0x430] sm:$0xff] }
  0x3b   : > { %317 = vst [vmem:[%s3356_s8 + $0x220] sm:$0xff] %v316_v4  ;;  %v322_v7 = vld [vmem:[%s3351_s7 + $0x438] sm:$0xff]  ;;  %319 = vst [vmem:[%s3356_s8 + $0x228] sm:$0xff] %v318_v5  ;;  %v324_v8 = vld [vmem:[%s3351_s7 + $0x480] sm:$0xff] }
  0x3c   : > { %321 = vst [vmem:[%s3356_s8 + $0x230] sm:$0xff] %v320_v6  ;;  %323 = vst [vmem:[%s3356_s8 + $0x238] sm:$0xff] %v322_v7  ;;  %v326_v9 = vld [vmem:[%s3351_s7 + $0x488] sm:$0xff]  ;;  %v328_v10 = vld [vmem:[%s3351_s7 + $0x490] sm:$0xff] }
  0x3d   : > { %325 = vst [vmem:[%s3356_s8 + $0x240] sm:$0xff] %v324_v8  ;;  %327 = vst [vmem:[%s3356_s8 + $0x248] sm:$0xff] %v326_v9  ;;  %v330_v11 = vld [vmem:[%s3351_s7 + $0x498] sm:$0xff]  ;;  %v332_v12 = vld [vmem:[%s3351_s7 + $0x4a0] sm:$0xff] }
  0x3e   : > { %329 = vst [vmem:[%s3356_s8 + $0x250] sm:$0xff] %v328_v10  ;;  %v334_v13 = vld [vmem:[%s3351_s7 + $0x4a8] sm:$0xff]  ;;  %331 = vst [vmem:[%s3356_s8 + $0x258] sm:$0xff] %v330_v11  ;;  %v336_v14 = vld [vmem:[%s3351_s7 + $0x4b0] sm:$0xff] }
  0x3f   : > { %333 = vst [vmem:[%s3356_s8 + $0x260] sm:$0xff] %v332_v12  ;;  %335 = vst [vmem:[%s3356_s8 + $0x268] sm:$0xff] %v334_v13  ;;  %v338_v15 = vld [vmem:[%s3351_s7 + $0x4b8] sm:$0xff]  ;;  %v340_v16 = vld [vmem:[%s3351_s7 + $0x500] sm:$0xff] }
  0x40   : > { %337 = vst [vmem:[%s3356_s8 + $0x270] sm:$0xff] %v336_v14  ;;  %339 = vst [vmem:[%s3356_s8 + $0x278] sm:$0xff] %v338_v15  ;;  %v342_v17 = vld [vmem:[%s3351_s7 + $0x508] sm:$0xff]  ;;  %v344_v18 = vld [vmem:[%s3351_s7 + $0x510] sm:$0xff] }
  0x41   : > { %341 = vst [vmem:[%s3356_s8 + $0x280] sm:$0xff] %v340_v16  ;;  %v346_v19 = vld [vmem:[%s3351_s7 + $0x518] sm:$0xff]  ;;  %343 = vst [vmem:[%s3356_s8 + $0x288] sm:$0xff] %v342_v17  ;;  %v348_v20 = vld [vmem:[%s3351_s7 + $0x520] sm:$0xff] }
  0x42   : > { %345 = vst [vmem:[%s3356_s8 + $0x290] sm:$0xff] %v344_v18  ;;  %347 = vst [vmem:[%s3356_s8 + $0x298] sm:$0xff] %v346_v19  ;;  %v350_v21 = vld [vmem:[%s3351_s7 + $0x528] sm:$0xff]  ;;  %v352_v22 = vld [vmem:[%s3351_s7 + $0x530] sm:$0xff] }
  0x43   : > { %349 = vst [vmem:[%s3356_s8 + $0x2a0] sm:$0xff] %v348_v20  ;;  %351 = vst [vmem:[%s3356_s8 + $0x2a8] sm:$0xff] %v350_v21  ;;  %v354_v23 = vld [vmem:[%s3351_s7 + $0x538] sm:$0xff]  ;;  %v356_v24 = vld [vmem:[%s3351_s7 + $0x580] sm:$0xff] }
  0x44   : > { %353 = vst [vmem:[%s3356_s8 + $0x2b0] sm:$0xff] %v352_v22  ;;  %v358_v25 = vld [vmem:[%s3351_s7 + $0x588] sm:$0xff]  ;;  %355 = vst [vmem:[%s3356_s8 + $0x2b8] sm:$0xff] %v354_v23  ;;  %v360_v26 = vld [vmem:[%s3351_s7 + $0x590] sm:$0xff] }
  0x45   : > { %357 = vst [vmem:[%s3356_s8 + $0x2c0] sm:$0xff] %v356_v24  ;;  %359 = vst [vmem:[%s3356_s8 + $0x2c8] sm:$0xff] %v358_v25  ;;  %v362_v27 = vld [vmem:[%s3351_s7 + $0x598] sm:$0xff]  ;;  %v364_v28 = vld [vmem:[%s3351_s7 + $0x5a0] sm:$0xff] }
  0x46   : > { %361 = vst [vmem:[%s3356_s8 + $0x2d0] sm:$0xff] %v360_v26  ;;  %363 = vst [vmem:[%s3356_s8 + $0x2d8] sm:$0xff] %v362_v27  ;;  %v366_v29 = vld [vmem:[%s3351_s7 + $0x5a8] sm:$0xff]  ;;  %v368_v30 = vld [vmem:[%s3351_s7 + $0x5b0] sm:$0xff] }
  0x47   : > { %365 = vst [vmem:[%s3356_s8 + $0x2e0] sm:$0xff] %v364_v28  ;;  %v370_v31 = vld [vmem:[%s3351_s7 + $0x5b8] sm:$0xff]  ;;  %367 = vst [vmem:[%s3356_s8 + $0x2e8] sm:$0xff] %v366_v29  ;;  %v372_v32 = vld [vmem:[%s3351_s7 + $0x600] sm:$0xff] }
  0x48   : > { %369 = vst [vmem:[%s3356_s8 + $0x2f0] sm:$0xff] %v368_v30  ;;  %371 = vst [vmem:[%s3356_s8 + $0x2f8] sm:$0xff] %v370_v31  ;;  %v374_v33 = vld [vmem:[%s3351_s7 + $0x608] sm:$0xff]  ;;  %v376_v34 = vld [vmem:[%s3351_s7 + $0x610] sm:$0xff] }
  0x49   : > { %373 = vst [vmem:[%s3356_s8 + $0x300] sm:$0xff] %v372_v32  ;;  %375 = vst [vmem:[%s3356_s8 + $0x308] sm:$0xff] %v374_v33  ;;  %v378_v35 = vld [vmem:[%s3351_s7 + $0x618] sm:$0xff]  ;;  %v380_v36 = vld [vmem:[%s3351_s7 + $0x620] sm:$0xff] }
  0x4a   : > { %377 = vst [vmem:[%s3356_s8 + $0x310] sm:$0xff] %v376_v34  ;;  %v382_v37 = vld [vmem:[%s3351_s7 + $0x628] sm:$0xff]  ;;  %379 = vst [vmem:[%s3356_s8 + $0x318] sm:$0xff] %v378_v35  ;;  %v384_v38 = vld [vmem:[%s3351_s7 + $0x630] sm:$0xff] }
  0x4b   : > { %381 = vst [vmem:[%s3356_s8 + $0x320] sm:$0xff] %v380_v36  ;;  %383 = vst [vmem:[%s3356_s8 + $0x328] sm:$0xff] %v382_v37  ;;  %v386_v39 = vld [vmem:[%s3351_s7 + $0x638] sm:$0xff]  ;;  %v388_v40 = vld [vmem:[%s3351_s7 + $0x680] sm:$0xff] }
  0x4c   : > { %385 = vst [vmem:[%s3356_s8 + $0x330] sm:$0xff] %v384_v38  ;;  %387 = vst [vmem:[%s3356_s8 + $0x338] sm:$0xff] %v386_v39  ;;  %v390_v41 = vld [vmem:[%s3351_s7 + $0x688] sm:$0xff]  ;;  %v392_v42 = vld [vmem:[%s3351_s7 + $0x690] sm:$0xff] }
  0x4d   : > { %389 = vst [vmem:[%s3356_s8 + $0x340] sm:$0xff] %v388_v40  ;;  %v394_v43 = vld [vmem:[%s3351_s7 + $0x698] sm:$0xff]  ;;  %391 = vst [vmem:[%s3356_s8 + $0x348] sm:$0xff] %v390_v41  ;;  %v396_v44 = vld [vmem:[%s3351_s7 + $0x6a0] sm:$0xff] }
  0x4e   : > { %393 = vst [vmem:[%s3356_s8 + $0x350] sm:$0xff] %v392_v42  ;;  %395 = vst [vmem:[%s3356_s8 + $0x358] sm:$0xff] %v394_v43  ;;  %v398_v45 = vld [vmem:[%s3351_s7 + $0x6a8] sm:$0xff]  ;;  %v400_v46 = vld [vmem:[%s3351_s7 + $0x6b0] sm:$0xff] }
  0x4f   : > { %397 = vst [vmem:[%s3356_s8 + $0x360] sm:$0xff] %v396_v44  ;;  %399 = vst [vmem:[%s3356_s8 + $0x368] sm:$0xff] %v398_v45  ;;  %v402_v47 = vld [vmem:[%s3351_s7 + $0x6b8] sm:$0xff]  ;;  %v404_v48 = vld [vmem:[%s3351_s7 + $0x700] sm:$0xff] }
  0x50   : > { %401 = vst [vmem:[%s3356_s8 + $0x370] sm:$0xff] %v400_v46  ;;  %v406_v49 = vld [vmem:[%s3351_s7 + $0x708] sm:$0xff]  ;;  %403 = vst [vmem:[%s3356_s8 + $0x378] sm:$0xff] %v402_v47  ;;  %v408_v50 = vld [vmem:[%s3351_s7 + $0x710] sm:$0xff] }
  0x51   : > { %405 = vst [vmem:[%s3356_s8 + $0x380] sm:$0xff] %v404_v48  ;;  %407 = vst [vmem:[%s3356_s8 + $0x388] sm:$0xff] %v406_v49  ;;  %v410_v51 = vld [vmem:[%s3351_s7 + $0x718] sm:$0xff]  ;;  %v412_v52 = vld [vmem:[%s3351_s7 + $0x720] sm:$0xff] }
  0x52   : > { %409 = vst [vmem:[%s3356_s8 + $0x390] sm:$0xff] %v408_v50  ;;  %411 = vst [vmem:[%s3356_s8 + $0x398] sm:$0xff] %v410_v51  ;;  %v414_v53 = vld [vmem:[%s3351_s7 + $0x728] sm:$0xff]  ;;  %v416_v54 = vld [vmem:[%s3351_s7 + $0x730] sm:$0xff] }
  0x53   : > { %413 = vst [vmem:[%s3356_s8 + $0x3a0] sm:$0xff] %v412_v52  ;;  %v418_v55 = vld [vmem:[%s3351_s7 + $0x738] sm:$0xff]  ;;  %415 = vst [vmem:[%s3356_s8 + $0x3a8] sm:$0xff] %v414_v53  ;;  %v420_v56 = vld [vmem:[%s3351_s7 + $0x780] sm:$0xff] }
  0x54   : > { %417 = vst [vmem:[%s3356_s8 + $0x3b0] sm:$0xff] %v416_v54  ;;  %419 = vst [vmem:[%s3356_s8 + $0x3b8] sm:$0xff] %v418_v55  ;;  %v422_v57 = vld [vmem:[%s3351_s7 + $0x788] sm:$0xff]  ;;  %v424_v58 = vld [vmem:[%s3351_s7 + $0x790] sm:$0xff] }
  0x55   : > { %421 = vst [vmem:[%s3356_s8 + $0x3c0] sm:$0xff] %v420_v56  ;;  %423 = vst [vmem:[%s3356_s8 + $0x3c8] sm:$0xff] %v422_v57  ;;  %v426_v59 = vld [vmem:[%s3351_s7 + $0x798] sm:$0xff]  ;;  %v428_v60 = vld [vmem:[%s3351_s7 + $0x7a0] sm:$0xff] }
  0x56   : > { %425 = vst [vmem:[%s3356_s8 + $0x3d0] sm:$0xff] %v424_v58  ;;  %v430_v61 = vld [vmem:[%s3351_s7 + $0x7a8] sm:$0xff]  ;;  %427 = vst [vmem:[%s3356_s8 + $0x3d8] sm:$0xff] %v426_v59  ;;  %v432_v62 = vld [vmem:[%s3351_s7 + $0x7b0] sm:$0xff] }
  0x57   : > { %429 = vst [vmem:[%s3356_s8 + $0x3e0] sm:$0xff] %v428_v60  ;;  %431 = vst [vmem:[%s3356_s8 + $0x3e8] sm:$0xff] %v430_v61  ;;  %v434_v63 = vld [vmem:[%s3351_s7 + $0x7b8] sm:$0xff]  ;;  %v436_v0 = vld [vmem:[%s3351_s7 + $0x800] sm:$0xff] }
  0x58   : > { %433 = vst [vmem:[%s3356_s8 + $0x3f0] sm:$0xff] %v432_v62  ;;  %435 = vst [vmem:[%s3356_s8 + $0x3f8] sm:$0xff] %v434_v63  ;;  %v438_v1 = vld [vmem:[%s3351_s7 + $0x808] sm:$0xff]  ;;  %v440_v2 = vld [vmem:[%s3351_s7 + $0x810] sm:$0xff] }
  0x59   : > { %437 = vst [vmem:[%s3356_s8 + $0x400] sm:$0xff] %v436_v0  ;;  %v442_v3 = vld [vmem:[%s3351_s7 + $0x818] sm:$0xff]  ;;  %439 = vst [vmem:[%s3356_s8 + $0x408] sm:$0xff] %v438_v1  ;;  %v444_v4 = vld [vmem:[%s3351_s7 + $0x820] sm:$0xff] }
  0x5a   : > { %441 = vst [vmem:[%s3356_s8 + $0x410] sm:$0xff] %v440_v2  ;;  %443 = vst [vmem:[%s3356_s8 + $0x418] sm:$0xff] %v442_v3  ;;  %v446_v5 = vld [vmem:[%s3351_s7 + $0x828] sm:$0xff]  ;;  %v448_v6 = vld [vmem:[%s3351_s7 + $0x830] sm:$0xff] }
  0x5b   : > { %445 = vst [vmem:[%s3356_s8 + $0x420] sm:$0xff] %v444_v4  ;;  %447 = vst [vmem:[%s3356_s8 + $0x428] sm:$0xff] %v446_v5  ;;  %v450_v7 = vld [vmem:[%s3351_s7 + $0x838] sm:$0xff]  ;;  %v452_v8 = vld [vmem:[%s3351_s7 + $0x880] sm:$0xff] }
  0x5c   : > { %449 = vst [vmem:[%s3356_s8 + $0x430] sm:$0xff] %v448_v6  ;;  %v454_v9 = vld [vmem:[%s3351_s7 + $0x888] sm:$0xff]  ;;  %451 = vst [vmem:[%s3356_s8 + $0x438] sm:$0xff] %v450_v7  ;;  %v456_v10 = vld [vmem:[%s3351_s7 + $0x890] sm:$0xff] }
  0x5d   : > { %453 = vst [vmem:[%s3356_s8 + $0x440] sm:$0xff] %v452_v8  ;;  %455 = vst [vmem:[%s3356_s8 + $0x448] sm:$0xff] %v454_v9  ;;  %v458_v11 = vld [vmem:[%s3351_s7 + $0x898] sm:$0xff]  ;;  %v460_v12 = vld [vmem:[%s3351_s7 + $0x8a0] sm:$0xff] }
  0x5e   : > { %457 = vst [vmem:[%s3356_s8 + $0x450] sm:$0xff] %v456_v10  ;;  %459 = vst [vmem:[%s3356_s8 + $0x458] sm:$0xff] %v458_v11  ;;  %v462_v13 = vld [vmem:[%s3351_s7 + $0x8a8] sm:$0xff]  ;;  %v464_v14 = vld [vmem:[%s3351_s7 + $0x8b0] sm:$0xff] }
  0x5f   : > { %461 = vst [vmem:[%s3356_s8 + $0x460] sm:$0xff] %v460_v12  ;;  %v466_v15 = vld [vmem:[%s3351_s7 + $0x8b8] sm:$0xff]  ;;  %463 = vst [vmem:[%s3356_s8 + $0x468] sm:$0xff] %v462_v13  ;;  %v468_v16 = vld [vmem:[%s3351_s7 + $0x900] sm:$0xff] }
  0x60   : > { %465 = vst [vmem:[%s3356_s8 + $0x470] sm:$0xff] %v464_v14  ;;  %467 = vst [vmem:[%s3356_s8 + $0x478] sm:$0xff] %v466_v15  ;;  %v470_v17 = vld [vmem:[%s3351_s7 + $0x908] sm:$0xff]  ;;  %v472_v18 = vld [vmem:[%s3351_s7 + $0x910] sm:$0xff] }
  0x61   : > { %469 = vst [vmem:[%s3356_s8 + $0x480] sm:$0xff] %v468_v16  ;;  %471 = vst [vmem:[%s3356_s8 + $0x488] sm:$0xff] %v470_v17  ;;  %v474_v19 = vld [vmem:[%s3351_s7 + $0x918] sm:$0xff]  ;;  %v476_v20 = vld [vmem:[%s3351_s7 + $0x920] sm:$0xff] }
  0x62   : > { %473 = vst [vmem:[%s3356_s8 + $0x490] sm:$0xff] %v472_v18  ;;  %v478_v21 = vld [vmem:[%s3351_s7 + $0x928] sm:$0xff]  ;;  %475 = vst [vmem:[%s3356_s8 + $0x498] sm:$0xff] %v474_v19  ;;  %v480_v22 = vld [vmem:[%s3351_s7 + $0x930] sm:$0xff] }
  0x63   : > { %477 = vst [vmem:[%s3356_s8 + $0x4a0] sm:$0xff] %v476_v20  ;;  %479 = vst [vmem:[%s3356_s8 + $0x4a8] sm:$0xff] %v478_v21  ;;  %v482_v23 = vld [vmem:[%s3351_s7 + $0x938] sm:$0xff]  ;;  %v484_v24 = vld [vmem:[%s3351_s7 + $0x980] sm:$0xff] }
  0x64   : > { %481 = vst [vmem:[%s3356_s8 + $0x4b0] sm:$0xff] %v480_v22  ;;  %483 = vst [vmem:[%s3356_s8 + $0x4b8] sm:$0xff] %v482_v23  ;;  %v486_v25 = vld [vmem:[%s3351_s7 + $0x988] sm:$0xff]  ;;  %v488_v26 = vld [vmem:[%s3351_s7 + $0x990] sm:$0xff] }
  0x65   : > { %485 = vst [vmem:[%s3356_s8 + $0x4c0] sm:$0xff] %v484_v24  ;;  %v490_v27 = vld [vmem:[%s3351_s7 + $0x998] sm:$0xff]  ;;  %487 = vst [vmem:[%s3356_s8 + $0x4c8] sm:$0xff] %v486_v25  ;;  %v492_v28 = vld [vmem:[%s3351_s7 + $0x9a0] sm:$0xff] }
  0x66   : > { %489 = vst [vmem:[%s3356_s8 + $0x4d0] sm:$0xff] %v488_v26  ;;  %491 = vst [vmem:[%s3356_s8 + $0x4d8] sm:$0xff] %v490_v27  ;;  %v494_v29 = vld [vmem:[%s3351_s7 + $0x9a8] sm:$0xff]  ;;  %v496_v30 = vld [vmem:[%s3351_s7 + $0x9b0] sm:$0xff] }
  0x67   : > { %493 = vst [vmem:[%s3356_s8 + $0x4e0] sm:$0xff] %v492_v28  ;;  %495 = vst [vmem:[%s3356_s8 + $0x4e8] sm:$0xff] %v494_v29  ;;  %v498_v31 = vld [vmem:[%s3351_s7 + $0x9b8] sm:$0xff]  ;;  %v500_v32 = vld [vmem:[%s3351_s7 + $0xa00] sm:$0xff] }
  0x68   : > { %497 = vst [vmem:[%s3356_s8 + $0x4f0] sm:$0xff] %v496_v30  ;;  %v502_v33 = vld [vmem:[%s3351_s7 + $0xa08] sm:$0xff]  ;;  %499 = vst [vmem:[%s3356_s8 + $0x4f8] sm:$0xff] %v498_v31  ;;  %v504_v34 = vld [vmem:[%s3351_s7 + $0xa10] sm:$0xff] }
  0x69   : > { %501 = vst [vmem:[%s3356_s8 + $0x500] sm:$0xff] %v500_v32  ;;  %503 = vst [vmem:[%s3356_s8 + $0x508] sm:$0xff] %v502_v33  ;;  %v506_v35 = vld [vmem:[%s3351_s7 + $0xa18] sm:$0xff]  ;;  %v508_v36 = vld [vmem:[%s3351_s7 + $0xa20] sm:$0xff] }
  0x6a   : > { %505 = vst [vmem:[%s3356_s8 + $0x510] sm:$0xff] %v504_v34  ;;  %507 = vst [vmem:[%s3356_s8 + $0x518] sm:$0xff] %v506_v35  ;;  %v510_v37 = vld [vmem:[%s3351_s7 + $0xa28] sm:$0xff]  ;;  %v512_v38 = vld [vmem:[%s3351_s7 + $0xa30] sm:$0xff] }
  0x6b   : > { %509 = vst [vmem:[%s3356_s8 + $0x520] sm:$0xff] %v508_v36  ;;  %v514_v39 = vld [vmem:[%s3351_s7 + $0xa38] sm:$0xff]  ;;  %511 = vst [vmem:[%s3356_s8 + $0x528] sm:$0xff] %v510_v37  ;;  %v516_v40 = vld [vmem:[%s3351_s7 + $0xa80] sm:$0xff] }
  0x6c   : > { %513 = vst [vmem:[%s3356_s8 + $0x530] sm:$0xff] %v512_v38  ;;  %515 = vst [vmem:[%s3356_s8 + $0x538] sm:$0xff] %v514_v39  ;;  %v518_v41 = vld [vmem:[%s3351_s7 + $0xa88] sm:$0xff]  ;;  %v520_v42 = vld [vmem:[%s3351_s7 + $0xa90] sm:$0xff] }
  0x6d   : > { %517 = vst [vmem:[%s3356_s8 + $0x540] sm:$0xff] %v516_v40  ;;  %519 = vst [vmem:[%s3356_s8 + $0x548] sm:$0xff] %v518_v41  ;;  %v522_v43 = vld [vmem:[%s3351_s7 + $0xa98] sm:$0xff]  ;;  %v524_v44 = vld [vmem:[%s3351_s7 + $0xaa0] sm:$0xff] }
  0x6e   : > { %521 = vst [vmem:[%s3356_s8 + $0x550] sm:$0xff] %v520_v42  ;;  %v526_v45 = vld [vmem:[%s3351_s7 + $0xaa8] sm:$0xff]  ;;  %523 = vst [vmem:[%s3356_s8 + $0x558] sm:$0xff] %v522_v43  ;;  %v528_v46 = vld [vmem:[%s3351_s7 + $0xab0] sm:$0xff] }
  0x6f   : > { %525 = vst [vmem:[%s3356_s8 + $0x560] sm:$0xff] %v524_v44  ;;  %527 = vst [vmem:[%s3356_s8 + $0x568] sm:$0xff] %v526_v45  ;;  %v530_v47 = vld [vmem:[%s3351_s7 + $0xab8] sm:$0xff]  ;;  %v532_v48 = vld [vmem:[%s3351_s7 + $0xb00] sm:$0xff] }
  0x70   : > { %529 = vst [vmem:[%s3356_s8 + $0x570] sm:$0xff] %v528_v46  ;;  %531 = vst [vmem:[%s3356_s8 + $0x578] sm:$0xff] %v530_v47  ;;  %v534_v49 = vld [vmem:[%s3351_s7 + $0xb08] sm:$0xff]  ;;  %v536_v50 = vld [vmem:[%s3351_s7 + $0xb10] sm:$0xff] }
  0x71   : > { %533 = vst [vmem:[%s3356_s8 + $0x580] sm:$0xff] %v532_v48  ;;  %v538_v51 = vld [vmem:[%s3351_s7 + $0xb18] sm:$0xff]  ;;  %535 = vst [vmem:[%s3356_s8 + $0x588] sm:$0xff] %v534_v49  ;;  %v540_v52 = vld [vmem:[%s3351_s7 + $0xb20] sm:$0xff] }
  0x72   : > { %537 = vst [vmem:[%s3356_s8 + $0x590] sm:$0xff] %v536_v50  ;;  %539 = vst [vmem:[%s3356_s8 + $0x598] sm:$0xff] %v538_v51  ;;  %v542_v53 = vld [vmem:[%s3351_s7 + $0xb28] sm:$0xff]  ;;  %v544_v54 = vld [vmem:[%s3351_s7 + $0xb30] sm:$0xff] }
  0x73   : > { %541 = vst [vmem:[%s3356_s8 + $0x5a0] sm:$0xff] %v540_v52  ;;  %543 = vst [vmem:[%s3356_s8 + $0x5a8] sm:$0xff] %v542_v53  ;;  %v546_v55 = vld [vmem:[%s3351_s7 + $0xb38] sm:$0xff]  ;;  %v548_v56 = vld [vmem:[%s3351_s7 + $0xb80] sm:$0xff] }
  0x74   : > { %545 = vst [vmem:[%s3356_s8 + $0x5b0] sm:$0xff] %v544_v54  ;;  %v550_v57 = vld [vmem:[%s3351_s7 + $0xb88] sm:$0xff]  ;;  %547 = vst [vmem:[%s3356_s8 + $0x5b8] sm:$0xff] %v546_v55  ;;  %v552_v58 = vld [vmem:[%s3351_s7 + $0xb90] sm:$0xff] }
  0x75   : > { %549 = vst [vmem:[%s3356_s8 + $0x5c0] sm:$0xff] %v548_v56  ;;  %551 = vst [vmem:[%s3356_s8 + $0x5c8] sm:$0xff] %v550_v57  ;;  %v554_v59 = vld [vmem:[%s3351_s7 + $0xb98] sm:$0xff]  ;;  %v556_v60 = vld [vmem:[%s3351_s7 + $0xba0] sm:$0xff] }
  0x76   : > { %553 = vst [vmem:[%s3356_s8 + $0x5d0] sm:$0xff] %v552_v58  ;;  %555 = vst [vmem:[%s3356_s8 + $0x5d8] sm:$0xff] %v554_v59  ;;  %v558_v61 = vld [vmem:[%s3351_s7 + $0xba8] sm:$0xff]  ;;  %v560_v62 = vld [vmem:[%s3351_s7 + $0xbb0] sm:$0xff] }
  0x77   : > { %557 = vst [vmem:[%s3356_s8 + $0x5e0] sm:$0xff] %v556_v60  ;;  %v562_v63 = vld [vmem:[%s3351_s7 + $0xbb8] sm:$0xff]  ;;  %559 = vst [vmem:[%s3356_s8 + $0x5e8] sm:$0xff] %v558_v61  ;;  %v564_v0 = vld [vmem:[%s3351_s7 + $0xc00] sm:$0xff] }
  0x78   : > { %561 = vst [vmem:[%s3356_s8 + $0x5f0] sm:$0xff] %v560_v62  ;;  %563 = vst [vmem:[%s3356_s8 + $0x5f8] sm:$0xff] %v562_v63  ;;  %v566_v1 = vld [vmem:[%s3351_s7 + $0xc08] sm:$0xff]  ;;  %v568_v2 = vld [vmem:[%s3351_s7 + $0xc10] sm:$0xff] }
  0x79   : > { %565 = vst [vmem:[%s3356_s8 + $0x600] sm:$0xff] %v564_v0  ;;  %567 = vst [vmem:[%s3356_s8 + $0x608] sm:$0xff] %v566_v1  ;;  %v570_v3 = vld [vmem:[%s3351_s7 + $0xc18] sm:$0xff]  ;;  %v572_v4 = vld [vmem:[%s3351_s7 + $0xc20] sm:$0xff] }
  0x7a   : > { %569 = vst [vmem:[%s3356_s8 + $0x610] sm:$0xff] %v568_v2  ;;  %v574_v5 = vld [vmem:[%s3351_s7 + $0xc28] sm:$0xff]  ;;  %571 = vst [vmem:[%s3356_s8 + $0x618] sm:$0xff] %v570_v3  ;;  %v576_v6 = vld [vmem:[%s3351_s7 + $0xc30] sm:$0xff] }
  0x7b   : > { %573 = vst [vmem:[%s3356_s8 + $0x620] sm:$0xff] %v572_v4  ;;  %575 = vst [vmem:[%s3356_s8 + $0x628] sm:$0xff] %v574_v5  ;;  %v578_v7 = vld [vmem:[%s3351_s7 + $0xc38] sm:$0xff]  ;;  %v580_v8 = vld [vmem:[%s3351_s7 + $0xc80] sm:$0xff] }
  0x7c   : > { %577 = vst [vmem:[%s3356_s8 + $0x630] sm:$0xff] %v576_v6  ;;  %579 = vst [vmem:[%s3356_s8 + $0x638] sm:$0xff] %v578_v7  ;;  %v582_v9 = vld [vmem:[%s3351_s7 + $0xc88] sm:$0xff]  ;;  %v584_v10 = vld [vmem:[%s3351_s7 + $0xc90] sm:$0xff] }
  0x7d   : > { %581 = vst [vmem:[%s3356_s8 + $0x640] sm:$0xff] %v580_v8  ;;  %v586_v11 = vld [vmem:[%s3351_s7 + $0xc98] sm:$0xff]  ;;  %583 = vst [vmem:[%s3356_s8 + $0x648] sm:$0xff] %v582_v9  ;;  %v588_v12 = vld [vmem:[%s3351_s7 + $0xca0] sm:$0xff] }
  0x7e   : > { %585 = vst [vmem:[%s3356_s8 + $0x650] sm:$0xff] %v584_v10  ;;  %587 = vst [vmem:[%s3356_s8 + $0x658] sm:$0xff] %v586_v11  ;;  %v590_v13 = vld [vmem:[%s3351_s7 + $0xca8] sm:$0xff]  ;;  %v592_v14 = vld [vmem:[%s3351_s7 + $0xcb0] sm:$0xff] }
  0x7f   : > { %589 = vst [vmem:[%s3356_s8 + $0x660] sm:$0xff] %v588_v12  ;;  %591 = vst [vmem:[%s3356_s8 + $0x668] sm:$0xff] %v590_v13  ;;  %v594_v15 = vld [vmem:[%s3351_s7 + $0xcb8] sm:$0xff]  ;;  %v596_v16 = vld [vmem:[%s3351_s7 + $0xd00] sm:$0xff] }
  0x80   : > { %593 = vst [vmem:[%s3356_s8 + $0x670] sm:$0xff] %v592_v14  ;;  %v598_v17 = vld [vmem:[%s3351_s7 + $0xd08] sm:$0xff]  ;;  %595 = vst [vmem:[%s3356_s8 + $0x678] sm:$0xff] %v594_v15  ;;  %v600_v18 = vld [vmem:[%s3351_s7 + $0xd10] sm:$0xff] }
  0x81   : > { %597 = vst [vmem:[%s3356_s8 + $0x680] sm:$0xff] %v596_v16  ;;  %599 = vst [vmem:[%s3356_s8 + $0x688] sm:$0xff] %v598_v17  ;;  %v602_v19 = vld [vmem:[%s3351_s7 + $0xd18] sm:$0xff]  ;;  %v604_v20 = vld [vmem:[%s3351_s7 + $0xd20] sm:$0xff] }
  0x82   : > { %601 = vst [vmem:[%s3356_s8 + $0x690] sm:$0xff] %v600_v18  ;;  %603 = vst [vmem:[%s3356_s8 + $0x698] sm:$0xff] %v602_v19  ;;  %v606_v21 = vld [vmem:[%s3351_s7 + $0xd28] sm:$0xff]  ;;  %v608_v22 = vld [vmem:[%s3351_s7 + $0xd30] sm:$0xff] }
  0x83   : > { %605 = vst [vmem:[%s3356_s8 + $0x6a0] sm:$0xff] %v604_v20  ;;  %v610_v23 = vld [vmem:[%s3351_s7 + $0xd38] sm:$0xff]  ;;  %607 = vst [vmem:[%s3356_s8 + $0x6a8] sm:$0xff] %v606_v21  ;;  %v612_v24 = vld [vmem:[%s3351_s7 + $0xd80] sm:$0xff] }
  0x84   : > { %609 = vst [vmem:[%s3356_s8 + $0x6b0] sm:$0xff] %v608_v22  ;;  %611 = vst [vmem:[%s3356_s8 + $0x6b8] sm:$0xff] %v610_v23  ;;  %v614_v25 = vld [vmem:[%s3351_s7 + $0xd88] sm:$0xff]  ;;  %v616_v26 = vld [vmem:[%s3351_s7 + $0xd90] sm:$0xff] }
  0x85   : > { %613 = vst [vmem:[%s3356_s8 + $0x6c0] sm:$0xff] %v612_v24  ;;  %615 = vst [vmem:[%s3356_s8 + $0x6c8] sm:$0xff] %v614_v25  ;;  %v618_v27 = vld [vmem:[%s3351_s7 + $0xd98] sm:$0xff]  ;;  %v620_v28 = vld [vmem:[%s3351_s7 + $0xda0] sm:$0xff] }
  0x86   : > { %617 = vst [vmem:[%s3356_s8 + $0x6d0] sm:$0xff] %v616_v26  ;;  %v622_v29 = vld [vmem:[%s3351_s7 + $0xda8] sm:$0xff]  ;;  %619 = vst [vmem:[%s3356_s8 + $0x6d8] sm:$0xff] %v618_v27  ;;  %v624_v30 = vld [vmem:[%s3351_s7 + $0xdb0] sm:$0xff] }
  0x87   : > { %621 = vst [vmem:[%s3356_s8 + $0x6e0] sm:$0xff] %v620_v28  ;;  %623 = vst [vmem:[%s3356_s8 + $0x6e8] sm:$0xff] %v622_v29  ;;  %v626_v31 = vld [vmem:[%s3351_s7 + $0xdb8] sm:$0xff]  ;;  %v628_v32 = vld [vmem:[%s3351_s7 + $0xe00] sm:$0xff] }
  0x88   : > { %625 = vst [vmem:[%s3356_s8 + $0x6f0] sm:$0xff] %v624_v30  ;;  %627 = vst [vmem:[%s3356_s8 + $0x6f8] sm:$0xff] %v626_v31  ;;  %v630_v33 = vld [vmem:[%s3351_s7 + $0xe08] sm:$0xff]  ;;  %v632_v34 = vld [vmem:[%s3351_s7 + $0xe10] sm:$0xff] }
  0x89   : > { %629 = vst [vmem:[%s3356_s8 + $0x700] sm:$0xff] %v628_v32  ;;  %v634_v35 = vld [vmem:[%s3351_s7 + $0xe18] sm:$0xff]  ;;  %631 = vst [vmem:[%s3356_s8 + $0x708] sm:$0xff] %v630_v33  ;;  %v636_v36 = vld [vmem:[%s3351_s7 + $0xe20] sm:$0xff] }
  0x8a   : > { %633 = vst [vmem:[%s3356_s8 + $0x710] sm:$0xff] %v632_v34  ;;  %635 = vst [vmem:[%s3356_s8 + $0x718] sm:$0xff] %v634_v35  ;;  %v638_v37 = vld [vmem:[%s3351_s7 + $0xe28] sm:$0xff]  ;;  %v640_v38 = vld [vmem:[%s3351_s7 + $0xe30] sm:$0xff] }
  0x8b   : > { %637 = vst [vmem:[%s3356_s8 + $0x720] sm:$0xff] %v636_v36  ;;  %639 = vst [vmem:[%s3356_s8 + $0x728] sm:$0xff] %v638_v37  ;;  %v642_v39 = vld [vmem:[%s3351_s7 + $0xe38] sm:$0xff]  ;;  %v644_v40 = vld [vmem:[%s3351_s7 + $0xe80] sm:$0xff] }
  0x8c   : > { %641 = vst [vmem:[%s3356_s8 + $0x730] sm:$0xff] %v640_v38  ;;  %v646_v41 = vld [vmem:[%s3351_s7 + $0xe88] sm:$0xff]  ;;  %643 = vst [vmem:[%s3356_s8 + $0x738] sm:$0xff] %v642_v39  ;;  %v648_v42 = vld [vmem:[%s3351_s7 + $0xe90] sm:$0xff] }
  0x8d   : > { %645 = vst [vmem:[%s3356_s8 + $0x740] sm:$0xff] %v644_v40  ;;  %647 = vst [vmem:[%s3356_s8 + $0x748] sm:$0xff] %v646_v41  ;;  %v650_v43 = vld [vmem:[%s3351_s7 + $0xe98] sm:$0xff]  ;;  %v652_v44 = vld [vmem:[%s3351_s7 + $0xea0] sm:$0xff] }
  0x8e   : > { %649 = vst [vmem:[%s3356_s8 + $0x750] sm:$0xff] %v648_v42  ;;  %651 = vst [vmem:[%s3356_s8 + $0x758] sm:$0xff] %v650_v43  ;;  %v654_v45 = vld [vmem:[%s3351_s7 + $0xea8] sm:$0xff]  ;;  %v656_v46 = vld [vmem:[%s3351_s7 + $0xeb0] sm:$0xff] }
  0x8f   : > { %653 = vst [vmem:[%s3356_s8 + $0x760] sm:$0xff] %v652_v44  ;;  %v658_v47 = vld [vmem:[%s3351_s7 + $0xeb8] sm:$0xff]  ;;  %655 = vst [vmem:[%s3356_s8 + $0x768] sm:$0xff] %v654_v45  ;;  %v660_v48 = vld [vmem:[%s3351_s7 + $0xf00] sm:$0xff] }
  0x90   : > { %657 = vst [vmem:[%s3356_s8 + $0x770] sm:$0xff] %v656_v46  ;;  %659 = vst [vmem:[%s3356_s8 + $0x778] sm:$0xff] %v658_v47  ;;  %v662_v49 = vld [vmem:[%s3351_s7 + $0xf08] sm:$0xff]  ;;  %v664_v50 = vld [vmem:[%s3351_s7 + $0xf10] sm:$0xff] }
  0x91   : > { %661 = vst [vmem:[%s3356_s8 + $0x780] sm:$0xff] %v660_v48  ;;  %663 = vst [vmem:[%s3356_s8 + $0x788] sm:$0xff] %v662_v49  ;;  %v666_v51 = vld [vmem:[%s3351_s7 + $0xf18] sm:$0xff]  ;;  %v668_v52 = vld [vmem:[%s3351_s7 + $0xf20] sm:$0xff] }
  0x92   : > { %665 = vst [vmem:[%s3356_s8 + $0x790] sm:$0xff] %v664_v50  ;;  %v670_v53 = vld [vmem:[%s3351_s7 + $0xf28] sm:$0xff]  ;;  %667 = vst [vmem:[%s3356_s8 + $0x798] sm:$0xff] %v666_v51  ;;  %v672_v54 = vld [vmem:[%s3351_s7 + $0xf30] sm:$0xff] }
  0x93   : > { %669 = vst [vmem:[%s3356_s8 + $0x7a0] sm:$0xff] %v668_v52  ;;  %671 = vst [vmem:[%s3356_s8 + $0x7a8] sm:$0xff] %v670_v53  ;;  %v674_v55 = vld [vmem:[%s3351_s7 + $0xf38] sm:$0xff]  ;;  %v676_v56 = vld [vmem:[%s3351_s7 + $0xf80] sm:$0xff] }
  0x94   : > { %673 = vst [vmem:[%s3356_s8 + $0x7b0] sm:$0xff] %v672_v54  ;;  %675 = vst [vmem:[%s3356_s8 + $0x7b8] sm:$0xff] %v674_v55  ;;  %v678_v57 = vld [vmem:[%s3351_s7 + $0xf88] sm:$0xff]  ;;  %v680_v58 = vld [vmem:[%s3351_s7 + $0xf90] sm:$0xff] }
  0x95   : > { %677 = vst [vmem:[%s3356_s8 + $0x7c0] sm:$0xff] %v676_v56  ;;  %v682_v59 = vld [vmem:[%s3351_s7 + $0xf98] sm:$0xff]  ;;  %679 = vst [vmem:[%s3356_s8 + $0x7c8] sm:$0xff] %v678_v57  ;;  %v684_v60 = vld [vmem:[%s3351_s7 + $0xfa0] sm:$0xff] }
  0x96   : > { %681 = vst [vmem:[%s3356_s8 + $0x7d0] sm:$0xff] %v680_v58  ;;  %683 = vst [vmem:[%s3356_s8 + $0x7d8] sm:$0xff] %v682_v59  ;;  %v686_v61 = vld [vmem:[%s3351_s7 + $0xfa8] sm:$0xff]  ;;  %v688_v62 = vld [vmem:[%s3351_s7 + $0xfb0] sm:$0xff] }
  0x97   : > { %685 = vst [vmem:[%s3356_s8 + $0x7e0] sm:$0xff] %v684_v60  ;;  %687 = vst [vmem:[%s3356_s8 + $0x7e8] sm:$0xff] %v686_v61  ;;  %v690_v63 = vld [vmem:[%s3351_s7 + $0xfb8] sm:$0xff]  ;;  %v692_v0 = vld [vmem:[%s3351_s7 + $0x1000] sm:$0xff] }
  0x98   : > { %689 = vst [vmem:[%s3356_s8 + $0x7f0] sm:$0xff] %v688_v62  ;;  %v694_v1 = vld [vmem:[%s3351_s7 + $0x1008] sm:$0xff]  ;;  %691 = vst [vmem:[%s3356_s8 + $0x7f8] sm:$0xff] %v690_v63  ;;  %v696_v2 = vld [vmem:[%s3351_s7 + $0x1010] sm:$0xff] }
  0x99   : > { %693 = vst [vmem:[%s3356_s8 + $0x800] sm:$0xff] %v692_v0  ;;  %695 = vst [vmem:[%s3356_s8 + $0x808] sm:$0xff] %v694_v1  ;;  %v698_v3 = vld [vmem:[%s3351_s7 + $0x1018] sm:$0xff]  ;;  %v700_v4 = vld [vmem:[%s3351_s7 + $0x1020] sm:$0xff] }
  0x9a   : > { %697 = vst [vmem:[%s3356_s8 + $0x810] sm:$0xff] %v696_v2  ;;  %699 = vst [vmem:[%s3356_s8 + $0x818] sm:$0xff] %v698_v3  ;;  %v702_v5 = vld [vmem:[%s3351_s7 + $0x1028] sm:$0xff]  ;;  %v704_v6 = vld [vmem:[%s3351_s7 + $0x1030] sm:$0xff] }
  0x9b   : > { %701 = vst [vmem:[%s3356_s8 + $0x820] sm:$0xff] %v700_v4  ;;  %v706_v7 = vld [vmem:[%s3351_s7 + $0x1038] sm:$0xff]  ;;  %703 = vst [vmem:[%s3356_s8 + $0x828] sm:$0xff] %v702_v5  ;;  %v708_v8 = vld [vmem:[%s3351_s7 + $0x1080] sm:$0xff] }
  0x9c   : > { %705 = vst [vmem:[%s3356_s8 + $0x830] sm:$0xff] %v704_v6  ;;  %707 = vst [vmem:[%s3356_s8 + $0x838] sm:$0xff] %v706_v7  ;;  %v710_v9 = vld [vmem:[%s3351_s7 + $0x1088] sm:$0xff]  ;;  %v712_v10 = vld [vmem:[%s3351_s7 + $0x1090] sm:$0xff] }
  0x9d   : > { %709 = vst [vmem:[%s3356_s8 + $0x840] sm:$0xff] %v708_v8  ;;  %711 = vst [vmem:[%s3356_s8 + $0x848] sm:$0xff] %v710_v9  ;;  %v714_v11 = vld [vmem:[%s3351_s7 + $0x1098] sm:$0xff]  ;;  %v716_v12 = vld [vmem:[%s3351_s7 + $0x10a0] sm:$0xff] }
  0x9e   : > { %713 = vst [vmem:[%s3356_s8 + $0x850] sm:$0xff] %v712_v10  ;;  %v718_v13 = vld [vmem:[%s3351_s7 + $0x10a8] sm:$0xff]  ;;  %715 = vst [vmem:[%s3356_s8 + $0x858] sm:$0xff] %v714_v11  ;;  %v720_v14 = vld [vmem:[%s3351_s7 + $0x10b0] sm:$0xff] }
  0x9f   : > { %717 = vst [vmem:[%s3356_s8 + $0x860] sm:$0xff] %v716_v12  ;;  %719 = vst [vmem:[%s3356_s8 + $0x868] sm:$0xff] %v718_v13  ;;  %v722_v15 = vld [vmem:[%s3351_s7 + $0x10b8] sm:$0xff]  ;;  %v724_v16 = vld [vmem:[%s3351_s7 + $0x1100] sm:$0xff] }
  0xa0   : > { %721 = vst [vmem:[%s3356_s8 + $0x870] sm:$0xff] %v720_v14  ;;  %723 = vst [vmem:[%s3356_s8 + $0x878] sm:$0xff] %v722_v15  ;;  %v726_v17 = vld [vmem:[%s3351_s7 + $0x1108] sm:$0xff]  ;;  %v728_v18 = vld [vmem:[%s3351_s7 + $0x1110] sm:$0xff] }
  0xa1   : > { %725 = vst [vmem:[%s3356_s8 + $0x880] sm:$0xff] %v724_v16  ;;  %v730_v19 = vld [vmem:[%s3351_s7 + $0x1118] sm:$0xff]  ;;  %727 = vst [vmem:[%s3356_s8 + $0x888] sm:$0xff] %v726_v17  ;;  %v732_v20 = vld [vmem:[%s3351_s7 + $0x1120] sm:$0xff] }
  0xa2   : > { %729 = vst [vmem:[%s3356_s8 + $0x890] sm:$0xff] %v728_v18  ;;  %731 = vst [vmem:[%s3356_s8 + $0x898] sm:$0xff] %v730_v19  ;;  %v734_v21 = vld [vmem:[%s3351_s7 + $0x1128] sm:$0xff]  ;;  %v736_v22 = vld [vmem:[%s3351_s7 + $0x1130] sm:$0xff] }
  0xa3   : > { %733 = vst [vmem:[%s3356_s8 + $0x8a0] sm:$0xff] %v732_v20  ;;  %735 = vst [vmem:[%s3356_s8 + $0x8a8] sm:$0xff] %v734_v21  ;;  %v738_v23 = vld [vmem:[%s3351_s7 + $0x1138] sm:$0xff]  ;;  %v740_v24 = vld [vmem:[%s3351_s7 + $0x1180] sm:$0xff] }
  0xa4   : > { %737 = vst [vmem:[%s3356_s8 + $0x8b0] sm:$0xff] %v736_v22  ;;  %v742_v25 = vld [vmem:[%s3351_s7 + $0x1188] sm:$0xff]  ;;  %739 = vst [vmem:[%s3356_s8 + $0x8b8] sm:$0xff] %v738_v23  ;;  %v744_v26 = vld [vmem:[%s3351_s7 + $0x1190] sm:$0xff] }
  0xa5   : > { %741 = vst [vmem:[%s3356_s8 + $0x8c0] sm:$0xff] %v740_v24  ;;  %743 = vst [vmem:[%s3356_s8 + $0x8c8] sm:$0xff] %v742_v25  ;;  %v746_v27 = vld [vmem:[%s3351_s7 + $0x1198] sm:$0xff]  ;;  %v748_v28 = vld [vmem:[%s3351_s7 + $0x11a0] sm:$0xff] }
  0xa6   : > { %745 = vst [vmem:[%s3356_s8 + $0x8d0] sm:$0xff] %v744_v26  ;;  %747 = vst [vmem:[%s3356_s8 + $0x8d8] sm:$0xff] %v746_v27  ;;  %v750_v29 = vld [vmem:[%s3351_s7 + $0x11a8] sm:$0xff]  ;;  %v752_v30 = vld [vmem:[%s3351_s7 + $0x11b0] sm:$0xff] }
  0xa7   : > { %749 = vst [vmem:[%s3356_s8 + $0x8e0] sm:$0xff] %v748_v28  ;;  %v754_v31 = vld [vmem:[%s3351_s7 + $0x11b8] sm:$0xff]  ;;  %751 = vst [vmem:[%s3356_s8 + $0x8e8] sm:$0xff] %v750_v29  ;;  %v756_v32 = vld [vmem:[%s3351_s7 + $0x1200] sm:$0xff] }
  0xa8   : > { %753 = vst [vmem:[%s3356_s8 + $0x8f0] sm:$0xff] %v752_v30  ;;  %755 = vst [vmem:[%s3356_s8 + $0x8f8] sm:$0xff] %v754_v31  ;;  %v758_v33 = vld [vmem:[%s3351_s7 + $0x1208] sm:$0xff]  ;;  %v760_v34 = vld [vmem:[%s3351_s7 + $0x1210] sm:$0xff] }
  0xa9   : > { %757 = vst [vmem:[%s3356_s8 + $0x900] sm:$0xff] %v756_v32  ;;  %759 = vst [vmem:[%s3356_s8 + $0x908] sm:$0xff] %v758_v33  ;;  %v762_v35 = vld [vmem:[%s3351_s7 + $0x1218] sm:$0xff]  ;;  %v764_v36 = vld [vmem:[%s3351_s7 + $0x1220] sm:$0xff] }
  0xaa   : > { %761 = vst [vmem:[%s3356_s8 + $0x910] sm:$0xff] %v760_v34  ;;  %v766_v37 = vld [vmem:[%s3351_s7 + $0x1228] sm:$0xff]  ;;  %763 = vst [vmem:[%s3356_s8 + $0x918] sm:$0xff] %v762_v35  ;;  %v768_v38 = vld [vmem:[%s3351_s7 + $0x1230] sm:$0xff] }
  0xab   : > { %765 = vst [vmem:[%s3356_s8 + $0x920] sm:$0xff] %v764_v36  ;;  %767 = vst [vmem:[%s3356_s8 + $0x928] sm:$0xff] %v766_v37  ;;  %v770_v39 = vld [vmem:[%s3351_s7 + $0x1238] sm:$0xff]  ;;  %v772_v40 = vld [vmem:[%s3351_s7 + $0x1280] sm:$0xff] }
  0xac   : > { %769 = vst [vmem:[%s3356_s8 + $0x930] sm:$0xff] %v768_v38  ;;  %771 = vst [vmem:[%s3356_s8 + $0x938] sm:$0xff] %v770_v39  ;;  %v774_v41 = vld [vmem:[%s3351_s7 + $0x1288] sm:$0xff]  ;;  %v776_v42 = vld [vmem:[%s3351_s7 + $0x1290] sm:$0xff] }
  0xad   : > { %773 = vst [vmem:[%s3356_s8 + $0x940] sm:$0xff] %v772_v40  ;;  %v778_v43 = vld [vmem:[%s3351_s7 + $0x1298] sm:$0xff]  ;;  %775 = vst [vmem:[%s3356_s8 + $0x948] sm:$0xff] %v774_v41  ;;  %v780_v44 = vld [vmem:[%s3351_s7 + $0x12a0] sm:$0xff] }
  0xae   : > { %777 = vst [vmem:[%s3356_s8 + $0x950] sm:$0xff] %v776_v42  ;;  %779 = vst [vmem:[%s3356_s8 + $0x958] sm:$0xff] %v778_v43  ;;  %v782_v45 = vld [vmem:[%s3351_s7 + $0x12a8] sm:$0xff]  ;;  %v784_v46 = vld [vmem:[%s3351_s7 + $0x12b0] sm:$0xff] }
  0xaf   : > { %781 = vst [vmem:[%s3356_s8 + $0x960] sm:$0xff] %v780_v44  ;;  %783 = vst [vmem:[%s3356_s8 + $0x968] sm:$0xff] %v782_v45  ;;  %v786_v47 = vld [vmem:[%s3351_s7 + $0x12b8] sm:$0xff]  ;;  %v788_v48 = vld [vmem:[%s3351_s7 + $0x1300] sm:$0xff] }
  0xb0   : > { %785 = vst [vmem:[%s3356_s8 + $0x970] sm:$0xff] %v784_v46  ;;  %v790_v49 = vld [vmem:[%s3351_s7 + $0x1308] sm:$0xff]  ;;  %787 = vst [vmem:[%s3356_s8 + $0x978] sm:$0xff] %v786_v47  ;;  %v792_v50 = vld [vmem:[%s3351_s7 + $0x1310] sm:$0xff] }
  0xb1   : > { %789 = vst [vmem:[%s3356_s8 + $0x980] sm:$0xff] %v788_v48  ;;  %791 = vst [vmem:[%s3356_s8 + $0x988] sm:$0xff] %v790_v49  ;;  %v794_v51 = vld [vmem:[%s3351_s7 + $0x1318] sm:$0xff]  ;;  %v796_v52 = vld [vmem:[%s3351_s7 + $0x1320] sm:$0xff] }
  0xb2   : > { %793 = vst [vmem:[%s3356_s8 + $0x990] sm:$0xff] %v792_v50  ;;  %795 = vst [vmem:[%s3356_s8 + $0x998] sm:$0xff] %v794_v51  ;;  %v798_v53 = vld [vmem:[%s3351_s7 + $0x1328] sm:$0xff]  ;;  %v800_v54 = vld [vmem:[%s3351_s7 + $0x1330] sm:$0xff] }
  0xb3   : > { %797 = vst [vmem:[%s3356_s8 + $0x9a0] sm:$0xff] %v796_v52  ;;  %v802_v55 = vld [vmem:[%s3351_s7 + $0x1338] sm:$0xff]  ;;  %799 = vst [vmem:[%s3356_s8 + $0x9a8] sm:$0xff] %v798_v53  ;;  %v804_v56 = vld [vmem:[%s3351_s7 + $0x1380] sm:$0xff] }
  0xb4   : > { %801 = vst [vmem:[%s3356_s8 + $0x9b0] sm:$0xff] %v800_v54  ;;  %803 = vst [vmem:[%s3356_s8 + $0x9b8] sm:$0xff] %v802_v55  ;;  %v806_v57 = vld [vmem:[%s3351_s7 + $0x1388] sm:$0xff]  ;;  %v808_v58 = vld [vmem:[%s3351_s7 + $0x1390] sm:$0xff] }
  0xb5   : > { %805 = vst [vmem:[%s3356_s8 + $0x9c0] sm:$0xff] %v804_v56  ;;  %807 = vst [vmem:[%s3356_s8 + $0x9c8] sm:$0xff] %v806_v57  ;;  %v810_v59 = vld [vmem:[%s3351_s7 + $0x1398] sm:$0xff]  ;;  %v812_v60 = vld [vmem:[%s3351_s7 + $0x13a0] sm:$0xff] }
  0xb6   : > { %809 = vst [vmem:[%s3356_s8 + $0x9d0] sm:$0xff] %v808_v58  ;;  %v814_v61 = vld [vmem:[%s3351_s7 + $0x13a8] sm:$0xff]  ;;  %811 = vst [vmem:[%s3356_s8 + $0x9d8] sm:$0xff] %v810_v59  ;;  %v816_v62 = vld [vmem:[%s3351_s7 + $0x13b0] sm:$0xff] }
  0xb7   : > { %813 = vst [vmem:[%s3356_s8 + $0x9e0] sm:$0xff] %v812_v60  ;;  %815 = vst [vmem:[%s3356_s8 + $0x9e8] sm:$0xff] %v814_v61  ;;  %v818_v63 = vld [vmem:[%s3351_s7 + $0x13b8] sm:$0xff]  ;;  %v820_v0 = vld [vmem:[%s3351_s7 + $0x1400] sm:$0xff] }
  0xb8   : > { %817 = vst [vmem:[%s3356_s8 + $0x9f0] sm:$0xff] %v816_v62  ;;  %819 = vst [vmem:[%s3356_s8 + $0x9f8] sm:$0xff] %v818_v63  ;;  %v822_v1 = vld [vmem:[%s3351_s7 + $0x1408] sm:$0xff]  ;;  %v824_v2 = vld [vmem:[%s3351_s7 + $0x1410] sm:$0xff] }
  0xb9   : > { %821 = vst [vmem:[%s3356_s8 + $0xa00] sm:$0xff] %v820_v0  ;;  %v826_v3 = vld [vmem:[%s3351_s7 + $0x1418] sm:$0xff]  ;;  %823 = vst [vmem:[%s3356_s8 + $0xa08] sm:$0xff] %v822_v1  ;;  %v828_v4 = vld [vmem:[%s3351_s7 + $0x1420] sm:$0xff] }
  0xba   : > { %825 = vst [vmem:[%s3356_s8 + $0xa10] sm:$0xff] %v824_v2  ;;  %827 = vst [vmem:[%s3356_s8 + $0xa18] sm:$0xff] %v826_v3  ;;  %v830_v5 = vld [vmem:[%s3351_s7 + $0x1428] sm:$0xff]  ;;  %v832_v6 = vld [vmem:[%s3351_s7 + $0x1430] sm:$0xff] }
  0xbb   : > { %829 = vst [vmem:[%s3356_s8 + $0xa20] sm:$0xff] %v828_v4  ;;  %831 = vst [vmem:[%s3356_s8 + $0xa28] sm:$0xff] %v830_v5  ;;  %v834_v7 = vld [vmem:[%s3351_s7 + $0x1438] sm:$0xff]  ;;  %v836_v8 = vld [vmem:[%s3351_s7 + $0x1480] sm:$0xff] }
  0xbc   : > { %833 = vst [vmem:[%s3356_s8 + $0xa30] sm:$0xff] %v832_v6  ;;  %v838_v9 = vld [vmem:[%s3351_s7 + $0x1488] sm:$0xff]  ;;  %835 = vst [vmem:[%s3356_s8 + $0xa38] sm:$0xff] %v834_v7  ;;  %v840_v10 = vld [vmem:[%s3351_s7 + $0x1490] sm:$0xff] }
  0xbd   : > { %837 = vst [vmem:[%s3356_s8 + $0xa40] sm:$0xff] %v836_v8  ;;  %839 = vst [vmem:[%s3356_s8 + $0xa48] sm:$0xff] %v838_v9  ;;  %v842_v11 = vld [vmem:[%s3351_s7 + $0x1498] sm:$0xff]  ;;  %v844_v12 = vld [vmem:[%s3351_s7 + $0x14a0] sm:$0xff] }
  0xbe   : > { %841 = vst [vmem:[%s3356_s8 + $0xa50] sm:$0xff] %v840_v10  ;;  %843 = vst [vmem:[%s3356_s8 + $0xa58] sm:$0xff] %v842_v11  ;;  %v846_v13 = vld [vmem:[%s3351_s7 + $0x14a8] sm:$0xff]  ;;  %v848_v14 = vld [vmem:[%s3351_s7 + $0x14b0] sm:$0xff] }
  0xbf   : > { %845 = vst [vmem:[%s3356_s8 + $0xa60] sm:$0xff] %v844_v12  ;;  %v850_v15 = vld [vmem:[%s3351_s7 + $0x14b8] sm:$0xff]  ;;  %847 = vst [vmem:[%s3356_s8 + $0xa68] sm:$0xff] %v846_v13  ;;  %v852_v16 = vld [vmem:[%s3351_s7 + $0x1500] sm:$0xff] }
  0xc0   : > { %849 = vst [vmem:[%s3356_s8 + $0xa70] sm:$0xff] %v848_v14  ;;  %851 = vst [vmem:[%s3356_s8 + $0xa78] sm:$0xff] %v850_v15  ;;  %v854_v17 = vld [vmem:[%s3351_s7 + $0x1508] sm:$0xff]  ;;  %v856_v18 = vld [vmem:[%s3351_s7 + $0x1510] sm:$0xff] }
  0xc1   : > { %853 = vst [vmem:[%s3356_s8 + $0xa80] sm:$0xff] %v852_v16  ;;  %855 = vst [vmem:[%s3356_s8 + $0xa88] sm:$0xff] %v854_v17  ;;  %v858_v19 = vld [vmem:[%s3351_s7 + $0x1518] sm:$0xff]  ;;  %v860_v20 = vld [vmem:[%s3351_s7 + $0x1520] sm:$0xff] }
  0xc2   : > { %857 = vst [vmem:[%s3356_s8 + $0xa90] sm:$0xff] %v856_v18  ;;  %v862_v21 = vld [vmem:[%s3351_s7 + $0x1528] sm:$0xff]  ;;  %859 = vst [vmem:[%s3356_s8 + $0xa98] sm:$0xff] %v858_v19  ;;  %v864_v22 = vld [vmem:[%s3351_s7 + $0x1530] sm:$0xff] }
  0xc3   : > { %861 = vst [vmem:[%s3356_s8 + $0xaa0] sm:$0xff] %v860_v20  ;;  %863 = vst [vmem:[%s3356_s8 + $0xaa8] sm:$0xff] %v862_v21  ;;  %v866_v23 = vld [vmem:[%s3351_s7 + $0x1538] sm:$0xff]  ;;  %v868_v24 = vld [vmem:[%s3351_s7 + $0x1580] sm:$0xff] }
  0xc4   : > { %865 = vst [vmem:[%s3356_s8 + $0xab0] sm:$0xff] %v864_v22  ;;  %867 = vst [vmem:[%s3356_s8 + $0xab8] sm:$0xff] %v866_v23  ;;  %v870_v25 = vld [vmem:[%s3351_s7 + $0x1588] sm:$0xff]  ;;  %v872_v26 = vld [vmem:[%s3351_s7 + $0x1590] sm:$0xff] }
  0xc5   : > { %869 = vst [vmem:[%s3356_s8 + $0xac0] sm:$0xff] %v868_v24  ;;  %v874_v27 = vld [vmem:[%s3351_s7 + $0x1598] sm:$0xff]  ;;  %871 = vst [vmem:[%s3356_s8 + $0xac8] sm:$0xff] %v870_v25  ;;  %v876_v28 = vld [vmem:[%s3351_s7 + $0x15a0] sm:$0xff] }
  0xc6   : > { %873 = vst [vmem:[%s3356_s8 + $0xad0] sm:$0xff] %v872_v26  ;;  %875 = vst [vmem:[%s3356_s8 + $0xad8] sm:$0xff] %v874_v27  ;;  %v878_v29 = vld [vmem:[%s3351_s7 + $0x15a8] sm:$0xff]  ;;  %v880_v30 = vld [vmem:[%s3351_s7 + $0x15b0] sm:$0xff] }
  0xc7   : > { %877 = vst [vmem:[%s3356_s8 + $0xae0] sm:$0xff] %v876_v28  ;;  %879 = vst [vmem:[%s3356_s8 + $0xae8] sm:$0xff] %v878_v29  ;;  %v882_v31 = vld [vmem:[%s3351_s7 + $0x15b8] sm:$0xff]  ;;  %v884_v32 = vld [vmem:[%s3351_s7 + $0x1600] sm:$0xff] }
  0xc8   : > { %881 = vst [vmem:[%s3356_s8 + $0xaf0] sm:$0xff] %v880_v30  ;;  %v886_v33 = vld [vmem:[%s3351_s7 + $0x1608] sm:$0xff]  ;;  %883 = vst [vmem:[%s3356_s8 + $0xaf8] sm:$0xff] %v882_v31  ;;  %v888_v34 = vld [vmem:[%s3351_s7 + $0x1610] sm:$0xff] }
  0xc9   : > { %885 = vst [vmem:[%s3356_s8 + $0xb00] sm:$0xff] %v884_v32  ;;  %887 = vst [vmem:[%s3356_s8 + $0xb08] sm:$0xff] %v886_v33  ;;  %v890_v35 = vld [vmem:[%s3351_s7 + $0x1618] sm:$0xff]  ;;  %v892_v36 = vld [vmem:[%s3351_s7 + $0x1620] sm:$0xff] }
  0xca   : > { %889 = vst [vmem:[%s3356_s8 + $0xb10] sm:$0xff] %v888_v34  ;;  %891 = vst [vmem:[%s3356_s8 + $0xb18] sm:$0xff] %v890_v35  ;;  %v894_v37 = vld [vmem:[%s3351_s7 + $0x1628] sm:$0xff]  ;;  %v896_v38 = vld [vmem:[%s3351_s7 + $0x1630] sm:$0xff] }
  0xcb   : > { %893 = vst [vmem:[%s3356_s8 + $0xb20] sm:$0xff] %v892_v36  ;;  %v898_v39 = vld [vmem:[%s3351_s7 + $0x1638] sm:$0xff]  ;;  %895 = vst [vmem:[%s3356_s8 + $0xb28] sm:$0xff] %v894_v37  ;;  %v900_v40 = vld [vmem:[%s3351_s7 + $0x1680] sm:$0xff] }
  0xcc   : > { %897 = vst [vmem:[%s3356_s8 + $0xb30] sm:$0xff] %v896_v38  ;;  %899 = vst [vmem:[%s3356_s8 + $0xb38] sm:$0xff] %v898_v39  ;;  %v902_v41 = vld [vmem:[%s3351_s7 + $0x1688] sm:$0xff]  ;;  %v904_v42 = vld [vmem:[%s3351_s7 + $0x1690] sm:$0xff] }
  0xcd   : > { %901 = vst [vmem:[%s3356_s8 + $0xb40] sm:$0xff] %v900_v40  ;;  %903 = vst [vmem:[%s3356_s8 + $0xb48] sm:$0xff] %v902_v41  ;;  %v906_v43 = vld [vmem:[%s3351_s7 + $0x1698] sm:$0xff]  ;;  %v908_v44 = vld [vmem:[%s3351_s7 + $0x16a0] sm:$0xff] }
  0xce   : > { %905 = vst [vmem:[%s3356_s8 + $0xb50] sm:$0xff] %v904_v42  ;;  %v910_v45 = vld [vmem:[%s3351_s7 + $0x16a8] sm:$0xff]  ;;  %907 = vst [vmem:[%s3356_s8 + $0xb58] sm:$0xff] %v906_v43  ;;  %v912_v46 = vld [vmem:[%s3351_s7 + $0x16b0] sm:$0xff] }
  0xcf   : > { %909 = vst [vmem:[%s3356_s8 + $0xb60] sm:$0xff] %v908_v44  ;;  %911 = vst [vmem:[%s3356_s8 + $0xb68] sm:$0xff] %v910_v45  ;;  %v914_v47 = vld [vmem:[%s3351_s7 + $0x16b8] sm:$0xff]  ;;  %v916_v48 = vld [vmem:[%s3351_s7 + $0x1700] sm:$0xff] }
  0xd0   : > { %913 = vst [vmem:[%s3356_s8 + $0xb70] sm:$0xff] %v912_v46  ;;  %915 = vst [vmem:[%s3356_s8 + $0xb78] sm:$0xff] %v914_v47  ;;  %v918_v49 = vld [vmem:[%s3351_s7 + $0x1708] sm:$0xff]  ;;  %v920_v50 = vld [vmem:[%s3351_s7 + $0x1710] sm:$0xff] }
  0xd1   : > { %917 = vst [vmem:[%s3356_s8 + $0xb80] sm:$0xff] %v916_v48  ;;  %v922_v51 = vld [vmem:[%s3351_s7 + $0x1718] sm:$0xff]  ;;  %919 = vst [vmem:[%s3356_s8 + $0xb88] sm:$0xff] %v918_v49  ;;  %v924_v52 = vld [vmem:[%s3351_s7 + $0x1720] sm:$0xff] }
  0xd2   : > { %921 = vst [vmem:[%s3356_s8 + $0xb90] sm:$0xff] %v920_v50  ;;  %923 = vst [vmem:[%s3356_s8 + $0xb98] sm:$0xff] %v922_v51  ;;  %v926_v53 = vld [vmem:[%s3351_s7 + $0x1728] sm:$0xff]  ;;  %v928_v54 = vld [vmem:[%s3351_s7 + $0x1730] sm:$0xff] }
  0xd3   : > { %925 = vst [vmem:[%s3356_s8 + $0xba0] sm:$0xff] %v924_v52  ;;  %927 = vst [vmem:[%s3356_s8 + $0xba8] sm:$0xff] %v926_v53  ;;  %v930_v55 = vld [vmem:[%s3351_s7 + $0x1738] sm:$0xff]  ;;  %v932_v56 = vld [vmem:[%s3351_s7 + $0x1780] sm:$0xff] }
  0xd4   : > { %929 = vst [vmem:[%s3356_s8 + $0xbb0] sm:$0xff] %v928_v54  ;;  %v934_v57 = vld [vmem:[%s3351_s7 + $0x1788] sm:$0xff]  ;;  %931 = vst [vmem:[%s3356_s8 + $0xbb8] sm:$0xff] %v930_v55  ;;  %v936_v58 = vld [vmem:[%s3351_s7 + $0x1790] sm:$0xff] }
  0xd5   : > { %933 = vst [vmem:[%s3356_s8 + $0xbc0] sm:$0xff] %v932_v56  ;;  %935 = vst [vmem:[%s3356_s8 + $0xbc8] sm:$0xff] %v934_v57  ;;  %v938_v59 = vld [vmem:[%s3351_s7 + $0x1798] sm:$0xff]  ;;  %v940_v60 = vld [vmem:[%s3351_s7 + $0x17a0] sm:$0xff] }
  0xd6   : > { %937 = vst [vmem:[%s3356_s8 + $0xbd0] sm:$0xff] %v936_v58  ;;  %939 = vst [vmem:[%s3356_s8 + $0xbd8] sm:$0xff] %v938_v59  ;;  %v942_v61 = vld [vmem:[%s3351_s7 + $0x17a8] sm:$0xff]  ;;  %v944_v62 = vld [vmem:[%s3351_s7 + $0x17b0] sm:$0xff] }
  0xd7   : > { %941 = vst [vmem:[%s3356_s8 + $0xbe0] sm:$0xff] %v940_v60  ;;  %v946_v63 = vld [vmem:[%s3351_s7 + $0x17b8] sm:$0xff]  ;;  %943 = vst [vmem:[%s3356_s8 + $0xbe8] sm:$0xff] %v942_v61  ;;  %v948_v0 = vld [vmem:[%s3351_s7 + $0x1800] sm:$0xff] }
  0xd8   : > { %945 = vst [vmem:[%s3356_s8 + $0xbf0] sm:$0xff] %v944_v62  ;;  %947 = vst [vmem:[%s3356_s8 + $0xbf8] sm:$0xff] %v946_v63  ;;  %v950_v1 = vld [vmem:[%s3351_s7 + $0x1808] sm:$0xff]  ;;  %v952_v2 = vld [vmem:[%s3351_s7 + $0x1810] sm:$0xff] }
  0xd9   : > { %949 = vst [vmem:[%s3356_s8 + $0xc00] sm:$0xff] %v948_v0  ;;  %951 = vst [vmem:[%s3356_s8 + $0xc08] sm:$0xff] %v950_v1  ;;  %v954_v3 = vld [vmem:[%s3351_s7 + $0x1818] sm:$0xff]  ;;  %v956_v4 = vld [vmem:[%s3351_s7 + $0x1820] sm:$0xff] }
  0xda   : > { %953 = vst [vmem:[%s3356_s8 + $0xc10] sm:$0xff] %v952_v2  ;;  %v958_v5 = vld [vmem:[%s3351_s7 + $0x1828] sm:$0xff]  ;;  %955 = vst [vmem:[%s3356_s8 + $0xc18] sm:$0xff] %v954_v3  ;;  %v960_v6 = vld [vmem:[%s3351_s7 + $0x1830] sm:$0xff] }
  0xdb   : > { %957 = vst [vmem:[%s3356_s8 + $0xc20] sm:$0xff] %v956_v4  ;;  %959 = vst [vmem:[%s3356_s8 + $0xc28] sm:$0xff] %v958_v5  ;;  %v962_v7 = vld [vmem:[%s3351_s7 + $0x1838] sm:$0xff]  ;;  %v964_v8 = vld [vmem:[%s3351_s7 + $0x1880] sm:$0xff] }
  0xdc   : > { %961 = vst [vmem:[%s3356_s8 + $0xc30] sm:$0xff] %v960_v6  ;;  %963 = vst [vmem:[%s3356_s8 + $0xc38] sm:$0xff] %v962_v7  ;;  %v966_v9 = vld [vmem:[%s3351_s7 + $0x1888] sm:$0xff]  ;;  %v968_v10 = vld [vmem:[%s3351_s7 + $0x1890] sm:$0xff] }
  0xdd   : > { %965 = vst [vmem:[%s3356_s8 + $0xc40] sm:$0xff] %v964_v8  ;;  %v970_v11 = vld [vmem:[%s3351_s7 + $0x1898] sm:$0xff]  ;;  %967 = vst [vmem:[%s3356_s8 + $0xc48] sm:$0xff] %v966_v9  ;;  %v972_v12 = vld [vmem:[%s3351_s7 + $0x18a0] sm:$0xff] }
  0xde   : > { %969 = vst [vmem:[%s3356_s8 + $0xc50] sm:$0xff] %v968_v10  ;;  %971 = vst [vmem:[%s3356_s8 + $0xc58] sm:$0xff] %v970_v11  ;;  %v974_v13 = vld [vmem:[%s3351_s7 + $0x18a8] sm:$0xff]  ;;  %v976_v14 = vld [vmem:[%s3351_s7 + $0x18b0] sm:$0xff] }
  0xdf   : > { %973 = vst [vmem:[%s3356_s8 + $0xc60] sm:$0xff] %v972_v12  ;;  %975 = vst [vmem:[%s3356_s8 + $0xc68] sm:$0xff] %v974_v13  ;;  %v978_v15 = vld [vmem:[%s3351_s7 + $0x18b8] sm:$0xff]  ;;  %v980_v16 = vld [vmem:[%s3351_s7 + $0x1900] sm:$0xff] }
  0xe0   : > { %977 = vst [vmem:[%s3356_s8 + $0xc70] sm:$0xff] %v976_v14  ;;  %v982_v17 = vld [vmem:[%s3351_s7 + $0x1908] sm:$0xff]  ;;  %979 = vst [vmem:[%s3356_s8 + $0xc78] sm:$0xff] %v978_v15  ;;  %v984_v18 = vld [vmem:[%s3351_s7 + $0x1910] sm:$0xff] }
  0xe1   : > { %981 = vst [vmem:[%s3356_s8 + $0xc80] sm:$0xff] %v980_v16  ;;  %983 = vst [vmem:[%s3356_s8 + $0xc88] sm:$0xff] %v982_v17  ;;  %v986_v19 = vld [vmem:[%s3351_s7 + $0x1918] sm:$0xff]  ;;  %v988_v20 = vld [vmem:[%s3351_s7 + $0x1920] sm:$0xff] }
  0xe2   : > { %985 = vst [vmem:[%s3356_s8 + $0xc90] sm:$0xff] %v984_v18  ;;  %987 = vst [vmem:[%s3356_s8 + $0xc98] sm:$0xff] %v986_v19  ;;  %v990_v21 = vld [vmem:[%s3351_s7 + $0x1928] sm:$0xff]  ;;  %v992_v22 = vld [vmem:[%s3351_s7 + $0x1930] sm:$0xff] }
  0xe3   : > { %989 = vst [vmem:[%s3356_s8 + $0xca0] sm:$0xff] %v988_v20  ;;  %v994_v23 = vld [vmem:[%s3351_s7 + $0x1938] sm:$0xff]  ;;  %991 = vst [vmem:[%s3356_s8 + $0xca8] sm:$0xff] %v990_v21  ;;  %v996_v24 = vld [vmem:[%s3351_s7 + $0x1980] sm:$0xff] }
  0xe4   : > { %993 = vst [vmem:[%s3356_s8 + $0xcb0] sm:$0xff] %v992_v22  ;;  %995 = vst [vmem:[%s3356_s8 + $0xcb8] sm:$0xff] %v994_v23  ;;  %v998_v25 = vld [vmem:[%s3351_s7 + $0x1988] sm:$0xff]  ;;  %v1000_v26 = vld [vmem:[%s3351_s7 + $0x1990] sm:$0xff] }
  0xe5   : > { %997 = vst [vmem:[%s3356_s8 + $0xcc0] sm:$0xff] %v996_v24  ;;  %999 = vst [vmem:[%s3356_s8 + $0xcc8] sm:$0xff] %v998_v25  ;;  %v1002_v27 = vld [vmem:[%s3351_s7 + $0x1998] sm:$0xff]  ;;  %v1004_v28 = vld [vmem:[%s3351_s7 + $0x19a0] sm:$0xff] }
  0xe6   : > { %1001 = vst [vmem:[%s3356_s8 + $0xcd0] sm:$0xff] %v1000_v26  ;;  %v1006_v29 = vld [vmem:[%s3351_s7 + $0x19a8] sm:$0xff]  ;;  %1003 = vst [vmem:[%s3356_s8 + $0xcd8] sm:$0xff] %v1002_v27  ;;  %v1008_v30 = vld [vmem:[%s3351_s7 + $0x19b0] sm:$0xff] }
  0xe7   : > { %1005 = vst [vmem:[%s3356_s8 + $0xce0] sm:$0xff] %v1004_v28  ;;  %1007 = vst [vmem:[%s3356_s8 + $0xce8] sm:$0xff] %v1006_v29  ;;  %v1010_v31 = vld [vmem:[%s3351_s7 + $0x19b8] sm:$0xff]  ;;  %v1012_v32 = vld [vmem:[%s3351_s7 + $0x1a00] sm:$0xff] }
  0xe8   : > { %1009 = vst [vmem:[%s3356_s8 + $0xcf0] sm:$0xff] %v1008_v30  ;;  %1011 = vst [vmem:[%s3356_s8 + $0xcf8] sm:$0xff] %v1010_v31  ;;  %v1014_v33 = vld [vmem:[%s3351_s7 + $0x1a08] sm:$0xff]  ;;  %v1016_v34 = vld [vmem:[%s3351_s7 + $0x1a10] sm:$0xff] }
  0xe9   : > { %1013 = vst [vmem:[%s3356_s8 + $0xd00] sm:$0xff] %v1012_v32  ;;  %v1018_v35 = vld [vmem:[%s3351_s7 + $0x1a18] sm:$0xff]  ;;  %1015 = vst [vmem:[%s3356_s8 + $0xd08] sm:$0xff] %v1014_v33  ;;  %v1020_v36 = vld [vmem:[%s3351_s7 + $0x1a20] sm:$0xff] }
  0xea   : > { %1017 = vst [vmem:[%s3356_s8 + $0xd10] sm:$0xff] %v1016_v34  ;;  %1019 = vst [vmem:[%s3356_s8 + $0xd18] sm:$0xff] %v1018_v35  ;;  %v1022_v37 = vld [vmem:[%s3351_s7 + $0x1a28] sm:$0xff]  ;;  %v1024_v38 = vld [vmem:[%s3351_s7 + $0x1a30] sm:$0xff] }
  0xeb   : > { %1021 = vst [vmem:[%s3356_s8 + $0xd20] sm:$0xff] %v1020_v36  ;;  %1023 = vst [vmem:[%s3356_s8 + $0xd28] sm:$0xff] %v1022_v37  ;;  %v1026_v39 = vld [vmem:[%s3351_s7 + $0x1a38] sm:$0xff]  ;;  %v1028_v40 = vld [vmem:[%s3351_s7 + $0x1a80] sm:$0xff] }
  0xec   : > { %1025 = vst [vmem:[%s3356_s8 + $0xd30] sm:$0xff] %v1024_v38  ;;  %v1030_v41 = vld [vmem:[%s3351_s7 + $0x1a88] sm:$0xff]  ;;  %1027 = vst [vmem:[%s3356_s8 + $0xd38] sm:$0xff] %v1026_v39  ;;  %v1032_v42 = vld [vmem:[%s3351_s7 + $0x1a90] sm:$0xff] }
  0xed   : > { %1029 = vst [vmem:[%s3356_s8 + $0xd40] sm:$0xff] %v1028_v40  ;;  %1031 = vst [vmem:[%s3356_s8 + $0xd48] sm:$0xff] %v1030_v41  ;;  %v1034_v43 = vld [vmem:[%s3351_s7 + $0x1a98] sm:$0xff]  ;;  %v1036_v44 = vld [vmem:[%s3351_s7 + $0x1aa0] sm:$0xff] }
  0xee   : > { %1033 = vst [vmem:[%s3356_s8 + $0xd50] sm:$0xff] %v1032_v42  ;;  %1035 = vst [vmem:[%s3356_s8 + $0xd58] sm:$0xff] %v1034_v43  ;;  %v1038_v45 = vld [vmem:[%s3351_s7 + $0x1aa8] sm:$0xff]  ;;  %v1040_v46 = vld [vmem:[%s3351_s7 + $0x1ab0] sm:$0xff] }
  0xef   : > { %1037 = vst [vmem:[%s3356_s8 + $0xd60] sm:$0xff] %v1036_v44  ;;  %v1042_v47 = vld [vmem:[%s3351_s7 + $0x1ab8] sm:$0xff]  ;;  %1039 = vst [vmem:[%s3356_s8 + $0xd68] sm:$0xff] %v1038_v45  ;;  %v1044_v48 = vld [vmem:[%s3351_s7 + $0x1b00] sm:$0xff] }
  0xf0   : > { %1041 = vst [vmem:[%s3356_s8 + $0xd70] sm:$0xff] %v1040_v46  ;;  %1043 = vst [vmem:[%s3356_s8 + $0xd78] sm:$0xff] %v1042_v47  ;;  %v1046_v49 = vld [vmem:[%s3351_s7 + $0x1b08] sm:$0xff]  ;;  %v1048_v50 = vld [vmem:[%s3351_s7 + $0x1b10] sm:$0xff] }
  0xf1   : > { %1045 = vst [vmem:[%s3356_s8 + $0xd80] sm:$0xff] %v1044_v48  ;;  %1047 = vst [vmem:[%s3356_s8 + $0xd88] sm:$0xff] %v1046_v49  ;;  %v1050_v51 = vld [vmem:[%s3351_s7 + $0x1b18] sm:$0xff]  ;;  %v1052_v52 = vld [vmem:[%s3351_s7 + $0x1b20] sm:$0xff] }
  0xf2   : > { %1049 = vst [vmem:[%s3356_s8 + $0xd90] sm:$0xff] %v1048_v50  ;;  %v1054_v53 = vld [vmem:[%s3351_s7 + $0x1b28] sm:$0xff]  ;;  %1051 = vst [vmem:[%s3356_s8 + $0xd98] sm:$0xff] %v1050_v51  ;;  %v1056_v54 = vld [vmem:[%s3351_s7 + $0x1b30] sm:$0xff] }
  0xf3   : > { %1053 = vst [vmem:[%s3356_s8 + $0xda0] sm:$0xff] %v1052_v52  ;;  %1055 = vst [vmem:[%s3356_s8 + $0xda8] sm:$0xff] %v1054_v53  ;;  %v1058_v55 = vld [vmem:[%s3351_s7 + $0x1b38] sm:$0xff]  ;;  %v1060_v56 = vld [vmem:[%s3351_s7 + $0x1b80] sm:$0xff] }
  0xf4   : > { %1057 = vst [vmem:[%s3356_s8 + $0xdb0] sm:$0xff] %v1056_v54  ;;  %1059 = vst [vmem:[%s3356_s8 + $0xdb8] sm:$0xff] %v1058_v55  ;;  %v1062_v57 = vld [vmem:[%s3351_s7 + $0x1b88] sm:$0xff]  ;;  %v1064_v58 = vld [vmem:[%s3351_s7 + $0x1b90] sm:$0xff] }
  0xf5   : > { %1061 = vst [vmem:[%s3356_s8 + $0xdc0] sm:$0xff] %v1060_v56  ;;  %v1066_v59 = vld [vmem:[%s3351_s7 + $0x1b98] sm:$0xff]  ;;  %1063 = vst [vmem:[%s3356_s8 + $0xdc8] sm:$0xff] %v1062_v57  ;;  %v1068_v60 = vld [vmem:[%s3351_s7 + $0x1ba0] sm:$0xff] }
  0xf6   : > { %1065 = vst [vmem:[%s3356_s8 + $0xdd0] sm:$0xff] %v1064_v58  ;;  %1067 = vst [vmem:[%s3356_s8 + $0xdd8] sm:$0xff] %v1066_v59  ;;  %v1070_v61 = vld [vmem:[%s3351_s7 + $0x1ba8] sm:$0xff]  ;;  %v1072_v62 = vld [vmem:[%s3351_s7 + $0x1bb0] sm:$0xff] }
  0xf7   : > { %1069 = vst [vmem:[%s3356_s8 + $0xde0] sm:$0xff] %v1068_v60  ;;  %1071 = vst [vmem:[%s3356_s8 + $0xde8] sm:$0xff] %v1070_v61  ;;  %v1074_v63 = vld [vmem:[%s3351_s7 + $0x1bb8] sm:$0xff]  ;;  %v1076_v0 = vld [vmem:[%s3351_s7 + $0x1c00] sm:$0xff] }
  0xf8   : > { %1073 = vst [vmem:[%s3356_s8 + $0xdf0] sm:$0xff] %v1072_v62  ;;  %v1078_v1 = vld [vmem:[%s3351_s7 + $0x1c08] sm:$0xff]  ;;  %1075 = vst [vmem:[%s3356_s8 + $0xdf8] sm:$0xff] %v1074_v63  ;;  %v1080_v2 = vld [vmem:[%s3351_s7 + $0x1c10] sm:$0xff] }
  0xf9   : > { %1077 = vst [vmem:[%s3356_s8 + $0xe00] sm:$0xff] %v1076_v0  ;;  %1079 = vst [vmem:[%s3356_s8 + $0xe08] sm:$0xff] %v1078_v1  ;;  %v1082_v3 = vld [vmem:[%s3351_s7 + $0x1c18] sm:$0xff]  ;;  %v1084_v4 = vld [vmem:[%s3351_s7 + $0x1c20] sm:$0xff] }
  0xfa   : > { %1081 = vst [vmem:[%s3356_s8 + $0xe10] sm:$0xff] %v1080_v2  ;;  %1083 = vst [vmem:[%s3356_s8 + $0xe18] sm:$0xff] %v1082_v3  ;;  %v1086_v5 = vld [vmem:[%s3351_s7 + $0x1c28] sm:$0xff]  ;;  %v1088_v6 = vld [vmem:[%s3351_s7 + $0x1c30] sm:$0xff] }
  0xfb   : > { %1085 = vst [vmem:[%s3356_s8 + $0xe20] sm:$0xff] %v1084_v4  ;;  %v1090_v7 = vld [vmem:[%s3351_s7 + $0x1c38] sm:$0xff]  ;;  %1087 = vst [vmem:[%s3356_s8 + $0xe28] sm:$0xff] %v1086_v5  ;;  %v1092_v8 = vld [vmem:[%s3351_s7 + $0x1c80] sm:$0xff] }
  0xfc   : > { %1089 = vst [vmem:[%s3356_s8 + $0xe30] sm:$0xff] %v1088_v6  ;;  %1091 = vst [vmem:[%s3356_s8 + $0xe38] sm:$0xff] %v1090_v7  ;;  %v1094_v9 = vld [vmem:[%s3351_s7 + $0x1c88] sm:$0xff]  ;;  %v1096_v10 = vld [vmem:[%s3351_s7 + $0x1c90] sm:$0xff] }
  0xfd   : > { %1093 = vst [vmem:[%s3356_s8 + $0xe40] sm:$0xff] %v1092_v8  ;;  %1095 = vst [vmem:[%s3356_s8 + $0xe48] sm:$0xff] %v1094_v9  ;;  %v1098_v11 = vld [vmem:[%s3351_s7 + $0x1c98] sm:$0xff]  ;;  %v1100_v12 = vld [vmem:[%s3351_s7 + $0x1ca0] sm:$0xff] }
  0xfe   : > { %1097 = vst [vmem:[%s3356_s8 + $0xe50] sm:$0xff] %v1096_v10  ;;  %v1102_v13 = vld [vmem:[%s3351_s7 + $0x1ca8] sm:$0xff]  ;;  %1099 = vst [vmem:[%s3356_s8 + $0xe58] sm:$0xff] %v1098_v11  ;;  %v1104_v14 = vld [vmem:[%s3351_s7 + $0x1cb0] sm:$0xff] }
  0xff   : > { %1101 = vst [vmem:[%s3356_s8 + $0xe60] sm:$0xff] %v1100_v12  ;;  %1103 = vst [vmem:[%s3356_s8 + $0xe68] sm:$0xff] %v1102_v13  ;;  %v1106_v15 = vld [vmem:[%s3351_s7 + $0x1cb8] sm:$0xff]  ;;  %v1108_v16 = vld [vmem:[%s3351_s7 + $0x1d00] sm:$0xff] }
 0x100   : > { %1105 = vst [vmem:[%s3356_s8 + $0xe70] sm:$0xff] %v1104_v14  ;;  %1107 = vst [vmem:[%s3356_s8 + $0xe78] sm:$0xff] %v1106_v15  ;;  %v1110_v17 = vld [vmem:[%s3351_s7 + $0x1d08] sm:$0xff]  ;;  %v1112_v18 = vld [vmem:[%s3351_s7 + $0x1d10] sm:$0xff] }
 0x101   : > { %1109 = vst [vmem:[%s3356_s8 + $0xe80] sm:$0xff] %v1108_v16  ;;  %v1114_v19 = vld [vmem:[%s3351_s7 + $0x1d18] sm:$0xff]  ;;  %1111 = vst [vmem:[%s3356_s8 + $0xe88] sm:$0xff] %v1110_v17  ;;  %v1116_v20 = vld [vmem:[%s3351_s7 + $0x1d20] sm:$0xff] }
 0x102   : > { %1113 = vst [vmem:[%s3356_s8 + $0xe90] sm:$0xff] %v1112_v18  ;;  %1115 = vst [vmem:[%s3356_s8 + $0xe98] sm:$0xff] %v1114_v19  ;;  %v1118_v21 = vld [vmem:[%s3351_s7 + $0x1d28] sm:$0xff]  ;;  %v1120_v22 = vld [vmem:[%s3351_s7 + $0x1d30] sm:$0xff] }
 0x103   : > { %1117 = vst [vmem:[%s3356_s8 + $0xea0] sm:$0xff] %v1116_v20  ;;  %1119 = vst [vmem:[%s3356_s8 + $0xea8] sm:$0xff] %v1118_v21  ;;  %v1122_v23 = vld [vmem:[%s3351_s7 + $0x1d38] sm:$0xff]  ;;  %v1124_v24 = vld [vmem:[%s3351_s7 + $0x1d80] sm:$0xff] }
 0x104   : > { %1121 = vst [vmem:[%s3356_s8 + $0xeb0] sm:$0xff] %v1120_v22  ;;  %v1126_v25 = vld [vmem:[%s3351_s7 + $0x1d88] sm:$0xff]  ;;  %1123 = vst [vmem:[%s3356_s8 + $0xeb8] sm:$0xff] %v1122_v23  ;;  %v1128_v26 = vld [vmem:[%s3351_s7 + $0x1d90] sm:$0xff] }
 0x105   : > { %1125 = vst [vmem:[%s3356_s8 + $0xec0] sm:$0xff] %v1124_v24  ;;  %1127 = vst [vmem:[%s3356_s8 + $0xec8] sm:$0xff] %v1126_v25  ;;  %v1130_v27 = vld [vmem:[%s3351_s7 + $0x1d98] sm:$0xff]  ;;  %v1132_v28 = vld [vmem:[%s3351_s7 + $0x1da0] sm:$0xff] }
 0x106   : > { %1129 = vst [vmem:[%s3356_s8 + $0xed0] sm:$0xff] %v1128_v26  ;;  %1131 = vst [vmem:[%s3356_s8 + $0xed8] sm:$0xff] %v1130_v27  ;;  %v1134_v29 = vld [vmem:[%s3351_s7 + $0x1da8] sm:$0xff]  ;;  %v1136_v30 = vld [vmem:[%s3351_s7 + $0x1db0] sm:$0xff] }
 0x107   : > { %1133 = vst [vmem:[%s3356_s8 + $0xee0] sm:$0xff] %v1132_v28  ;;  %v1138_v31 = vld [vmem:[%s3351_s7 + $0x1db8] sm:$0xff]  ;;  %1135 = vst [vmem:[%s3356_s8 + $0xee8] sm:$0xff] %v1134_v29  ;;  %v1140_v32 = vld [vmem:[%s3351_s7 + $0x1e00] sm:$0xff] }
 0x108   : > { %1137 = vst [vmem:[%s3356_s8 + $0xef0] sm:$0xff] %v1136_v30  ;;  %1139 = vst [vmem:[%s3356_s8 + $0xef8] sm:$0xff] %v1138_v31  ;;  %v1142_v33 = vld [vmem:[%s3351_s7 + $0x1e08] sm:$0xff]  ;;  %v1144_v34 = vld [vmem:[%s3351_s7 + $0x1e10] sm:$0xff] }
 0x109   : > { %1141 = vst [vmem:[%s3356_s8 + $0xf00] sm:$0xff] %v1140_v32  ;;  %1143 = vst [vmem:[%s3356_s8 + $0xf08] sm:$0xff] %v1142_v33  ;;  %v1146_v35 = vld [vmem:[%s3351_s7 + $0x1e18] sm:$0xff]  ;;  %v1148_v36 = vld [vmem:[%s3351_s7 + $0x1e20] sm:$0xff] }
 0x10a   : > { %1145 = vst [vmem:[%s3356_s8 + $0xf10] sm:$0xff] %v1144_v34  ;;  %v1150_v37 = vld [vmem:[%s3351_s7 + $0x1e28] sm:$0xff]  ;;  %1147 = vst [vmem:[%s3356_s8 + $0xf18] sm:$0xff] %v1146_v35  ;;  %v1152_v38 = vld [vmem:[%s3351_s7 + $0x1e30] sm:$0xff] }
 0x10b   : > { %1149 = vst [vmem:[%s3356_s8 + $0xf20] sm:$0xff] %v1148_v36  ;;  %1151 = vst [vmem:[%s3356_s8 + $0xf28] sm:$0xff] %v1150_v37  ;;  %v1154_v39 = vld [vmem:[%s3351_s7 + $0x1e38] sm:$0xff]  ;;  %v1156_v40 = vld [vmem:[%s3351_s7 + $0x1e80] sm:$0xff] }
 0x10c   : > { %1153 = vst [vmem:[%s3356_s8 + $0xf30] sm:$0xff] %v1152_v38  ;;  %1155 = vst [vmem:[%s3356_s8 + $0xf38] sm:$0xff] %v1154_v39  ;;  %v1158_v41 = vld [vmem:[%s3351_s7 + $0x1e88] sm:$0xff]  ;;  %v1160_v42 = vld [vmem:[%s3351_s7 + $0x1e90] sm:$0xff] }
 0x10d   : > { %1157 = vst [vmem:[%s3356_s8 + $0xf40] sm:$0xff] %v1156_v40  ;;  %v1162_v43 = vld [vmem:[%s3351_s7 + $0x1e98] sm:$0xff]  ;;  %1159 = vst [vmem:[%s3356_s8 + $0xf48] sm:$0xff] %v1158_v41  ;;  %v1164_v44 = vld [vmem:[%s3351_s7 + $0x1ea0] sm:$0xff] }
 0x10e   : > { %1161 = vst [vmem:[%s3356_s8 + $0xf50] sm:$0xff] %v1160_v42  ;;  %1163 = vst [vmem:[%s3356_s8 + $0xf58] sm:$0xff] %v1162_v43  ;;  %v1166_v45 = vld [vmem:[%s3351_s7 + $0x1ea8] sm:$0xff]  ;;  %v1168_v46 = vld [vmem:[%s3351_s7 + $0x1eb0] sm:$0xff] }
 0x10f   : > { %1165 = vst [vmem:[%s3356_s8 + $0xf60] sm:$0xff] %v1164_v44  ;;  %1167 = vst [vmem:[%s3356_s8 + $0xf68] sm:$0xff] %v1166_v45  ;;  %v1170_v47 = vld [vmem:[%s3351_s7 + $0x1eb8] sm:$0xff]  ;;  %v1172_v48 = vld [vmem:[%s3351_s7 + $0x1f00] sm:$0xff] }
 0x110   : > { %1169 = vst [vmem:[%s3356_s8 + $0xf70] sm:$0xff] %v1168_v46  ;;  %v1174_v49 = vld [vmem:[%s3351_s7 + $0x1f08] sm:$0xff]  ;;  %1171 = vst [vmem:[%s3356_s8 + $0xf78] sm:$0xff] %v1170_v47  ;;  %v1176_v50 = vld [vmem:[%s3351_s7 + $0x1f10] sm:$0xff] }
 0x111   : > { %1173 = vst [vmem:[%s3356_s8 + $0xf80] sm:$0xff] %v1172_v48  ;;  %1175 = vst [vmem:[%s3356_s8 + $0xf88] sm:$0xff] %v1174_v49  ;;  %v1178_v51 = vld [vmem:[%s3351_s7 + $0x1f18] sm:$0xff]  ;;  %v1180_v52 = vld [vmem:[%s3351_s7 + $0x1f20] sm:$0xff] }
 0x112   : > { %1177 = vst [vmem:[%s3356_s8 + $0xf90] sm:$0xff] %v1176_v50  ;;  %1179 = vst [vmem:[%s3356_s8 + $0xf98] sm:$0xff] %v1178_v51  ;;  %v1182_v53 = vld [vmem:[%s3351_s7 + $0x1f28] sm:$0xff]  ;;  %v1184_v54 = vld [vmem:[%s3351_s7 + $0x1f30] sm:$0xff] }
 0x113   : > { %1181 = vst [vmem:[%s3356_s8 + $0xfa0] sm:$0xff] %v1180_v52  ;;  %v1186_v55 = vld [vmem:[%s3351_s7 + $0x1f38] sm:$0xff]  ;;  %1183 = vst [vmem:[%s3356_s8 + $0xfa8] sm:$0xff] %v1182_v53  ;;  %v1188_v56 = vld [vmem:[%s3351_s7 + $0x1f80] sm:$0xff] }
 0x114   : > { %1185 = vst [vmem:[%s3356_s8 + $0xfb0] sm:$0xff] %v1184_v54  ;;  %1187 = vst [vmem:[%s3356_s8 + $0xfb8] sm:$0xff] %v1186_v55  ;;  %v1190_v57 = vld [vmem:[%s3351_s7 + $0x1f88] sm:$0xff]  ;;  %v1192_v58 = vld [vmem:[%s3351_s7 + $0x1f90] sm:$0xff] }
 0x115   : > { %1189 = vst [vmem:[%s3356_s8 + $0xfc0] sm:$0xff] %v1188_v56  ;;  %1191 = vst [vmem:[%s3356_s8 + $0xfc8] sm:$0xff] %v1190_v57  ;;  %v1194_v59 = vld [vmem:[%s3351_s7 + $0x1f98] sm:$0xff]  ;;  %v1196_v60 = vld [vmem:[%s3351_s7 + $0x1fa0] sm:$0xff] }
 0x116   : > { %1193 = vst [vmem:[%s3356_s8 + $0xfd0] sm:$0xff] %v1192_v58  ;;  %v1198_v61 = vld [vmem:[%s3351_s7 + $0x1fa8] sm:$0xff]  ;;  %1195 = vst [vmem:[%s3356_s8 + $0xfd8] sm:$0xff] %v1194_v59  ;;  %v1200_v62 = vld [vmem:[%s3351_s7 + $0x1fb0] sm:$0xff] }
 0x117   : > { %1197 = vst [vmem:[%s3356_s8 + $0xfe0] sm:$0xff] %v1196_v60  ;;  %1199 = vst [vmem:[%s3356_s8 + $0xfe8] sm:$0xff] %v1198_v61  ;;  %v1202_v63 = vld [vmem:[%s3351_s7 + $0x1fb8] sm:$0xff] }
 0x118   : > { %1201 = vst [vmem:[%s3356_s8 + $0xff0] sm:$0xff] %v1200_v62  ;;  %1203 = vst [vmem:[%s3356_s8 + $0xff8] sm:$0xff] %v1202_v63 }
 0x119 PF: > { %p2622_p7 = scmp.ge.s32.totalorder %s3267_s18, 1  ;;  %p1216_p8 = scmp.lt.s32.totalorder %s3267_s18, 9 }
 0x11b   : > { %p1217_p9 = pnand %p2622_p7, %p1216_p8 }
 0x11c   : > { %s1223_s9 = sand.u32 (!%p1217_p9), 1, %s3243_s12   ;;  %s2624_s10 = sshll.u32 (!%p1217_p9), %s3251_s14, 2 }
 0x11d   : > { %1220 = sbr.rel (%p1217_p9) target bundleno = 797 (0x31d), region = 51  ;;  %s2623_s11 = sshll.u32 (!%p1217_p9), %s1223_s9, 12 }
 0x11e   : > { %p1256_p10 = scmp.lt.s32.totalorder (!%p1217_p9), %s2624_s10, 15  ;;  %s2626_s21 = sshll.u32 (!%p1217_p9), %s3255_s15, 3 }
 0x11f   : > { %p1264_p11 = scmp.lt.s32.totalorder (!%p1217_p9), %s2626_s21, 15  ;;  %s4401_s5 = scalar_lea.vmem (!%p1217_p9), [#allocation2], %s2623_s11 }
 0x120   : > { %p2629_p12 = scmp.ne.s32.totalorder (!%p1217_p9), %s3251_s14, 0 }
 0x124   : > { %s5027_s10 = smov (!%p1256_p10, %s2624_s10), 15  ;;  %s5029_s21 = smov (!%p1264_p11, %s2626_s21), 15 }
 0x125   : > { %s2625_s22 = sshll.u32 %s5027_s10, 1  ;;  %s1266_s12 = scalar_lea.vmem %s5012_s2, %s5029_s21  ;;  %v3269_v0 = vmov (!%p2629_p12), 0.0  }
 0x126   : > { %s4387_s26 = scalar_lea.vmem %s5010_s0, %s2625_s22  ;;  %s2628_s29 = sshll.u32 %s5029_s21, 1 }
 0x127   : > { %s4399_s15 = scalar_lea.vmem %s5013_s3, %s2628_s29  ;;  %1277 = sbr.rel (%p2629_p12) target bundleno = 302 (0x12e), region = 59 }
 0x128   : > { %1278 = vst [vmem:[%s4399_s15] sm:$0xff] (!%p2629_p12), %v3269_v0  ;;  %1279 = vst [vmem:[%s4399_s15 + $0x8] sm:$0xff] (!%p2629_p12), %v3269_v0 }
 0x12e PF: > { %v1284_v1 = vld [vmem:[%s4401_s5 + $0x8] sm:$0xff]  ;;  %v1286_v3 = vld [vmem:[%s4401_s5 + $0x18] sm:$0xff]  ;;  %v1283_v6 = vld [vmem:[%s4401_s5] sm:$0xff]  ;;  %p2630_p13 = scmp.ne.s32.totalorder %s3251_s14, 3 }
 0x12f   : > { %v1292_v2 = vld [vmem:[%s4401_s5 + $0x48] sm:$0xff]  ;;  %v1294_v5 = vld [vmem:[%s4401_s5 + $0x58] sm:$0xff]  ;;  %v1291_v7 = vld [vmem:[%s4401_s5 + $0x40] sm:$0xff] }
 0x130   : > { %v2634_v4 = vpack.c.bf16 %v1292_v2, %v1284_v1  ;;  %v2762_v8 = vpack.c.bf16 %v1294_v5, %v1286_v3  ;;  %v2636_v9 = vpack.c.bf16 %v1291_v7, %v1283_v6  ;;  %v1285_v10 = vld [vmem:[%s4401_s5 + $0x10] sm:$0xff]  ;;  %v1300_v12 = vld [vmem:[%s4401_s5 + $0x88] sm:$0xff]  ;;  %v1302_v15 = vld [vmem:[%s4401_s5 + $0x98] sm:$0xff] }
 0x131   : > { %v1293_v11 = vld [vmem:[%s4401_s5 + $0x50] sm:$0xff]  ;;  %v1308_v14 = vld [vmem:[%s4401_s5 + $0xc8] sm:$0xff]  ;;  %v1310_v16 = vld [vmem:[%s4401_s5 + $0xd8] sm:$0xff] }
 0x132   : > { %2635 = vmatprep.subr.bf16.mxu0 %v2634_v4  ;;  %v2764_v13 = vpack.c.bf16 %v1293_v11, %v1285_v10  ;;  %2763 = vmatprep.subr.bf16.mxu1 %v2762_v8  ;;  %v2638_v17 = vpack.c.bf16 %v1308_v14, %v1300_v12  ;;  %v2766_v18 = vpack.c.bf16 %v1310_v16, %v1302_v15  ;;  %v1299_v19 = vld [vmem:[%s4401_s5 + $0x80] sm:$0xff]  ;;  %v1301_v21 = vld [vmem:[%s4401_s5 + $0x90] sm:$0xff]  ;;  %v1316_v24 = vld [vmem:[%s4401_s5 + $0x108] sm:$0xff] }
 0x133   : > { %2637 = vmatpush1.bf16.msra.mxu0 %v2636_v9  ;;  %v1307_v20 = vld [vmem:[%s4401_s5 + $0xc0] sm:$0xff]  ;;  %v1309_v23 = vld [vmem:[%s4401_s5 + $0xd0] sm:$0xff]  ;;  %v1324_v25 = vld [vmem:[%s4401_s5 + $0x148] sm:$0xff] }
 0x134   : > { %2765 = vmatpush1.bf16.msra.mxu1 %v2764_v13  ;;  %v2640_v22 = vpack.c.bf16 %v1307_v20, %v1299_v19  ;;  %2639 = vmatprep.subr.bf16.mxu0 %v2638_v17  ;;  %v2768_v26 = vpack.c.bf16 %v1309_v23, %v1301_v21  ;;  %v2642_v27 = vpack.c.bf16 %v1324_v25, %v1316_v24  ;;  %v1318_v28 = vld [vmem:[%s4401_s5 + $0x118] sm:$0xff]  ;;  %v1315_v30 = vld [vmem:[%s4401_s5 + $0x100] sm:$0xff]  ;;  %v1317_v33 = vld [vmem:[%s4401_s5 + $0x110] sm:$0xff] }
 0x135   : > { %2767 = vmatprep.subr.bf16.mxu1 %v2766_v18  ;;  %v1326_v29 = vld [vmem:[%s4401_s5 + $0x158] sm:$0xff]  ;;  %v1323_v32 = vld [vmem:[%s4401_s5 + $0x140] sm:$0xff]  ;;  %v1325_v34 = vld [vmem:[%s4401_s5 + $0x150] sm:$0xff] }
 0x136   : > { %v2770_v31 = vpack.c.bf16 %v1326_v29, %v1318_v28  ;;  %v2644_v35 = vpack.c.bf16 %v1323_v32, %v1315_v30  ;;  %v1332_v36 = vld [vmem:[%s4401_s5 + $0x188] sm:$0xff]  ;;  %v1334_v38 = vld [vmem:[%s4401_s5 + $0x198] sm:$0xff]  ;;  %v2772_v39 = vpack.c.bf16 %v1325_v34, %v1317_v33  ;;  %v1331_v42 = vld [vmem:[%s4401_s5 + $0x180] sm:$0xff] }
 0x137   : > { %2641 = vmatpush1.bf16.msra.mxu0 %v2640_v22  ;;  %v1340_v37 = vld [vmem:[%s4401_s5 + $0x1c8] sm:$0xff]  ;;  %v1342_v41 = vld [vmem:[%s4401_s5 + $0x1d8] sm:$0xff]  ;;  %v1339_v43 = vld [vmem:[%s4401_s5 + $0x1c0] sm:$0xff] }
 0x138   : > { %2769 = vmatpush1.bf16.msra.mxu1 %v2768_v26  ;;  %2643 = vmatprep.subr.bf16.mxu0 %v2642_v27  ;;  %v2646_v40 = vpack.c.bf16 %v1340_v37, %v1332_v36  ;;  %v2774_v44 = vpack.c.bf16 %v1342_v41, %v1334_v38  ;;  %v1333_v45 = vld [vmem:[%s4401_s5 + $0x190] sm:$0xff]  ;;  %v1348_v47 = vld [vmem:[%s4401_s5 + $0x208] sm:$0xff]  ;;  %v1350_v49 = vld [vmem:[%s4401_s5 + $0x218] sm:$0xff]  ;;  %v2648_v51 = vpack.c.bf16 %v1339_v43, %v1331_v42 }
 0x139   : > { %2771 = vmatprep.subr.bf16.mxu1 %v2770_v31  ;;  %v1341_v46 = vld [vmem:[%s4401_s5 + $0x1d0] sm:$0xff]  ;;  %v1356_v48 = vld [vmem:[%s4401_s5 + $0x248] sm:$0xff]  ;;  %v1358_v50 = vld [vmem:[%s4401_s5 + $0x258] sm:$0xff] }
 0x13a   : > { %v2776_v52 = vpack.c.bf16 %v1341_v46, %v1333_v45  ;;  %v2650_v53 = vpack.c.bf16 %v1356_v48, %v1348_v47  ;;  %v1347_v54 = vld [vmem:[%s4401_s5 + $0x200] sm:$0xff]  ;;  %v1349_v56 = vld [vmem:[%s4401_s5 + $0x210] sm:$0xff]  ;;  %v2778_v57 = vpack.c.bf16 %v1358_v50, %v1350_v49  ;;  %v1364_v59 = vld [vmem:[%s4401_s5 + $0x288] sm:$0xff]  ;;  %v3270_v47 = vmov 1983009808  }
 0x13b   : > { %2645 = vmatpush1.bf16.msra.mxu0 %v2644_v35  ;;  %v1355_v55 = vld [vmem:[%s4401_s5 + $0x240] sm:$0xff]  ;;  %v1357_v58 = vld [vmem:[%s4401_s5 + $0x250] sm:$0xff]  ;;  %v1372_v60 = vld [vmem:[%s4401_s5 + $0x2c8] sm:$0xff]  ;;  %v1798_v48 = vunpack.c.l.s4 %v3270_v47  ;;  %v1800_v49 = vlaneseq }
 0x13c   : > { %2773 = vmatpush1.bf16.msra.mxu1 %v2772_v39  ;;  %2647 = vmatprep.subr.bf16.mxu0 %v2646_v40  ;;  %v1366_v61 = vld [vmem:[%s4401_s5 + $0x298] sm:$0xff]  ;;  %v2652_v63 = vpack.c.bf16 %v1355_v55, %v1347_v54  ;;  %v2780_v0 = vpack.c.bf16 %v1357_v58, %v1349_v56  ;;  %v2654_v1 = vpack.c.bf16 %v1372_v60, %v1364_v59  ;;  %v1363_v2 = vld [vmem:[%s4401_s5 + $0x280] sm:$0xff]  ;;  %v1365_v4 = vld [vmem:[%s4401_s5 + $0x290] sm:$0xff] }
 0x13d   : > { %2775 = vmatprep.subr.bf16.mxu1 %v2774_v44  ;;  %v1374_v62 = vld [vmem:[%s4401_s5 + $0x2d8] sm:$0xff]  ;;  %v1371_v3 = vld [vmem:[%s4401_s5 + $0x2c0] sm:$0xff]  ;;  %v1373_v6 = vld [vmem:[%s4401_s5 + $0x2d0] sm:$0xff] }
 0x13e   : > { %v2782_v5 = vpack.c.bf16 %v1374_v62, %v1366_v61  ;;  %v1380_v7 = vld [vmem:[%s4401_s5 + $0x308] sm:$0xff]  ;;  %v1382_v9 = vld [vmem:[%s4401_s5 + $0x318] sm:$0xff]  ;;  %v2656_v11 = vpack.c.bf16 %v1371_v3, %v1363_v2  ;;  %v2784_v12 = vpack.c.bf16 %v1373_v6, %v1365_v4  ;;  %v1379_v14 = vld [vmem:[%s4401_s5 + $0x300] sm:$0xff]  ;;  %v1799_v62 = vunpack.c.0.s8 %v1798_v48 }
 0x13f   : > { %2649 = vmatpush1.bf16.msra.mxu0 %v2648_v51  ;;  %v1388_v8 = vld [vmem:[%s4401_s5 + $0x348] sm:$0xff]  ;;  %v1390_v10 = vld [vmem:[%s4401_s5 + $0x358] sm:$0xff]  ;;  %v1387_v15 = vld [vmem:[%s4401_s5 + $0x340] sm:$0xff] }
 0x140   : > { %2777 = vmatpush1.bf16.msra.mxu1 %v2776_v52  ;;  %2651 = vmatprep.subr.bf16.mxu0 %v2650_v53  ;;  %v2658_v13 = vpack.c.bf16 %v1388_v8, %v1380_v7  ;;  %v1381_v16 = vld [vmem:[%s4401_s5 + $0x310] sm:$0xff]  ;;  %v2786_v17 = vpack.c.bf16 %v1390_v10, %v1382_v9  ;;  %v1396_v19 = vld [vmem:[%s4401_s5 + $0x388] sm:$0xff]  ;;  %v1398_v21 = vld [vmem:[%s4401_s5 + $0x398] sm:$0xff]  ;;  %v2660_v23 = vpack.c.bf16 %v1387_v15, %v1379_v14 }
 0x141   : > { %2779 = vmatprep.subr.bf16.mxu1 %v2778_v57  ;;  %v1389_v18 = vld [vmem:[%s4401_s5 + $0x350] sm:$0xff]  ;;  %v1404_v20 = vld [vmem:[%s4401_s5 + $0x3c8] sm:$0xff]  ;;  %v1406_v22 = vld [vmem:[%s4401_s5 + $0x3d8] sm:$0xff] }
 0x142   : > { %v2788_v24 = vpack.c.bf16 %v1389_v18, %v1381_v16  ;;  %v2662_v25 = vpack.c.bf16 %v1404_v20, %v1396_v19  ;;  %v1395_v26 = vld [vmem:[%s4401_s5 + $0x380] sm:$0xff]  ;;  %v1397_v28 = vld [vmem:[%s4401_s5 + $0x390] sm:$0xff]  ;;  %v2790_v29 = vpack.c.bf16 %v1406_v22, %v1398_v21  ;;  %v1412_v31 = vld [vmem:[%s4401_s5 + $0x408] sm:$0xff] }
 0x143   : > { %2653 = vmatpush1.bf16.msra.mxu0 %v2652_v63  ;;  %v1403_v27 = vld [vmem:[%s4401_s5 + $0x3c0] sm:$0xff]  ;;  %v1405_v30 = vld [vmem:[%s4401_s5 + $0x3d0] sm:$0xff]  ;;  %v1420_v32 = vld [vmem:[%s4401_s5 + $0x448] sm:$0xff]  ;;  %v4490_v63 = vshrl.u32 %v1800_v49, 7 }
 0x144   : > { %2781 = vmatpush1.bf16.msra.mxu1 %v2780_v0  ;;  %2655 = vmatprep.subr.bf16.mxu0 %v2654_v1  ;;  %v1414_v33 = vld [vmem:[%s4401_s5 + $0x418] sm:$0xff]  ;;  %v2664_v35 = vpack.c.bf16 %v1403_v27, %v1395_v26  ;;  %v2792_v36 = vpack.c.bf16 %v1405_v30, %v1397_v28  ;;  %v2666_v37 = vpack.c.bf16 %v1420_v32, %v1412_v31  ;;  %v1411_v38 = vld [vmem:[%s4401_s5 + $0x400] sm:$0xff]  ;;  %v1413_v40 = vld [vmem:[%s4401_s5 + $0x410] sm:$0xff] }
 0x145   : > { %2783 = vmatprep.subr.bf16.mxu1 %v2782_v5  ;;  %v1422_v34 = vld [vmem:[%s4401_s5 + $0x458] sm:$0xff]  ;;  %v1419_v39 = vld [vmem:[%s4401_s5 + $0x440] sm:$0xff]  ;;  %v1421_v42 = vld [vmem:[%s4401_s5 + $0x450] sm:$0xff] }
 0x146   : > { %v2794_v41 = vpack.c.bf16 %v1422_v34, %v1414_v33  ;;  %v1428_v43 = vld [vmem:[%s4401_s5 + $0x488] sm:$0xff]  ;;  %v1430_v45 = vld [vmem:[%s4401_s5 + $0x498] sm:$0xff]  ;;  %v2668_v50 = vpack.c.bf16 %v1419_v39, %v1411_v38  ;;  %v2796_v51 = vpack.c.bf16 %v1421_v42, %v1413_v40  ;;  %v1427_v53 = vld [vmem:[%s4401_s5 + $0x480] sm:$0xff] }
 0x147   : > { %2657 = vmatpush1.bf16.msra.mxu0 %v2656_v11  ;;  %v1436_v44 = vld [vmem:[%s4401_s5 + $0x4c8] sm:$0xff]  ;;  %v1438_v46 = vld [vmem:[%s4401_s5 + $0x4d8] sm:$0xff]  ;;  %v1435_v54 = vld [vmem:[%s4401_s5 + $0x4c0] sm:$0xff] }
 0x148   : > { %2785 = vmatpush1.bf16.msra.mxu1 %v2784_v12  ;;  %2659 = vmatprep.subr.bf16.mxu0 %v2658_v13  ;;  %v2670_v52 = vpack.c.bf16 %v1436_v44, %v1428_v43  ;;  %v1429_v55 = vld [vmem:[%s4401_s5 + $0x490] sm:$0xff]  ;;  %v2798_v56 = vpack.c.bf16 %v1438_v46, %v1430_v45  ;;  %v1444_v58 = vld [vmem:[%s4401_s5 + $0x508] sm:$0xff]  ;;  %v1446_v60 = vld [vmem:[%s4401_s5 + $0x518] sm:$0xff]  ;;  %v2672_v0 = vpack.c.bf16 %v1435_v54, %v1427_v53 }
 0x149   : > { %2787 = vmatprep.subr.bf16.mxu1 %v2786_v17  ;;  %v1437_v57 = vld [vmem:[%s4401_s5 + $0x4d0] sm:$0xff]  ;;  %v1452_v59 = vld [vmem:[%s4401_s5 + $0x548] sm:$0xff]  ;;  %v1454_v61 = vld [vmem:[%s4401_s5 + $0x558] sm:$0xff]  ;;  %v4501_v12 = vsub.s32 %v1799_v62, %v4490_v63 }
 0x14a   : > { %v2800_v1 = vpack.c.bf16 %v1437_v57, %v1429_v55  ;;  %v2674_v2 = vpack.c.bf16 %v1452_v59, %v1444_v58  ;;  %v1443_v3 = vld [vmem:[%s4401_s5 + $0x500] sm:$0xff]  ;;  %v1445_v5 = vld [vmem:[%s4401_s5 + $0x510] sm:$0xff]  ;;  %v2802_v6 = vpack.c.bf16 %v1454_v61, %v1446_v60  ;;  %v1460_v8 = vld [vmem:[%s4401_s5 + $0x588] sm:$0xff] }
 0x14b   : > { %2661 = vmatpush1.bf16.msra.mxu0 %v2660_v23  ;;  %v1451_v4 = vld [vmem:[%s4401_s5 + $0x540] sm:$0xff]  ;;  %v1453_v7 = vld [vmem:[%s4401_s5 + $0x550] sm:$0xff]  ;;  %v1468_v9 = vld [vmem:[%s4401_s5 + $0x5c8] sm:$0xff] }
 0x14c   : > { %2789 = vmatpush1.bf16.msra.mxu1 %v2788_v24  ;;  %2663 = vmatprep.subr.bf16.mxu0 %v2662_v25  ;;  %v1462_v10 = vld [vmem:[%s4401_s5 + $0x598] sm:$0xff]  ;;  %v2676_v13 = vpack.c.bf16 %v1451_v4, %v1443_v3  ;;  %v1459_v14 = vld [vmem:[%s4401_s5 + $0x580] sm:$0xff]  ;;  %v2804_v15 = vpack.c.bf16 %v1453_v7, %v1445_v5  ;;  %v2678_v16 = vpack.c.bf16 %v1468_v9, %v1460_v8  ;;  %v1461_v18 = vld [vmem:[%s4401_s5 + $0x590] sm:$0xff] }
 0x14d   : > { %2791 = vmatprep.subr.bf16.mxu1 %v2790_v29  ;;  %v1470_v11 = vld [vmem:[%s4401_s5 + $0x5d8] sm:$0xff]  ;;  %v1467_v17 = vld [vmem:[%s4401_s5 + $0x5c0] sm:$0xff]  ;;  %v1469_v19 = vld [vmem:[%s4401_s5 + $0x5d0] sm:$0xff] }
 0x14e   : > { %v2806_v20 = vpack.c.bf16 %v1470_v11, %v1462_v10  ;;  %v1476_v21 = vld [vmem:[%s4401_s5 + $0x608] sm:$0xff]  ;;  %v4510_v23 = vld [vmem:[%s4387_s26] sm:$0xff]  ;;  %v1478_v24 = vld [vmem:[%s4401_s5 + $0x618] sm:$0xff]  ;;  %v2680_v27 = vpack.c.bf16 %v1467_v17, %v1459_v14  ;;  %v2808_v28 = vpack.c.bf16 %v1469_v19, %v1461_v18 }
 0x14f   : > { %2665 = vmatpush1.bf16.msra.mxu0 %v2664_v35  ;;  %v1484_v22 = vld [vmem:[%s4401_s5 + $0x648] sm:$0xff]  ;;  %v1486_v25 = vld [vmem:[%s4401_s5 + $0x658] sm:$0xff]  ;;  %v4516_v26 = vrot.slane %v4510_v23, %v4501_v12  ;;  %v1475_v30 = vld [vmem:[%s4401_s5 + $0x600] sm:$0xff]  ;;  %v1796_v11 = vcombine.high %v4510_v23, %v4510_v23 }
 0x150   : > { %2793 = vmatpush1.bf16.msra.mxu1 %v2792_v36  ;;  %2667 = vmatprep.subr.bf16.mxu0 %v2666_v37  ;;  %v2682_v29 = vpack.c.bf16 %v1484_v22, %v1476_v21  ;;  %v1483_v31 = vld [vmem:[%s4401_s5 + $0x640] sm:$0xff]  ;;  %v1477_v32 = vld [vmem:[%s4401_s5 + $0x610] sm:$0xff]  ;;  %v2810_v34 = vpack.c.bf16 %v1486_v25, %v1478_v24  ;;  %v1492_v36 = vld [vmem:[%s4401_s5 + $0x688] sm:$0xff] }
 0x151   : > { %2795 = vmatprep.subr.bf16.mxu1 %v2794_v41  ;;  %v4523_v33 = vcombine.high %v4516_v26, %v4516_v26  ;;  %v1485_v35 = vld [vmem:[%s4401_s5 + $0x650] sm:$0xff]  ;;  %v1500_v37 = vld [vmem:[%s4401_s5 + $0x6c8] sm:$0xff]  ;;  %v1494_v38 = vld [vmem:[%s4401_s5 + $0x698] sm:$0xff]  ;;  %v2684_v40 = vpack.c.bf16 %v1483_v31, %v1475_v30  ;;  %v4565_v25 = vrot.slane %v1796_v11, %v4501_v12 }
 0x152   : > { %v1502_v39 = vld [vmem:[%s4401_s5 + $0x6d8] sm:$0xff]  ;;  %v2812_v41 = vpack.c.bf16 %v1485_v35, %v1477_v32  ;;  %v2686_v42 = vpack.c.bf16 %v1500_v37, %v1492_v36  ;;  %v1491_v43 = vld [vmem:[%s4401_s5 + $0x680] sm:$0xff]  ;;  %v1493_v45 = vld [vmem:[%s4401_s5 + $0x690] sm:$0xff] }
 0x153   : > { %2669 = vmatpush1.bf16.msra.mxu0 %v2668_v50  ;;  %1881 = vmatprep.mubr.f32.mxu0 %v4523_v33  ;;  %v1499_v44 = vld [vmem:[%s4401_s5 + $0x6c0] sm:$0xff]  ;;  %v2814_v46 = vpack.c.bf16 %v1502_v39, %v1494_v38  ;;  %v1501_v47 = vld [vmem:[%s4401_s5 + $0x6d0] sm:$0xff]  ;;  %v1508_v48 = vld [vmem:[%s4401_s5 + $0x708] sm:$0xff] }
 0x154   : > { %2797 = vmatpush1.bf16.msra.mxu1 %v2796_v51  ;;  %2671 = vmatprep.subr.bf16.mxu0 %v2670_v52  ;;  %v1516_v49 = vld [vmem:[%s4401_s5 + $0x748] sm:$0xff]  ;;  %v1510_v50 = vld [vmem:[%s4401_s5 + $0x718] sm:$0xff]  ;;  %v2688_v52 = vpack.c.bf16 %v1499_v44, %v1491_v43  ;;  %v2816_v53 = vpack.c.bf16 %v1501_v47, %v1493_v45  ;;  %v1507_v55 = vld [vmem:[%s4401_s5 + $0x700] sm:$0xff] }
 0x155   : > { %2799 = vmatprep.subr.bf16.mxu1 %v2798_v56  ;;  %2023 = vmatprep.mubr.f32.mxu1 %v4523_v33  ;;  %v1518_v51 = vld [vmem:[%s4401_s5 + $0x758] sm:$0xff]  ;;  %v2690_v54 = vpack.c.bf16 %v1516_v49, %v1508_v48  ;;  %v1515_v56 = vld [vmem:[%s4401_s5 + $0x740] sm:$0xff]  ;;  %v1509_v57 = vld [vmem:[%s4401_s5 + $0x710] sm:$0xff] }
 0x156   : > { %v2818_v58 = vpack.c.bf16 %v1518_v51, %v1510_v50  ;;  %v1517_v59 = vld [vmem:[%s4401_s5 + $0x750] sm:$0xff]  ;;  %v1524_v60 = vld [vmem:[%s4401_s5 + $0x788] sm:$0xff]  ;;  %v1526_v62 = vld [vmem:[%s4401_s5 + $0x798] sm:$0xff] }
 0x157   : > { %2673 = vmatpush1.bf16.msra.mxu0 %v2672_v0  ;;  %v1532_v61 = vld [vmem:[%s4401_s5 + $0x7c8] sm:$0xff]  ;;  %v1534_v0 = vld [vmem:[%s4401_s5 + $0x7d8] sm:$0xff]  ;;  %v1523_v4 = vld [vmem:[%s4401_s5 + $0x780] sm:$0xff] }
 0x158   : > { %2801 = vmatpush1.bf16.msra.mxu1 %v2800_v1  ;;  %2675 = vmatprep.subr.bf16.mxu0 %v2674_v2  ;;  %v2692_v1 = vpack.c.bf16 %v1515_v56, %v1507_v55  ;;  %v2820_v2 = vpack.c.bf16 %v1517_v59, %v1509_v57  ;;  %v2694_v3 = vpack.c.bf16 %v1532_v61, %v1524_v60  ;;  %v1531_v5 = vld [vmem:[%s4401_s5 + $0x7c0] sm:$0xff]  ;;  %v1533_v8 = vld [vmem:[%s4401_s5 + $0x7d0] sm:$0xff]  ;;  %v1540_v9 = vld [vmem:[%s4401_s5 + $0x808] sm:$0xff] }
 0x159   : > { %2803 = vmatprep.subr.bf16.mxu1 %v2802_v6  ;;  %v1525_v6 = vld [vmem:[%s4401_s5 + $0x790] sm:$0xff]  ;;  %v2822_v7 = vpack.c.bf16 %v1534_v0, %v1526_v62  ;;  %v1548_v10 = vld [vmem:[%s4401_s5 + $0x848] sm:$0xff]  ;;  %v1550_v14 = vld [vmem:[%s4401_s5 + $0x858] sm:$0xff] }
 0x15a   : > { %v2698_v17 = vpack.c.bf16 %v1548_v10, %v1540_v9  ;;  %v1539_v18 = vld [vmem:[%s4401_s5 + $0x800] sm:$0xff]  ;;  %v1549_v22 = vld [vmem:[%s4401_s5 + $0x850] sm:$0xff]  ;;  %v1556_v23 = vld [vmem:[%s4401_s5 + $0x888] sm:$0xff] }
 0x15b   : > { %2677 = vmatpush1.bf16.msra.mxu0 %v2676_v13  ;;  %v1542_v13 = vld [vmem:[%s4401_s5 + $0x818] sm:$0xff]  ;;  %v1547_v19 = vld [vmem:[%s4401_s5 + $0x840] sm:$0xff]  ;;  %v1564_v24 = vld [vmem:[%s4401_s5 + $0x8c8] sm:$0xff] }
 0x15c   : > { %2805 = vmatpush1.bf16.msra.mxu1 %v2804_v15  ;;  %2679 = vmatprep.subr.bf16.mxu0 %v2678_v16  ;;  %v2696_v15 = vpack.c.bf16 %v1531_v5, %v1523_v4  ;;  %v2824_v16 = vpack.c.bf16 %v1533_v8, %v1525_v6  ;;  %v2826_v21 = vpack.c.bf16 %v1550_v14, %v1542_v13  ;;  %v1555_v32 = vld [vmem:[%s4401_s5 + $0x880] sm:$0xff]  ;;  %v1557_v35 = vld [vmem:[%s4401_s5 + $0x890] sm:$0xff]  ;;  %v1572_v38 = vld [vmem:[%s4401_s5 + $0x908] sm:$0xff] }
 0x15d   : > { %2807 = vmatprep.subr.bf16.mxu1 %v2806_v20  ;;  %v1541_v20 = vld [vmem:[%s4401_s5 + $0x810] sm:$0xff]  ;;  %v2702_v31 = vpack.c.bf16 %v1564_v24, %v1556_v23  ;;  %v1580_v39 = vld [vmem:[%s4401_s5 + $0x948] sm:$0xff]  ;;  %v1579_v47 = vld [vmem:[%s4401_s5 + $0x940] sm:$0xff] }
 0x15e   : > { %v2828_v30 = vpack.c.bf16 %v1549_v22, %v1541_v20  ;;  %v1565_v37 = vld [vmem:[%s4401_s5 + $0x8d0] sm:$0xff]  ;;  %v2706_v45 = vpack.c.bf16 %v1580_v39, %v1572_v38  ;;  %v1588_v51 = vld [vmem:[%s4401_s5 + $0x988] sm:$0xff]  ;;  %v1595_v59 = vld [vmem:[%s4401_s5 + $0x9c0] sm:$0xff] }
 0x15f   : > { %2681 = vmatpush1.bf16.msra.mxu0 %v2680_v27  ;;  %v1558_v27 = vld [vmem:[%s4401_s5 + $0x898] sm:$0xff]  ;;  %v2832_v44 = vpack.c.bf16 %v1565_v37, %v1557_v35  ;;  %v1573_v48 = vld [vmem:[%s4401_s5 + $0x910] sm:$0xff]  ;;  %v1604_v0 = vld [vmem:[%s4401_s5 + $0xa08] sm:$0xff] }
 0x160   : > { %2809 = vmatpush1.bf16.msra.mxu1 %v2808_v28  ;;  %2683 = vmatprep.subr.bf16.mxu0 %v2682_v29  ;;  %v1566_v28 = vld [vmem:[%s4401_s5 + $0x8d8] sm:$0xff]  ;;  %v2700_v29 = vpack.c.bf16 %v1547_v19, %v1539_v18  ;;  %v1581_v50 = vld [vmem:[%s4401_s5 + $0x950] sm:$0xff]  ;;  %v1611_v8 = vld [vmem:[%s4401_s5 + $0xa40] sm:$0xff] }
 0x161   : > { %2811 = vmatprep.subr.bf16.mxu1 %v2810_v34  ;;  %v1563_v34 = vld [vmem:[%s4401_s5 + $0x8c0] sm:$0xff]  ;;  %v2830_v36 = vpack.c.bf16 %v1566_v28, %v1558_v27  ;;  %v2836_v56 = vpack.c.bf16 %v1581_v50, %v1573_v48  ;;  %v1589_v60 = vld [vmem:[%s4401_s5 + $0x990] sm:$0xff]  ;;  %v1620_v13 = vld [vmem:[%s4401_s5 + $0xa88] sm:$0xff] }
 0x162   : > { %v2704_v43 = vpack.c.bf16 %v1563_v34, %v1555_v32  ;;  %v1597_v62 = vld [vmem:[%s4401_s5 + $0x9d0] sm:$0xff]  ;;  %v1628_v14 = vld [vmem:[%s4401_s5 + $0xac8] sm:$0xff]  ;;  %v1619_v20 = vld [vmem:[%s4401_s5 + $0xa80] sm:$0xff] }
 0x163   : > { %2685 = vmatpush1.bf16.msra.mxu0 %v2684_v40  ;;  %v4577_v40 = vcombine.high %v4565_v25, %v4565_v25  ;;  %v2840_v5 = vpack.c.bf16 %v1597_v62, %v1589_v60  ;;  %v1605_v9 = vld [vmem:[%s4401_s5 + $0xa10] sm:$0xff]  ;;  %v2718_v19 = vpack.c.bf16 %v1628_v14, %v1620_v13  ;;  %v1636_v27 = vld [vmem:[%s4401_s5 + $0xb08] sm:$0xff]  ;;  %v1635_v35 = vld [vmem:[%s4401_s5 + $0xb00] sm:$0xff] }
 0x164   : > { %2813 = vmatpush1.bf16.msra.mxu1 %v2812_v41  ;;  %2687 = vmatprep.subr.bf16.mxu0 %v2686_v42  ;;  %v1574_v41 = vld [vmem:[%s4401_s5 + $0x918] sm:$0xff]  ;;  %v1613_v11 = vld [vmem:[%s4401_s5 + $0xa50] sm:$0xff]  ;;  %v1644_v28 = vld [vmem:[%s4401_s5 + $0xb48] sm:$0xff] }
 0x165   : > { %2815 = vmatprep.subr.bf16.mxu1 %v2814_v46  ;;  %v1582_v42 = vld [vmem:[%s4401_s5 + $0x958] sm:$0xff]  ;;  %v1571_v46 = vld [vmem:[%s4401_s5 + $0x900] sm:$0xff]  ;;  %v2844_v18 = vpack.c.bf16 %v1613_v11, %v1605_v9  ;;  %v1621_v22 = vld [vmem:[%s4401_s5 + $0xa90] sm:$0xff]  ;;  %v2722_v34 = vpack.c.bf16 %v1644_v28, %v1636_v27 }
 0x166   : > { %v2834_v49 = vpack.c.bf16 %v1582_v42, %v1574_v41  ;;  %v2708_v55 = vpack.c.bf16 %v1579_v47, %v1571_v46  ;;  %v1629_v24 = vld [vmem:[%s4401_s5 + $0xad0] sm:$0xff]  ;;  %v1652_v41 = vld [vmem:[%s4401_s5 + $0xb88] sm:$0xff]  ;;  %v1651_v48 = vld [vmem:[%s4401_s5 + $0xb80] sm:$0xff] }
 0x167   : > { %2689 = vmatpush1.bf16.msra.mxu0 %v2688_v52  ;;  %v1596_v52 = vld [vmem:[%s4401_s5 + $0x9c8] sm:$0xff]  ;;  %v2848_v32 = vpack.c.bf16 %v1629_v24, %v1621_v22  ;;  %v1637_v37 = vld [vmem:[%s4401_s5 + $0xb10] sm:$0xff]  ;;  %v1667_v60 = vld [vmem:[%s4401_s5 + $0xc00] sm:$0xff] }
 0x168   : > { %2817 = vmatpush1.bf16.msra.mxu1 %v2816_v53  ;;  %2691 = vmatprep.subr.bf16.mxu0 %v2690_v54  ;;  %v1590_v53 = vld [vmem:[%s4401_s5 + $0x998] sm:$0xff]  ;;  %v2710_v57 = vpack.c.bf16 %v1596_v52, %v1588_v51  ;;  %v1645_v39 = vld [vmem:[%s4401_s5 + $0xb50] sm:$0xff]  ;;  %v1660_v42 = vld [vmem:[%s4401_s5 + $0xbc8] sm:$0xff] }
 0x169   : > { %2819 = vmatprep.subr.bf16.mxu1 %v2818_v58  ;;  %v1598_v54 = vld [vmem:[%s4401_s5 + $0x9d8] sm:$0xff]  ;;  %v1587_v58 = vld [vmem:[%s4401_s5 + $0x980] sm:$0xff]  ;;  %v2852_v46 = vpack.c.bf16 %v1645_v39, %v1637_v37  ;;  %v2726_v47 = vpack.c.bf16 %v1660_v42, %v1652_v41  ;;  %v1653_v50 = vld [vmem:[%s4401_s5 + $0xb90] sm:$0xff] }
 0x16a   : > { %v2838_v61 = vpack.c.bf16 %v1598_v54, %v1590_v53  ;;  %v2712_v4 = vpack.c.bf16 %v1595_v59, %v1587_v58  ;;  %v1661_v52 = vld [vmem:[%s4401_s5 + $0xbd0] sm:$0xff]  ;;  %v1668_v53 = vld [vmem:[%s4401_s5 + $0xc08] sm:$0xff]  ;;  %v1683_v9 = vld [vmem:[%s4401_s5 + $0xc80] sm:$0xff] }
 0x16b   : > { %2693 = vmatpush1.bf16.msra.mxu0 %v2692_v1  ;;  %v1612_v1 = vld [vmem:[%s4401_s5 + $0xa48] sm:$0xff]  ;;  %v2856_v58 = vpack.c.bf16 %v1661_v52, %v1653_v50  ;;  %v1669_v62 = vld [vmem:[%s4401_s5 + $0xc10] sm:$0xff]  ;;  %v1699_v22 = vld [vmem:[%s4401_s5 + $0xd00] sm:$0xff] }
 0x16c   : > { %2821 = vmatpush1.bf16.msra.mxu1 %v2820_v2  ;;  %2695 = vmatprep.subr.bf16.mxu0 %v2694_v3  ;;  %v1606_v2 = vld [vmem:[%s4401_s5 + $0xa18] sm:$0xff]  ;;  %v2714_v6 = vpack.c.bf16 %v1612_v1, %v1604_v0  ;;  %v1676_v54 = vld [vmem:[%s4401_s5 + $0xc48] sm:$0xff]  ;;  %v1677_v1 = vld [vmem:[%s4401_s5 + $0xc50] sm:$0xff] }
 0x16d   : > { %2823 = vmatprep.subr.bf16.mxu1 %v2822_v7  ;;  %v1614_v3 = vld [vmem:[%s4401_s5 + $0xa58] sm:$0xff]  ;;  %v1603_v7 = vld [vmem:[%s4401_s5 + $0xa00] sm:$0xff]  ;;  %v2730_v59 = vpack.c.bf16 %v1676_v54, %v1668_v53  ;;  %v1685_v11 = vld [vmem:[%s4401_s5 + $0xc90] sm:$0xff] }
 0x16e   : > { %v2842_v10 = vpack.c.bf16 %v1614_v3, %v1606_v2  ;;  %v1684_v2 = vld [vmem:[%s4401_s5 + $0xc88] sm:$0xff]  ;;  %v1693_v14 = vld [vmem:[%s4401_s5 + $0xcd0] sm:$0xff]  ;;  %v1715_v37 = vld [vmem:[%s4401_s5 + $0xd80] sm:$0xff] }
 0x16f   : > { %2697 = vmatpush1.bf16.msra.mxu0 %v2696_v15  ;;  %v1622_v15 = vld [vmem:[%s4401_s5 + $0xa98] sm:$0xff]  ;;  %v1692_v3 = vld [vmem:[%s4401_s5 + $0xcc8] sm:$0xff]  ;;  %v1701_v24 = vld [vmem:[%s4401_s5 + $0xd10] sm:$0xff] }
 0x170   : > { %2825 = vmatpush1.bf16.msra.mxu1 %v2824_v16  ;;  %2699 = vmatprep.subr.bf16.mxu0 %v2698_v17  ;;  %v1630_v16 = vld [vmem:[%s4401_s5 + $0xad8] sm:$0xff]  ;;  %v2716_v17 = vpack.c.bf16 %v1611_v8, %v1603_v7  ;;  %v2860_v7 = vpack.c.bf16 %v1677_v1, %v1669_v62  ;;  %v2734_v8 = vpack.c.bf16 %v1692_v3, %v1684_v2  ;;  %v1709_v28 = vld [vmem:[%s4401_s5 + $0xd50] sm:$0xff]  ;;  %v1731_v50 = vld [vmem:[%s4401_s5 + $0xe00] sm:$0xff] }
 0x171   : > { %2827 = vmatprep.subr.bf16.mxu1 %v2826_v21  ;;  %v1627_v21 = vld [vmem:[%s4401_s5 + $0xac0] sm:$0xff]  ;;  %v2846_v23 = vpack.c.bf16 %v1630_v16, %v1622_v15  ;;  %v1700_v15 = vld [vmem:[%s4401_s5 + $0xd08] sm:$0xff]  ;;  %v1717_v39 = vld [vmem:[%s4401_s5 + $0xd90] sm:$0xff] }
 0x172   : > { %1882 = vmatmul.mubr.f32.vlgmr.msra.gmra.mrb[0].mxu0 %v4516_v26  ;;  %v1708_v16 = vld [vmem:[%s4401_s5 + $0xd48] sm:$0xff]  ;;  %v1725_v42 = vld [vmem:[%s4401_s5 + $0xdd0] sm:$0xff]  ;;  %v1747_v62 = vld [vmem:[%s4401_s5 + $0xe80] sm:$0xff] }
 0x173   : > { %2701 = vmatpush1.bf16.msra.mxu0 %v2700_v29  ;;  %2024 = vmatmul.mubr.f32.vlgmr.msra.gmra.mrb[0].mxu1 %v4516_v26  ;;  %v1638_v29 = vld [vmem:[%s4401_s5 + $0xb18] sm:$0xff]  ;;  %v1733_v52 = vld [vmem:[%s4401_s5 + $0xe10] sm:$0xff] }
 0x174   : > { %2829 = vmatpush1.bf16.msra.mxu1 %v2828_v30  ;;  %2703 = vmatprep.subr.bf16.mxu0 %v2702_v31  ;;  %v1646_v30 = vld [vmem:[%s4401_s5 + $0xb58] sm:$0xff]  ;;  %v2720_v31 = vpack.c.bf16 %v1627_v21, %v1619_v20  ;;  %v2864_v20 = vpack.c.bf16 %v1693_v14, %v1685_v11  ;;  %v2738_v21 = vpack.c.bf16 %v1708_v16, %v1700_v15  ;;  %v1741_v54 = vld [vmem:[%s4401_s5 + $0xe50] sm:$0xff]  ;;  %v1763_v11 = vld [vmem:[%s4401_s5 + $0xf00] sm:$0xff] }
 0x175   : > { %2831 = vmatprep.subr.bf16.mxu1 %v2830_v36  ;;  %1952 = vmatprep.mubr.f32.mxu0 %v4577_v40  ;;  %v1643_v36 = vld [vmem:[%s4401_s5 + $0xb40] sm:$0xff]  ;;  %v2850_v38 = vpack.c.bf16 %v1646_v30, %v1638_v29  ;;  %v1716_v29 = vld [vmem:[%s4401_s5 + $0xd88] sm:$0xff]  ;;  %v1749_v1 = vld [vmem:[%s4401_s5 + $0xe90] sm:$0xff] }
 0x176   : > { %2094 = vmatprep.mubr.f32.mxu1 %v4577_v40  ;;  %v1724_v30 = vld [vmem:[%s4401_s5 + $0xdc8] sm:$0xff]  ;;  %v1757_v3 = vld [vmem:[%s4401_s5 + $0xed0] sm:$0xff] }
 0x177   : > { %2705 = vmatpush1.bf16.msra.mxu0 %v2704_v43  ;;  %v1654_v43 = vld [vmem:[%s4401_s5 + $0xb98] sm:$0xff]  ;;  %v1765_v14 = vld [vmem:[%s4401_s5 + $0xf10] sm:$0xff] }
 0x178   : > { %2833 = vmatpush1.bf16.msra.mxu1 %v2832_v44  ;;  %2707 = vmatprep.subr.bf16.mxu0 %v2706_v45  ;;  %v1662_v44 = vld [vmem:[%s4401_s5 + $0xbd8] sm:$0xff]  ;;  %v2724_v45 = vpack.c.bf16 %v1643_v36, %v1635_v35  ;;  %v2868_v35 = vpack.c.bf16 %v1709_v28, %v1701_v24  ;;  %v2742_v36 = vpack.c.bf16 %v1724_v30, %v1716_v29  ;;  %v1773_v16 = vld [vmem:[%s4401_s5 + $0xf50] sm:$0xff]  ;;  %v1779_v24 = vld [vmem:[%s4401_s5 + $0xf80] sm:$0xff] }
 0x179   : > { %2835 = vmatprep.subr.bf16.mxu1 %v2834_v49  ;;  %v1659_v49 = vld [vmem:[%s4401_s5 + $0xbc0] sm:$0xff]  ;;  %v2854_v51 = vpack.c.bf16 %v1662_v44, %v1654_v43  ;;  %v1732_v43 = vld [vmem:[%s4401_s5 + $0xe08] sm:$0xff]  ;;  %v1781_v28 = vld [vmem:[%s4401_s5 + $0xf90] sm:$0xff] }
 0x17a   : > { %v1740_v44 = vld [vmem:[%s4401_s5 + $0xe48] sm:$0xff]  ;;  %v1789_v30 = vld [vmem:[%s4401_s5 + $0xfd0] sm:$0xff] }
 0x17b   : > { %2709 = vmatpush1.bf16.msra.mxu0 %v2708_v55  ;;  %v1670_v55 = vld [vmem:[%s4401_s5 + $0xc18] sm:$0xff] }
 0x17c   : > { %2837 = vmatpush1.bf16.msra.mxu1 %v2836_v56  ;;  %2711 = vmatprep.subr.bf16.mxu0 %v2710_v57  ;;  %v1678_v56 = vld [vmem:[%s4401_s5 + $0xc58] sm:$0xff]  ;;  %v2728_v57 = vpack.c.bf16 %v1659_v49, %v1651_v48  ;;  %v2872_v48 = vpack.c.bf16 %v1725_v42, %v1717_v39  ;;  %v2746_v49 = vpack.c.bf16 %v1740_v44, %v1732_v43  ;;  %v1287_v39 = vld [vmem:[%s4401_s5 + $0x20] sm:$0xff]  ;;  %v1289_v42 = vld [vmem:[%s4401_s5 + $0x30] sm:$0xff] }
 0x17d   : > { %2839 = vmatprep.subr.bf16.mxu1 %v2838_v61  ;;  %v1675_v61 = vld [vmem:[%s4401_s5 + $0xc40] sm:$0xff]  ;;  %v2858_v0 = vpack.c.bf16 %v1678_v56, %v1670_v55  ;;  %v1748_v55 = vld [vmem:[%s4401_s5 + $0xe88] sm:$0xff]  ;;  %v1297_v44 = vld [vmem:[%s4401_s5 + $0x70] sm:$0xff] }
 0x17e   : > { %v1756_v56 = vld [vmem:[%s4401_s5 + $0xec8] sm:$0xff] }
 0x17f   : > { %2713 = vmatpush1.bf16.msra.mxu0 %v2712_v4  ;;  %v1686_v4 = vld [vmem:[%s4401_s5 + $0xc98] sm:$0xff] }
 0x180   : > { %2841 = vmatpush1.bf16.msra.mxu1 %v2840_v5  ;;  %2715 = vmatprep.subr.bf16.mxu0 %v2714_v6  ;;  %v1694_v5 = vld [vmem:[%s4401_s5 + $0xcd8] sm:$0xff]  ;;  %v2732_v6 = vpack.c.bf16 %v1675_v61, %v1667_v60  ;;  %v2876_v60 = vpack.c.bf16 %v1741_v54, %v1733_v52  ;;  %v2750_v61 = vpack.c.bf16 %v1756_v56, %v1748_v55  ;;  %v1303_v52 = vld [vmem:[%s4401_s5 + $0xa0] sm:$0xff]  ;;  %v1305_v54 = vld [vmem:[%s4401_s5 + $0xb0] sm:$0xff] }
 0x181   : > { %2843 = vmatprep.subr.bf16.mxu1 %v2842_v10  ;;  %v1691_v10 = vld [vmem:[%s4401_s5 + $0xcc0] sm:$0xff]  ;;  %v2862_v13 = vpack.c.bf16 %v1694_v5, %v1686_v4  ;;  %v1764_v4 = vld [vmem:[%s4401_s5 + $0xf08] sm:$0xff]  ;;  %v1313_v56 = vld [vmem:[%s4401_s5 + $0xf0] sm:$0xff] }
 0x182   : > { %v1772_v5 = vld [vmem:[%s4401_s5 + $0xf48] sm:$0xff] }
 0x183   : > { %2717 = vmatpush1.bf16.msra.mxu0 %v2716_v17  ;;  %v1702_v17 = vld [vmem:[%s4401_s5 + $0xd18] sm:$0xff] }
 0x184   : > { %2845 = vmatpush1.bf16.msra.mxu1 %v2844_v18  ;;  %2719 = vmatprep.subr.bf16.mxu0 %v2718_v19  ;;  %v1710_v18 = vld [vmem:[%s4401_s5 + $0xd58] sm:$0xff]  ;;  %v2736_v19 = vpack.c.bf16 %v1691_v10, %v1683_v9  ;;  %v2880_v9 = vpack.c.bf16 %v1757_v3, %v1749_v1  ;;  %v2754_v10 = vpack.c.bf16 %v1772_v5, %v1764_v4  ;;  %v1319_v1 = vld [vmem:[%s4401_s5 + $0x120] sm:$0xff]  ;;  %v1321_v3 = vld [vmem:[%s4401_s5 + $0x130] sm:$0xff] }
 0x185   : > { %2847 = vmatprep.subr.bf16.mxu1 %v2846_v23  ;;  %v1707_v23 = vld [vmem:[%s4401_s5 + $0xd40] sm:$0xff]  ;;  %v2866_v27 = vpack.c.bf16 %v1710_v18, %v1702_v17  ;;  %v1780_v17 = vld [vmem:[%s4401_s5 + $0xf88] sm:$0xff]  ;;  %v1329_v5 = vld [vmem:[%s4401_s5 + $0x170] sm:$0xff] }
 0x186   : > { %v1788_v18 = vld [vmem:[%s4401_s5 + $0xfc8] sm:$0xff] }
 0x187   : > { %2721 = vmatpush1.bf16.msra.mxu0 %v2720_v31  ;;  %v1718_v31 = vld [vmem:[%s4401_s5 + $0xd98] sm:$0xff] }
 0x188   : > { %2849 = vmatpush1.bf16.msra.mxu1 %v2848_v32  ;;  %2723 = vmatprep.subr.bf16.mxu0 %v2722_v34  ;;  %v1726_v32 = vld [vmem:[%s4401_s5 + $0xdd8] sm:$0xff]  ;;  %v2740_v34 = vpack.c.bf16 %v1707_v23, %v1699_v22  ;;  %v2884_v22 = vpack.c.bf16 %v1773_v16, %v1765_v14  ;;  %v2758_v23 = vpack.c.bf16 %v1788_v18, %v1780_v17  ;;  %v1335_v14 = vld [vmem:[%s4401_s5 + $0x1a0] sm:$0xff]  ;;  %v1337_v16 = vld [vmem:[%s4401_s5 + $0x1b0] sm:$0xff] }
 0x189   : > { %2851 = vmatprep.subr.bf16.mxu1 %v2850_v38  ;;  %v1723_v38 = vld [vmem:[%s4401_s5 + $0xdc0] sm:$0xff]  ;;  %v2870_v41 = vpack.c.bf16 %v1726_v32, %v1718_v31  ;;  %v1288_v31 = vld [vmem:[%s4401_s5 + $0x28] sm:$0xff]  ;;  %v1345_v18 = vld [vmem:[%s4401_s5 + $0x1f0] sm:$0xff] }
 0x18a   : > { %v1296_v32 = vld [vmem:[%s4401_s5 + $0x68] sm:$0xff] }
 0x18b   : > { %2725 = vmatpush1.bf16.msra.mxu0 %v2724_v45  ;;  %v1734_v45 = vld [vmem:[%s4401_s5 + $0xe18] sm:$0xff] }
 0x18c   : > { %2853 = vmatpush1.bf16.msra.mxu1 %v2852_v46  ;;  %2727 = vmatprep.subr.bf16.mxu0 %v2726_v47  ;;  %v1742_v46 = vld [vmem:[%s4401_s5 + $0xe58] sm:$0xff]  ;;  %v2744_v47 = vpack.c.bf16 %v1723_v38, %v1715_v37  ;;  %v2888_v37 = vpack.c.bf16 %v1789_v30, %v1781_v28  ;;  %v2890_v38 = vpack.c.bf16 %v1296_v32, %v1288_v31  ;;  %v1359_v28 = vld [vmem:[%s4401_s5 + $0x260] sm:$0xff]  ;;  %v1361_v31 = vld [vmem:[%s4401_s5 + $0x270] sm:$0xff] }
 0x18d   : > { %2855 = vmatprep.subr.bf16.mxu1 %v2854_v51  ;;  %v1739_v51 = vld [vmem:[%s4401_s5 + $0xe40] sm:$0xff]  ;;  %v2874_v53 = vpack.c.bf16 %v1742_v46, %v1734_v45  ;;  %v1304_v45 = vld [vmem:[%s4401_s5 + $0xa8] sm:$0xff] }
 0x18e   : > { %v1312_v46 = vld [vmem:[%s4401_s5 + $0xe8] sm:$0xff] }
 0x18f   : > { %2729 = vmatpush1.bf16.msra.mxu0 %v2728_v57  ;;  %v1750_v57 = vld [vmem:[%s4401_s5 + $0xe98] sm:$0xff]  ;;  %v1368_v32 = vld [vmem:[%s4401_s5 + $0x2a8] sm:$0xff] }
 0x190   : > { %2857 = vmatpush1.bf16.msra.mxu1 %v2856_v58  ;;  %2731 = vmatprep.subr.bf16.mxu0 %v2730_v59  ;;  %v1758_v58 = vld [vmem:[%s4401_s5 + $0xed8] sm:$0xff]  ;;  %v2748_v59 = vpack.c.bf16 %v1739_v51, %v1731_v50  ;;  %v3020_v50 = vpack.c.bf16 %v1297_v44, %v1289_v42  ;;  %v2894_v51 = vpack.c.bf16 %v1312_v46, %v1304_v45  ;;  %v1375_v42 = vld [vmem:[%s4401_s5 + $0x2e0] sm:$0xff]  ;;  %v1377_v45 = vld [vmem:[%s4401_s5 + $0x2f0] sm:$0xff] }
 0x191   : > { %2859 = vmatprep.subr.bf16.mxu1 %v2858_v0  ;;  %v1755_v0 = vld [vmem:[%s4401_s5 + $0xec0] sm:$0xff]  ;;  %v2878_v2 = vpack.c.bf16 %v1758_v58, %v1750_v57  ;;  %v1320_v57 = vld [vmem:[%s4401_s5 + $0x128] sm:$0xff] }
 0x192   : > { %v1328_v58 = vld [vmem:[%s4401_s5 + $0x168] sm:$0xff] }
 0x193   : > { %2733 = vmatpush1.bf16.msra.mxu0 %v2732_v6  ;;  %v1766_v6 = vld [vmem:[%s4401_s5 + $0xf18] sm:$0xff]  ;;  %v1384_v46 = vld [vmem:[%s4401_s5 + $0x328] sm:$0xff] }
 0x194   : > { %2861 = vmatpush1.bf16.msra.mxu1 %v2860_v7  ;;  %2735 = vmatprep.subr.bf16.mxu0 %v2734_v8  ;;  %v1774_v7 = vld [vmem:[%s4401_s5 + $0xf58] sm:$0xff]  ;;  %v2752_v8 = vpack.c.bf16 %v1755_v0, %v1747_v62  ;;  %v3024_v62 = vpack.c.bf16 %v1313_v56, %v1305_v54  ;;  %v2898_v0 = vpack.c.bf16 %v1328_v58, %v1320_v57  ;;  %v1391_v54 = vld [vmem:[%s4401_s5 + $0x360] sm:$0xff]  ;;  %v1393_v57 = vld [vmem:[%s4401_s5 + $0x370] sm:$0xff] }
 0x195   : > { %2863 = vmatprep.subr.bf16.mxu1 %v2862_v13  ;;  %v1771_v13 = vld [vmem:[%s4401_s5 + $0xf40] sm:$0xff]  ;;  %v2882_v15 = vpack.c.bf16 %v1774_v7, %v1766_v6  ;;  %v1336_v6 = vld [vmem:[%s4401_s5 + $0x1a8] sm:$0xff] }
 0x196   : > { %v1344_v7 = vld [vmem:[%s4401_s5 + $0x1e8] sm:$0xff] }
 0x197   : > { %2737 = vmatpush1.bf16.msra.mxu0 %v2736_v19  ;;  %v1782_v19 = vld [vmem:[%s4401_s5 + $0xf98] sm:$0xff]  ;;  %v1400_v58 = vld [vmem:[%s4401_s5 + $0x3a8] sm:$0xff] }
 0x198   : > { %2865 = vmatpush1.bf16.msra.mxu1 %v2864_v20  ;;  %2739 = vmatprep.subr.bf16.mxu0 %v2738_v21  ;;  %v1790_v20 = vld [vmem:[%s4401_s5 + $0xfd8] sm:$0xff]  ;;  %v2756_v21 = vpack.c.bf16 %v1771_v13, %v1763_v11  ;;  %v3028_v11 = vpack.c.bf16 %v1329_v5, %v1321_v3  ;;  %v2902_v13 = vpack.c.bf16 %v1344_v7, %v1336_v6  ;;  %v1407_v3 = vld [vmem:[%s4401_s5 + $0x3e0] sm:$0xff]  ;;  %v1409_v6 = vld [vmem:[%s4401_s5 + $0x3f0] sm:$0xff] }
 0x199   : > { %2867 = vmatprep.subr.bf16.mxu1 %v2866_v27  ;;  %v1787_v27 = vld [vmem:[%s4401_s5 + $0xfc0] sm:$0xff]  ;;  %v2886_v29 = vpack.c.bf16 %v1790_v20, %v1782_v19  ;;  %v1352_v19 = vld [vmem:[%s4401_s5 + $0x228] sm:$0xff]  ;;  %v1354_v20 = vld [vmem:[%s4401_s5 + $0x238] sm:$0xff] }
 0x19a   : > { %v1416_v7 = vld [vmem:[%s4401_s5 + $0x428] sm:$0xff] }
 0x19b   : > { %2741 = vmatpush1.bf16.msra.mxu0 %v2740_v34  ;;  %v1290_v34 = vld [vmem:[%s4401_s5 + $0x38] sm:$0xff] }
 0x19c   : > { %2869 = vmatpush1.bf16.msra.mxu1 %v2868_v35  ;;  %2743 = vmatprep.subr.bf16.mxu0 %v2742_v36  ;;  %v1298_v35 = vld [vmem:[%s4401_s5 + $0x78] sm:$0xff]  ;;  %v2760_v36 = vpack.c.bf16 %v1787_v27, %v1779_v24  ;;  %v1351_v27 = vld [vmem:[%s4401_s5 + $0x220] sm:$0xff] }
 0x19d   : > { %2871 = vmatprep.subr.bf16.mxu1 %v2870_v41  ;;  %v1295_v41 = vld [vmem:[%s4401_s5 + $0x60] sm:$0xff]  ;;  %v3018_v43 = vpack.c.bf16 %v1298_v35, %v1290_v34  ;;  %v1376_v34 = vld [vmem:[%s4401_s5 + $0x2e8] sm:$0xff]  ;;  %v1370_v35 = vld [vmem:[%s4401_s5 + $0x2b8] sm:$0xff] }
 0x19f   : > { %2745 = vmatpush1.bf16.msra.mxu0 %v2744_v47  ;;  %v1306_v47 = vld [vmem:[%s4401_s5 + $0xb8] sm:$0xff] }
 0x1a0   : > { %2873 = vmatpush1.bf16.msra.mxu1 %v2872_v48  ;;  %2747 = vmatprep.subr.bf16.mxu0 %v2746_v49  ;;  %v1314_v48 = vld [vmem:[%s4401_s5 + $0xf8] sm:$0xff]  ;;  %v2892_v49 = vpack.c.bf16 %v1295_v41, %v1287_v39  ;;  %v2910_v39 = vpack.c.bf16 %v1376_v34, %v1368_v32  ;;  %v1367_v41 = vld [vmem:[%s4401_s5 + $0x2a0] sm:$0xff]  ;;  %v1441_v32 = vld [vmem:[%s4401_s5 + $0x4f0] sm:$0xff] }
 0x1a1   : > { %2875 = vmatprep.subr.bf16.mxu1 %v2874_v53  ;;  %v1311_v53 = vld [vmem:[%s4401_s5 + $0xe0] sm:$0xff]  ;;  %v3022_v55 = vpack.c.bf16 %v1314_v48, %v1306_v47  ;;  %v1392_v47 = vld [vmem:[%s4401_s5 + $0x368] sm:$0xff]  ;;  %v1386_v48 = vld [vmem:[%s4401_s5 + $0x338] sm:$0xff] }
 0x1a2   : > { %v1448_v34 = vld [vmem:[%s4401_s5 + $0x528] sm:$0xff] }
 0x1a3   : > { %2749 = vmatpush1.bf16.msra.mxu0 %v2748_v59  ;;  %v1322_v59 = vld [vmem:[%s4401_s5 + $0x138] sm:$0xff] }
 0x1a4   : > { %2877 = vmatpush1.bf16.msra.mxu1 %v2876_v60  ;;  %2751 = vmatprep.subr.bf16.mxu0 %v2750_v61  ;;  %v1330_v60 = vld [vmem:[%s4401_s5 + $0x178] sm:$0xff]  ;;  %v2896_v61 = vpack.c.bf16 %v1311_v53, %v1303_v52  ;;  %v2914_v52 = vpack.c.bf16 %v1392_v47, %v1384_v46  ;;  %v1383_v53 = vld [vmem:[%s4401_s5 + $0x320] sm:$0xff]  ;;  %v1457_v46 = vld [vmem:[%s4401_s5 + $0x570] sm:$0xff] }
 0x1a5   : > { %2879 = vmatprep.subr.bf16.mxu1 %v2878_v2  ;;  %v1327_v2 = vld [vmem:[%s4401_s5 + $0x160] sm:$0xff]  ;;  %v3026_v4 = vpack.c.bf16 %v1330_v60, %v1322_v59  ;;  %v1408_v59 = vld [vmem:[%s4401_s5 + $0x3e8] sm:$0xff]  ;;  %v1402_v60 = vld [vmem:[%s4401_s5 + $0x3b8] sm:$0xff] }
 0x1a6   : > { %v1464_v47 = vld [vmem:[%s4401_s5 + $0x5a8] sm:$0xff] }
 0x1a7   : > { %2753 = vmatpush1.bf16.msra.mxu0 %v2752_v8  ;;  %v1338_v8 = vld [vmem:[%s4401_s5 + $0x1b8] sm:$0xff] }
 0x1a8   : > { %2881 = vmatpush1.bf16.msra.mxu1 %v2880_v9  ;;  %2755 = vmatprep.subr.bf16.mxu0 %v2754_v10  ;;  %v1346_v9 = vld [vmem:[%s4401_s5 + $0x1f8] sm:$0xff]  ;;  %v2900_v10 = vpack.c.bf16 %v1327_v2, %v1319_v1  ;;  %v2918_v1 = vpack.c.bf16 %v1408_v59, %v1400_v58  ;;  %v1399_v2 = vld [vmem:[%s4401_s5 + $0x3a0] sm:$0xff]  ;;  %v1473_v58 = vld [vmem:[%s4401_s5 + $0x5f0] sm:$0xff] }
 0x1a9   : > { %2883 = vmatprep.subr.bf16.mxu1 %v2882_v15  ;;  %v1343_v15 = vld [vmem:[%s4401_s5 + $0x1e0] sm:$0xff]  ;;  %v3030_v17 = vpack.c.bf16 %v1346_v9, %v1338_v8  ;;  %v1424_v8 = vld [vmem:[%s4401_s5 + $0x468] sm:$0xff]  ;;  %v1418_v9 = vld [vmem:[%s4401_s5 + $0x438] sm:$0xff] }
 0x1aa   : > { %v1480_v59 = vld [vmem:[%s4401_s5 + $0x628] sm:$0xff] }
 0x1ab   : > { %2757 = vmatpush1.bf16.msra.mxu0 %v2756_v21  ;;  %v1362_v21 = vld [vmem:[%s4401_s5 + $0x278] sm:$0xff] }
 0x1ac   : > { %2885 = vmatpush1.bf16.msra.mxu1 %v2884_v22  ;;  %2759 = vmatprep.subr.bf16.mxu0 %v2758_v23  ;;  %v2904_v22 = vpack.c.bf16 %v1343_v15, %v1335_v14  ;;  %v3032_v23 = vpack.c.bf16 %v1345_v18, %v1337_v16  ;;  %v3034_v30 = vpack.c.bf16 %v1362_v21, %v1354_v20  ;;  %v1415_v15 = vld [vmem:[%s4401_s5 + $0x420] sm:$0xff]  ;;  %v1440_v20 = vld [vmem:[%s4401_s5 + $0x4e8] sm:$0xff]  ;;  %v1434_v21 = vld [vmem:[%s4401_s5 + $0x4b8] sm:$0xff] }
 0x1ad   : > { %2887 = vmatprep.subr.bf16.mxu1 %v2886_v29  ;;  %v1353_v29 = vld [vmem:[%s4401_s5 + $0x230] sm:$0xff]  ;;  %v2922_v14 = vpack.c.bf16 %v1424_v8, %v1416_v7  ;;  %v1423_v16 = vld [vmem:[%s4401_s5 + $0x460] sm:$0xff]  ;;  %v1496_v8 = vld [vmem:[%s4401_s5 + $0x6a8] sm:$0xff] }
 0x1ae   : > { %v1489_v7 = vld [vmem:[%s4401_s5 + $0x670] sm:$0xff] }
 0x1af   : > { %2761 = vmatpush1.bf16.msra.mxu0 %v2760_v36  ;;  %v1378_v36 = vld [vmem:[%s4401_s5 + $0x2f8] sm:$0xff] }
 0x1b0   : > { %2889 = vmatpush1.bf16.msra.mxu1 %v2888_v37  ;;  %2891 = vmatprep.subr.bf16.mxu0 %v2890_v38  ;;  %v2908_v37 = vpack.c.bf16 %v1359_v28, %v1351_v27  ;;  %v3036_v38 = vpack.c.bf16 %v1361_v31, %v1353_v29  ;;  %v3038_v44 = vpack.c.bf16 %v1378_v36, %v1370_v35  ;;  %v1431_v28 = vld [vmem:[%s4401_s5 + $0x4a0] sm:$0xff]  ;;  %v1456_v35 = vld [vmem:[%s4401_s5 + $0x568] sm:$0xff]  ;;  %v1450_v36 = vld [vmem:[%s4401_s5 + $0x538] sm:$0xff] }
 0x1b1   : > { %3019 = vmatprep.subr.bf16.mxu1 %v3018_v43  ;;  %v1369_v43 = vld [vmem:[%s4401_s5 + $0x2b0] sm:$0xff]  ;;  %v1439_v29 = vld [vmem:[%s4401_s5 + $0x4e0] sm:$0xff] }
 0x1b2   : > { %1953 = vmatmul.mubr.f32.vlgmr.msra.gmra.mrb[0].mxu0 %v4565_v25 }
 0x1b3   : > { %2095 = vmatmul.mubr.f32.vlgmr.msra.gmra.mrb[0].mxu1 %v4565_v25  ;;  %2893 = vmatpush1.bf16.msra.mxu0 %v2892_v49  ;;  %v1394_v49 = vld [vmem:[%s4401_s5 + $0x378] sm:$0xff] }
 0x1b4   : > { %3021 = vmatpush1.bf16.msra.mxu1 %v3020_v50  ;;  %2895 = vmatprep.subr.bf16.mxu0 %v2894_v51  ;;  %v2912_v50 = vpack.c.bf16 %v1375_v42, %v1367_v41  ;;  %v3040_v51 = vpack.c.bf16 %v1377_v45, %v1369_v43  ;;  %v3042_v56 = vpack.c.bf16 %v1394_v49, %v1386_v48  ;;  %v1447_v42 = vld [vmem:[%s4401_s5 + $0x520] sm:$0xff]  ;;  %v1472_v48 = vld [vmem:[%s4401_s5 + $0x5e8] sm:$0xff]  ;;  %v1466_v49 = vld [vmem:[%s4401_s5 + $0x5b8] sm:$0xff] }
 0x1b5   : > { %3023 = vmatprep.subr.bf16.mxu1 %v3022_v55  ;;  %2165 = vmatprep.mubr.f32.mxu0 %v4523_v33  ;;  %v1385_v55 = vld [vmem:[%s4401_s5 + $0x330] sm:$0xff]  ;;  %v2930_v41 = vpack.c.bf16 %v1456_v35, %v1448_v34  ;;  %v1455_v43 = vld [vmem:[%s4401_s5 + $0x560] sm:$0xff]  ;;  %v1528_v35 = vld [vmem:[%s4401_s5 + $0x7a8] sm:$0xff] }
 0x1b6   : > { %2307 = vmatprep.mubr.f32.mxu1 %v4523_v33  ;;  %v1360_v33 = vld [vmem:[%s4401_s5 + $0x268] sm:$0xff]  ;;  %v1521_v34 = vld [vmem:[%s4401_s5 + $0x770] sm:$0xff] }
 0x1b7   : > { %2897 = vmatpush1.bf16.msra.mxu0 %v2896_v61  ;;  %v2906_v24 = vpack.c.bf16 %v1360_v33, %v1352_v19  ;;  %v1410_v61 = vld [vmem:[%s4401_s5 + $0x3f8] sm:$0xff]  ;;  %v1425_v19 = vld [vmem:[%s4401_s5 + $0x470] sm:$0xff]  ;;  %v1432_v33 = vld [vmem:[%s4401_s5 + $0x4a8] sm:$0xff] }
 0x1b8   : > { %3025 = vmatpush1.bf16.msra.mxu1 %v3024_v62  ;;  %2899 = vmatprep.subr.bf16.mxu0 %v2898_v0  ;;  %v2916_v62 = vpack.c.bf16 %v1391_v54, %v1383_v53  ;;  %v3044_v0 = vpack.c.bf16 %v1393_v57, %v1385_v55  ;;  %v3046_v5 = vpack.c.bf16 %v1410_v61, %v1402_v60  ;;  %v1463_v54 = vld [vmem:[%s4401_s5 + $0x5a0] sm:$0xff]  ;;  %v1488_v60 = vld [vmem:[%s4401_s5 + $0x668] sm:$0xff]  ;;  %v1482_v61 = vld [vmem:[%s4401_s5 + $0x638] sm:$0xff] }
 0x1b9   : > { %3027 = vmatprep.subr.bf16.mxu1 %v3026_v4  ;;  %v1401_v4 = vld [vmem:[%s4401_s5 + $0x3b0] sm:$0xff]  ;;  %v2926_v27 = vpack.c.bf16 %v1440_v20, %v1432_v33  ;;  %v2934_v53 = vpack.c.bf16 %v1472_v48, %v1464_v47  ;;  %v1471_v55 = vld [vmem:[%s4401_s5 + $0x5e0] sm:$0xff]  ;;  %v1512_v20 = vld [vmem:[%s4401_s5 + $0x728] sm:$0xff] }
 0x1ba   : > { %v1505_v33 = vld [vmem:[%s4401_s5 + $0x6f0] sm:$0xff]  ;;  %v1544_v48 = vld [vmem:[%s4401_s5 + $0x828] sm:$0xff] }
 0x1bb   : > { %2901 = vmatpush1.bf16.msra.mxu0 %v2900_v10  ;;  %v1426_v10 = vld [vmem:[%s4401_s5 + $0x478] sm:$0xff]  ;;  %v1537_v47 = vld [vmem:[%s4401_s5 + $0x7f0] sm:$0xff] }
 0x1bc   : > { %3029 = vmatpush1.bf16.msra.mxu1 %v3028_v11  ;;  %2903 = vmatprep.subr.bf16.mxu0 %v2902_v13  ;;  %v2920_v11 = vpack.c.bf16 %v1407_v3, %v1399_v2  ;;  %v3048_v13 = vpack.c.bf16 %v1409_v6, %v1401_v4  ;;  %v3050_v18 = vpack.c.bf16 %v1426_v10, %v1418_v9  ;;  %v1479_v3 = vld [vmem:[%s4401_s5 + $0x620] sm:$0xff]  ;;  %v1504_v9 = vld [vmem:[%s4401_s5 + $0x6e8] sm:$0xff]  ;;  %v1498_v10 = vld [vmem:[%s4401_s5 + $0x6b8] sm:$0xff] }
 0x1bd   : > { %3031 = vmatprep.subr.bf16.mxu1 %v3030_v17  ;;  %v1417_v17 = vld [vmem:[%s4401_s5 + $0x430] sm:$0xff]  ;;  %v2938_v2 = vpack.c.bf16 %v1488_v60, %v1480_v59  ;;  %v1487_v4 = vld [vmem:[%s4401_s5 + $0x660] sm:$0xff]  ;;  %v1560_v60 = vld [vmem:[%s4401_s5 + $0x8a8] sm:$0xff] }
 0x1be   : > { %v1553_v59 = vld [vmem:[%s4401_s5 + $0x870] sm:$0xff] }
 0x1bf   : > { %2905 = vmatpush1.bf16.msra.mxu0 %v2904_v22  ;;  %v1442_v22 = vld [vmem:[%s4401_s5 + $0x4f8] sm:$0xff] }
 0x1c0   : > { %3033 = vmatpush1.bf16.msra.mxu1 %v3032_v23  ;;  %2907 = vmatprep.subr.bf16.mxu0 %v2906_v24  ;;  %v2924_v23 = vpack.c.bf16 %v1423_v16, %v1415_v15  ;;  %v3052_v24 = vpack.c.bf16 %v1425_v19, %v1417_v17  ;;  %v3054_v31 = vpack.c.bf16 %v1442_v22, %v1434_v21  ;;  %v1495_v16 = vld [vmem:[%s4401_s5 + $0x6a0] sm:$0xff]  ;;  %v1520_v21 = vld [vmem:[%s4401_s5 + $0x768] sm:$0xff]  ;;  %v1514_v22 = vld [vmem:[%s4401_s5 + $0x738] sm:$0xff] }
 0x1c1   : > { %3035 = vmatprep.subr.bf16.mxu1 %v3034_v30  ;;  %v1433_v30 = vld [vmem:[%s4401_s5 + $0x4b0] sm:$0xff]  ;;  %v2942_v15 = vpack.c.bf16 %v1504_v9, %v1496_v8  ;;  %v1503_v17 = vld [vmem:[%s4401_s5 + $0x6e0] sm:$0xff]  ;;  %v1576_v9 = vld [vmem:[%s4401_s5 + $0x928] sm:$0xff] }
 0x1c2   : > { %v1569_v8 = vld [vmem:[%s4401_s5 + $0x8f0] sm:$0xff] }
 0x1c3   : > { %2909 = vmatpush1.bf16.msra.mxu0 %v2908_v37  ;;  %v1458_v37 = vld [vmem:[%s4401_s5 + $0x578] sm:$0xff] }
 0x1c4   : > { %3037 = vmatpush1.bf16.msra.mxu1 %v3036_v38  ;;  %2911 = vmatprep.subr.bf16.mxu0 %v2910_v39  ;;  %v2928_v38 = vpack.c.bf16 %v1439_v29, %v1431_v28  ;;  %v3056_v39 = vpack.c.bf16 %v1441_v32, %v1433_v30  ;;  %v3058_v45 = vpack.c.bf16 %v1458_v37, %v1450_v36  ;;  %v1511_v29 = vld [vmem:[%s4401_s5 + $0x720] sm:$0xff]  ;;  %v1536_v36 = vld [vmem:[%s4401_s5 + $0x7e8] sm:$0xff]  ;;  %v1530_v37 = vld [vmem:[%s4401_s5 + $0x7b8] sm:$0xff] }
 0x1c5   : > { %3039 = vmatprep.subr.bf16.mxu1 %v3038_v44  ;;  %v1449_v44 = vld [vmem:[%s4401_s5 + $0x530] sm:$0xff]  ;;  %v2946_v28 = vpack.c.bf16 %v1520_v21, %v1512_v20  ;;  %v1519_v30 = vld [vmem:[%s4401_s5 + $0x760] sm:$0xff]  ;;  %v1592_v21 = vld [vmem:[%s4401_s5 + $0x9a8] sm:$0xff] }
 0x1c6   : > { %v1585_v20 = vld [vmem:[%s4401_s5 + $0x970] sm:$0xff] }
 0x1c7   : > { %2913 = vmatpush1.bf16.msra.mxu0 %v2912_v50  ;;  %v1474_v50 = vld [vmem:[%s4401_s5 + $0x5f8] sm:$0xff] }
 0x1c8   : > { %3041 = vmatpush1.bf16.msra.mxu1 %v3040_v51  ;;  %2915 = vmatprep.subr.bf16.mxu0 %v2914_v52  ;;  %v2932_v51 = vpack.c.bf16 %v1455_v43, %v1447_v42  ;;  %v3060_v52 = vpack.c.bf16 %v1457_v46, %v1449_v44  ;;  %v3062_v57 = vpack.c.bf16 %v1474_v50, %v1466_v49  ;;  %v1527_v43 = vld [vmem:[%s4401_s5 + $0x7a0] sm:$0xff]  ;;  %v1552_v49 = vld [vmem:[%s4401_s5 + $0x868] sm:$0xff]  ;;  %v1546_v50 = vld [vmem:[%s4401_s5 + $0x838] sm:$0xff] }
 0x1c9   : > { %3043 = vmatprep.subr.bf16.mxu1 %v3042_v56  ;;  %v1465_v56 = vld [vmem:[%s4401_s5 + $0x5b0] sm:$0xff]  ;;  %v2950_v42 = vpack.c.bf16 %v1536_v36, %v1528_v35  ;;  %v1535_v44 = vld [vmem:[%s4401_s5 + $0x7e0] sm:$0xff]  ;;  %v1608_v35 = vld [vmem:[%s4401_s5 + $0xa28] sm:$0xff] }
 0x1ca   : > { %v1610_v36 = vld [vmem:[%s4401_s5 + $0xa38] sm:$0xff] }
 0x1cb   : > { %2917 = vmatpush1.bf16.msra.mxu0 %v2916_v62  ;;  %v1490_v62 = vld [vmem:[%s4401_s5 + $0x678] sm:$0xff] }
 0x1cc   : > { %3045 = vmatpush1.bf16.msra.mxu1 %v3044_v0  ;;  %2919 = vmatprep.subr.bf16.mxu0 %v2918_v1  ;;  %v2936_v0 = vpack.c.bf16 %v1471_v55, %v1463_v54  ;;  %v3064_v1 = vpack.c.bf16 %v1473_v58, %v1465_v56  ;;  %v3066_v6 = vpack.c.bf16 %v1490_v62, %v1482_v61  ;;  %v1543_v55 = vld [vmem:[%s4401_s5 + $0x820] sm:$0xff]  ;;  %v1568_v61 = vld [vmem:[%s4401_s5 + $0x8e8] sm:$0xff]  ;;  %v1562_v62 = vld [vmem:[%s4401_s5 + $0x8b8] sm:$0xff] }
 0x1cd   : > { %3047 = vmatprep.subr.bf16.mxu1 %v3046_v5  ;;  %v1481_v5 = vld [vmem:[%s4401_s5 + $0x630] sm:$0xff]  ;;  %v2954_v54 = vpack.c.bf16 %v1552_v49, %v1544_v48  ;;  %v1551_v56 = vld [vmem:[%s4401_s5 + $0x860] sm:$0xff]  ;;  %v1632_v48 = vld [vmem:[%s4401_s5 + $0xae8] sm:$0xff] }
 0x1ce   : > { %v1626_v49 = vld [vmem:[%s4401_s5 + $0xab8] sm:$0xff] }
 0x1cf   : > { %2921 = vmatpush1.bf16.msra.mxu0 %v2920_v11  ;;  %v1506_v11 = vld [vmem:[%s4401_s5 + $0x6f8] sm:$0xff] }
 0x1d0   : > { %3049 = vmatpush1.bf16.msra.mxu1 %v3048_v13  ;;  %2923 = vmatprep.subr.bf16.mxu0 %v2922_v14  ;;  %v2940_v13 = vpack.c.bf16 %v1487_v4, %v1479_v3  ;;  %v3068_v14 = vpack.c.bf16 %v1489_v7, %v1481_v5  ;;  %v3070_v19 = vpack.c.bf16 %v1506_v11, %v1498_v10  ;;  %v1559_v4 = vld [vmem:[%s4401_s5 + $0x8a0] sm:$0xff]  ;;  %v1584_v10 = vld [vmem:[%s4401_s5 + $0x968] sm:$0xff]  ;;  %v1578_v11 = vld [vmem:[%s4401_s5 + $0x938] sm:$0xff] }
 0x1d1   : > { %3051 = vmatprep.subr.bf16.mxu1 %v3050_v18  ;;  %v1497_v18 = vld [vmem:[%s4401_s5 + $0x6b0] sm:$0xff]  ;;  %v2958_v3 = vpack.c.bf16 %v1568_v61, %v1560_v60  ;;  %v1567_v5 = vld [vmem:[%s4401_s5 + $0x8e0] sm:$0xff]  ;;  %v1648_v60 = vld [vmem:[%s4401_s5 + $0xb68] sm:$0xff] }
 0x1d2   : > { %v1642_v61 = vld [vmem:[%s4401_s5 + $0xb38] sm:$0xff] }
 0x1d3   : > { %2925 = vmatpush1.bf16.msra.mxu0 %v2924_v23  ;;  %v1522_v23 = vld [vmem:[%s4401_s5 + $0x778] sm:$0xff] }
 0x1d4   : > { %3053 = vmatpush1.bf16.msra.mxu1 %v3052_v24  ;;  %2927 = vmatprep.subr.bf16.mxu0 %v2926_v27  ;;  %v2944_v24 = vpack.c.bf16 %v1503_v17, %v1495_v16  ;;  %v3072_v27 = vpack.c.bf16 %v1505_v33, %v1497_v18  ;;  %v3074_v32 = vpack.c.bf16 %v1522_v23, %v1514_v22  ;;  %v1575_v17 = vld [vmem:[%s4401_s5 + $0x920] sm:$0xff]  ;;  %v1600_v22 = vld [vmem:[%s4401_s5 + $0x9e8] sm:$0xff]  ;;  %v1602_v23 = vld [vmem:[%s4401_s5 + $0x9f8] sm:$0xff] }
 0x1d5   : > { %3055 = vmatprep.subr.bf16.mxu1 %v3054_v31  ;;  %v1513_v31 = vld [vmem:[%s4401_s5 + $0x730] sm:$0xff]  ;;  %v2962_v16 = vpack.c.bf16 %v1584_v10, %v1576_v9  ;;  %v1583_v18 = vld [vmem:[%s4401_s5 + $0x960] sm:$0xff]  ;;  %v1664_v9 = vld [vmem:[%s4401_s5 + $0xbe8] sm:$0xff] }
 0x1d6   : > { %v1658_v10 = vld [vmem:[%s4401_s5 + $0xbb8] sm:$0xff] }
 0x1d7   : > { %2929 = vmatpush1.bf16.msra.mxu0 %v2928_v38  ;;  %v1538_v38 = vld [vmem:[%s4401_s5 + $0x7f8] sm:$0xff] }
 0x1d8   : > { %3057 = vmatpush1.bf16.msra.mxu1 %v3056_v39  ;;  %2931 = vmatprep.subr.bf16.mxu0 %v2930_v41  ;;  %v2948_v39 = vpack.c.bf16 %v1519_v30, %v1511_v29  ;;  %v3076_v41 = vpack.c.bf16 %v1521_v34, %v1513_v31  ;;  %v3078_v46 = vpack.c.bf16 %v1538_v38, %v1530_v37  ;;  %v1591_v29 = vld [vmem:[%s4401_s5 + $0x9a0] sm:$0xff]  ;;  %v1593_v31 = vld [vmem:[%s4401_s5 + $0x9b0] sm:$0xff]  ;;  %v1618_v37 = vld [vmem:[%s4401_s5 + $0xa78] sm:$0xff] }
 0x1d9   : > { %3059 = vmatprep.subr.bf16.mxu1 %v3058_v45  ;;  %v1529_v45 = vld [vmem:[%s4401_s5 + $0x7b0] sm:$0xff]  ;;  %v1599_v30 = vld [vmem:[%s4401_s5 + $0x9e0] sm:$0xff] }
 0x1da   : > { %v1601_v34 = vld [vmem:[%s4401_s5 + $0x9f0] sm:$0xff]  ;;  %v2968_v38 = vpack.c.bf16 %v1599_v30, %v1591_v29  ;;  %v1679_v29 = vld [vmem:[%s4401_s5 + $0xc60] sm:$0xff] }
 0x1db   : > { %2933 = vmatpush1.bf16.msra.mxu0 %v2932_v51  ;;  %v1554_v51 = vld [vmem:[%s4401_s5 + $0x878] sm:$0xff]  ;;  %v1673_v30 = vld [vmem:[%s4401_s5 + $0xc30] sm:$0xff] }
 0x1dc   : > { %3061 = vmatpush1.bf16.msra.mxu1 %v3060_v52  ;;  %2935 = vmatprep.subr.bf16.mxu0 %v2934_v53  ;;  %v2952_v52 = vpack.c.bf16 %v1535_v44, %v1527_v43  ;;  %v3080_v53 = vpack.c.bf16 %v1537_v47, %v1529_v45  ;;  %v3082_v58 = vpack.c.bf16 %v1554_v51, %v1546_v50  ;;  %v1615_v43 = vld [vmem:[%s4401_s5 + $0xa60] sm:$0xff]  ;;  %v1609_v44 = vld [vmem:[%s4401_s5 + $0xa30] sm:$0xff]  ;;  %v1624_v47 = vld [vmem:[%s4401_s5 + $0xaa8] sm:$0xff] }
 0x1dd   : > { %3063 = vmatprep.subr.bf16.mxu1 %v3062_v57  ;;  %v1545_v57 = vld [vmem:[%s4401_s5 + $0x830] sm:$0xff]  ;;  %v3098_v45 = vpack.c.bf16 %v1618_v37, %v1610_v36  ;;  %v1634_v50 = vld [vmem:[%s4401_s5 + $0xaf8] sm:$0xff] }
 0x1de   : > { %v1698_v36 = vld [vmem:[%s4401_s5 + $0xcf8] sm:$0xff] }
 0x1df   : > { %2937 = vmatpush1.bf16.msra.mxu0 %v2936_v0  ;;  %v1570_v0 = vld [vmem:[%s4401_s5 + $0x8f8] sm:$0xff] }
 0x1e0   : > { %3065 = vmatpush1.bf16.msra.mxu1 %v3064_v1  ;;  %2939 = vmatprep.subr.bf16.mxu0 %v2938_v2  ;;  %v2956_v1 = vpack.c.bf16 %v1551_v56, %v1543_v55  ;;  %v3084_v2 = vpack.c.bf16 %v1553_v59, %v1545_v57  ;;  %v3086_v7 = vpack.c.bf16 %v1570_v0, %v1562_v62  ;;  %v1631_v55 = vld [vmem:[%s4401_s5 + $0xae0] sm:$0xff]  ;;  %v1625_v56 = vld [vmem:[%s4401_s5 + $0xab0] sm:$0xff]  ;;  %v1640_v59 = vld [vmem:[%s4401_s5 + $0xb28] sm:$0xff] }
 0x1e1   : > { %3067 = vmatprep.subr.bf16.mxu1 %v3066_v6  ;;  %v1561_v6 = vld [vmem:[%s4401_s5 + $0x8b0] sm:$0xff]  ;;  %v3102_v57 = vpack.c.bf16 %v1634_v50, %v1626_v49  ;;  %v1650_v62 = vld [vmem:[%s4401_s5 + $0xb78] sm:$0xff] }
 0x1e2   : > { %v1714_v49 = vld [vmem:[%s4401_s5 + $0xd78] sm:$0xff] }
 0x1e3   : > { %2941 = vmatpush1.bf16.msra.mxu0 %v2940_v13  ;;  %v1586_v13 = vld [vmem:[%s4401_s5 + $0x978] sm:$0xff] }
 0x1e4   : > { %3069 = vmatpush1.bf16.msra.mxu1 %v3068_v14  ;;  %2943 = vmatprep.subr.bf16.mxu0 %v2942_v15  ;;  %v2960_v14 = vpack.c.bf16 %v1567_v5, %v1559_v4  ;;  %v3088_v15 = vpack.c.bf16 %v1569_v8, %v1561_v6  ;;  %v3090_v33 = vpack.c.bf16 %v1586_v13, %v1578_v11  ;;  %v1647_v4 = vld [vmem:[%s4401_s5 + $0xb60] sm:$0xff]  ;;  %v1641_v5 = vld [vmem:[%s4401_s5 + $0xb30] sm:$0xff]  ;;  %v1656_v8 = vld [vmem:[%s4401_s5 + $0xba8] sm:$0xff] }
 0x1e5   : > { %3071 = vmatprep.subr.bf16.mxu1 %v3070_v19  ;;  %v1577_v19 = vld [vmem:[%s4401_s5 + $0x930] sm:$0xff]  ;;  %v3106_v6 = vpack.c.bf16 %v1650_v62, %v1642_v61  ;;  %v1666_v11 = vld [vmem:[%s4401_s5 + $0xbf8] sm:$0xff] }
 0x1e6   : > { %v1730_v61 = vld [vmem:[%s4401_s5 + $0xdf8] sm:$0xff] }
 0x1e7   : > { %2945 = vmatpush1.bf16.msra.mxu0 %v2944_v24  ;;  %v2964_v24 = vpack.c.bf16 %v1583_v18, %v1575_v17  ;;  %v1663_v17 = vld [vmem:[%s4401_s5 + $0xbe0] sm:$0xff]  ;;  %v1657_v18 = vld [vmem:[%s4401_s5 + $0xbb0] sm:$0xff] }
 0x1e8   : > { %3073 = vmatpush1.bf16.msra.mxu1 %v3072_v27  ;;  %2947 = vmatprep.subr.bf16.mxu0 %v2946_v28  ;;  %v3092_v27 = vpack.c.bf16 %v1585_v20, %v1577_v19  ;;  %v2966_v28 = vpack.c.bf16 %v1600_v22, %v1592_v21  ;;  %v3110_v19 = vpack.c.bf16 %v1666_v11, %v1658_v10  ;;  %v1672_v20 = vld [vmem:[%s4401_s5 + $0xc28] sm:$0xff]  ;;  %v1674_v22 = vld [vmem:[%s4401_s5 + $0xc38] sm:$0xff] }
 0x1e9   : > { %3075 = vmatprep.subr.bf16.mxu1 %v3074_v32  ;;  %v1680_v21 = vld [vmem:[%s4401_s5 + $0xc68] sm:$0xff]  ;;  %v1746_v10 = vld [vmem:[%s4401_s5 + $0xe78] sm:$0xff] }
 0x1eb   : > { %2949 = vmatpush1.bf16.msra.mxu0 %v2948_v39  ;;  %v3096_v39 = vpack.c.bf16 %v1601_v34, %v1593_v31  ;;  %v1688_v34 = vld [vmem:[%s4401_s5 + $0xca8] sm:$0xff] }
 0x1ec   : > { %3077 = vmatpush1.bf16.msra.mxu1 %v3076_v41  ;;  %2951 = vmatprep.subr.bf16.mxu0 %v2950_v42  ;;  %v1607_v42 = vld [vmem:[%s4401_s5 + $0xa20] sm:$0xff] }
 0x1ed   : > { %3079 = vmatprep.subr.bf16.mxu1 %v3078_v46  ;;  %v1617_v46 = vld [vmem:[%s4401_s5 + $0xa70] sm:$0xff]  ;;  %v2972_v51 = vpack.c.bf16 %v1615_v43, %v1607_v42  ;;  %v1695_v42 = vld [vmem:[%s4401_s5 + $0xce0] sm:$0xff] }
 0x1ee   : > { %v1689_v43 = vld [vmem:[%s4401_s5 + $0xcb0] sm:$0xff] }
 0x1ef   : > { %2953 = vmatpush1.bf16.msra.mxu0 %v2952_v52  ;;  %v3100_v52 = vpack.c.bf16 %v1617_v46, %v1609_v44  ;;  %v1704_v46 = vld [vmem:[%s4401_s5 + $0xd28] sm:$0xff] }
 0x1f0   : > { %3081 = vmatpush1.bf16.msra.mxu1 %v3080_v53  ;;  %2955 = vmatprep.subr.bf16.mxu0 %v2954_v54  ;;  %v2974_v53 = vpack.c.bf16 %v1632_v48, %v1624_v47  ;;  %v1623_v54 = vld [vmem:[%s4401_s5 + $0xaa0] sm:$0xff]  ;;  %v1712_v47 = vld [vmem:[%s4401_s5 + $0xd68] sm:$0xff]  ;;  %v1706_v48 = vld [vmem:[%s4401_s5 + $0xd38] sm:$0xff] }
 0x1f1   : > { %3083 = vmatprep.subr.bf16.mxu1 %v3082_v58  ;;  %v1633_v58 = vld [vmem:[%s4401_s5 + $0xaf0] sm:$0xff]  ;;  %v2976_v0 = vpack.c.bf16 %v1631_v55, %v1623_v54  ;;  %v1711_v54 = vld [vmem:[%s4401_s5 + $0xd60] sm:$0xff] }
 0x1f2   : > { %2166 = vmatmul.mubr.f32.vlgmr.msra.gmra.mrb[2].mxu0 %v4516_v26  ;;  %v1705_v55 = vld [vmem:[%s4401_s5 + $0xd30] sm:$0xff] }
 0x1f3   : > { %2957 = vmatpush1.bf16.msra.mxu0 %v2956_v1  ;;  %2308 = vmatmul.mubr.f32.vlgmr.msra.gmra.mrb[2].mxu1 %v4516_v26  ;;  %v1594_v26 = vld [vmem:[%s4401_s5 + $0x9b8] sm:$0xff]  ;;  %v3104_v1 = vpack.c.bf16 %v1633_v58, %v1625_v56  ;;  %v3122_v56 = vpack.c.bf16 %v1714_v49, %v1706_v48  ;;  %v1720_v58 = vld [vmem:[%s4401_s5 + $0xda8] sm:$0xff] }
 0x1f4   : > { %3085 = vmatpush1.bf16.msra.mxu1 %v3084_v2  ;;  %2959 = vmatprep.subr.bf16.mxu0 %v2958_v3  ;;  %v3094_v32 = vpack.c.bf16 %v1602_v23, %v1594_v26  ;;  %v2978_v2 = vpack.c.bf16 %v1648_v60, %v1640_v59  ;;  %v1639_v3 = vld [vmem:[%s4401_s5 + $0xb20] sm:$0xff]  ;;  %v1682_v26 = vld [vmem:[%s4401_s5 + $0xc78] sm:$0xff]  ;;  %v1728_v59 = vld [vmem:[%s4401_s5 + $0xde8] sm:$0xff] }
 0x1f5   : > { %3087 = vmatprep.subr.bf16.mxu1 %v3086_v7  ;;  %2236 = vmatprep.mubr.f32.mxu0 %v4577_v40  ;;  %v1649_v7 = vld [vmem:[%s4401_s5 + $0xb70] sm:$0xff]  ;;  %v2980_v13 = vpack.c.bf16 %v1647_v4, %v1639_v3  ;;  %v3114_v31 = vpack.c.bf16 %v1682_v26, %v1674_v22  ;;  %v1722_v60 = vld [vmem:[%s4401_s5 + $0xdb8] sm:$0xff]  ;;  %v1727_v3 = vld [vmem:[%s4401_s5 + $0xde0] sm:$0xff] }
 0x1f6   : > { %2378 = vmatprep.mubr.f32.mxu1 %v4577_v40  ;;  %v1616_v40 = vld [vmem:[%s4401_s5 + $0xa68] sm:$0xff]  ;;  %v1721_v4 = vld [vmem:[%s4401_s5 + $0xdb0] sm:$0xff]  ;;  %v1762_v22 = vld [vmem:[%s4401_s5 + $0xef8] sm:$0xff] }
 0x1f7   : > { %2961 = vmatpush1.bf16.msra.mxu0 %v2960_v14  ;;  %v2970_v41 = vpack.c.bf16 %v1616_v40, %v1608_v35  ;;  %v3108_v14 = vpack.c.bf16 %v1649_v7, %v1641_v5  ;;  %v1696_v35 = vld [vmem:[%s4401_s5 + $0xce8] sm:$0xff]  ;;  %v1690_v40 = vld [vmem:[%s4401_s5 + $0xcb8] sm:$0xff]  ;;  %v3126_v5 = vpack.c.bf16 %v1730_v61, %v1722_v60 }
 0x1f8   : > { %3089 = vmatpush1.bf16.msra.mxu1 %v3088_v15  ;;  %2963 = vmatprep.subr.bf16.mxu0 %v2962_v16  ;;  %v2982_v15 = vpack.c.bf16 %v1664_v9, %v1656_v8  ;;  %v1655_v16 = vld [vmem:[%s4401_s5 + $0xba0] sm:$0xff]  ;;  %v3118_v44 = vpack.c.bf16 %v1698_v36, %v1690_v40  ;;  %v1736_v7 = vld [vmem:[%s4401_s5 + $0xe28] sm:$0xff]  ;;  %v1738_v9 = vld [vmem:[%s4401_s5 + $0xe38] sm:$0xff] }
 0x1f9   : > { %3091 = vmatprep.subr.bf16.mxu1 %v3090_v33  ;;  %v1665_v33 = vld [vmem:[%s4401_s5 + $0xbf0] sm:$0xff]  ;;  %v2984_v23 = vpack.c.bf16 %v1663_v17, %v1655_v16  ;;  %v1744_v8 = vld [vmem:[%s4401_s5 + $0xe68] sm:$0xff]  ;;  %v1743_v16 = vld [vmem:[%s4401_s5 + $0xe60] sm:$0xff] }
 0x1fa   : > { %v1737_v17 = vld [vmem:[%s4401_s5 + $0xe30] sm:$0xff]  ;;  %v1778_v40 = vld [vmem:[%s4401_s5 + $0xf78] sm:$0xff] }
 0x1fb   : > { %2965 = vmatpush1.bf16.msra.mxu0 %v2964_v24  ;;  %v3112_v24 = vpack.c.bf16 %v1665_v33, %v1657_v18  ;;  %v3130_v18 = vpack.c.bf16 %v1746_v10, %v1738_v9  ;;  %v1752_v33 = vld [vmem:[%s4401_s5 + $0xea8] sm:$0xff]  ;;  %v1794_v48 = vld [vmem:[%s4401_s5 + $0xff8] sm:$0xff] }
 0x1fc   : > { %3093 = vmatpush1.bf16.msra.mxu1 %v3092_v27  ;;  %2967 = vmatprep.subr.bf16.mxu0 %v2966_v28  ;;  %v2986_v27 = vpack.c.bf16 %v1680_v21, %v1672_v20  ;;  %v1671_v28 = vld [vmem:[%s4401_s5 + $0xc20] sm:$0xff]  ;;  %v1760_v20 = vld [vmem:[%s4401_s5 + $0xee8] sm:$0xff]  ;;  %v1754_v21 = vld [vmem:[%s4401_s5 + $0xeb8] sm:$0xff] }
 0x1fd   : > { %3095 = vmatprep.subr.bf16.mxu1 %v3094_v32  ;;  %v1681_v32 = vld [vmem:[%s4401_s5 + $0xc70] sm:$0xff]  ;;  %v2988_v37 = vpack.c.bf16 %v1679_v29, %v1671_v28  ;;  %v1759_v28 = vld [vmem:[%s4401_s5 + $0xee0] sm:$0xff] }
 0x1fe   : > { %v1753_v29 = vld [vmem:[%s4401_s5 + $0xeb0] sm:$0xff] }
 0x1ff   : > { %2969 = vmatpush1.bf16.msra.mxu0 %v2968_v38  ;;  %v3116_v38 = vpack.c.bf16 %v1681_v32, %v1673_v30  ;;  %v3134_v30 = vpack.c.bf16 %v1762_v22, %v1754_v21  ;;  %v1768_v32 = vld [vmem:[%s4401_s5 + $0xf28] sm:$0xff]  ;;  %v2455_v21 = vsub.s32 (!%p2630_p13), 3, %v4490_v63  ;;  %v2459_v22 = vsub.s32 (!%p2630_p13), 4, %v4490_v63 }
 0x200   : > { %3097 = vmatpush1.bf16.msra.mxu1 %v3096_v39  ;;  %2971 = vmatprep.subr.bf16.mxu0 %v2970_v41  ;;  %v2990_v39 = vpack.c.bf16 %v1696_v35, %v1688_v34  ;;  %v1687_v41 = vld [vmem:[%s4401_s5 + $0xca0] sm:$0xff]  ;;  %v1776_v34 = vld [vmem:[%s4401_s5 + $0xf68] sm:$0xff]  ;;  %v1770_v35 = vld [vmem:[%s4401_s5 + $0xf38] sm:$0xff] }
 0x201   : > { %3099 = vmatprep.subr.bf16.mxu1 %v3098_v45  ;;  %v1697_v45 = vld [vmem:[%s4401_s5 + $0xcf0] sm:$0xff]  ;;  %v2992_v50 = vpack.c.bf16 %v1695_v42, %v1687_v41  ;;  %v1775_v41 = vld [vmem:[%s4401_s5 + $0xf60] sm:$0xff] }
 0x202   : > { %v1769_v42 = vld [vmem:[%s4401_s5 + $0xf30] sm:$0xff] }
 0x203   : > { %2973 = vmatpush1.bf16.msra.mxu0 %v2972_v51  ;;  %v3120_v51 = vpack.c.bf16 %v1697_v45, %v1689_v43  ;;  %v3138_v43 = vpack.c.bf16 %v1778_v40, %v1770_v35  ;;  %v1784_v45 = vld [vmem:[%s4401_s5 + $0xfa8] sm:$0xff] }
 0x204   : > { %3101 = vmatpush1.bf16.msra.mxu1 %v3100_v52  ;;  %2975 = vmatprep.subr.bf16.mxu0 %v2974_v53  ;;  %v2994_v52 = vpack.c.bf16 %v1712_v47, %v1704_v46  ;;  %v1703_v53 = vld [vmem:[%s4401_s5 + $0xd20] sm:$0xff]  ;;  %v1792_v46 = vld [vmem:[%s4401_s5 + $0xfe8] sm:$0xff]  ;;  %v1786_v47 = vld [vmem:[%s4401_s5 + $0xfb8] sm:$0xff] }
 0x205   : > { %3103 = vmatprep.subr.bf16.mxu1 %v3102_v57  ;;  %v1713_v57 = vld [vmem:[%s4401_s5 + $0xd70] sm:$0xff]  ;;  %v2996_v62 = vpack.c.bf16 %v1711_v54, %v1703_v53  ;;  %v1791_v53 = vld [vmem:[%s4401_s5 + $0xfe0] sm:$0xff]  ;;  %v3142_v54 = vpack.c.bf16 %v1794_v48, %v1786_v47 }
 0x207   : > { %2977 = vmatpush1.bf16.msra.mxu0 %v2976_v0  ;;  %v3124_v0 = vpack.c.bf16 %v1713_v57, %v1705_v55  ;;  %v1785_v55 = vld [vmem:[%s4401_s5 + $0xfb0] sm:$0xff] }
 0x208   : > { %3105 = vmatpush1.bf16.msra.mxu1 %v3104_v1  ;;  %2979 = vmatprep.subr.bf16.mxu0 %v2978_v2  ;;  %v2998_v1 = vpack.c.bf16 %v1728_v59, %v1720_v58  ;;  %v1719_v2 = vld [vmem:[%s4401_s5 + $0xda0] sm:$0xff] }
 0x209   : > { %3107 = vmatprep.subr.bf16.mxu1 %v3106_v6  ;;  %v1729_v6 = vld [vmem:[%s4401_s5 + $0xdf0] sm:$0xff]  ;;  %v3000_v11 = vpack.c.bf16 %v1727_v3, %v1719_v2 }
 0x20b   : > { %2981 = vmatpush1.bf16.msra.mxu0 %v2980_v13  ;;  %v3128_v13 = vpack.c.bf16 %v1729_v6, %v1721_v4  ;;  %v1280_v4 = vld [vmem:[%s4399_s15] sm:$0xff] }
 0x20c   : > { %3109 = vmatpush1.bf16.msra.mxu1 %v3108_v14  ;;  %2983 = vmatprep.subr.bf16.mxu0 %v2982_v15  ;;  %v3002_v14 = vpack.c.bf16 %v1744_v8, %v1736_v7  ;;  %v1735_v15 = vld [vmem:[%s4401_s5 + $0xe20] sm:$0xff] }
 0x20d   : > { %3111 = vmatprep.subr.bf16.mxu1 %v3110_v19  ;;  %v1745_v19 = vld [vmem:[%s4401_s5 + $0xe70] sm:$0xff]  ;;  %v3004_v26 = vpack.c.bf16 %v1743_v16, %v1735_v15  ;;  %v1281_v15 = vld [vmem:[%s4399_s15 + $0x8] sm:$0xff] }
 0x20f   : > { %2985 = vmatpush1.bf16.msra.mxu0 %v2984_v23  ;;  %v3132_v23 = vpack.c.bf16 %v1745_v19, %v1737_v17  ;;  %v2443_v19 = vsub.s32 (!%p2630_p13), 0, %v4490_v63 }
 0x210   : > { %3113 = vmatpush1.bf16.msra.mxu1 %v3112_v24  ;;  %2987 = vmatprep.subr.bf16.mxu0 %v2986_v27  ;;  %v3006_v24 = vpack.c.bf16 %v1760_v20, %v1752_v33  ;;  %v1751_v27 = vld [vmem:[%s4401_s5 + $0xea0] sm:$0xff]  ;;  %v2447_v33 = vsub.s32 (!%p2630_p13), 1, %v4490_v63  ;;  %v2451_v20 = vsub.s32 (!%p2630_p13), 2, %v4490_v63 }
 0x211   : > { %3115 = vmatprep.subr.bf16.mxu1 %v3114_v31  ;;  %v1761_v31 = vld [vmem:[%s4401_s5 + $0xef0] sm:$0xff]  ;;  %v3008_v36 = vpack.c.bf16 %v1759_v28, %v1751_v27 }
 0x213   : > { %2989 = vmatpush1.bf16.msra.mxu0 %v2988_v37  ;;  %v3136_v37 = vpack.c.bf16 %v1761_v31, %v1753_v29 }
 0x214   : > { %3117 = vmatpush1.bf16.msra.mxu1 %v3116_v38  ;;  %2991 = vmatprep.subr.bf16.mxu0 %v2990_v39  ;;  %v3010_v38 = vpack.c.bf16 %v1776_v34, %v1768_v32  ;;  %v1767_v39 = vld [vmem:[%s4401_s5 + $0xf20] sm:$0xff] }
 0x215   : > { %3119 = vmatprep.subr.bf16.mxu1 %v3118_v44  ;;  %v1777_v44 = vld [vmem:[%s4401_s5 + $0xf70] sm:$0xff]  ;;  %v3012_v49 = vpack.c.bf16 %v1775_v41, %v1767_v39 }
 0x217   : > { %2993 = vmatpush1.bf16.msra.mxu0 %v2992_v50  ;;  %v3140_v50 = vpack.c.bf16 %v1777_v44, %v1769_v42 }
 0x218   : > { %3121 = vmatpush1.bf16.msra.mxu1 %v3120_v51  ;;  %2995 = vmatprep.subr.bf16.mxu0 %v2994_v52  ;;  %v3014_v51 = vpack.c.bf16 %v1792_v46, %v1784_v45  ;;  %v1783_v52 = vld [vmem:[%s4401_s5 + $0xfa0] sm:$0xff] }
 0x219   : > { %3123 = vmatprep.subr.bf16.mxu1 %v3122_v56  ;;  %v1793_v56 = vld [vmem:[%s4401_s5 + $0xff0] sm:$0xff]  ;;  %v3016_v57 = vpack.c.bf16 %v1791_v53, %v1783_v52 }
 0x21a   : > { %v3144_v58 = vpack.c.bf16 %v1793_v56, %v1785_v55 }
 0x21b   : > { %2997 = vmatpush1.bf16.msra.mxu0 %v2996_v62 }
 0x21c   : > { %3125 = vmatpush1.bf16.msra.mxu1 %v3124_v0  ;;  %2999 = vmatprep.subr.bf16.mxu0 %v2998_v1 }
 0x21d   : > { %3127 = vmatprep.subr.bf16.mxu1 %v3126_v5 }
 0x21f   : > { %3001 = vmatpush1.bf16.msra.mxu0 %v3000_v11 }
 0x220   : > { %3129 = vmatpush1.bf16.msra.mxu1 %v3128_v13  ;;  %3003 = vmatprep.subr.bf16.mxu0 %v3002_v14 }
 0x221   : > { %3131 = vmatprep.subr.bf16.mxu1 %v3130_v18  ;;  %v2439_v18 = vld [vmem:[%s1266_s12] sm:$0xff] (!%p2630_p13) }
 0x222   : > { %v2444_v27 = vrot.slane (!%p2630_p13), %v2439_v18, %v2443_v19  ;;  %v2448_v28 = vrot.slane (!%p2630_p13), %v2439_v18, %v2447_v33  ;;  %v2452_v29 = vrot.slane (!%p2630_p13), %v2439_v18, %v2451_v20  ;;  %v2460_v31 = vrot.slane (!%p2630_p13), %v2439_v18, %v2459_v22 }
 0x223   : > { %3005 = vmatpush1.bf16.msra.mxu0 %v3004_v26  ;;  %v2463_v26 = vsub.s32 (!%p2630_p13), 5, %v4490_v63 }
 0x224   : > { %3133 = vmatpush1.bf16.msra.mxu1 %v3132_v23  ;;  %3007 = vmatprep.subr.bf16.mxu0 %v3006_v24  ;;  %v2467_v23 = vsub.s32 (!%p2630_p13), 6, %v4490_v63  ;;  %v2471_v24 = vsub.s32 (!%p2630_p13), 7, %v4490_v63  ;;  %v2473_v40 = vcombine.low (!%p2630_p13), %v2444_v27, %v2448_v28 }
 0x225   : > { %3135 = vmatprep.subr.bf16.mxu1 %v3134_v30  ;;  %v2456_v30 = vrot.slane (!%p2630_p13), %v2439_v18, %v2455_v21  ;;  %v2464_v32 = vrot.slane (!%p2630_p13), %v2439_v18, %v2463_v26 }
 0x226   : > { %v2468_v34 = vrot.slane (!%p2630_p13), %v2439_v18, %v2467_v23  ;;  %v2472_v35 = vrot.slane (!%p2630_p13), %v2439_v18, %v2471_v24  ;;  %v2481_v39 = vrot.slane (!%p2630_p13), %v2473_v40, %v4501_v12 }
 0x227   : > { %3009 = vmatpush1.bf16.msra.mxu0 %v3008_v36  ;;  %v2474_v36 = vcombine.low (!%p2630_p13), %v2452_v29, %v2456_v30 }
 0x228   : > { %3137 = vmatpush1.bf16.msra.mxu1 %v3136_v37  ;;  %3011 = vmatprep.subr.bf16.mxu0 %v3010_v38  ;;  %v2490_v37 = vcombine.low (!%p2630_p13), %v2460_v31, %v2464_v32  ;;  %v2491_v38 = vcombine.low (!%p2630_p13), %v2468_v34, %v2472_v35 }
 0x229   : > { %3139 = vmatprep.subr.bf16.mxu1 %v3138_v43  ;;  %v2488_v41 = vrot.slane (!%p2630_p13), %v2474_v36, %v4501_v12 }
 0x22a   : > { %v2498_v42 = vrot.slane (!%p2630_p13), %v2490_v37, %v4501_v12  ;;  %v2505_v43 = vrot.slane (!%p2630_p13), %v2491_v38, %v4501_v12 }
 0x22b   : > { %3013 = vmatpush1.bf16.msra.mxu0 %v3012_v49  ;;  %v2489_v44 = vcombine.low (!%p2630_p13), %v2481_v39, %v2488_v41 }
 0x22c   : > { %3141 = vmatpush1.bf16.msra.mxu1 %v3140_v50  ;;  %3015 = vmatprep.subr.bf16.mxu0 %v3014_v51  ;;  %v2506_v46 = vcombine.low (!%p2630_p13), %v2498_v42, %v2505_v43 }
 0x22d   : > { %3143 = vmatprep.subr.bf16.mxu1 %v3142_v54 }
 0x22f   : > { %3017 = vmatpush1.bf16.msra.mxu0 %v3016_v57 }
 0x230   : > { %3145 = vmatpush1.bf16.msra.mxu1 %v3144_v58 }
 0x232   : > { %2237 = vmatmul.mubr.f32.vlgmr.msra.gmra.mrb[2].mxu0 %v4565_v25 }
 0x233   : > { %2379 = vmatmul.mubr.f32.vlgmr.msra.gmra.mrb[2].mxu1 %v4565_v25 }
 0x285   : > { %v1954_v59 = vpop.f32.mrb[0].mxu0 }
 0x286   : > { %v2096_v60 = vpop.f32.mrb[0].mxu1  ;;  %v1956_v61 = vpop.f32.mrb[1].mxu0 }
 0x287   : > { %v2393_v62 = vcombine.low %v1954_v59, %v1956_v61  ;;  %v2098_v0 = vpop.f32.mrb[1].mxu1 }
 0x288   : > { %v2394_v1 = vcombine.low %v2096_v60, %v2098_v0 }
 0x289   : > { %v2401_v2 = vrot.slane %v2393_v62, %v4501_v12 }
 0x28a   : > { %v2408_v3 = vrot.slane %v2394_v1, %v4501_v12 }
 0x28c   : > { %v2409_v5 = vcombine.low %v2401_v2, %v2408_v3 }
 0x28e   : > { %v2429_v6 = vadd.f32 %v2409_v5, %v1280_v4 }
 0x290   : > { %2431 = vst [vmem:[%s4399_s15] sm:$0xff] %v2429_v6 }
 0x297   : > { %v2437_v63 = vld [vmem:[%s4399_s15] sm:$0xff] (!%p2630_p13) }
 0x298   : > { %v2509_v47 = vadd.f32 (!%p2630_p13), %v2489_v44, %v2437_v63 }
 0x29a   : > { %v2511_v49 = vmax.f32 (!%p2630_p13), %v2509_v47, 0.0 }
 0x29c   : > { %2513 = vst [vmem:[%s4399_s15] sm:$0xff] (!%p2630_p13), %v2511_v49 }
 0x305   : > { %v2238_v7 = vpop.f32.mrb[2].mxu0 }
 0x306   : > { %v2380_v8 = vpop.f32.mrb[2].mxu1  ;;  %v2240_v9 = vpop.f32.mrb[3].mxu0 }
 0x307   : > { %v2410_v25 = vcombine.low %v2238_v7, %v2240_v9  ;;  %v2382_v10 = vpop.f32.mrb[3].mxu1 }
 0x308   : > { %v2411_v11 = vcombine.low %v2380_v8, %v2382_v10 }
 0x309   : > { %v2418_v13 = vrot.slane %v2410_v25, %v4501_v12 }
 0x30a   : > { %v2425_v14 = vrot.slane %v2411_v11, %v4501_v12  ;;  %2436 = sbr.rel (%p2630_p13) target bundleno = 797 (0x31d), region = 63 }
 0x30c   : > { %v2426_v16 = vcombine.low %v2418_v13, %v2425_v14 }
 0x30e   : > { %v2430_v17 = vadd.f32 %v2426_v16, %v1281_v15 }
 0x310   : > { %2432 = vst [vmem:[%s4399_s15 + $0x8] sm:$0xff] %v2430_v17 }
 0x317   : > { %v2438_v45 = vld [vmem:[%s4399_s15 + $0x8] sm:$0xff] }
 0x318   : > { %v2510_v48 = vadd.f32 %v2506_v46, %v2438_v45 }
 0x31a   : > { %v2512_v50 = vmax.f32 %v2510_v48, 0.0 }
 0x31c   : > { %2514 = vst [vmem:[%s4399_s15 + $0x8] sm:$0xff] %v2512_v50 }
 0x31d PF: > { %s13_s18 = sadd.s32 1, %s3267_s18   ;;  %s5014_s12 = smov %s3247_s13 }
 0x31e   : > { %p10_p0 = scmp.ge.s32.totalorder %s13_s18, 10   ;;  %s5015_s13 = smov %s3342_s25 }
 0x31f   : > { %s5016_s14 = smov %s3259_s16  ;;  %s5017_s15 = smov %s3263_s17 }
 0x320   : > { %s5018_s16 = smov %s5021_s19  ;;  %s5019_s17 = smov %s5025_s20 }
 0x321   :  { %12 = sbr.rel (!%p10_p0) target bundleno = 4 (0x4), region = 104 }

</bundles_post_ra>
